<compile_context>
chip_gen: v7x
topology: tpu7x:2x2x1
jax: 0.10.0
libtpu: 0.0.40
codegen_flags: <defaults>
</compile_context>

<pallas_src>
import jax
import jax.numpy as jnp
from jax import lax
from jax.experimental import pallas as pl
from jax.experimental.pallas import tpu as pltpu

BN_EPS = 1e-5
KSIZE = 128
PAD = 64
FC3_TILES = 2


# ---------------------------------------------------------------------------
# Pallas kernels
# ---------------------------------------------------------------------------
def conv_bn_relu_pool_kernel(p_ref, w_ref, shift_ref, o_ref):
    """Fused Conv1d (im2col matmul, BN scale pre-folded) + shift + ReLU + MaxPool(2,2).

    p_ref    : (1, C_in*K, 2*Lp) bf16 patches; cols [0:Lp] = even conv positions,
               cols [Lp:2Lp] = odd conv positions.
    w_ref    : (C_out, C_in*K)   bf16, BN scale folded in.
    shift_ref: (C_out, 1)        f32 folded conv-bias/BN shift.
    o_ref    : (1, C_out, Lp)    f32 pooled output.
    """
    y = jnp.dot(w_ref[...], p_ref[0], preferred_element_type=jnp.float32)  # (C_out, 2*Lp)
    y = jnp.maximum(y + shift_ref[...], 0.0)
    lp = o_ref.shape[-1]
    # maxpool(2,2): max of the even-position half and the odd-position half.
    o_ref[0] = jnp.maximum(y[:, :lp], y[:, lp:]).astype(o_ref.dtype)


def fc_stack_kernel(x_ref, w1_ref, b1_ref, w2_ref, b2_ref, w3_ref, b3_ref, o_ref):
    """fc1+ReLU -> fc2+ReLU -> fc3, all fused.

    Weights stay (Dout, Din); contraction is on dim 1 of both operands, so no
    transpose is ever materialized.  The grid tiles fc3's Dout (w3/b3/o blocks);
    fc1/fc2 are recomputed per tile (negligible FLOPs) so tiles are independent.
    """
    dn = (((1,), (1,)), ((), ()))  # contract x dim 1 with w dim 1 -> (N, Dout)
    x = x_ref[...].astype(jnp.bfloat16)
    h = lax.dot_general(x, w1_ref[...], dn, preferred_element_type=jnp.float32)
    h = jnp.maximum(h + b1_ref[...], 0.0).astype(jnp.bfloat16)
    h = lax.dot_general(h, w2_ref[...], dn, preferred_element_type=jnp.float32)
    h = jnp.maximum(h + b2_ref[...], 0.0).astype(jnp.bfloat16)
    y = lax.dot_general(h, w3_ref[...], dn, preferred_element_type=jnp.float32)
    o_ref[...] = (y + b3_ref[...]).astype(o_ref.dtype)


# ---------------------------------------------------------------------------
# Wrappers (JAX glue: gather-free patch construction, pallas_call setup)
# ---------------------------------------------------------------------------
def _even_odd_patches(x):
    """x: (N, C, L) -> (N, C*K, 2*(L//2)) bf16 im2col patches.

    Column j in [0,Lp) is the conv receptive field at even output position 2j;
    column Lp+j is position 2j+1.  Rows are ordered (channel-major, tap-minor) to
    match w.reshape(C_out, C_in*K).  Built from contiguous slices of the even/odd
    phases of the zero-padded input -> no XLA gather.
    """
    n, c, length = x.shape
    lp = length // 2
    xp = jnp.pad(x, ((0, 0), (0, 0), (PAD, PAD)))
    xe = xp[:, :, 0::2]   # (N, C, L//2 + PAD): x_pad[2m]
    xo = xp[:, :, 1::2]   # (N, C, L//2 + PAD): x_pad[2m+1]
    rows_e, rows_o = [], []
    for k in range(KSIZE):
        a = k // 2
        if k % 2 == 0:
            rows_e.append(xe[:, :, a:a + lp])              # x_pad[2j + k]
            rows_o.append(xo[:, :, a:a + lp])              # x_pad[2j + 1 + k]
        else:
            rows_e.append(xo[:, :, a:a + lp])              # x_pad[2j + k]
            rows_o.append(xe[:, :, a + 1:a + 1 + lp])      # x_pad[2j + 1 + k]
    pe = jnp.stack(rows_e, axis=2)                         # (N, C, K, Lp)
    po = jnp.stack(rows_o, axis=2)                         # (N, C, K, Lp)
    p = jnp.concatenate([pe, po], axis=-1)                 # (N, C, K, 2*Lp)
    return p.reshape(n, c * KSIZE, 2 * lp).astype(jnp.bfloat16)


def conv_bn_relu_pool(x, w_mat, shift):
    """Conv1d(k=128,s=1,p=64) -> BN(eval, folded) -> ReLU -> MaxPool1d(2,2).

    x: (N, C_in, L) f32; w_mat: (C_out, C_in*K) bf16 (BN scale folded); shift: (C_out,1) f32.
    """
    n, c_in, length = x.shape
    c_out = w_mat.shape[0]
    lp = length // 2
    cin_k = c_in * KSIZE
    p = _even_odd_patches(x)
    return pl.pallas_call(
        conv_bn_relu_pool_kernel,
        out_shape=jax.ShapeDtypeStruct((n, c_out, lp), jnp.float32),
        grid=(n,),
        in_specs=[
            pl.BlockSpec((1, cin_k, 2 * lp), lambda i: (i, 0, 0)),
            pl.BlockSpec((c_out, cin_k), lambda i: (0, 0)),
            pl.BlockSpec((c_out, 1), lambda i: (0, 0)),
        ],
        out_specs=pl.BlockSpec((1, c_out, lp), lambda i: (i, 0, 0)),
        compiler_params=pltpu.CompilerParams(
            dimension_semantics=("parallel",),
            vmem_limit_bytes=16 * 1024 * 1024,
        ),
    )(p, w_mat, shift)


def fc_stack(x, w1, b1, w2, b2, w3, b3):
    """Fused fc1(+ReLU) -> fc2(+ReLU) -> fc3.  x: (N, 2048) f32, weights (Dout, Din) bf16."""
    n = x.shape[0]
    d1, din = w1.shape
    d2 = w2.shape[0]
    d3 = w3.shape[0]
    t3 = d3 // FC3_TILES
    return pl.pallas_call(
        fc_stack_kernel,
        out_shape=jax.ShapeDtypeStruct((n, d3), jnp.float32),
        grid=(FC3_TILES,),
        in_specs=[
            pl.BlockSpec((n, din), lambda j: (0, 0)),
            pl.BlockSpec((d1, din), lambda j: (0, 0)),
            pl.BlockSpec((1, d1), lambda j: (0, 0)),
            pl.BlockSpec((d2, d1), lambda j: (0, 0)),
            pl.BlockSpec((1, d2), lambda j: (0, 0)),
            pl.BlockSpec((t3, d2), lambda j: (j, 0)),   # fc3 weight Dout-tile
            pl.BlockSpec((1, t3), lambda j: (0, j)),    # fc3 bias tile
        ],
        out_specs=pl.BlockSpec((n, t3), lambda j: (0, j)),
        compiler_params=pltpu.CompilerParams(
            dimension_semantics=("parallel",),
            vmem_limit_bytes=32 * 1024 * 1024,
        ),
    )(x, w1, b1, w2, b2, w3, b3)


# ---------------------------------------------------------------------------
# Model: parameters + forward
# ---------------------------------------------------------------------------
def init_params(key):
    """Random parameters in PyTorch layout."""
    conv_dims = [(2, 1), (4, 2), (8, 4), (16, 8)]   # (C_out, C_in), kernel = 128
    params = {"convs": []}
    for c_out, c_in in conv_dims:
        key, kw, kb, kg, kbt, km, kv = jax.random.split(key, 7)
        params["convs"].append(dict(
            w=jax.random.normal(kw, (c_out, c_in, KSIZE), jnp.float32) * 0.02,
            b=jax.random.normal(kb, (c_out,), jnp.float32) * 0.01,
            gamma=jax.random.uniform(kg, (c_out,), jnp.float32, 0.8, 1.2),
            beta=jax.random.normal(kbt, (c_out,), jnp.float32) * 0.01,
            mean=jax.random.normal(km, (c_out,), jnp.float32) * 0.01,
            var=jax.random.uniform(kv, (c_out,), jnp.float32, 0.5, 1.5),
        ))
    fc_dims = [(1024, 2048), (512, 1024), (2048, 512)]  # (Dout, Din)
    for name, (d_out, d_in) in zip(("fc1", "fc2", "fc3"), fc_dims):
        key, kw, kb = jax.random.split(key, 3)
        params[name + "_w"] = jax.random.normal(kw, (d_out, d_in), jnp.float32) * 0.02
        params[name + "_b"] = jax.random.normal(kb, (d_out,), jnp.float32) * 0.01
    return params


def prepare_params(params):
    """One-time prep (outside the forward): fold BN into the conv weight, reshape to
    matmul form, cast MXU operands to bf16, keep FC weights as (Dout, Din)."""
    prepped = {"convs": []}
    for p in params["convs"]:
        c_out, c_in, k = p["w"].shape
        scale = p["gamma"] / jnp.sqrt(p["var"] + BN_EPS)                           # (C_out,)
        w_mat = (p["w"].reshape(c_out, c_in * k) * scale[:, None]).astype(jnp.bfloat16)
        shift = (p["beta"] + (p["b"] - p["mean"]) * scale).reshape(c_out, 1).astype(jnp.float32)
        prepped["convs"].append(dict(w=w_mat, shift=shift))
    for name in ("fc1", "fc2", "fc3"):
        prepped[name + "_w"] = params[name + "_w"].astype(jnp.bfloat16)            # (Dout, Din)
        prepped[name + "_b"] = params[name + "_b"].reshape(1, -1).astype(jnp.float32)
    return prepped


def cnn_model_forward(x, prepped):
    # x: (N, 1, 2048) NCL.  After 4x (conv -> bn -> relu -> pool/2): (N, 16, 128).
    for layer in prepped["convs"]:
        x = conv_bn_relu_pool(x, layer["w"], layer["shift"])
    n = x.shape[0]
    # (N, 16, 128) -> (N, 2048): matches torch .view(-1, 128*1*16) under NCL layout.
    x = x.reshape(n, 16 * 128)
    return fc_stack(x, prepped["fc1_w"], prepped["fc1_b"],
                    prepped["fc2_w"], prepped["fc2_b"],
                    prepped["fc3_w"], prepped["fc3_b"])


# TODO(synk): BatchNorm1d is implemented in inference mode (running stats folded into the
#             conv weights); training-mode batch statistics are not computed in-kernel.

if __name__ == "__main__":
    key = jax.random.PRNGKey(0)
    key, kx = jax.random.split(key)
    # Forward implies L=2048 so the flattened conv4 output is 128*1*16 = 2048 (fc1 input).
    x = jax.random.normal(kx, (2, 1, 2048), jnp.float32)
    params = init_params(key)
    prepped = prepare_params(params)

    forward = jax.jit(cnn_model_forward)
    out = jax.block_until_ready(forward(x, prepped))
    assert out.shape == (2, 2048), out.shape
    assert bool(jnp.all(jnp.isfinite(out)))
    print("KERNEL_OK")
</pallas_src>

<mosaic_0001>
module attributes {stable_mosaic.version = 11 : i64} {
  func.func @conv_bn_relu_pool_kernel(%arg0: i32, %arg1: memref<1x128x2048xbf16, #tpu.memory_space<vmem>>, %arg2: memref<2x128xbf16, #tpu.memory_space<vmem>>, %arg3: memref<2x1xf32, #tpu.memory_space<vmem>>, %arg4: memref<1x2x1024xf32, #tpu.memory_space<vmem>>) attributes {dimension_semantics = [#tpu.dimension_semantics<parallel>], iteration_bounds = array<i64: 2>, scalar_prefetch = 0 : i64, scratch_operands = 0 : i64, tpu.core_type = #tpu.core_type<tc>, window_params = [{transform_indices = @transform_0, window_bounds = array<i64: 1, 128, 2048>}, {pipeline_mode = #tpu.pipeline_mode<synchronous>, transform_indices = @transform_1, window_bounds = array<i64: 2, 128>}, {pipeline_mode = #tpu.pipeline_mode<synchronous>, transform_indices = @transform_2, window_bounds = array<i64: 2, 1>}, {transform_indices = @transform_3, window_bounds = array<i64: 1, 2, 1024>}]} {
    %c0 = arith.constant 0 : index
    %c0_0 = arith.constant 0 : index
    %0 = vector.load %arg2[%c0, %c0_0] : memref<2x128xbf16, #tpu.memory_space<vmem>>, vector<2x128xbf16>
    %c0_1 = arith.constant 0 : index
    %c0_2 = arith.constant 0 : index
    %c0_3 = arith.constant 0 : index
    %1 = vector.load %arg1[%c0_1, %c0_2, %c0_3] : memref<1x128x2048xbf16, #tpu.memory_space<vmem>>, vector<1x128x2048xbf16>
    %2 = vector.shape_cast %1 : vector<1x128x2048xbf16> to vector<128x2048xbf16>
    %cst = arith.constant dense<0.000000e+00> : vector<2x2048xf32>
    %3 = tpu.matmul %0, %2, %cst {dimension_numbers = #tpu.dot_dimension_numbers<[1], [0], [0], [1], [0, 0, 1, 1], [], []>} : vector<2x128xbf16>, vector<128x2048xbf16>, vector<2x2048xf32> -> vector<2x2048xf32>
    %c0_4 = arith.constant 0 : index
    %c0_5 = arith.constant 0 : index
    %4 = vector.load %arg3[%c0_4, %c0_5] : memref<2x1xf32, #tpu.memory_space<vmem>>, vector<2x1xf32>
    %5 = vector.broadcast %4 : vector<2x1xf32> to vector<2x2048xf32>
    %6 = arith.addf %3, %5 : vector<2x2048xf32>
    %cst_6 = arith.constant 0.000000e+00 : f32
    %7 = vector.broadcast %cst_6 : f32 to vector<2x2048xf32>
    %8 = arith.maximumf %6, %7 : vector<2x2048xf32>
    %9 = vector.extract_strided_slice %8 {offsets = [0, 0], sizes = [2, 1024], strides = [1, 1]} : vector<2x2048xf32> to vector<2x1024xf32>
    %10 = vector.extract_strided_slice %8 {offsets = [0, 1024], sizes = [2, 1024], strides = [1, 1]} : vector<2x2048xf32> to vector<2x1024xf32>
    %11 = arith.maximumf %9, %10 : vector<2x1024xf32>
    %c0_7 = arith.constant 0 : index
    %c0_8 = arith.constant 0 : index
    %c0_9 = arith.constant 0 : index
    %12 = vector.load %arg4[%c0_7, %c0_8, %c0_9] : memref<1x2x1024xf32, #tpu.memory_space<vmem>>, vector<1x2x1024xf32>
    %13 = vector.shape_cast %12 : vector<1x2x1024xf32> to vector<2x1024xf32>
    %14 = vector.shape_cast %11 : vector<2x1024xf32> to vector<1x2x1024xf32>
    tpu.vector_store %arg4[%c0_7, %c0_8, %c0_9], %14 {strides = array<i32>} : memref<1x2x1024xf32, #tpu.memory_space<vmem>>, vector<1x2x1024xf32>,
    return
  }
  func.func @transform_0(%arg0: i32) -> (i32, i32, i32) {
    %c0_i32 = arith.constant 0 : i32
    %c0_i32_0 = arith.constant 0 : i32
    %c0_i32_1 = arith.constant 0 : i32
    return %arg0, %c0_i32, %c0_i32_0 : i32, i32, i32
  }
  func.func @transform_1(%arg0: i32) -> (i32, i32) {
    %c0_i32 = arith.constant 0 : i32
    %c0_i32_0 = arith.constant 0 : i32
    %c0_i32_1 = arith.constant 0 : i32
    return %c0_i32, %c0_i32_0 : i32, i32
  }
  func.func @transform_2(%arg0: i32) -> (i32, i32) {
    %c0_i32 = arith.constant 0 : i32
    %c0_i32_0 = arith.constant 0 : i32
    %c0_i32_1 = arith.constant 0 : i32
    return %c0_i32, %c0_i32_0 : i32, i32
  }
  func.func @transform_3(%arg0: i32) -> (i32, i32, i32) {
    %c0_i32 = arith.constant 0 : i32
    %c0_i32_0 = arith.constant 0 : i32
    %c0_i32_1 = arith.constant 0 : i32
    return %arg0, %c0_i32, %c0_i32_0 : i32, i32, i32
  }
}

module attributes {stable_mosaic.version = 11 : i64} {
  func.func @conv_bn_relu_pool_kernel(%arg0: i32, %arg1: memref<1x256x1024xbf16, #tpu.memory_space<vmem>>, %arg2: memref<4x256xbf16, #tpu.memory_space<vmem>>, %arg3: memref<4x1xf32, #tpu.memory_space<vmem>>, %arg4: memref<1x4x512xf32, #tpu.memory_space<vmem>>) attributes {dimension_semantics = [#tpu.dimension_semantics<parallel>], iteration_bounds = array<i64: 2>, scalar_prefetch = 0 : i64, scratch_operands = 0 : i64, tpu.core_type = #tpu.core_type<tc>, window_params = [{transform_indices = @transform_0, window_bounds = array<i64: 1, 256, 1024>}, {pipeline_mode = #tpu.pipeline_mode<synchronous>, transform_indices = @transform_1, window_bounds = array<i64: 4, 256>}, {pipeline_mode = #tpu.pipeline_mode<synchronous>, transform_indices = @transform_2, window_bounds = array<i64: 4, 1>}, {transform_indices = @transform_3, window_bounds = array<i64: 1, 4, 512>}]} {
    %c0 = arith.constant 0 : index
    %c0_0 = arith.constant 0 : index
    %0 = vector.load %arg2[%c0, %c0_0] : memref<4x256xbf16, #tpu.memory_space<vmem>>, vector<4x256xbf16>
    %c0_1 = arith.constant 0 : index
    %c0_2 = arith.constant 0 : index
    %c0_3 = arith.constant 0 : index
    %1 = vector.load %arg1[%c0_1, %c0_2, %c0_3] : memref<1x256x1024xbf16, #tpu.memory_space<vmem>>, vector<1x256x1024xbf16>
    %2 = vector.shape_cast %1 : vector<1x256x1024xbf16> to vector<256x1024xbf16>
    %cst = arith.constant dense<0.000000e+00> : vector<4x1024xf32>
    %3 = tpu.matmul %0, %2, %cst {dimension_numbers = #tpu.dot_dimension_numbers<[1], [0], [0], [1], [0, 0, 1, 1], [], []>} : vector<4x256xbf16>, vector<256x1024xbf16>, vector<4x1024xf32> -> vector<4x1024xf32>
    %c0_4 = arith.constant 0 : index
    %c0_5 = arith.constant 0 : index
    %4 = vector.load %arg3[%c0_4, %c0_5] : memref<4x1xf32, #tpu.memory_space<vmem>>, vector<4x1xf32>
    %5 = vector.broadcast %4 : vector<4x1xf32> to vector<4x1024xf32>
    %6 = arith.addf %3, %5 : vector<4x1024xf32>
    %cst_6 = arith.constant 0.000000e+00 : f32
    %7 = vector.broadcast %cst_6 : f32 to vector<4x1024xf32>
    %8 = arith.maximumf %6, %7 : vector<4x1024xf32>
    %9 = vector.extract_strided_slice %8 {offsets = [0, 0], sizes = [4, 512], strides = [1, 1]} : vector<4x1024xf32> to vector<4x512xf32>
    %10 = vector.extract_strided_slice %8 {offsets = [0, 512], sizes = [4, 512], strides = [1, 1]} : vector<4x1024xf32> to vector<4x512xf32>
    %11 = arith.maximumf %9, %10 : vector<4x512xf32>
    %c0_7 = arith.constant 0 : index
    %c0_8 = arith.constant 0 : index
    %c0_9 = arith.constant 0 : index
    %12 = vector.load %arg4[%c0_7, %c0_8, %c0_9] : memref<1x4x512xf32, #tpu.memory_space<vmem>>, vector<1x4x512xf32>
    %13 = vector.shape_cast %12 : vector<1x4x512xf32> to vector<4x512xf32>
    %14 = vector.shape_cast %11 : vector<4x512xf32> to vector<1x4x512xf32>
    tpu.vector_store %arg4[%c0_7, %c0_8, %c0_9], %14 {strides = array<i32>} : memref<1x4x512xf32, #tpu.memory_space<vmem>>, vector<1x4x512xf32>,
    return
  }
  func.func @transform_0(%arg0: i32) -> (i32, i32, i32) {
    %c0_i32 = arith.constant 0 : i32
    %c0_i32_0 = arith.constant 0 : i32
    %c0_i32_1 = arith.constant 0 : i32
    return %arg0, %c0_i32, %c0_i32_0 : i32, i32, i32
  }
  func.func @transform_1(%arg0: i32) -> (i32, i32) {
    %c0_i32 = arith.constant 0 : i32
    %c0_i32_0 = arith.constant 0 : i32
    %c0_i32_1 = arith.constant 0 : i32
    return %c0_i32, %c0_i32_0 : i32, i32
  }
  func.func @transform_2(%arg0: i32) -> (i32, i32) {
    %c0_i32 = arith.constant 0 : i32
    %c0_i32_0 = arith.constant 0 : i32
    %c0_i32_1 = arith.constant 0 : i32
    return %c0_i32, %c0_i32_0 : i32, i32
  }
  func.func @transform_3(%arg0: i32) -> (i32, i32, i32) {
    %c0_i32 = arith.constant 0 : i32
    %c0_i32_0 = arith.constant 0 : i32
    %c0_i32_1 = arith.constant 0 : i32
    return %arg0, %c0_i32, %c0_i32_0 : i32, i32, i32
  }
}

module attributes {stable_mosaic.version = 11 : i64} {
  func.func @conv_bn_relu_pool_kernel(%arg0: i32, %arg1: memref<1x512x512xbf16, #tpu.memory_space<vmem>>, %arg2: memref<8x512xbf16, #tpu.memory_space<vmem>>, %arg3: memref<8x1xf32, #tpu.memory_space<vmem>>, %arg4: memref<1x8x256xf32, #tpu.memory_space<vmem>>) attributes {dimension_semantics = [#tpu.dimension_semantics<parallel>], iteration_bounds = array<i64: 2>, scalar_prefetch = 0 : i64, scratch_operands = 0 : i64, tpu.core_type = #tpu.core_type<tc>, window_params = [{transform_indices = @transform_0, window_bounds = array<i64: 1, 512, 512>}, {pipeline_mode = #tpu.pipeline_mode<synchronous>, transform_indices = @transform_1, window_bounds = array<i64: 8, 512>}, {pipeline_mode = #tpu.pipeline_mode<synchronous>, transform_indices = @transform_2, window_bounds = array<i64: 8, 1>}, {transform_indices = @transform_3, window_bounds = array<i64: 1, 8, 256>}]} {
    %c0 = arith.constant 0 : index
    %c0_0 = arith.constant 0 : index
    %0 = vector.load %arg2[%c0, %c0_0] : memref<8x512xbf16, #tpu.memory_space<vmem>>, vector<8x512xbf16>
    %c0_1 = arith.constant 0 : index
    %c0_2 = arith.constant 0 : index
    %c0_3 = arith.constant 0 : index
    %1 = vector.load %arg1[%c0_1, %c0_2, %c0_3] : memref<1x512x512xbf16, #tpu.memory_space<vmem>>, vector<1x512x512xbf16>
    %2 = vector.shape_cast %1 : vector<1x512x512xbf16> to vector<512x512xbf16>
    %cst = arith.constant dense<0.000000e+00> : vector<8x512xf32>
    %3 = tpu.matmul %0, %2, %cst {dimension_numbers = #tpu.dot_dimension_numbers<[1], [0], [0], [1], [0, 0, 1, 1], [], []>} : vector<8x512xbf16>, vector<512x512xbf16>, vector<8x512xf32> -> vector<8x512xf32>
    %c0_4 = arith.constant 0 : index
    %c0_5 = arith.constant 0 : index
    %4 = vector.load %arg3[%c0_4, %c0_5] : memref<8x1xf32, #tpu.memory_space<vmem>>, vector<8x1xf32>
    %5 = vector.broadcast %4 : vector<8x1xf32> to vector<8x512xf32>
    %6 = arith.addf %3, %5 : vector<8x512xf32>
    %cst_6 = arith.constant 0.000000e+00 : f32
    %7 = vector.broadcast %cst_6 : f32 to vector<8x512xf32>
    %8 = arith.maximumf %6, %7 : vector<8x512xf32>
    %9 = vector.extract_strided_slice %8 {offsets = [0, 0], sizes = [8, 256], strides = [1, 1]} : vector<8x512xf32> to vector<8x256xf32>
    %10 = vector.extract_strided_slice %8 {offsets = [0, 256], sizes = [8, 256], strides = [1, 1]} : vector<8x512xf32> to vector<8x256xf32>
    %11 = arith.maximumf %9, %10 : vector<8x256xf32>
    %c0_7 = arith.constant 0 : index
    %c0_8 = arith.constant 0 : index
    %c0_9 = arith.constant 0 : index
    %12 = vector.load %arg4[%c0_7, %c0_8, %c0_9] : memref<1x8x256xf32, #tpu.memory_space<vmem>>, vector<1x8x256xf32>
    %13 = vector.shape_cast %12 : vector<1x8x256xf32> to vector<8x256xf32>
    %14 = vector.shape_cast %11 : vector<8x256xf32> to vector<1x8x256xf32>
    tpu.vector_store %arg4[%c0_7, %c0_8, %c0_9], %14 {strides = array<i32>} : memref<1x8x256xf32, #tpu.memory_space<vmem>>, vector<1x8x256xf32>,
    return
  }
  func.func @transform_0(%arg0: i32) -> (i32, i32, i32) {
    %c0_i32 = arith.constant 0 : i32
    %c0_i32_0 = arith.constant 0 : i32
    %c0_i32_1 = arith.constant 0 : i32
    return %arg0, %c0_i32, %c0_i32_0 : i32, i32, i32
  }
  func.func @transform_1(%arg0: i32) -> (i32, i32) {
    %c0_i32 = arith.constant 0 : i32
    %c0_i32_0 = arith.constant 0 : i32
    %c0_i32_1 = arith.constant 0 : i32
    return %c0_i32, %c0_i32_0 : i32, i32
  }
  func.func @transform_2(%arg0: i32) -> (i32, i32) {
    %c0_i32 = arith.constant 0 : i32
    %c0_i32_0 = arith.constant 0 : i32
    %c0_i32_1 = arith.constant 0 : i32
    return %c0_i32, %c0_i32_0 : i32, i32
  }
  func.func @transform_3(%arg0: i32) -> (i32, i32, i32) {
    %c0_i32 = arith.constant 0 : i32
    %c0_i32_0 = arith.constant 0 : i32
    %c0_i32_1 = arith.constant 0 : i32
    return %arg0, %c0_i32, %c0_i32_0 : i32, i32, i32
  }
}

module attributes {stable_mosaic.version = 11 : i64} {
  func.func @conv_bn_relu_pool_kernel(%arg0: i32, %arg1: memref<1x1024x256xbf16, #tpu.memory_space<vmem>>, %arg2: memref<16x1024xbf16, #tpu.memory_space<vmem>>, %arg3: memref<16x1xf32, #tpu.memory_space<vmem>>, %arg4: memref<1x16x128xf32, #tpu.memory_space<vmem>>) attributes {dimension_semantics = [#tpu.dimension_semantics<parallel>], iteration_bounds = array<i64: 2>, scalar_prefetch = 0 : i64, scratch_operands = 0 : i64, tpu.core_type = #tpu.core_type<tc>, window_params = [{transform_indices = @transform_0, window_bounds = array<i64: 1, 1024, 256>}, {pipeline_mode = #tpu.pipeline_mode<synchronous>, transform_indices = @transform_1, window_bounds = array<i64: 16, 1024>}, {pipeline_mode = #tpu.pipeline_mode<synchronous>, transform_indices = @transform_2, window_bounds = array<i64: 16, 1>}, {transform_indices = @transform_3, window_bounds = array<i64: 1, 16, 128>}]} {
    %c0 = arith.constant 0 : index
    %c0_0 = arith.constant 0 : index
    %0 = vector.load %arg2[%c0, %c0_0] : memref<16x1024xbf16, #tpu.memory_space<vmem>>, vector<16x1024xbf16>
    %c0_1 = arith.constant 0 : index
    %c0_2 = arith.constant 0 : index
    %c0_3 = arith.constant 0 : index
    %1 = vector.load %arg1[%c0_1, %c0_2, %c0_3] : memref<1x1024x256xbf16, #tpu.memory_space<vmem>>, vector<1x1024x256xbf16>
    %2 = vector.shape_cast %1 : vector<1x1024x256xbf16> to vector<1024x256xbf16>
    %cst = arith.constant dense<0.000000e+00> : vector<16x256xf32>
    %3 = tpu.matmul %0, %2, %cst {dimension_numbers = #tpu.dot_dimension_numbers<[1], [0], [0], [1], [0, 0, 1, 1], [], []>} : vector<16x1024xbf16>, vector<1024x256xbf16>, vector<16x256xf32> -> vector<16x256xf32>
    %c0_4 = arith.constant 0 : index
    %c0_5 = arith.constant 0 : index
    %4 = vector.load %arg3[%c0_4, %c0_5] : memref<16x1xf32, #tpu.memory_space<vmem>>, vector<16x1xf32>
    %5 = vector.broadcast %4 : vector<16x1xf32> to vector<16x256xf32>
    %6 = arith.addf %3, %5 : vector<16x256xf32>
    %cst_6 = arith.constant 0.000000e+00 : f32
    %7 = vector.broadcast %cst_6 : f32 to vector<16x256xf32>
    %8 = arith.maximumf %6, %7 : vector<16x256xf32>
    %9 = vector.extract_strided_slice %8 {offsets = [0, 0], sizes = [16, 128], strides = [1, 1]} : vector<16x256xf32> to vector<16x128xf32>
    %10 = vector.extract_strided_slice %8 {offsets = [0, 128], sizes = [16, 128], strides = [1, 1]} : vector<16x256xf32> to vector<16x128xf32>
    %11 = arith.maximumf %9, %10 : vector<16x128xf32>
    %c0_7 = arith.constant 0 : index
    %c0_8 = arith.constant 0 : index
    %c0_9 = arith.constant 0 : index
    %12 = vector.load %arg4[%c0_7, %c0_8, %c0_9] : memref<1x16x128xf32, #tpu.memory_space<vmem>>, vector<1x16x128xf32>
    %13 = vector.shape_cast %12 : vector<1x16x128xf32> to vector<16x128xf32>
    %14 = vector.shape_cast %11 : vector<16x128xf32> to vector<1x16x128xf32>
    tpu.vector_store %arg4[%c0_7, %c0_8, %c0_9], %14 {strides = array<i32>} : memref<1x16x128xf32, #tpu.memory_space<vmem>>, vector<1x16x128xf32>,
    return
  }
  func.func @transform_0(%arg0: i32) -> (i32, i32, i32) {
    %c0_i32 = arith.constant 0 : i32
    %c0_i32_0 = arith.constant 0 : i32
    %c0_i32_1 = arith.constant 0 : i32
    return %arg0, %c0_i32, %c0_i32_0 : i32, i32, i32
  }
  func.func @transform_1(%arg0: i32) -> (i32, i32) {
    %c0_i32 = arith.constant 0 : i32
    %c0_i32_0 = arith.constant 0 : i32
    %c0_i32_1 = arith.constant 0 : i32
    return %c0_i32, %c0_i32_0 : i32, i32
  }
  func.func @transform_2(%arg0: i32) -> (i32, i32) {
    %c0_i32 = arith.constant 0 : i32
    %c0_i32_0 = arith.constant 0 : i32
    %c0_i32_1 = arith.constant 0 : i32
    return %c0_i32, %c0_i32_0 : i32, i32
  }
  func.func @transform_3(%arg0: i32) -> (i32, i32, i32) {
    %c0_i32 = arith.constant 0 : i32
    %c0_i32_0 = arith.constant 0 : i32
    %c0_i32_1 = arith.constant 0 : i32
    return %arg0, %c0_i32, %c0_i32_0 : i32, i32, i32
  }
}

module attributes {stable_mosaic.version = 11 : i64} {
  func.func @fc_stack_kernel(%arg0: i32, %arg1: memref<2x2048xf32, #tpu.memory_space<vmem>>, %arg2: memref<1024x2048xbf16, #tpu.memory_space<vmem>>, %arg3: memref<1x1024xf32, #tpu.memory_space<vmem>>, %arg4: memref<512x1024xbf16, #tpu.memory_space<vmem>>, %arg5: memref<1x512xf32, #tpu.memory_space<vmem>>, %arg6: memref<1024x512xbf16, #tpu.memory_space<vmem>>, %arg7: memref<1x1024xf32, #tpu.memory_space<vmem>>, %arg8: memref<2x1024xf32, #tpu.memory_space<vmem>>) attributes {dimension_semantics = [#tpu.dimension_semantics<parallel>], iteration_bounds = array<i64: 2>, scalar_prefetch = 0 : i64, scratch_operands = 0 : i64, tpu.core_type = #tpu.core_type<tc>, window_params = [{pipeline_mode = #tpu.pipeline_mode<synchronous>, transform_indices = @transform_0, window_bounds = array<i64: 2, 2048>}, {pipeline_mode = #tpu.pipeline_mode<synchronous>, transform_indices = @transform_1, window_bounds = array<i64: 1024, 2048>}, {pipeline_mode = #tpu.pipeline_mode<synchronous>, transform_indices = @transform_2, window_bounds = array<i64: 1, 1024>}, {pipeline_mode = #tpu.pipeline_mode<synchronous>, transform_indices = @transform_3, window_bounds = array<i64: 512, 1024>}, {pipeline_mode = #tpu.pipeline_mode<synchronous>, transform_indices = @transform_4, window_bounds = array<i64: 1, 512>}, {transform_indices = @transform_5, window_bounds = array<i64: 1024, 512>}, {transform_indices = @transform_6, window_bounds = array<i64: 1, 1024>}, {transform_indices = @transform_7, window_bounds = array<i64: 2, 1024>}]} {
    %c0 = arith.constant 0 : index
    %c0_0 = arith.constant 0 : index
    %0 = vector.load %arg1[%c0, %c0_0] : memref<2x2048xf32, #tpu.memory_space<vmem>>, vector<2x2048xf32>
    %1 = arith.truncf %0 : vector<2x2048xf32> to vector<2x2048xbf16>
    %c0_1 = arith.constant 0 : index
    %c0_2 = arith.constant 0 : index
    %2 = vector.load %arg2[%c0_1, %c0_2] : memref<1024x2048xbf16, #tpu.memory_space<vmem>>, vector<1024x2048xbf16>
    %cst = arith.constant dense<0.000000e+00> : vector<2x1024xf32>
    %3 = tpu.matmul %1, %2, %cst {dimension_numbers = #tpu.dot_dimension_numbers<[1], [1], [0], [0], [0, 0, 1, 0], [], []>} : vector<2x2048xbf16>, vector<1024x2048xbf16>, vector<2x1024xf32> -> vector<2x1024xf32>
    %c0_3 = arith.constant 0 : index
    %c0_4 = arith.constant 0 : index
    %4 = vector.load %arg3[%c0_3, %c0_4] : memref<1x1024xf32, #tpu.memory_space<vmem>>, vector<1x1024xf32>
    %5 = vector.broadcast %4 : vector<1x1024xf32> to vector<2x1024xf32>
    %6 = arith.addf %3, %5 : vector<2x1024xf32>
    %cst_5 = arith.constant 0.000000e+00 : f32
    %7 = vector.broadcast %cst_5 : f32 to vector<2x1024xf32>
    %8 = arith.maximumf %6, %7 : vector<2x1024xf32>
    %9 = arith.truncf %8 : vector<2x1024xf32> to vector<2x1024xbf16>
    %c0_6 = arith.constant 0 : index
    %c0_7 = arith.constant 0 : index
    %10 = vector.load %arg4[%c0_6, %c0_7] : memref<512x1024xbf16, #tpu.memory_space<vmem>>, vector<512x1024xbf16>
    %cst_8 = arith.constant dense<0.000000e+00> : vector<2x512xf32>
    %11 = tpu.matmul %9, %10, %cst_8 {dimension_numbers = #tpu.dot_dimension_numbers<[1], [1], [0], [0], [0, 0, 1, 0], [], []>} : vector<2x1024xbf16>, vector<512x1024xbf16>, vector<2x512xf32> -> vector<2x512xf32>
    %c0_9 = arith.constant 0 : index
    %c0_10 = arith.constant 0 : index
    %12 = vector.load %arg5[%c0_9, %c0_10] : memref<1x512xf32, #tpu.memory_space<vmem>>, vector<1x512xf32>
    %13 = vector.broadcast %12 : vector<1x512xf32> to vector<2x512xf32>
    %14 = arith.addf %11, %13 : vector<2x512xf32>
    %cst_11 = arith.constant 0.000000e+00 : f32
    %15 = vector.broadcast %cst_11 : f32 to vector<2x512xf32>
    %16 = arith.maximumf %14, %15 : vector<2x512xf32>
    %17 = arith.truncf %16 : vector<2x512xf32> to vector<2x512xbf16>
    %c0_12 = arith.constant 0 : index
    %c0_13 = arith.constant 0 : index
    %18 = vector.load %arg6[%c0_12, %c0_13] : memref<1024x512xbf16, #tpu.memory_space<vmem>>, vector<1024x512xbf16>
    %cst_14 = arith.constant dense<0.000000e+00> : vector<2x1024xf32>
    %19 = tpu.matmul %17, %18, %cst_14 {dimension_numbers = #tpu.dot_dimension_numbers<[1], [1], [0], [0], [0, 0, 1, 0], [], []>} : vector<2x512xbf16>, vector<1024x512xbf16>, vector<2x1024xf32> -> vector<2x1024xf32>
    %c0_15 = arith.constant 0 : index
    %c0_16 = arith.constant 0 : index
    %20 = vector.load %arg7[%c0_15, %c0_16] : memref<1x1024xf32, #tpu.memory_space<vmem>>, vector<1x1024xf32>
    %21 = vector.broadcast %20 : vector<1x1024xf32> to vector<2x1024xf32>
    %22 = arith.addf %19, %21 : vector<2x1024xf32>
    %c0_17 = arith.constant 0 : index
    %c0_18 = arith.constant 0 : index
    %23 = vector.load %arg8[%c0_17, %c0_18] : memref<2x1024xf32, #tpu.memory_space<vmem>>, vector<2x1024xf32>
    tpu.vector_store %arg8[%c0_17, %c0_18], %22 {strides = array<i32>} : memref<2x1024xf32, #tpu.memory_space<vmem>>, vector<2x1024xf32>,
    return
  }
  func.func @transform_0(%arg0: i32) -> (i32, i32) {
    %c0_i32 = arith.constant 0 : i32
    %c0_i32_0 = arith.constant 0 : i32
    %c0_i32_1 = arith.constant 0 : i32
    return %c0_i32, %c0_i32_0 : i32, i32
  }
  func.func @transform_1(%arg0: i32) -> (i32, i32) {
    %c0_i32 = arith.constant 0 : i32
    %c0_i32_0 = arith.constant 0 : i32
    %c0_i32_1 = arith.constant 0 : i32
    return %c0_i32, %c0_i32_0 : i32, i32
  }
  func.func @transform_2(%arg0: i32) -> (i32, i32) {
    %c0_i32 = arith.constant 0 : i32
    %c0_i32_0 = arith.constant 0 : i32
    %c0_i32_1 = arith.constant 0 : i32
    return %c0_i32, %c0_i32_0 : i32, i32
  }
  func.func @transform_3(%arg0: i32) -> (i32, i32) {
    %c0_i32 = arith.constant 0 : i32
    %c0_i32_0 = arith.constant 0 : i32
    %c0_i32_1 = arith.constant 0 : i32
    return %c0_i32, %c0_i32_0 : i32, i32
  }
  func.func @transform_4(%arg0: i32) -> (i32, i32) {
    %c0_i32 = arith.constant 0 : i32
    %c0_i32_0 = arith.constant 0 : i32
    %c0_i32_1 = arith.constant 0 : i32
    return %c0_i32, %c0_i32_0 : i32, i32
  }
  func.func @transform_5(%arg0: i32) -> (i32, i32) {
    %c0_i32 = arith.constant 0 : i32
    %c0_i32_0 = arith.constant 0 : i32
    return %arg0, %c0_i32 : i32, i32
  }
  func.func @transform_6(%arg0: i32) -> (i32, i32) {
    %c0_i32 = arith.constant 0 : i32
    %c0_i32_0 = arith.constant 0 : i32
    return %c0_i32, %arg0 : i32, i32
  }
  func.func @transform_7(%arg0: i32) -> (i32, i32) {
    %c0_i32 = arith.constant 0 : i32
    %c0_i32_0 = arith.constant 0 : i32
    return %c0_i32, %arg0 : i32, i32
  }
}

</mosaic_0001>

<bundles_post_ra>
// kernel: cnn_model_forward.5
= control target key start
LH: loop header
LB: loop body
LE: loop exit
PB: predicated region body
PF: predicated region fallthrough
CT: control target
= control target key end

     0   :  { %s1582_s12 = smov 0   ;;  %s1762_s0 = inlined_call_operand.vmem [shape: bf16[2,128,2048], index: 0, kind: input, shape index: {}]   ;;  %s1763_s1 = inlined_call_operand.vmem [shape: bf16[2,128], index: 1, kind: input, shape index: {}]   ;;  %s1764_s2 = inlined_call_operand.vmem [shape: f32[2,1], index: 2, kind: input, shape index: {}]   ;;  %s1765_s3 = inlined_call_operand.vmem [shape: f32[2,2,1024], index: 3, kind: output, shape index: {}]  }
   0x1 LB: > { %s1400_s13 = sadd.s32 4294967295, %s1558_s12   ;;  %p1404_p0 = scmp.ge.s32.totalorder %s1558_s12, 1  ;;  %s1558_s12 = sphi %s1582_s12, %s13_s12  }
   0x2   : > { %p137_p1 = scmp.lt.s32.totalorder %s1558_s12, 3 }
   0x4   : > { %p138_p2 = pnand %p1404_p0, %p137_p1 }
   0x5   : > { %p161_p3 = scmp.lt.s32.totalorder (!%p138_p2), %s1400_s13, 1  ;;  %v301_v0 = vld [vmem:[%s1764_s2] sm:$0x3] (!%p138_p2)  ;;  %v1560_v1 = vmov (!%p138_p2), 0  }
   0x6   : > { %141 = sbr.rel (%p138_p2) target bundleno = 374 (0x176), region = 32  ;;  %979 = vmatprep.mubr.bf16.mxu0 (!%p138_p2), %v1560_v1  ;;  %1020 = vmatprep.mubr.bf16.mxu1 (!%p138_p2), %v1560_v1 }
   0x7   : > { %1551 = vset.pattern.permute.xlu0 (!%p138_p2), %v1560_v1 }
   0x8   : > { %304 = vperm.xlu0 (!%p138_p2), %1551, %v301_v0  }
   0xd   : > { %s1767_s13 = smov (!%p161_p3, %s1400_s13), 1 }
   0xe   : > { %s1539_s16 = sshll.u32 %s1767_s13, 10  ;;  %s1540_s22 = sshll.u32 %s1767_s13, 4 }
   0xf   : > { %s1602_s19 = scalar_lea.vmem %s1762_s0, %s1539_s16  ;;  %s1755_s25 = scalar_lea.vmem %s1765_s3, %s1540_s22 }
  0x10   : > { %v173_v2 = vld [vmem:[%s1602_s19] sm:$0xff]  ;;  %v174_v4 = vld [vmem:[%s1602_s19 + $0x8] sm:$0xff]  ;;  %v175_v0 = vld [vmem:[%s1602_s19 + $0x10] sm:$0xff] }
  0x11   : > { %v181_v3 = vld [vmem:[%s1602_s19 + $0x40] sm:$0xff]  ;;  %v182_v6 = vld [vmem:[%s1602_s19 + $0x48] sm:$0xff] }
  0x12   : > { %v1410_v5 = vcombine.high %v173_v2, %v181_v3  ;;  %v1409_v7 = vcombine.low %v173_v2, %v181_v3  ;;  %v189_v8 = vld [vmem:[%s1602_s19 + $0x80] sm:$0xff]  ;;  %v1412_v10 = vcombine.high %v174_v4, %v182_v6  ;;  %v1411_v11 = vcombine.low %v174_v4, %v182_v6  ;;  %v190_v13 = vld [vmem:[%s1602_s19 + $0x88] sm:$0xff]  ;;  %v183_v2 = vld [vmem:[%s1602_s19 + $0x50] sm:$0xff] }
  0x13   : > { %v197_v9 = vld [vmem:[%s1602_s19 + $0xc0] sm:$0xff]  ;;  %v198_v14 = vld [vmem:[%s1602_s19 + $0xc8] sm:$0xff]  ;;  %v176_v3 = vld [vmem:[%s1602_s19 + $0x18] sm:$0xff] }
  0x14   : > { %v1426_v12 = vcombine.high %v189_v8, %v197_v9  ;;  %v205_v15 = vld [vmem:[%s1602_s19 + $0x100] sm:$0xff]  ;;  %947 = vmatprep.subr.bf16.mxu0 %v1410_v5  ;;  %v1428_v16 = vcombine.high %v190_v13, %v198_v14  ;;  %v206_v18 = vld [vmem:[%s1602_s19 + $0x108] sm:$0xff]  ;;  %988 = vmatprep.subr.bf16.mxu1 %v1412_v10  ;;  %v1425_v20 = vcombine.low %v189_v8, %v197_v9  ;;  %v184_v4 = vld [vmem:[%s1602_s19 + $0x58] sm:$0xff] }
  0x15   : > { %v213_v17 = vld [vmem:[%s1602_s19 + $0x140] sm:$0xff]  ;;  %v214_v19 = vld [vmem:[%s1602_s19 + $0x148] sm:$0xff]  ;;  %948 = vmatpush1.bf16.msra.mxu0 %v1409_v7  ;;  %989 = vmatpush1.bf16.msra.mxu1 %v1411_v11  ;;  %v1427_v21 = vcombine.low %v190_v13, %v198_v14  ;;  %v1414_v7 = vcombine.high %v175_v0, %v183_v2  ;;  %v1416_v8 = vcombine.high %v176_v3, %v184_v4  ;;  %v191_v9 = vld [vmem:[%s1602_s19 + $0x90] sm:$0xff] }
  0x16   : > { %949 = vmatprep.subr.bf16.mxu0 %v1426_v12  ;;  %v1442_v22 = vcombine.high %v205_v15, %v213_v17  ;;  %990 = vmatprep.subr.bf16.mxu1 %v1428_v16  ;;  %v1444_v23 = vcombine.high %v206_v18, %v214_v19  ;;  %v221_v24 = vld [vmem:[%s1602_s19 + $0x180] sm:$0xff]  ;;  %v222_v26 = vld [vmem:[%s1602_s19 + $0x188] sm:$0xff]  ;;  %v1441_v28 = vcombine.low %v205_v15, %v213_v17  ;;  %v199_v10 = vld [vmem:[%s1602_s19 + $0xd0] sm:$0xff] }
  0x17   : > { %v229_v25 = vld [vmem:[%s1602_s19 + $0x1c0] sm:$0xff]  ;;  %v230_v27 = vld [vmem:[%s1602_s19 + $0x1c8] sm:$0xff]  ;;  %v1443_v29 = vcombine.low %v206_v18, %v214_v19  ;;  %v192_v11 = vld [vmem:[%s1602_s19 + $0x98] sm:$0xff]  ;;  %v1413_v14 = vcombine.low %v175_v0, %v183_v2  ;;  %v1415_v15 = vcombine.low %v176_v3, %v184_v4  ;;  %v1430_v16 = vcombine.high %v191_v9, %v199_v10 }
  0x18   : > { %v1458_v30 = vcombine.high %v221_v24, %v229_v25  ;;  %v1460_v31 = vcombine.high %v222_v26, %v230_v27  ;;  %v237_v32 = vld [vmem:[%s1602_s19 + $0x200] sm:$0xff]  ;;  %v238_v34 = vld [vmem:[%s1602_s19 + $0x208] sm:$0xff]  ;;  %v1457_v36 = vcombine.low %v221_v24, %v229_v25  ;;  %v1459_v37 = vcombine.low %v222_v26, %v230_v27  ;;  %v200_v12 = vld [vmem:[%s1602_s19 + $0xd8] sm:$0xff] }
  0x19   : > { %950 = vmatpush1.bf16.msra.mxu0 %v1425_v20  ;;  %991 = vmatpush1.bf16.msra.mxu1 %v1427_v21  ;;  %v245_v33 = vld [vmem:[%s1602_s19 + $0x240] sm:$0xff]  ;;  %v246_v35 = vld [vmem:[%s1602_s19 + $0x248] sm:$0xff]  ;;  %v1432_v17 = vcombine.high %v192_v11, %v200_v12  ;;  %v207_v18 = vld [vmem:[%s1602_s19 + $0x110] sm:$0xff] }
  0x1a   : > { %951 = vmatprep.subr.bf16.mxu0 %v1442_v22  ;;  %992 = vmatprep.subr.bf16.mxu1 %v1444_v23  ;;  %v1474_v38 = vcombine.high %v237_v32, %v245_v33  ;;  %v1476_v39 = vcombine.high %v238_v34, %v246_v35  ;;  %v253_v40 = vld [vmem:[%s1602_s19 + $0x280] sm:$0xff]  ;;  %v254_v42 = vld [vmem:[%s1602_s19 + $0x288] sm:$0xff]  ;;  %v1473_v44 = vcombine.low %v237_v32, %v245_v33  ;;  %v215_v19 = vld [vmem:[%s1602_s19 + $0x150] sm:$0xff] }
  0x1b   : > { %v261_v41 = vld [vmem:[%s1602_s19 + $0x2c0] sm:$0xff]  ;;  %v262_v43 = vld [vmem:[%s1602_s19 + $0x2c8] sm:$0xff]  ;;  %v1475_v45 = vcombine.low %v238_v34, %v246_v35  ;;  %v208_v20 = vld [vmem:[%s1602_s19 + $0x118] sm:$0xff]  ;;  %v1429_v22 = vcombine.low %v191_v9, %v199_v10  ;;  %v1431_v23 = vcombine.low %v192_v11, %v200_v12  ;;  %v1446_v24 = vcombine.high %v207_v18, %v215_v19 }
  0x1c   : > { %v1490_v46 = vcombine.high %v253_v40, %v261_v41  ;;  %v1492_v47 = vcombine.high %v254_v42, %v262_v43  ;;  %v269_v48 = vld [vmem:[%s1602_s19 + $0x300] sm:$0xff]  ;;  %v270_v50 = vld [vmem:[%s1602_s19 + $0x308] sm:$0xff]  ;;  %v1489_v52 = vcombine.low %v253_v40, %v261_v41  ;;  %v1491_v53 = vcombine.low %v254_v42, %v262_v43  ;;  %v216_v21 = vld [vmem:[%s1602_s19 + $0x158] sm:$0xff] }
  0x1d   : > { %952 = vmatpush1.bf16.msra.mxu0 %v1441_v28  ;;  %993 = vmatpush1.bf16.msra.mxu1 %v1443_v29  ;;  %v277_v49 = vld [vmem:[%s1602_s19 + $0x340] sm:$0xff]  ;;  %v278_v51 = vld [vmem:[%s1602_s19 + $0x348] sm:$0xff]  ;;  %v1448_v25 = vcombine.high %v208_v20, %v216_v21  ;;  %v223_v26 = vld [vmem:[%s1602_s19 + $0x190] sm:$0xff] }
  0x1e   : > { %953 = vmatprep.subr.bf16.mxu0 %v1458_v30  ;;  %994 = vmatprep.subr.bf16.mxu1 %v1460_v31  ;;  %v1506_v54 = vcombine.high %v269_v48, %v277_v49  ;;  %v1508_v55 = vcombine.high %v270_v50, %v278_v51  ;;  %v285_v56 = vld [vmem:[%s1602_s19 + $0x380] sm:$0xff]  ;;  %v286_v58 = vld [vmem:[%s1602_s19 + $0x388] sm:$0xff]  ;;  %v1505_v60 = vcombine.low %v269_v48, %v277_v49  ;;  %v231_v27 = vld [vmem:[%s1602_s19 + $0x1d0] sm:$0xff] }
  0x1f   : > { %v293_v57 = vld [vmem:[%s1602_s19 + $0x3c0] sm:$0xff]  ;;  %v294_v59 = vld [vmem:[%s1602_s19 + $0x3c8] sm:$0xff]  ;;  %v1507_v61 = vcombine.low %v270_v50, %v278_v51  ;;  %v224_v28 = vld [vmem:[%s1602_s19 + $0x198] sm:$0xff]  ;;  %v1445_v30 = vcombine.low %v207_v18, %v215_v19  ;;  %v1447_v31 = vcombine.low %v208_v20, %v216_v21  ;;  %v1462_v32 = vcombine.high %v223_v26, %v231_v27 }
  0x20   : > { %v1522_v62 = vcombine.high %v285_v56, %v293_v57  ;;  %v1524_v63 = vcombine.high %v286_v58, %v294_v59  ;;  %v1521_v5 = vcombine.low %v285_v56, %v293_v57  ;;  %v1523_v6 = vcombine.low %v286_v58, %v294_v59  ;;  %v1647_v13 = vld [vmem:[%s1763_s1] sm:$0x1]  ;;  %v232_v29 = vld [vmem:[%s1602_s19 + $0x1d8] sm:$0xff]  ;;  %v239_v34 = vld [vmem:[%s1602_s19 + $0x210] sm:$0xff] }
  0x21   : > { %954 = vmatpush1.bf16.msra.mxu0 %v1457_v36  ;;  %995 = vmatpush1.bf16.msra.mxu1 %v1459_v37  ;;  %v1464_v33 = vcombine.high %v224_v28, %v232_v29  ;;  %v247_v35 = vld [vmem:[%s1602_s19 + $0x250] sm:$0xff]  ;;  %v240_v36 = vld [vmem:[%s1602_s19 + $0x218] sm:$0xff]  ;;  %v177_v3 = vld [vmem:[%s1602_s19 + $0x20] sm:$0xff] }
  0x22   : > { %955 = vmatprep.subr.bf16.mxu0 %v1474_v38  ;;  %996 = vmatprep.subr.bf16.mxu1 %v1476_v39  ;;  %v248_v37 = vld [vmem:[%s1602_s19 + $0x258] sm:$0xff]  ;;  %v1461_v38 = vcombine.low %v223_v26, %v231_v27  ;;  %v1463_v39 = vcombine.low %v224_v28, %v232_v29  ;;  %v1478_v40 = vcombine.high %v239_v34, %v247_v35  ;;  %v255_v42 = vld [vmem:[%s1602_s19 + $0x290] sm:$0xff]  ;;  %v185_v4 = vld [vmem:[%s1602_s19 + $0x60] sm:$0xff] }
  0x23   : > { %v1480_v41 = vcombine.high %v240_v36, %v248_v37  ;;  %v263_v43 = vld [vmem:[%s1602_s19 + $0x2d0] sm:$0xff]  ;;  %v1418_v9 = vcombine.high %v177_v3, %v185_v4  ;;  %v193_v11 = vld [vmem:[%s1602_s19 + $0xa0] sm:$0xff] }
  0x24   : > { %v1494_v48 = vcombine.high %v255_v42, %v263_v43  ;;  %v271_v50 = vld [vmem:[%s1602_s19 + $0x310] sm:$0xff]  ;;  %v201_v12 = vld [vmem:[%s1602_s19 + $0xe0] sm:$0xff] }
  0x25   : > { %956 = vmatpush1.bf16.msra.mxu0 %v1473_v44  ;;  %997 = vmatpush1.bf16.msra.mxu1 %v1475_v45  ;;  %v256_v44 = vld [vmem:[%s1602_s19 + $0x298] sm:$0xff]  ;;  %v279_v51 = vld [vmem:[%s1602_s19 + $0x350] sm:$0xff]  ;;  %v1434_v18 = vcombine.high %v193_v11, %v201_v12  ;;  %v209_v20 = vld [vmem:[%s1602_s19 + $0x120] sm:$0xff] }
  0x26   : > { %957 = vmatprep.subr.bf16.mxu0 %v1490_v46  ;;  %998 = vmatprep.subr.bf16.mxu1 %v1492_v47  ;;  %v264_v45 = vld [vmem:[%s1602_s19 + $0x2d8] sm:$0xff]  ;;  %v1477_v46 = vcombine.low %v239_v34, %v247_v35  ;;  %v1479_v47 = vcombine.low %v240_v36, %v248_v37  ;;  %v1510_v56 = vcombine.high %v271_v50, %v279_v51  ;;  %v287_v58 = vld [vmem:[%s1602_s19 + $0x390] sm:$0xff]  ;;  %v217_v21 = vld [vmem:[%s1602_s19 + $0x160] sm:$0xff] }
  0x27   : > { %v1496_v49 = vcombine.high %v256_v44, %v264_v45  ;;  %v295_v59 = vld [vmem:[%s1602_s19 + $0x3d0] sm:$0xff]  ;;  %v1450_v26 = vcombine.high %v209_v20, %v217_v21  ;;  %v225_v28 = vld [vmem:[%s1602_s19 + $0x1a0] sm:$0xff] }
  0x28   : > { %v1526_v0 = vcombine.high %v287_v58, %v295_v59  ;;  %v233_v29 = vld [vmem:[%s1602_s19 + $0x1e0] sm:$0xff] }
  0x29   : > { %958 = vmatpush1.bf16.msra.mxu0 %v1489_v52  ;;  %999 = vmatpush1.bf16.msra.mxu1 %v1491_v53  ;;  %v272_v52 = vld [vmem:[%s1602_s19 + $0x318] sm:$0xff]  ;;  %v1466_v34 = vcombine.high %v225_v28, %v233_v29  ;;  %v241_v36 = vld [vmem:[%s1602_s19 + $0x220] sm:$0xff] }
  0x2a   : > { %959 = vmatprep.subr.bf16.mxu0 %v1506_v54  ;;  %1000 = vmatprep.subr.bf16.mxu1 %v1508_v55  ;;  %v280_v53 = vld [vmem:[%s1602_s19 + $0x358] sm:$0xff]  ;;  %v1493_v54 = vcombine.low %v255_v42, %v263_v43  ;;  %v1495_v55 = vcombine.low %v256_v44, %v264_v45  ;;  %v249_v37 = vld [vmem:[%s1602_s19 + $0x260] sm:$0xff] }
  0x2b   : > { %v1512_v57 = vcombine.high %v272_v52, %v280_v53  ;;  %v1482_v42 = vcombine.high %v241_v36, %v249_v37  ;;  %v257_v44 = vld [vmem:[%s1602_s19 + $0x2a0] sm:$0xff] }
  0x2c   : > { %v265_v45 = vld [vmem:[%s1602_s19 + $0x2e0] sm:$0xff] }
  0x2d   : > { %960 = vmatpush1.bf16.msra.mxu0 %v1505_v60  ;;  %1001 = vmatpush1.bf16.msra.mxu1 %v1507_v61  ;;  %v288_v60 = vld [vmem:[%s1602_s19 + $0x398] sm:$0xff] }
  0x2e   : > { %961 = vmatprep.subr.bf16.mxu0 %v1522_v62  ;;  %1002 = vmatprep.subr.bf16.mxu1 %v1524_v63  ;;  %v296_v61 = vld [vmem:[%s1602_s19 + $0x3d8] sm:$0xff]  ;;  %v1509_v62 = vcombine.low %v271_v50, %v279_v51  ;;  %v1511_v63 = vcombine.low %v272_v52, %v280_v53  ;;  %v1498_v50 = vcombine.high %v257_v44, %v265_v45  ;;  %v273_v52 = vld [vmem:[%s1602_s19 + $0x320] sm:$0xff] }
  0x2f   : > { %v1528_v2 = vcombine.high %v288_v60, %v296_v61  ;;  %v281_v53 = vld [vmem:[%s1602_s19 + $0x360] sm:$0xff] }
  0x31   : > { %962 = vmatpush1.bf16.msra.mxu0 %v1521_v5  ;;  %1003 = vmatpush1.bf16.msra.mxu1 %v1523_v6  ;;  %v178_v5 = vld [vmem:[%s1602_s19 + $0x28] sm:$0xff] }
  0x32   : > { %1029 = vmatprep.subr.bf16.mxu0 %v1414_v7  ;;  %1070 = vmatprep.subr.bf16.mxu1 %v1416_v8  ;;  %v186_v6 = vld [vmem:[%s1602_s19 + $0x68] sm:$0xff]  ;;  %v1525_v7 = vcombine.low %v287_v58, %v295_v59  ;;  %v1527_v8 = vcombine.low %v288_v60, %v296_v61  ;;  %v1514_v58 = vcombine.high %v273_v52, %v281_v53  ;;  %v289_v60 = vld [vmem:[%s1602_s19 + $0x3a0] sm:$0xff] }
  0x33   : > { %v1420_v10 = vcombine.high %v178_v5, %v186_v6  ;;  %v297_v61 = vld [vmem:[%s1602_s19 + $0x3e0] sm:$0xff] }
  0x34   : > { %980 = vmatmul.mubr.bf16.vlgmr.msra.gmra.mrb[0].mxu0 %v1647_v13  ;;  %1021 = vmatmul.mubr.bf16.vlgmr.msra.gmra.mrb[0].mxu1 %v1647_v13 }
  0x35   : > { %1030 = vmatpush1.bf16.msra.mxu0 %v1413_v14  ;;  %1071 = vmatpush1.bf16.msra.mxu1 %v1415_v15  ;;  %v194_v14 = vld [vmem:[%s1602_s19 + $0xa8] sm:$0xff] }
  0x36   : > { %1031 = vmatprep.subr.bf16.mxu0 %v1430_v16  ;;  %1072 = vmatprep.subr.bf16.mxu1 %v1432_v17  ;;  %v202_v15 = vld [vmem:[%s1602_s19 + $0xe8] sm:$0xff]  ;;  %v1417_v16 = vcombine.low %v177_v3, %v185_v4  ;;  %v1419_v17 = vcombine.low %v178_v5, %v186_v6  ;;  %v1530_v3 = vcombine.high %v289_v60, %v297_v61  ;;  %v179_v5 = vld [vmem:[%s1602_s19 + $0x30] sm:$0xff] }
  0x37   : > { %1061 = vmatprep.mubr.bf16.mxu0 %v1560_v1  ;;  %1102 = vmatprep.mubr.bf16.mxu1 %v1560_v1  ;;  %v1436_v19 = vcombine.high %v194_v14, %v202_v15  ;;  %v187_v6 = vld [vmem:[%s1602_s19 + $0x70] sm:$0xff] }
  0x39   : > { %1032 = vmatpush1.bf16.msra.mxu0 %v1429_v22  ;;  %1073 = vmatpush1.bf16.msra.mxu1 %v1431_v23  ;;  %v210_v22 = vld [vmem:[%s1602_s19 + $0x128] sm:$0xff] }
  0x3a   : > { %1033 = vmatprep.subr.bf16.mxu0 %v1446_v24  ;;  %1074 = vmatprep.subr.bf16.mxu1 %v1448_v25  ;;  %v218_v23 = vld [vmem:[%s1602_s19 + $0x168] sm:$0xff]  ;;  %v1433_v24 = vcombine.low %v193_v11, %v201_v12  ;;  %v1435_v25 = vcombine.low %v194_v14, %v202_v15  ;;  %v1422_v11 = vcombine.high %v179_v5, %v187_v6  ;;  %v195_v14 = vld [vmem:[%s1602_s19 + $0xb0] sm:$0xff] }
  0x3b   : > { %v1452_v27 = vcombine.high %v210_v22, %v218_v23  ;;  %v203_v15 = vld [vmem:[%s1602_s19 + $0xf0] sm:$0xff] }
  0x3d   : > { %1034 = vmatpush1.bf16.msra.mxu0 %v1445_v30  ;;  %1075 = vmatpush1.bf16.msra.mxu1 %v1447_v31  ;;  %v226_v30 = vld [vmem:[%s1602_s19 + $0x1a8] sm:$0xff] }
  0x3e   : > { %1035 = vmatprep.subr.bf16.mxu0 %v1462_v32  ;;  %1076 = vmatprep.subr.bf16.mxu1 %v1464_v33  ;;  %v234_v31 = vld [vmem:[%s1602_s19 + $0x1e8] sm:$0xff]  ;;  %v1449_v32 = vcombine.low %v209_v20, %v217_v21  ;;  %v1451_v33 = vcombine.low %v210_v22, %v218_v23  ;;  %v1438_v20 = vcombine.high %v195_v14, %v203_v15  ;;  %v211_v22 = vld [vmem:[%s1602_s19 + $0x130] sm:$0xff] }
  0x3f   : > { %v1468_v35 = vcombine.high %v226_v30, %v234_v31  ;;  %v219_v23 = vld [vmem:[%s1602_s19 + $0x170] sm:$0xff] }
  0x41   : > { %1036 = vmatpush1.bf16.msra.mxu0 %v1461_v38  ;;  %1077 = vmatpush1.bf16.msra.mxu1 %v1463_v39  ;;  %v242_v38 = vld [vmem:[%s1602_s19 + $0x228] sm:$0xff] }
  0x42   : > { %1037 = vmatprep.subr.bf16.mxu0 %v1478_v40  ;;  %1078 = vmatprep.subr.bf16.mxu1 %v1480_v41  ;;  %v250_v39 = vld [vmem:[%s1602_s19 + $0x268] sm:$0xff]  ;;  %v1465_v40 = vcombine.low %v225_v28, %v233_v29  ;;  %v1467_v41 = vcombine.low %v226_v30, %v234_v31  ;;  %v1454_v28 = vcombine.high %v211_v22, %v219_v23  ;;  %v227_v30 = vld [vmem:[%s1602_s19 + $0x1b0] sm:$0xff] }
  0x43   : > { %v1484_v43 = vcombine.high %v242_v38, %v250_v39  ;;  %v235_v31 = vld [vmem:[%s1602_s19 + $0x1f0] sm:$0xff] }
  0x45   : > { %1038 = vmatpush1.bf16.msra.mxu0 %v1477_v46  ;;  %1079 = vmatpush1.bf16.msra.mxu1 %v1479_v47  ;;  %v258_v46 = vld [vmem:[%s1602_s19 + $0x2a8] sm:$0xff] }
  0x46   : > { %1039 = vmatprep.subr.bf16.mxu0 %v1494_v48  ;;  %1080 = vmatprep.subr.bf16.mxu1 %v1496_v49  ;;  %v266_v47 = vld [vmem:[%s1602_s19 + $0x2e8] sm:$0xff]  ;;  %v1481_v48 = vcombine.low %v241_v36, %v249_v37  ;;  %v1483_v49 = vcombine.low %v242_v38, %v250_v39  ;;  %v1470_v36 = vcombine.high %v227_v30, %v235_v31  ;;  %v243_v38 = vld [vmem:[%s1602_s19 + $0x230] sm:$0xff] }
  0x47   : > { %v1500_v51 = vcombine.high %v258_v46, %v266_v47  ;;  %v251_v39 = vld [vmem:[%s1602_s19 + $0x270] sm:$0xff] }
  0x49   : > { %1040 = vmatpush1.bf16.msra.mxu0 %v1493_v54  ;;  %1081 = vmatpush1.bf16.msra.mxu1 %v1495_v55  ;;  %v274_v54 = vld [vmem:[%s1602_s19 + $0x328] sm:$0xff] }
  0x4a   : > { %1041 = vmatprep.subr.bf16.mxu0 %v1510_v56  ;;  %1082 = vmatprep.subr.bf16.mxu1 %v1512_v57  ;;  %v282_v55 = vld [vmem:[%s1602_s19 + $0x368] sm:$0xff]  ;;  %v1497_v56 = vcombine.low %v257_v44, %v265_v45  ;;  %v1499_v57 = vcombine.low %v258_v46, %v266_v47  ;;  %v259_v45 = vld [vmem:[%s1602_s19 + $0x2b0] sm:$0xff]  ;;  %v260_v47 = vld [vmem:[%s1602_s19 + $0x2b8] sm:$0xff] }
  0x4b   : > { %v1516_v59 = vcombine.high %v274_v54, %v282_v55  ;;  %v267_v46 = vld [vmem:[%s1602_s19 + $0x2f0] sm:$0xff] }
  0x4d   : > { %1042 = vmatpush1.bf16.msra.mxu0 %v1509_v62  ;;  %1083 = vmatpush1.bf16.msra.mxu1 %v1511_v63  ;;  %v290_v62 = vld [vmem:[%s1602_s19 + $0x3a8] sm:$0xff] }
  0x4e   : > { %1043 = vmatprep.subr.bf16.mxu0 %v1526_v0  ;;  %1084 = vmatprep.subr.bf16.mxu1 %v1528_v2  ;;  %v298_v63 = vld [vmem:[%s1602_s19 + $0x3e8] sm:$0xff]  ;;  %v1513_v0 = vcombine.low %v273_v52, %v281_v53  ;;  %v1515_v2 = vcombine.low %v274_v54, %v282_v55  ;;  %v275_v53 = vld [vmem:[%s1602_s19 + $0x330] sm:$0xff]  ;;  %v276_v55 = vld [vmem:[%s1602_s19 + $0x338] sm:$0xff] }
  0x4f   : > { %v1532_v4 = vcombine.high %v290_v62, %v298_v63  ;;  %v283_v54 = vld [vmem:[%s1602_s19 + $0x370] sm:$0xff] }
  0x51   : > { %1044 = vmatpush1.bf16.msra.mxu0 %v1525_v7  ;;  %1085 = vmatpush1.bf16.msra.mxu1 %v1527_v8  ;;  %v180_v7 = vld [vmem:[%s1602_s19 + $0x38] sm:$0xff] }
  0x52   : > { %1111 = vmatprep.subr.bf16.mxu0 %v1418_v9  ;;  %1152 = vmatprep.subr.bf16.mxu1 %v1420_v10  ;;  %v188_v8 = vld [vmem:[%s1602_s19 + $0x78] sm:$0xff]  ;;  %v1529_v9 = vcombine.low %v289_v60, %v297_v61  ;;  %v1531_v10 = vcombine.low %v290_v62, %v298_v63  ;;  %v291_v61 = vld [vmem:[%s1602_s19 + $0x3b0] sm:$0xff] }
  0x53   : > { %v1424_v12 = vcombine.high %v180_v7, %v188_v8  ;;  %v299_v62 = vld [vmem:[%s1602_s19 + $0x3f0] sm:$0xff]  ;;  %v292_v63 = vld [vmem:[%s1602_s19 + $0x3b8] sm:$0xff] }
  0x54   : > { %1062 = vmatmul.mubr.bf16.vlgmr.msra.gmra.mrb[4].mxu0 %v1647_v13  ;;  %1103 = vmatmul.mubr.bf16.vlgmr.msra.gmra.mrb[4].mxu1 %v1647_v13 }
  0x55   : > { %1112 = vmatpush1.bf16.msra.mxu0 %v1417_v16  ;;  %1153 = vmatpush1.bf16.msra.mxu1 %v1419_v17  ;;  %v196_v16 = vld [vmem:[%s1602_s19 + $0xb8] sm:$0xff] }
  0x56   : > { %1113 = vmatprep.subr.bf16.mxu0 %v1434_v18  ;;  %1154 = vmatprep.subr.bf16.mxu1 %v1436_v19  ;;  %v204_v17 = vld [vmem:[%s1602_s19 + $0xf8] sm:$0xff]  ;;  %v1421_v18 = vcombine.low %v179_v5, %v187_v6  ;;  %v1423_v19 = vcombine.low %v180_v7, %v188_v8  ;;  %v1533_v6 = vcombine.low %v291_v61, %v299_v62 }
  0x57   : > { %1143 = vmatprep.mubr.bf16.mxu0 %v1560_v1  ;;  %1184 = vmatprep.mubr.bf16.mxu1 %v1560_v1  ;;  %v1440_v21 = vcombine.high %v196_v16, %v204_v17 }
  0x59   : > { %1114 = vmatpush1.bf16.msra.mxu0 %v1433_v24  ;;  %1155 = vmatpush1.bf16.msra.mxu1 %v1435_v25  ;;  %v212_v24 = vld [vmem:[%s1602_s19 + $0x138] sm:$0xff] }
  0x5a   : > { %1115 = vmatprep.subr.bf16.mxu0 %v1450_v26  ;;  %1156 = vmatprep.subr.bf16.mxu1 %v1452_v27  ;;  %v220_v25 = vld [vmem:[%s1602_s19 + $0x178] sm:$0xff]  ;;  %v1437_v26 = vcombine.low %v195_v14, %v203_v15  ;;  %v1439_v27 = vcombine.low %v196_v16, %v204_v17 }
  0x5b   : > { %v1456_v29 = vcombine.high %v212_v24, %v220_v25 }
  0x5d   : > { %1116 = vmatpush1.bf16.msra.mxu0 %v1449_v32  ;;  %1157 = vmatpush1.bf16.msra.mxu1 %v1451_v33  ;;  %v228_v32 = vld [vmem:[%s1602_s19 + $0x1b8] sm:$0xff] }
  0x5e   : > { %1117 = vmatprep.subr.bf16.mxu0 %v1466_v34  ;;  %1158 = vmatprep.subr.bf16.mxu1 %v1468_v35  ;;  %v236_v33 = vld [vmem:[%s1602_s19 + $0x1f8] sm:$0xff]  ;;  %v1453_v34 = vcombine.low %v211_v22, %v219_v23  ;;  %v1455_v35 = vcombine.low %v212_v24, %v220_v25 }
  0x5f   : > { %v1472_v37 = vcombine.high %v228_v32, %v236_v33 }
  0x61   : > { %1118 = vmatpush1.bf16.msra.mxu0 %v1465_v40  ;;  %1159 = vmatpush1.bf16.msra.mxu1 %v1467_v41  ;;  %v244_v40 = vld [vmem:[%s1602_s19 + $0x238] sm:$0xff] }
  0x62   : > { %1119 = vmatprep.subr.bf16.mxu0 %v1482_v42  ;;  %1160 = vmatprep.subr.bf16.mxu1 %v1484_v43  ;;  %v252_v41 = vld [vmem:[%s1602_s19 + $0x278] sm:$0xff]  ;;  %v1469_v42 = vcombine.low %v227_v30, %v235_v31  ;;  %v1486_v43 = vcombine.high %v243_v38, %v251_v39 }
  0x63   : > { %v1488_v44 = vcombine.high %v244_v40, %v252_v41 }
  0x65   : > { %1120 = vmatpush1.bf16.msra.mxu0 %v1481_v48  ;;  %1161 = vmatpush1.bf16.msra.mxu1 %v1483_v49  ;;  %v268_v48 = vld [vmem:[%s1602_s19 + $0x2f8] sm:$0xff]  ;;  %v1485_v49 = vcombine.low %v243_v38, %v251_v39 }
  0x66   : > { %1121 = vmatprep.subr.bf16.mxu0 %v1498_v50  ;;  %1162 = vmatprep.subr.bf16.mxu1 %v1500_v51  ;;  %v1487_v50 = vcombine.low %v244_v40, %v252_v41  ;;  %v1502_v51 = vcombine.high %v259_v45, %v267_v46  ;;  %v1504_v52 = vcombine.high %v260_v47, %v268_v48 }
  0x69   : > { %1122 = vmatpush1.bf16.msra.mxu0 %v1497_v56  ;;  %1163 = vmatpush1.bf16.msra.mxu1 %v1499_v57  ;;  %v284_v56 = vld [vmem:[%s1602_s19 + $0x378] sm:$0xff]  ;;  %v1501_v57 = vcombine.low %v259_v45, %v267_v46 }
  0x6a   : > { %1123 = vmatprep.subr.bf16.mxu0 %v1514_v58  ;;  %1164 = vmatprep.subr.bf16.mxu1 %v1516_v59  ;;  %v1503_v58 = vcombine.low %v260_v47, %v268_v48  ;;  %v1518_v59 = vcombine.high %v275_v53, %v283_v54  ;;  %v1520_v60 = vcombine.high %v276_v55, %v284_v56 }
  0x6d   : > { %1124 = vmatpush1.bf16.msra.mxu0 %v1513_v0  ;;  %1165 = vmatpush1.bf16.msra.mxu1 %v1515_v2  ;;  %v300_v0 = vld [vmem:[%s1602_s19 + $0x3f8] sm:$0xff]  ;;  %v1517_v2 = vcombine.low %v275_v53, %v283_v54 }
  0x6e   : > { %1125 = vmatprep.subr.bf16.mxu0 %v1530_v3  ;;  %1166 = vmatprep.subr.bf16.mxu1 %v1532_v4  ;;  %v1519_v3 = vcombine.low %v276_v55, %v284_v56  ;;  %v1534_v4 = vcombine.high %v291_v61, %v299_v62  ;;  %v1536_v5 = vcombine.high %v292_v63, %v300_v0 }
  0x6f   : > { %v1535_v7 = vcombine.low %v292_v63, %v300_v0 }
  0x71   : > { %1126 = vmatpush1.bf16.msra.mxu0 %v1529_v9  ;;  %1167 = vmatpush1.bf16.msra.mxu1 %v1531_v10 }
  0x72   : > { %1193 = vmatprep.subr.bf16.mxu0 %v1422_v11  ;;  %1234 = vmatprep.subr.bf16.mxu1 %v1424_v12 }
  0x74   : > { %1144 = vmatmul.mubr.bf16.vlgmr.msra.gmra.mrb[8].mxu0 %v1647_v13  ;;  %1185 = vmatmul.mubr.bf16.vlgmr.msra.gmra.mrb[8].mxu1 %v1647_v13 }
  0x75   : > { %1194 = vmatpush1.bf16.msra.mxu0 %v1421_v18  ;;  %1235 = vmatpush1.bf16.msra.mxu1 %v1423_v19 }
  0x76   : > { %1195 = vmatprep.subr.bf16.mxu0 %v1438_v20  ;;  %1236 = vmatprep.subr.bf16.mxu1 %v1440_v21 }
  0x77   : > { %1225 = vmatprep.mubr.bf16.mxu0 %v1560_v1  ;;  %1266 = vmatprep.mubr.bf16.mxu1 %v1560_v1  ;;  %v1471_v1 = vcombine.low %v228_v32, %v236_v33 }
  0x79   : > { %1196 = vmatpush1.bf16.msra.mxu0 %v1437_v26  ;;  %1237 = vmatpush1.bf16.msra.mxu1 %v1439_v27  ;;  %v1561_v26 = vmov 1983009808  }
  0x7a   : > { %1197 = vmatprep.subr.bf16.mxu0 %v1454_v28  ;;  %1238 = vmatprep.subr.bf16.mxu1 %v1456_v29  ;;  %v1310_v27 = vunpack.c.l.s4 %v1561_v26 }
  0x7c   : > { %v1311_v38 = vunpack.c.0.s8 %v1310_v27 }
  0x7d   : > { %1198 = vmatpush1.bf16.msra.mxu0 %v1453_v34  ;;  %1239 = vmatpush1.bf16.msra.mxu1 %v1455_v35 }
  0x7e   : > { %1199 = vmatprep.subr.bf16.mxu0 %v1470_v36  ;;  %1240 = vmatprep.subr.bf16.mxu1 %v1472_v37 }
  0x81   : > { %1200 = vmatpush1.bf16.msra.mxu0 %v1469_v42  ;;  %1241 = vmatpush1.bf16.msra.mxu1 %v1471_v1 }
  0x82   : > { %1201 = vmatprep.subr.bf16.mxu0 %v1486_v43  ;;  %1242 = vmatprep.subr.bf16.mxu1 %v1488_v44 }
  0x85   : > { %1202 = vmatpush1.bf16.msra.mxu0 %v1485_v49  ;;  %1243 = vmatpush1.bf16.msra.mxu1 %v1487_v50 }
  0x86   : > { %1203 = vmatprep.subr.bf16.mxu0 %v1502_v51  ;;  %1244 = vmatprep.subr.bf16.mxu1 %v1504_v52 }
  0x87   : > { %v305_v25 = vpop.permute.xlu0 %304 }
  0x89   : > { %1204 = vmatpush1.bf16.msra.mxu0 %v1501_v57  ;;  %1245 = vmatpush1.bf16.msra.mxu1 %v1503_v58 }
  0x8a   : > { %1205 = vmatprep.subr.bf16.mxu0 %v1518_v59  ;;  %1246 = vmatprep.subr.bf16.mxu1 %v1520_v60 }
  0x8d   : > { %1206 = vmatpush1.bf16.msra.mxu0 %v1517_v2  ;;  %1247 = vmatpush1.bf16.msra.mxu1 %v1519_v3 }
  0x8e   : > { %1207 = vmatprep.subr.bf16.mxu0 %v1534_v4  ;;  %1248 = vmatprep.subr.bf16.mxu1 %v1536_v5 }
  0x91   : > { %1208 = vmatpush1.bf16.msra.mxu0 %v1533_v6  ;;  %1249 = vmatpush1.bf16.msra.mxu1 %v1535_v7 }
  0x94   : > { %1226 = vmatmul.mubr.bf16.vlgmr.msra.gmra.mrb[12].mxu0 %v1647_v13  ;;  %1267 = vmatmul.mubr.bf16.vlgmr.msra.gmra.mrb[12].mxu1 %v1647_v13  ;;  %v1312_v13 = vlaneseq }
  0x96   : > { %v1313_v39 = vshrl.u32 %v1312_v13, 7 }
  0x98   : > { %v1314_v56 = vsub.s32 %v1311_v38, %v1313_v39 }
 0x107   : > { %v981_v8 = vpop.f32.mrb[0].mxu0  ;;  %v1022_v9 = vpop.f32.mrb[0].mxu1 }
 0x108   : > { %v983_v10 = vpop.f32.mrb[1].mxu0  ;;  %v1024_v11 = vpop.f32.mrb[1].mxu1  ;;  %v982_v28 = vadd.f32 %v981_v8, %v305_v25  ;;  %v1023_v31 = vadd.f32 %v1022_v9, %v305_v25 }
 0x109   : > { %v985_v12 = vpop.f32.mrb[2].mxu0  ;;  %v1026_v14 = vpop.f32.mrb[2].mxu1  ;;  %v984_v29 = vadd.f32 %v983_v10, %v305_v25  ;;  %v1025_v32 = vadd.f32 %v1024_v11, %v305_v25 }
 0x10a   : > { %v986_v15 = vpop.f32.mrb[3].mxu0  ;;  %v1027_v16 = vpop.f32.mrb[3].mxu1  ;;  %v1275_v42 = vmax.f32 %v982_v28, 0.0  ;;  %v1277_v47 = vmax.f32 %v1023_v31, 0.0 }
 0x10b   : > { %v1276_v46 = vmax.f32 %v984_v29, 0.0  ;;  %v1278_v51 = vmax.f32 %v1025_v32, 0.0 }
 0x127   : > { %v1063_v17 = vpop.f32.mrb[4].mxu0  ;;  %v1104_v18 = vpop.f32.mrb[4].mxu1 }
 0x128   : > { %v1065_v19 = vpop.f32.mrb[5].mxu0  ;;  %v1106_v20 = vpop.f32.mrb[5].mxu1  ;;  %v1064_v63 = vadd.f32 %v1063_v17, %v305_v25  ;;  %v1105_v0 = vadd.f32 %v1104_v18, %v305_v25 }
 0x129   : > { %v1067_v21 = vpop.f32.mrb[6].mxu0  ;;  %v1108_v22 = vpop.f32.mrb[6].mxu1  ;;  %v1066_v2 = vadd.f32 %v1065_v19, %v305_v25  ;;  %v1107_v4 = vadd.f32 %v1106_v20, %v305_v25 }
 0x12a   : > { %v1068_v23 = vpop.f32.mrb[7].mxu0  ;;  %v1109_v24 = vpop.f32.mrb[7].mxu1  ;;  %v1279_v12 = vmax.f32 %v1064_v63, 0.0  ;;  %v1281_v22 = vmax.f32 %v1105_v0, 0.0 }
 0x12b   : > { %v1280_v23 = vmax.f32 %v1066_v2, 0.0  ;;  %v1282_v24 = vmax.f32 %v1107_v4, 0.0 }
 0x147   : > { %v1145_v30 = vpop.f32.mrb[8].mxu0  ;;  %v1186_v34 = vpop.f32.mrb[8].mxu1 }
 0x148   : > { %v1146_v33 = vadd.f32 %v1145_v30, %v305_v25  ;;  %v1147_v35 = vpop.f32.mrb[9].mxu0  ;;  %v1187_v36 = vadd.f32 %v1186_v34, %v305_v25  ;;  %v1188_v40 = vpop.f32.mrb[9].mxu1 }
 0x149   : > { %v1148_v37 = vadd.f32 %v1147_v35, %v305_v25  ;;  %v1149_v41 = vpop.f32.mrb[10].mxu0  ;;  %v1189_v43 = vadd.f32 %v1188_v40, %v305_v25  ;;  %v1190_v44 = vpop.f32.mrb[10].mxu1 }
 0x14a   : > { %v1283_v1 = vmax.f32 %v1146_v33, 0.0  ;;  %v1150_v45 = vpop.f32.mrb[11].mxu0  ;;  %v1285_v48 = vmax.f32 %v1187_v36, 0.0  ;;  %v1191_v50 = vpop.f32.mrb[11].mxu1 }
 0x14b   : > { %v1284_v49 = vmax.f32 %v1148_v37, 0.0  ;;  %v1286_v53 = vmax.f32 %v1189_v43, 0.0 }
 0x14c   : > { %v1291_v52 = vmax.f32 %v1275_v42, %v1283_v1  ;;  %v1293_v54 = vmax.f32 %v1277_v47, %v1285_v48 }
 0x14d   : > { %v1292_v55 = vmax.f32 %v1276_v46, %v1284_v49  ;;  %v1294_v57 = vmax.f32 %v1278_v51, %v1286_v53 }
 0x14f   : > { %v1307_v58 = vcombine.low %v1291_v52, %v1292_v55  ;;  %v1308_v59 = vcombine.low %v1293_v54, %v1294_v57 }
 0x151   : > { %v1315_v60 = vrot.slane %v1307_v58, %v1314_v56  ;;  %v1322_v61 = vrot.slane %v1308_v59, %v1314_v56 }
 0x153   : > { %v1323_v62 = vcombine.low %v1315_v60, %v1322_v61 }
 0x155   : > { %1343 = vst [vmem:[%s1755_s25] sm:$0xff] %v1323_v62 }
 0x167   : > { %v1227_v3 = vpop.f32.mrb[12].mxu0  ;;  %v1268_v6 = vpop.f32.mrb[12].mxu1 }
 0x168   : > { %v1228_v5 = vadd.f32 %v1227_v3, %v305_v25  ;;  %v1229_v7 = vpop.f32.mrb[13].mxu0  ;;  %v1269_v8 = vadd.f32 %v1268_v6, %v305_v25  ;;  %v1270_v10 = vpop.f32.mrb[13].mxu1 }
 0x169   : > { %v1230_v9 = vadd.f32 %v1229_v7, %v305_v25  ;;  %v1231_v11 = vpop.f32.mrb[14].mxu0  ;;  %v1271_v15 = vadd.f32 %v1270_v10, %v305_v25  ;;  %v1272_v16 = vpop.f32.mrb[14].mxu1 }
 0x16a   : > { %v1287_v14 = vmax.f32 %v1228_v5, 0.0  ;;  %v1232_v21 = vpop.f32.mrb[15].mxu0  ;;  %v1289_v17 = vmax.f32 %v1269_v8, 0.0  ;;  %v1273_v19 = vpop.f32.mrb[15].mxu1 }
 0x16b   : > { %v1288_v18 = vmax.f32 %v1230_v9, 0.0  ;;  %v1290_v26 = vmax.f32 %v1271_v15, 0.0 }
 0x16c   : > { %v1295_v20 = vmax.f32 %v1279_v12, %v1287_v14  ;;  %v1297_v27 = vmax.f32 %v1281_v22, %v1289_v17 }
 0x16d   : > { %v1296_v13 = vmax.f32 %v1280_v23, %v1288_v18  ;;  %v1298_v28 = vmax.f32 %v1282_v24, %v1290_v26 }
 0x16f   : > { %v1324_v29 = vcombine.low %v1295_v20, %v1296_v13  ;;  %v1325_v30 = vcombine.low %v1297_v27, %v1298_v28 }
 0x171   : > { %v1332_v31 = vrot.slane %v1324_v29, %v1314_v56  ;;  %v1339_v32 = vrot.slane %v1325_v30, %v1314_v56 }
 0x173   : > { %v1340_v33 = vcombine.low %v1332_v31, %v1339_v32 }
 0x175   : > { %1344 = vst [vmem:[%s1755_s25 + $0x8] sm:$0xff] %v1340_v33 }
 0x176 PF: > { %s13_s12 = sadd.s32 1, %s1558_s12  }
 0x177   : > { %p10_p4 = scmp.ge.s32.totalorder %s13_s12, 4  }
 0x179   :  { %12 = sbr.rel (!%p10_p4) target bundleno = 1 (0x1), region = 62 }

// kernel: cnn_model_forward.6
= control target key start
LH: loop header
LB: loop body
LE: loop exit
PB: predicated region body
PF: predicated region fallthrough
CT: control target
= control target key end

     0   :  { %s1379_s12 = smov 0   ;;  %s1550_s0 = inlined_call_operand.vmem [shape: bf16[2,256,1024], index: 0, kind: input, shape index: {}]   ;;  %s1551_s1 = inlined_call_operand.vmem [shape: bf16[4,256], index: 1, kind: input, shape index: {}]   ;;  %s1552_s2 = inlined_call_operand.vmem [shape: f32[4,1], index: 2, kind: input, shape index: {}]   ;;  %s1553_s3 = inlined_call_operand.vmem [shape: f32[2,4,512], index: 3, kind: output, shape index: {}]  }
   0x1 LB: > { %s1198_s13 = sadd.s32 4294967295, %s1356_s12   ;;  %p1202_p0 = scmp.ge.s32.totalorder %s1356_s12, 1  ;;  %s1356_s12 = sphi %s1379_s12, %s13_s12  }
   0x2   : > { %p137_p1 = scmp.lt.s32.totalorder %s1356_s12, 3 }
   0x4   : > { %p138_p2 = pnand %p1202_p0, %p137_p1 }
   0x5   : > { %p161_p3 = scmp.lt.s32.totalorder (!%p138_p2), %s1198_s13, 1  ;;  %v1390_v0 = vld.sshfl [vmem:[%s1551_s1] sm:$0x33 pattern:$0x76325410] (!%p138_p2)  ;;  %v1358_v28 = vmov (!%p138_p2), 0  }
   0x6   : > { %141 = sbr.rel (%p138_p2) target bundleno = 370 (0x172), region = 32  ;;  %v1394_v1 = vcombine.high (!%p138_p2), %v1390_v0, %v1390_v0  ;;  %1349 = vset.pattern.permute.xlu0 (!%p138_p2), %v1358_v28 }
   0x8   : > { %989 = vmatprep.mubr.bf16.mxu0 (!%p138_p2), %v1394_v1  ;;  %1030 = vmatprep.mubr.bf16.mxu1 (!%p138_p2), %v1394_v1 }
   0xd   : > { %s1555_s13 = smov (!%p161_p3, %s1198_s13), 1 }
   0xe   : > { %s1338_s16 = sshll.u32 %s1555_s13, 10  ;;  %s1339_s22 = sshll.u32 %s1555_s13, 4 }
   0xf   : > { %s1404_s19 = scalar_lea.vmem %s1550_s0, %s1338_s16  ;;  %s170_s25 = scalar_lea.vmem %s1553_s3, %s1339_s22 }
  0x10   : > { %v172_v2 = vld [vmem:[%s1404_s19] sm:$0xff]  ;;  %v173_v4 = vld [vmem:[%s1404_s19 + $0x8] sm:$0xff] }
  0x11   : > { %v176_v3 = vld [vmem:[%s1404_s19 + $0x20] sm:$0xff]  ;;  %v177_v6 = vld [vmem:[%s1404_s19 + $0x28] sm:$0xff] }
  0x12   : > { %v1209_v5 = vcombine.high %v172_v2, %v176_v3  ;;  %v1208_v7 = vcombine.low %v172_v2, %v176_v3  ;;  %v180_v8 = vld [vmem:[%s1404_s19 + $0x40] sm:$0xff]  ;;  %v1211_v10 = vcombine.high %v173_v4, %v177_v6  ;;  %v1210_v11 = vcombine.low %v173_v4, %v177_v6  ;;  %v181_v13 = vld [vmem:[%s1404_s19 + $0x48] sm:$0xff] }
  0x13   : > { %v184_v9 = vld [vmem:[%s1404_s19 + $0x60] sm:$0xff]  ;;  %v185_v14 = vld [vmem:[%s1404_s19 + $0x68] sm:$0xff] }
  0x14   : > { %v1217_v12 = vcombine.high %v180_v8, %v184_v9  ;;  %v188_v15 = vld [vmem:[%s1404_s19 + $0x80] sm:$0xff]  ;;  %957 = vmatprep.subr.bf16.mxu0 %v1209_v5  ;;  %v1219_v16 = vcombine.high %v181_v13, %v185_v14  ;;  %v189_v18 = vld [vmem:[%s1404_s19 + $0x88] sm:$0xff]  ;;  %998 = vmatprep.subr.bf16.mxu1 %v1211_v10  ;;  %v1216_v20 = vcombine.low %v180_v8, %v184_v9 }
  0x15   : > { %v192_v17 = vld [vmem:[%s1404_s19 + $0xa0] sm:$0xff]  ;;  %v193_v19 = vld [vmem:[%s1404_s19 + $0xa8] sm:$0xff]  ;;  %958 = vmatpush1.bf16.msra.mxu0 %v1208_v7  ;;  %999 = vmatpush1.bf16.msra.mxu1 %v1210_v11  ;;  %v1218_v21 = vcombine.low %v181_v13, %v185_v14 }
  0x16   : > { %959 = vmatprep.subr.bf16.mxu0 %v1217_v12  ;;  %v1225_v22 = vcombine.high %v188_v15, %v192_v17  ;;  %1000 = vmatprep.subr.bf16.mxu1 %v1219_v16  ;;  %v1227_v23 = vcombine.high %v189_v18, %v193_v19  ;;  %v196_v24 = vld [vmem:[%s1404_s19 + $0xc0] sm:$0xff]  ;;  %v197_v26 = vld [vmem:[%s1404_s19 + $0xc8] sm:$0xff]  ;;  %v1224_v29 = vcombine.low %v188_v15, %v192_v17 }
  0x17   : > { %v200_v25 = vld [vmem:[%s1404_s19 + $0xe0] sm:$0xff]  ;;  %v201_v27 = vld [vmem:[%s1404_s19 + $0xe8] sm:$0xff]  ;;  %v1226_v30 = vcombine.low %v189_v18, %v193_v19 }
  0x18   : > { %v1233_v31 = vcombine.high %v196_v24, %v200_v25  ;;  %v1235_v32 = vcombine.high %v197_v26, %v201_v27  ;;  %v204_v33 = vld [vmem:[%s1404_s19 + $0x100] sm:$0xff]  ;;  %v205_v35 = vld [vmem:[%s1404_s19 + $0x108] sm:$0xff]  ;;  %v1232_v37 = vcombine.low %v196_v24, %v200_v25  ;;  %v1234_v38 = vcombine.low %v197_v26, %v201_v27 }
  0x19   : > { %960 = vmatpush1.bf16.msra.mxu0 %v1216_v20  ;;  %1001 = vmatpush1.bf16.msra.mxu1 %v1218_v21  ;;  %v208_v34 = vld [vmem:[%s1404_s19 + $0x120] sm:$0xff]  ;;  %v209_v36 = vld [vmem:[%s1404_s19 + $0x128] sm:$0xff] }
  0x1a   : > { %961 = vmatprep.subr.bf16.mxu0 %v1225_v22  ;;  %1002 = vmatprep.subr.bf16.mxu1 %v1227_v23  ;;  %v1241_v39 = vcombine.high %v204_v33, %v208_v34  ;;  %v1243_v40 = vcombine.high %v205_v35, %v209_v36  ;;  %v212_v41 = vld [vmem:[%s1404_s19 + $0x140] sm:$0xff]  ;;  %v213_v43 = vld [vmem:[%s1404_s19 + $0x148] sm:$0xff]  ;;  %v1240_v45 = vcombine.low %v204_v33, %v208_v34 }
  0x1b   : > { %v216_v42 = vld [vmem:[%s1404_s19 + $0x160] sm:$0xff]  ;;  %v217_v44 = vld [vmem:[%s1404_s19 + $0x168] sm:$0xff]  ;;  %v1242_v46 = vcombine.low %v205_v35, %v209_v36 }
  0x1c   : > { %v1249_v47 = vcombine.high %v212_v41, %v216_v42  ;;  %v1251_v48 = vcombine.high %v213_v43, %v217_v44  ;;  %v220_v49 = vld [vmem:[%s1404_s19 + $0x180] sm:$0xff]  ;;  %v221_v51 = vld [vmem:[%s1404_s19 + $0x188] sm:$0xff]  ;;  %v1248_v53 = vcombine.low %v212_v41, %v216_v42  ;;  %v1250_v54 = vcombine.low %v213_v43, %v217_v44 }
  0x1d   : > { %962 = vmatpush1.bf16.msra.mxu0 %v1224_v29  ;;  %1003 = vmatpush1.bf16.msra.mxu1 %v1226_v30  ;;  %v224_v50 = vld [vmem:[%s1404_s19 + $0x1a0] sm:$0xff]  ;;  %v225_v52 = vld [vmem:[%s1404_s19 + $0x1a8] sm:$0xff] }
  0x1e   : > { %963 = vmatprep.subr.bf16.mxu0 %v1233_v31  ;;  %1004 = vmatprep.subr.bf16.mxu1 %v1235_v32  ;;  %v1257_v55 = vcombine.high %v220_v49, %v224_v50  ;;  %v1259_v56 = vcombine.high %v221_v51, %v225_v52  ;;  %v228_v57 = vld [vmem:[%s1404_s19 + $0x1c0] sm:$0xff]  ;;  %v229_v59 = vld [vmem:[%s1404_s19 + $0x1c8] sm:$0xff]  ;;  %v1256_v61 = vcombine.low %v220_v49, %v224_v50 }
  0x1f   : > { %v232_v58 = vld [vmem:[%s1404_s19 + $0x1e0] sm:$0xff]  ;;  %v233_v60 = vld [vmem:[%s1404_s19 + $0x1e8] sm:$0xff]  ;;  %v1258_v62 = vcombine.low %v221_v51, %v225_v52 }
  0x20   : > { %v1265_v63 = vcombine.high %v228_v57, %v232_v58  ;;  %v1267_v2 = vcombine.high %v229_v59, %v233_v60  ;;  %v236_v3 = vld [vmem:[%s1404_s19 + $0x200] sm:$0xff]  ;;  %v237_v5 = vld [vmem:[%s1404_s19 + $0x208] sm:$0xff]  ;;  %v1264_v7 = vcombine.low %v228_v57, %v232_v58  ;;  %v1266_v8 = vcombine.low %v229_v59, %v233_v60 }
  0x21   : > { %964 = vmatpush1.bf16.msra.mxu0 %v1232_v37  ;;  %1005 = vmatpush1.bf16.msra.mxu1 %v1234_v38  ;;  %v240_v4 = vld [vmem:[%s1404_s19 + $0x220] sm:$0xff]  ;;  %v241_v6 = vld [vmem:[%s1404_s19 + $0x228] sm:$0xff] }
  0x22   : > { %965 = vmatprep.subr.bf16.mxu0 %v1241_v39  ;;  %1006 = vmatprep.subr.bf16.mxu1 %v1243_v40  ;;  %v1273_v9 = vcombine.high %v236_v3, %v240_v4  ;;  %v1275_v10 = vcombine.high %v237_v5, %v241_v6  ;;  %v244_v11 = vld [vmem:[%s1404_s19 + $0x240] sm:$0xff]  ;;  %v245_v13 = vld [vmem:[%s1404_s19 + $0x248] sm:$0xff]  ;;  %v1272_v15 = vcombine.low %v236_v3, %v240_v4 }
  0x23   : > { %v248_v12 = vld [vmem:[%s1404_s19 + $0x260] sm:$0xff]  ;;  %v249_v14 = vld [vmem:[%s1404_s19 + $0x268] sm:$0xff]  ;;  %v1274_v16 = vcombine.low %v237_v5, %v241_v6  ;;  %v174_v6 = vld [vmem:[%s1404_s19 + $0x10] sm:$0xff] }
  0x24   : > { %v1281_v17 = vcombine.high %v244_v11, %v248_v12  ;;  %v1283_v18 = vcombine.high %v245_v13, %v249_v14  ;;  %v252_v19 = vld [vmem:[%s1404_s19 + $0x280] sm:$0xff]  ;;  %v253_v21 = vld [vmem:[%s1404_s19 + $0x288] sm:$0xff]  ;;  %v1280_v23 = vcombine.low %v244_v11, %v248_v12  ;;  %v1282_v24 = vcombine.low %v245_v13, %v249_v14  ;;  %v182_v14 = vld [vmem:[%s1404_s19 + $0x50] sm:$0xff] }
  0x25   : > { %966 = vmatpush1.bf16.msra.mxu0 %v1240_v45  ;;  %1007 = vmatpush1.bf16.msra.mxu1 %v1242_v46  ;;  %v256_v20 = vld [vmem:[%s1404_s19 + $0x2a0] sm:$0xff]  ;;  %v257_v22 = vld [vmem:[%s1404_s19 + $0x2a8] sm:$0xff] }
  0x26   : > { %967 = vmatprep.subr.bf16.mxu0 %v1249_v47  ;;  %1008 = vmatprep.subr.bf16.mxu1 %v1251_v48  ;;  %v1289_v25 = vcombine.high %v252_v19, %v256_v20  ;;  %v1291_v26 = vcombine.high %v253_v21, %v257_v22  ;;  %v260_v27 = vld [vmem:[%s1404_s19 + $0x2c0] sm:$0xff]  ;;  %v261_v29 = vld [vmem:[%s1404_s19 + $0x2c8] sm:$0xff]  ;;  %v1288_v31 = vcombine.low %v252_v19, %v256_v20 }
  0x27   : > { %v264_v28 = vld [vmem:[%s1404_s19 + $0x2e0] sm:$0xff]  ;;  %v265_v30 = vld [vmem:[%s1404_s19 + $0x2e8] sm:$0xff]  ;;  %v1290_v32 = vcombine.low %v253_v21, %v257_v22  ;;  %v190_v22 = vld [vmem:[%s1404_s19 + $0x90] sm:$0xff] }
  0x28   : > { %v1297_v33 = vcombine.high %v260_v27, %v264_v28  ;;  %v1299_v34 = vcombine.high %v261_v29, %v265_v30  ;;  %v268_v35 = vld [vmem:[%s1404_s19 + $0x300] sm:$0xff]  ;;  %v269_v38 = vld [vmem:[%s1404_s19 + $0x308] sm:$0xff]  ;;  %v1296_v40 = vcombine.low %v260_v27, %v264_v28  ;;  %v1298_v41 = vcombine.low %v261_v29, %v265_v30  ;;  %v198_v30 = vld [vmem:[%s1404_s19 + $0xd0] sm:$0xff] }
  0x29   : > { %968 = vmatpush1.bf16.msra.mxu0 %v1248_v53  ;;  %1009 = vmatpush1.bf16.msra.mxu1 %v1250_v54  ;;  %v272_v36 = vld [vmem:[%s1404_s19 + $0x320] sm:$0xff]  ;;  %v273_v39 = vld [vmem:[%s1404_s19 + $0x328] sm:$0xff] }
  0x2a   : > { %969 = vmatprep.subr.bf16.mxu0 %v1257_v55  ;;  %1010 = vmatprep.subr.bf16.mxu1 %v1259_v56  ;;  %v300_v37 = vld [vmem:[%s1552_s2] sm:$0xf]  ;;  %v1305_v42 = vcombine.high %v268_v35, %v272_v36  ;;  %v1307_v43 = vcombine.high %v269_v38, %v273_v39  ;;  %v277_v46 = vld [vmem:[%s1404_s19 + $0x348] sm:$0xff]  ;;  %v1304_v48 = vcombine.low %v268_v35, %v272_v36 }
  0x2b   : > { %303 = vperm.xlu0 %1349, %v300_v37   ;;  %v276_v44 = vld [vmem:[%s1404_s19 + $0x340] sm:$0xff]  ;;  %v281_v47 = vld [vmem:[%s1404_s19 + $0x368] sm:$0xff]  ;;  %v1306_v49 = vcombine.low %v269_v38, %v273_v39  ;;  %v206_v38 = vld [vmem:[%s1404_s19 + $0x110] sm:$0xff] }
  0x2c   : > { %v280_v45 = vld [vmem:[%s1404_s19 + $0x360] sm:$0xff]  ;;  %v1315_v51 = vcombine.high %v277_v46, %v281_v47  ;;  %v285_v54 = vld [vmem:[%s1404_s19 + $0x388] sm:$0xff]  ;;  %v1314_v57 = vcombine.low %v277_v46, %v281_v47  ;;  %v210_v39 = vld [vmem:[%s1404_s19 + $0x130] sm:$0xff] }
  0x2d   : > { %970 = vmatpush1.bf16.msra.mxu0 %v1256_v61  ;;  %1011 = vmatpush1.bf16.msra.mxu1 %v1258_v62  ;;  %v1313_v50 = vcombine.high %v276_v44, %v280_v45  ;;  %v284_v52 = vld [vmem:[%s1404_s19 + $0x380] sm:$0xff]  ;;  %v289_v55 = vld [vmem:[%s1404_s19 + $0x3a8] sm:$0xff]  ;;  %v1312_v56 = vcombine.low %v276_v44, %v280_v45  ;;  %v214_v45 = vld [vmem:[%s1404_s19 + $0x150] sm:$0xff] }
  0x2e   : > { %971 = vmatprep.subr.bf16.mxu0 %v1265_v63  ;;  %1012 = vmatprep.subr.bf16.mxu1 %v1267_v2  ;;  %v288_v53 = vld [vmem:[%s1404_s19 + $0x3a0] sm:$0xff]  ;;  %v1323_v59 = vcombine.high %v285_v54, %v289_v55  ;;  %v293_v62 = vld [vmem:[%s1404_s19 + $0x3c8] sm:$0xff]  ;;  %v1322_v3 = vcombine.low %v285_v54, %v289_v55  ;;  %v218_v46 = vld [vmem:[%s1404_s19 + $0x170] sm:$0xff] }
  0x2f   : > { %v1321_v58 = vcombine.high %v284_v52, %v288_v53  ;;  %v292_v60 = vld [vmem:[%s1404_s19 + $0x3c0] sm:$0xff]  ;;  %v297_v63 = vld [vmem:[%s1404_s19 + $0x3e8] sm:$0xff]  ;;  %v1320_v2 = vcombine.low %v284_v52, %v288_v53  ;;  %v215_v47 = vld [vmem:[%s1404_s19 + $0x158] sm:$0xff] }
  0x30   : > { %v296_v61 = vld [vmem:[%s1404_s19 + $0x3e0] sm:$0xff]  ;;  %v1331_v5 = vcombine.high %v293_v62, %v297_v63  ;;  %v1330_v11 = vcombine.low %v293_v62, %v297_v63  ;;  %v222_v53 = vld [vmem:[%s1404_s19 + $0x190] sm:$0xff]  ;;  %v223_v55 = vld [vmem:[%s1404_s19 + $0x198] sm:$0xff] }
  0x31   : > { %972 = vmatpush1.bf16.msra.mxu0 %v1264_v7  ;;  %1013 = vmatpush1.bf16.msra.mxu1 %v1266_v8  ;;  %v1329_v4 = vcombine.high %v292_v60, %v296_v61  ;;  %v178_v7 = vld [vmem:[%s1404_s19 + $0x30] sm:$0xff]  ;;  %v175_v8 = vld [vmem:[%s1404_s19 + $0x18] sm:$0xff] }
  0x32   : > { %973 = vmatprep.subr.bf16.mxu0 %v1273_v9  ;;  %1014 = vmatprep.subr.bf16.mxu1 %v1275_v10  ;;  %v179_v9 = vld [vmem:[%s1404_s19 + $0x38] sm:$0xff]  ;;  %v1328_v10 = vcombine.low %v292_v60, %v296_v61  ;;  %v1213_v12 = vcombine.high %v174_v6, %v178_v7  ;;  %v226_v54 = vld [vmem:[%s1404_s19 + $0x1b0] sm:$0xff] }
  0x33   : > { %v1215_v13 = vcombine.high %v175_v8, %v179_v9  ;;  %v1214_v19 = vcombine.low %v175_v8, %v179_v9  ;;  %v230_v61 = vld [vmem:[%s1404_s19 + $0x1d0] sm:$0xff]  ;;  %v231_v63 = vld [vmem:[%s1404_s19 + $0x1d8] sm:$0xff] }
  0x34   : > { %v234_v62 = vld [vmem:[%s1404_s19 + $0x1f0] sm:$0xff]  ;;  %v239_v9 = vld [vmem:[%s1404_s19 + $0x218] sm:$0xff] }
  0x35   : > { %974 = vmatpush1.bf16.msra.mxu0 %v1272_v15  ;;  %1015 = vmatpush1.bf16.msra.mxu1 %v1274_v16  ;;  %v186_v15 = vld [vmem:[%s1404_s19 + $0x70] sm:$0xff]  ;;  %v183_v16 = vld [vmem:[%s1404_s19 + $0x58] sm:$0xff] }
  0x36   : > { %975 = vmatprep.subr.bf16.mxu0 %v1281_v17  ;;  %1016 = vmatprep.subr.bf16.mxu1 %v1283_v18  ;;  %v187_v17 = vld [vmem:[%s1404_s19 + $0x78] sm:$0xff]  ;;  %v1212_v18 = vcombine.low %v174_v6, %v178_v7  ;;  %v1221_v20 = vcombine.high %v182_v14, %v186_v15  ;;  %v238_v7 = vld [vmem:[%s1404_s19 + $0x210] sm:$0xff] }
  0x37   : > { %v1223_v21 = vcombine.high %v183_v16, %v187_v17  ;;  %v1222_v27 = vcombine.low %v183_v16, %v187_v17  ;;  %v242_v8 = vld [vmem:[%s1404_s19 + $0x230] sm:$0xff]  ;;  %v247_v17 = vld [vmem:[%s1404_s19 + $0x258] sm:$0xff] }
  0x38   : > { %v250_v16 = vld [vmem:[%s1404_s19 + $0x270] sm:$0xff] }
  0x39   : > { %976 = vmatpush1.bf16.msra.mxu0 %v1280_v23  ;;  %1017 = vmatpush1.bf16.msra.mxu1 %v1282_v24  ;;  %v194_v23 = vld [vmem:[%s1404_s19 + $0xb0] sm:$0xff]  ;;  %v191_v24 = vld [vmem:[%s1404_s19 + $0x98] sm:$0xff] }
  0x3a   : > { %977 = vmatprep.subr.bf16.mxu0 %v1289_v25  ;;  %1018 = vmatprep.subr.bf16.mxu1 %v1291_v26  ;;  %v195_v25 = vld [vmem:[%s1404_s19 + $0xb8] sm:$0xff]  ;;  %v1220_v26 = vcombine.low %v182_v14, %v186_v15  ;;  %v1229_v28 = vcombine.high %v190_v22, %v194_v23  ;;  %v246_v15 = vld [vmem:[%s1404_s19 + $0x250] sm:$0xff] }
  0x3b   : > { %v1231_v29 = vcombine.high %v191_v24, %v195_v25  ;;  %v1230_v35 = vcombine.low %v191_v24, %v195_v25  ;;  %v258_v24 = vld [vmem:[%s1404_s19 + $0x2b0] sm:$0xff]  ;;  %v255_v25 = vld [vmem:[%s1404_s19 + $0x298] sm:$0xff] }
  0x3d   : > { %978 = vmatpush1.bf16.msra.mxu0 %v1288_v31  ;;  %1019 = vmatpush1.bf16.msra.mxu1 %v1290_v32  ;;  %v202_v31 = vld [vmem:[%s1404_s19 + $0xf0] sm:$0xff]  ;;  %v199_v32 = vld [vmem:[%s1404_s19 + $0xd8] sm:$0xff] }
  0x3e   : > { %979 = vmatprep.subr.bf16.mxu0 %v1297_v33  ;;  %1020 = vmatprep.subr.bf16.mxu1 %v1299_v34  ;;  %v203_v33 = vld [vmem:[%s1404_s19 + $0xf8] sm:$0xff]  ;;  %v1228_v34 = vcombine.low %v190_v22, %v194_v23  ;;  %v1237_v36 = vcombine.high %v198_v30, %v202_v31  ;;  %v254_v23 = vld [vmem:[%s1404_s19 + $0x290] sm:$0xff] }
  0x3f   : > { %v1239_v37 = vcombine.high %v199_v32, %v203_v33 }
  0x41   : > { %980 = vmatpush1.bf16.msra.mxu0 %v1296_v40  ;;  %1021 = vmatpush1.bf16.msra.mxu1 %v1298_v41  ;;  %v207_v40 = vld [vmem:[%s1404_s19 + $0x118] sm:$0xff] }
  0x42   : > { %981 = vmatprep.subr.bf16.mxu0 %v1305_v42  ;;  %1022 = vmatprep.subr.bf16.mxu1 %v1307_v43  ;;  %v211_v41 = vld [vmem:[%s1404_s19 + $0x138] sm:$0xff]  ;;  %v1236_v42 = vcombine.low %v198_v30, %v202_v31  ;;  %v1245_v43 = vcombine.high %v206_v38, %v210_v39  ;;  %v262_v31 = vld [vmem:[%s1404_s19 + $0x2d0] sm:$0xff] }
  0x43   : > { %v1247_v44 = vcombine.high %v207_v40, %v211_v41 }
  0x45   : > { %982 = vmatpush1.bf16.msra.mxu0 %v1304_v48  ;;  %1023 = vmatpush1.bf16.msra.mxu1 %v1306_v49  ;;  %v219_v48 = vld [vmem:[%s1404_s19 + $0x178] sm:$0xff]  ;;  %v1244_v49 = vcombine.low %v206_v38, %v210_v39  ;;  %v270_v39 = vld [vmem:[%s1404_s19 + $0x310] sm:$0xff] }
  0x46   : > { %983 = vmatprep.subr.bf16.mxu0 %v1313_v50  ;;  %1024 = vmatprep.subr.bf16.mxu1 %v1315_v51  ;;  %v1246_v50 = vcombine.low %v207_v40, %v211_v41  ;;  %v1253_v51 = vcombine.high %v214_v45, %v218_v46  ;;  %v1255_v52 = vcombine.high %v215_v47, %v219_v48  ;;  %v274_v40 = vld [vmem:[%s1404_s19 + $0x330] sm:$0xff]  ;;  %v271_v41 = vld [vmem:[%s1404_s19 + $0x318] sm:$0xff] }
  0x49   : > { %984 = vmatpush1.bf16.msra.mxu0 %v1312_v56  ;;  %1025 = vmatpush1.bf16.msra.mxu1 %v1314_v57  ;;  %v227_v56 = vld [vmem:[%s1404_s19 + $0x1b8] sm:$0xff]  ;;  %v1252_v57 = vcombine.low %v214_v45, %v218_v46  ;;  %v278_v46 = vld [vmem:[%s1404_s19 + $0x350] sm:$0xff] }
  0x4a   : > { %985 = vmatprep.subr.bf16.mxu0 %v1321_v58  ;;  %1026 = vmatprep.subr.bf16.mxu1 %v1323_v59  ;;  %v1254_v58 = vcombine.low %v215_v47, %v219_v48  ;;  %v1261_v59 = vcombine.high %v222_v53, %v226_v54  ;;  %v1263_v60 = vcombine.high %v223_v55, %v227_v56  ;;  %v282_v47 = vld [vmem:[%s1404_s19 + $0x370] sm:$0xff]  ;;  %v279_v48 = vld [vmem:[%s1404_s19 + $0x358] sm:$0xff] }
  0x4d   : > { %986 = vmatpush1.bf16.msra.mxu0 %v1320_v2  ;;  %1027 = vmatpush1.bf16.msra.mxu1 %v1322_v3  ;;  %v235_v2 = vld [vmem:[%s1404_s19 + $0x1f8] sm:$0xff]  ;;  %v1260_v3 = vcombine.low %v222_v53, %v226_v54  ;;  %v286_v54 = vld [vmem:[%s1404_s19 + $0x390] sm:$0xff] }
  0x4e   : > { %987 = vmatprep.subr.bf16.mxu0 %v1329_v4  ;;  %1028 = vmatprep.subr.bf16.mxu1 %v1331_v5  ;;  %v1262_v4 = vcombine.low %v223_v55, %v227_v56  ;;  %v1269_v5 = vcombine.high %v230_v61, %v234_v62  ;;  %v1271_v6 = vcombine.high %v231_v63, %v235_v2  ;;  %v290_v55 = vld [vmem:[%s1404_s19 + $0x3b0] sm:$0xff]  ;;  %v287_v56 = vld [vmem:[%s1404_s19 + $0x398] sm:$0xff] }
  0x51   : > { %988 = vmatpush1.bf16.msra.mxu0 %v1328_v10  ;;  %1029 = vmatpush1.bf16.msra.mxu1 %v1330_v11  ;;  %v243_v10 = vld [vmem:[%s1404_s19 + $0x238] sm:$0xff]  ;;  %v1268_v11 = vcombine.low %v230_v61, %v234_v62  ;;  %v294_v62 = vld [vmem:[%s1404_s19 + $0x3d0] sm:$0xff] }
  0x52   : > { %1039 = vmatprep.subr.bf16.mxu0 %v1213_v12  ;;  %1080 = vmatprep.subr.bf16.mxu1 %v1215_v13  ;;  %v1270_v12 = vcombine.low %v231_v63, %v235_v2  ;;  %v1277_v13 = vcombine.high %v238_v7, %v242_v8  ;;  %v1279_v14 = vcombine.high %v239_v9, %v243_v10  ;;  %v298_v63 = vld [vmem:[%s1404_s19 + $0x3f0] sm:$0xff]  ;;  %v295_v2 = vld [vmem:[%s1404_s19 + $0x3d8] sm:$0xff] }
  0x54   : > { %990 = vmatmul.mubr.bf16.vlgmr.msra.gmra.mrb[0].mxu0 %v1390_v0  ;;  %1031 = vmatmul.mubr.bf16.vlgmr.msra.gmra.mrb[0].mxu1 %v1390_v0 }
  0x55   : > { %1040 = vmatpush1.bf16.msra.mxu0 %v1212_v18  ;;  %1081 = vmatpush1.bf16.msra.mxu1 %v1214_v19  ;;  %v251_v18 = vld [vmem:[%s1404_s19 + $0x278] sm:$0xff]  ;;  %v1276_v19 = vcombine.low %v238_v7, %v242_v8  ;;  %v1332_v8 = vcombine.low %v294_v62, %v298_v63 }
  0x56   : > { %1041 = vmatprep.subr.bf16.mxu0 %v1221_v20  ;;  %1082 = vmatprep.subr.bf16.mxu1 %v1223_v21  ;;  %v1278_v20 = vcombine.low %v239_v9, %v243_v10  ;;  %v1285_v21 = vcombine.high %v246_v15, %v250_v16  ;;  %v1287_v22 = vcombine.high %v247_v17, %v251_v18 }
  0x57   : > { %1071 = vmatprep.mubr.bf16.mxu0 %v1394_v1  ;;  %1112 = vmatprep.mubr.bf16.mxu1 %v1394_v1  ;;  %v1238_v1 = vcombine.low %v199_v32, %v203_v33  ;;  %v266_v32 = vld [vmem:[%s1404_s19 + $0x2f0] sm:$0xff]  ;;  %v263_v33 = vld [vmem:[%s1404_s19 + $0x2d8] sm:$0xff] }
  0x59   : > { %1042 = vmatpush1.bf16.msra.mxu0 %v1220_v26  ;;  %1083 = vmatpush1.bf16.msra.mxu1 %v1222_v27  ;;  %v259_v26 = vld [vmem:[%s1404_s19 + $0x2b8] sm:$0xff]  ;;  %v1284_v27 = vcombine.low %v246_v15, %v250_v16 }
  0x5a   : > { %1043 = vmatprep.subr.bf16.mxu0 %v1229_v28  ;;  %1084 = vmatprep.subr.bf16.mxu1 %v1231_v29  ;;  %v1286_v28 = vcombine.low %v247_v17, %v251_v18  ;;  %v1293_v29 = vcombine.high %v254_v23, %v258_v24  ;;  %v1295_v30 = vcombine.high %v255_v25, %v259_v26 }
  0x5d   : > { %1044 = vmatpush1.bf16.msra.mxu0 %v1228_v34  ;;  %1085 = vmatpush1.bf16.msra.mxu1 %v1230_v35  ;;  %v267_v34 = vld [vmem:[%s1404_s19 + $0x2f8] sm:$0xff]  ;;  %v1292_v35 = vcombine.low %v254_v23, %v258_v24 }
  0x5e   : > { %1045 = vmatprep.subr.bf16.mxu0 %v1237_v36  ;;  %1086 = vmatprep.subr.bf16.mxu1 %v1239_v37  ;;  %v1294_v36 = vcombine.low %v255_v25, %v259_v26  ;;  %v1301_v37 = vcombine.high %v262_v31, %v266_v32  ;;  %v1303_v38 = vcombine.high %v263_v33, %v267_v34 }
  0x61   : > { %1046 = vmatpush1.bf16.msra.mxu0 %v1236_v42  ;;  %1087 = vmatpush1.bf16.msra.mxu1 %v1238_v1  ;;  %v275_v42 = vld [vmem:[%s1404_s19 + $0x338] sm:$0xff]  ;;  %v1300_v1 = vcombine.low %v262_v31, %v266_v32 }
  0x62   : > { %1047 = vmatprep.subr.bf16.mxu0 %v1245_v43  ;;  %1088 = vmatprep.subr.bf16.mxu1 %v1247_v44  ;;  %v1302_v43 = vcombine.low %v263_v33, %v267_v34  ;;  %v1309_v44 = vcombine.high %v270_v39, %v274_v40  ;;  %v1311_v45 = vcombine.high %v271_v41, %v275_v42 }
  0x65   : > { %1048 = vmatpush1.bf16.msra.mxu0 %v1244_v49  ;;  %1089 = vmatpush1.bf16.msra.mxu1 %v1246_v50  ;;  %v283_v49 = vld [vmem:[%s1404_s19 + $0x378] sm:$0xff]  ;;  %v1308_v50 = vcombine.low %v270_v39, %v274_v40 }
  0x66   : > { %1049 = vmatprep.subr.bf16.mxu0 %v1253_v51  ;;  %1090 = vmatprep.subr.bf16.mxu1 %v1255_v52  ;;  %v1310_v51 = vcombine.low %v271_v41, %v275_v42  ;;  %v1317_v52 = vcombine.high %v278_v46, %v282_v47  ;;  %v1319_v53 = vcombine.high %v279_v48, %v283_v49 }
  0x69   : > { %1050 = vmatpush1.bf16.msra.mxu0 %v1252_v57  ;;  %1091 = vmatpush1.bf16.msra.mxu1 %v1254_v58  ;;  %v291_v57 = vld [vmem:[%s1404_s19 + $0x3b8] sm:$0xff]  ;;  %v1316_v58 = vcombine.low %v278_v46, %v282_v47 }
  0x6a   : > { %1051 = vmatprep.subr.bf16.mxu0 %v1261_v59  ;;  %1092 = vmatprep.subr.bf16.mxu1 %v1263_v60  ;;  %v1318_v59 = vcombine.low %v279_v48, %v283_v49  ;;  %v1325_v60 = vcombine.high %v286_v54, %v290_v55  ;;  %v1327_v61 = vcombine.high %v287_v56, %v291_v57 }
  0x6d   : > { %1052 = vmatpush1.bf16.msra.mxu0 %v1260_v3  ;;  %1093 = vmatpush1.bf16.msra.mxu1 %v1262_v4  ;;  %v299_v3 = vld [vmem:[%s1404_s19 + $0x3f8] sm:$0xff]  ;;  %v1324_v4 = vcombine.low %v286_v54, %v290_v55 }
  0x6e   : > { %1053 = vmatprep.subr.bf16.mxu0 %v1269_v5  ;;  %1094 = vmatprep.subr.bf16.mxu1 %v1271_v6  ;;  %v1326_v5 = vcombine.low %v287_v56, %v291_v57  ;;  %v1333_v6 = vcombine.high %v294_v62, %v298_v63  ;;  %v1335_v7 = vcombine.high %v295_v2, %v299_v3 }
  0x6f   : > { %v1334_v9 = vcombine.low %v295_v2, %v299_v3 }
  0x71   : > { %1054 = vmatpush1.bf16.msra.mxu0 %v1268_v11  ;;  %1095 = vmatpush1.bf16.msra.mxu1 %v1270_v12 }
  0x72   : > { %1055 = vmatprep.subr.bf16.mxu0 %v1277_v13  ;;  %1096 = vmatprep.subr.bf16.mxu1 %v1279_v14 }
  0x75   : > { %1056 = vmatpush1.bf16.msra.mxu0 %v1276_v19  ;;  %1097 = vmatpush1.bf16.msra.mxu1 %v1278_v20 }
  0x76   : > { %1057 = vmatprep.subr.bf16.mxu0 %v1285_v21  ;;  %1098 = vmatprep.subr.bf16.mxu1 %v1287_v22 }
  0x79   : > { %1058 = vmatpush1.bf16.msra.mxu0 %v1284_v27  ;;  %1099 = vmatpush1.bf16.msra.mxu1 %v1286_v28 }
  0x7a   : > { %1059 = vmatprep.subr.bf16.mxu0 %v1293_v29  ;;  %1100 = vmatprep.subr.bf16.mxu1 %v1295_v30 }
  0x7d   : > { %1060 = vmatpush1.bf16.msra.mxu0 %v1292_v35  ;;  %1101 = vmatpush1.bf16.msra.mxu1 %v1294_v36 }
  0x7e   : > { %1061 = vmatprep.subr.bf16.mxu0 %v1301_v37  ;;  %1102 = vmatprep.subr.bf16.mxu1 %v1303_v38 }
  0x81   : > { %1062 = vmatpush1.bf16.msra.mxu0 %v1300_v1  ;;  %1103 = vmatpush1.bf16.msra.mxu1 %v1302_v43 }
  0x82   : > { %1063 = vmatprep.subr.bf16.mxu0 %v1309_v44  ;;  %1104 = vmatprep.subr.bf16.mxu1 %v1311_v45 }
  0x85   : > { %1064 = vmatpush1.bf16.msra.mxu0 %v1308_v50  ;;  %1105 = vmatpush1.bf16.msra.mxu1 %v1310_v51 }
  0x86   : > { %1065 = vmatprep.subr.bf16.mxu0 %v1317_v52  ;;  %1106 = vmatprep.subr.bf16.mxu1 %v1319_v53 }
  0x89   : > { %1066 = vmatpush1.bf16.msra.mxu0 %v1316_v58  ;;  %1107 = vmatpush1.bf16.msra.mxu1 %v1318_v59 }
  0x8a   : > { %1067 = vmatprep.subr.bf16.mxu0 %v1325_v60  ;;  %1108 = vmatprep.subr.bf16.mxu1 %v1327_v61 }
  0x8d   : > { %1068 = vmatpush1.bf16.msra.mxu0 %v1324_v4  ;;  %1109 = vmatpush1.bf16.msra.mxu1 %v1326_v5 }
  0x8e   : > { %1069 = vmatprep.subr.bf16.mxu0 %v1333_v6  ;;  %1110 = vmatprep.subr.bf16.mxu1 %v1335_v7 }
  0x91   : > { %1070 = vmatpush1.bf16.msra.mxu0 %v1332_v8  ;;  %1111 = vmatpush1.bf16.msra.mxu1 %v1334_v9 }
  0x94   : > { %1072 = vmatmul.mubr.bf16.vlgmr.msra.gmra.mrb[4].mxu0 %v1390_v0  ;;  %1113 = vmatmul.mubr.bf16.vlgmr.msra.gmra.mrb[4].mxu1 %v1390_v0 }
  0xaa   : > { %v304_v18 = vpop.permute.xlu0 %303 }
 0x127   : > { %v991_v10 = vpop.f32.mrb[0].mxu0  ;;  %v1032_v11 = vpop.f32.mrb[0].mxu1 }
 0x128   : > { %v993_v12 = vpop.f32.mrb[1].mxu0  ;;  %v1034_v13 = vpop.f32.mrb[1].mxu1  ;;  %v992_v19 = vadd.f32 %v991_v10, %v304_v18  ;;  %v1033_v22 = vadd.f32 %v1032_v11, %v304_v18 }
 0x129   : > { %v995_v14 = vpop.f32.mrb[2].mxu0  ;;  %v1036_v15 = vpop.f32.mrb[2].mxu1  ;;  %v994_v20 = vadd.f32 %v993_v12, %v304_v18  ;;  %v1035_v23 = vadd.f32 %v1034_v13, %v304_v18 }
 0x12a   : > { %v996_v16 = vpop.f32.mrb[3].mxu0  ;;  %v1037_v17 = vpop.f32.mrb[3].mxu1  ;;  %v1121_v30 = vmax.f32 %v992_v19, 0.0  ;;  %v1123_v36 = vmax.f32 %v1033_v22, 0.0 }
 0x12b   : > { %v1122_v35 = vmax.f32 %v994_v20, 0.0  ;;  %v1124_v40 = vmax.f32 %v1035_v23, 0.0 }
 0x167   : > { %v1073_v21 = vpop.f32.mrb[4].mxu0  ;;  %v1114_v25 = vpop.f32.mrb[4].mxu1 }
 0x168   : > { %v1074_v24 = vadd.f32 %v1073_v21, %v304_v18  ;;  %v1075_v26 = vpop.f32.mrb[5].mxu0  ;;  %v1115_v27 = vadd.f32 %v1114_v25, %v304_v18  ;;  %v1116_v28 = vpop.f32.mrb[5].mxu1 }
 0x169   : > { %v1076_v0 = vadd.f32 %v1075_v26, %v304_v18  ;;  %v1077_v29 = vpop.f32.mrb[6].mxu0  ;;  %v1117_v32 = vadd.f32 %v1116_v28, %v304_v18  ;;  %v1118_v33 = vpop.f32.mrb[6].mxu1 }
 0x16a   : > { %v1125_v31 = vmax.f32 %v1074_v24, 0.0  ;;  %v1078_v34 = vpop.f32.mrb[7].mxu0  ;;  %v1127_v37 = vmax.f32 %v1115_v27, 0.0  ;;  %v1119_v39 = vpop.f32.mrb[7].mxu1 }
 0x16b   : > { %v1126_v38 = vmax.f32 %v1076_v0, 0.0  ;;  %v1128_v42 = vmax.f32 %v1117_v32, 0.0 }
 0x16c   : > { %v1129_v41 = vmax.f32 %v1121_v30, %v1125_v31  ;;  %v1131_v1 = vmax.f32 %v1123_v36, %v1127_v37 }
 0x16d   : > { %v1130_v43 = vmax.f32 %v1122_v35, %v1126_v38  ;;  %v1132_v44 = vmax.f32 %v1124_v40, %v1128_v42 }
 0x16f   : > { %v1137_v45 = vcombine.low %v1129_v41, %v1130_v43  ;;  %v1138_v46 = vcombine.low %v1131_v1, %v1132_v44 }
 0x171   : > { %1141 = vst [vmem:[%s170_s25] sm:$0xff] %v1137_v45  ;;  %1142 = vst [vmem:[%s170_s25 + $0x8] sm:$0xff] %v1138_v46 }
 0x172 PF: > { %s13_s12 = sadd.s32 1, %s1356_s12  }
 0x173   : > { %p10_p4 = scmp.ge.s32.totalorder %s13_s12, 4  }
 0x175   :  { %12 = sbr.rel (!%p10_p4) target bundleno = 1 (0x1), region = 62 }

// kernel: cnn_model_forward.7
= control target key start
LH: loop header
LB: loop body
LE: loop exit
PB: predicated region body
PF: predicated region fallthrough
CT: control target
= control target key end

     0   :  { %s1580_s12 = smov 0   ;;  %s1752_s0 = inlined_call_operand.vmem [shape: bf16[2,512,512], index: 0, kind: input, shape index: {}]   ;;  %s1753_s1 = inlined_call_operand.vmem [shape: bf16[8,512], index: 1, kind: input, shape index: {}]   ;;  %s1754_s2 = inlined_call_operand.vmem [shape: f32[8,1], index: 2, kind: input, shape index: {}]   ;;  %s1755_s3 = inlined_call_operand.vmem [shape: f32[2,8,256], index: 3, kind: output, shape index: {}]  }
   0x1 LB: > { %s1188_s13 = sadd.s32 4294967295, %s1557_s12   ;;  %p1192_p0 = scmp.ge.s32.totalorder %s1557_s12, 1  ;;  %s1557_s12 = sphi %s1580_s12, %s13_s12  }
   0x2   : > { %p137_p1 = scmp.lt.s32.totalorder %s1557_s12, 3 }
   0x4   : > { %p138_p2 = pnand %p1192_p0, %p137_p1 }
   0x5   : > { %p161_p3 = scmp.lt.s32.totalorder (!%p138_p2), %s1188_s13, 1  ;;  %v1591_v0 = vld [vmem:[%s1753_s1] sm:$0xff] (!%p138_p2)  ;;  %v1559_v10 = vmov (!%p138_p2), 0  }
   0x6   : > { %141 = sbr.rel (%p138_p2) target bundleno = 365 (0x16d), region = 32  ;;  %v1198_v1 = vcombine.high (!%p138_p2), %v1591_v0, %v1591_v0  ;;  %1354 = vset.pattern.permute.xlu0 (!%p138_p2), %v1559_v10 }
   0x8   : > { %993 = vmatprep.mubr.bf16.mxu0 (!%p138_p2), %v1198_v1  ;;  %1075 = vmatprep.mubr.bf16.mxu1 (!%p138_p2), %v1198_v1 }
   0xd   : > { %s1757_s13 = smov (!%p161_p3, %s1188_s13), 1 }
   0xe   : > { %s1331_s16 = sshll.u32 %s1757_s13, 10  ;;  %s1332_s24 = sshll.u32 %s1757_s13, 4 }
   0xf   : > { %s1601_s19 = scalar_lea.vmem %s1752_s0, %s1331_s16  ;;  %s170_s27 = scalar_lea.vmem %s1755_s3, %s1332_s24 }
  0x10   : > { %v1355_v2 = vld [vmem:[%s1601_s19 + $0x4] ss:$16 sps:$4 sm:$0xff]   ;;  %v1357_v3 = vld [vmem:[%s1601_s19 + $0xc] ss:$16 sps:$4 sm:$0xff]   ;;  %v1359_v4 = vld [vmem:[%s1601_s19] ss:$16 sps:$4 sm:$0xff]  }
  0x11   : > { %961 = vmatprep.subr.bf16.mxu0 %v1355_v2  ;;  %v1360_v5 = vld [vmem:[%s1601_s19 + $0x8] ss:$16 sps:$4 sm:$0xff]   ;;  %1043 = vmatprep.subr.bf16.mxu1 %v1357_v3  ;;  %v1361_v6 = vld [vmem:[%s1601_s19 + $0x24] ss:$16 sps:$4 sm:$0xff]   ;;  %v1363_v7 = vld [vmem:[%s1601_s19 + $0x2c] ss:$16 sps:$4 sm:$0xff]  }
  0x12   : > { %962 = vmatpush1.bf16.msra.mxu0 %v1359_v4  ;;  %1044 = vmatpush1.bf16.msra.mxu1 %v1360_v5  ;;  %v1365_v8 = vld [vmem:[%s1601_s19 + $0x20] ss:$16 sps:$4 sm:$0xff]   ;;  %v1366_v9 = vld [vmem:[%s1601_s19 + $0x28] ss:$16 sps:$4 sm:$0xff]   ;;  %v1367_v11 = vld [vmem:[%s1601_s19 + $0x44] ss:$16 sps:$4 sm:$0xff]  }
  0x13   : > { %963 = vmatprep.subr.bf16.mxu0 %v1361_v6  ;;  %1045 = vmatprep.subr.bf16.mxu1 %v1363_v7  ;;  %v1369_v12 = vld [vmem:[%s1601_s19 + $0x4c] ss:$16 sps:$4 sm:$0xff]   ;;  %v1371_v13 = vld [vmem:[%s1601_s19 + $0x40] ss:$16 sps:$4 sm:$0xff]   ;;  %v1372_v14 = vld [vmem:[%s1601_s19 + $0x48] ss:$16 sps:$4 sm:$0xff]   ;;  %v1197_v7 = vcombine.low %v1591_v0, %v1591_v0 }
  0x14   : > { %v1373_v15 = vld [vmem:[%s1601_s19 + $0x64] ss:$16 sps:$4 sm:$0xff]   ;;  %v1375_v16 = vld [vmem:[%s1601_s19 + $0x6c] ss:$16 sps:$4 sm:$0xff]   ;;  %v1377_v17 = vld [vmem:[%s1601_s19 + $0x60] ss:$16 sps:$4 sm:$0xff]  }
  0x15   : > { %v1378_v18 = vld [vmem:[%s1601_s19 + $0x68] ss:$16 sps:$4 sm:$0xff]   ;;  %v1379_v19 = vld [vmem:[%s1601_s19 + $0x84] ss:$16 sps:$4 sm:$0xff]   ;;  %v1381_v20 = vld [vmem:[%s1601_s19 + $0x8c] ss:$16 sps:$4 sm:$0xff]  }
  0x16   : > { %964 = vmatpush1.bf16.msra.mxu0 %v1365_v8  ;;  %1046 = vmatpush1.bf16.msra.mxu1 %v1366_v9  ;;  %v1383_v21 = vld [vmem:[%s1601_s19 + $0x80] ss:$16 sps:$4 sm:$0xff]   ;;  %v1384_v22 = vld [vmem:[%s1601_s19 + $0x88] ss:$16 sps:$4 sm:$0xff]   ;;  %v1385_v23 = vld [vmem:[%s1601_s19 + $0xa4] ss:$16 sps:$4 sm:$0xff]  }
  0x17   : > { %965 = vmatprep.subr.bf16.mxu0 %v1367_v11  ;;  %1047 = vmatprep.subr.bf16.mxu1 %v1369_v12  ;;  %v1387_v24 = vld [vmem:[%s1601_s19 + $0xac] ss:$16 sps:$4 sm:$0xff]   ;;  %v1389_v25 = vld [vmem:[%s1601_s19 + $0xa0] ss:$16 sps:$4 sm:$0xff]   ;;  %v1390_v26 = vld [vmem:[%s1601_s19 + $0xa8] ss:$16 sps:$4 sm:$0xff]  }
  0x18   : > { %v1391_v27 = vld [vmem:[%s1601_s19 + $0xc4] ss:$16 sps:$4 sm:$0xff]   ;;  %v1393_v28 = vld [vmem:[%s1601_s19 + $0xcc] ss:$16 sps:$4 sm:$0xff]   ;;  %v1395_v29 = vld [vmem:[%s1601_s19 + $0xc0] ss:$16 sps:$4 sm:$0xff]  }
  0x19   : > { %v1396_v30 = vld [vmem:[%s1601_s19 + $0xc8] ss:$16 sps:$4 sm:$0xff]   ;;  %v1397_v31 = vld [vmem:[%s1601_s19 + $0xe4] ss:$16 sps:$4 sm:$0xff]   ;;  %v1399_v32 = vld [vmem:[%s1601_s19 + $0xec] ss:$16 sps:$4 sm:$0xff]  }
  0x1a   : > { %966 = vmatpush1.bf16.msra.mxu0 %v1371_v13  ;;  %1048 = vmatpush1.bf16.msra.mxu1 %v1372_v14  ;;  %v1401_v33 = vld [vmem:[%s1601_s19 + $0xe0] ss:$16 sps:$4 sm:$0xff]   ;;  %v1402_v34 = vld [vmem:[%s1601_s19 + $0xe8] ss:$16 sps:$4 sm:$0xff]   ;;  %v1403_v35 = vld [vmem:[%s1601_s19 + $0x104] ss:$16 sps:$4 sm:$0xff]  }
  0x1b   : > { %967 = vmatprep.subr.bf16.mxu0 %v1373_v15  ;;  %1049 = vmatprep.subr.bf16.mxu1 %v1375_v16  ;;  %v1405_v36 = vld [vmem:[%s1601_s19 + $0x10c] ss:$16 sps:$4 sm:$0xff]   ;;  %v1407_v37 = vld [vmem:[%s1601_s19 + $0x100] ss:$16 sps:$4 sm:$0xff]   ;;  %v1408_v38 = vld [vmem:[%s1601_s19 + $0x108] ss:$16 sps:$4 sm:$0xff]  }
  0x1c   : > { %v1409_v39 = vld [vmem:[%s1601_s19 + $0x124] ss:$16 sps:$4 sm:$0xff]   ;;  %v1411_v40 = vld [vmem:[%s1601_s19 + $0x12c] ss:$16 sps:$4 sm:$0xff]   ;;  %v1413_v41 = vld [vmem:[%s1601_s19 + $0x120] ss:$16 sps:$4 sm:$0xff]  }
  0x1d   : > { %v1414_v42 = vld [vmem:[%s1601_s19 + $0x128] ss:$16 sps:$4 sm:$0xff]   ;;  %v1415_v43 = vld [vmem:[%s1601_s19 + $0x144] ss:$16 sps:$4 sm:$0xff]   ;;  %v1417_v44 = vld [vmem:[%s1601_s19 + $0x14c] ss:$16 sps:$4 sm:$0xff]  }
  0x1e   : > { %968 = vmatpush1.bf16.msra.mxu0 %v1377_v17  ;;  %1050 = vmatpush1.bf16.msra.mxu1 %v1378_v18  ;;  %v1419_v45 = vld [vmem:[%s1601_s19 + $0x140] ss:$16 sps:$4 sm:$0xff]   ;;  %v1420_v46 = vld [vmem:[%s1601_s19 + $0x148] ss:$16 sps:$4 sm:$0xff]   ;;  %v1421_v47 = vld [vmem:[%s1601_s19 + $0x164] ss:$16 sps:$4 sm:$0xff]  }
  0x1f   : > { %969 = vmatprep.subr.bf16.mxu0 %v1379_v19  ;;  %1051 = vmatprep.subr.bf16.mxu1 %v1381_v20  ;;  %v1423_v48 = vld [vmem:[%s1601_s19 + $0x16c] ss:$16 sps:$4 sm:$0xff]   ;;  %v1425_v49 = vld [vmem:[%s1601_s19 + $0x160] ss:$16 sps:$4 sm:$0xff]   ;;  %v1426_v50 = vld [vmem:[%s1601_s19 + $0x168] ss:$16 sps:$4 sm:$0xff]  }
  0x20   : > { %v1427_v51 = vld [vmem:[%s1601_s19 + $0x184] ss:$16 sps:$4 sm:$0xff]   ;;  %v1429_v52 = vld [vmem:[%s1601_s19 + $0x18c] ss:$16 sps:$4 sm:$0xff]   ;;  %v1431_v53 = vld [vmem:[%s1601_s19 + $0x180] ss:$16 sps:$4 sm:$0xff]  }
  0x21   : > { %v1432_v54 = vld [vmem:[%s1601_s19 + $0x188] ss:$16 sps:$4 sm:$0xff]   ;;  %v1433_v55 = vld [vmem:[%s1601_s19 + $0x1a4] ss:$16 sps:$4 sm:$0xff]   ;;  %v1435_v56 = vld [vmem:[%s1601_s19 + $0x1ac] ss:$16 sps:$4 sm:$0xff]  }
  0x22   : > { %970 = vmatpush1.bf16.msra.mxu0 %v1383_v21  ;;  %1052 = vmatpush1.bf16.msra.mxu1 %v1384_v22  ;;  %v1437_v57 = vld [vmem:[%s1601_s19 + $0x1a0] ss:$16 sps:$4 sm:$0xff]   ;;  %v1438_v58 = vld [vmem:[%s1601_s19 + $0x1a8] ss:$16 sps:$4 sm:$0xff]   ;;  %v1439_v59 = vld [vmem:[%s1601_s19 + $0x1c4] ss:$16 sps:$4 sm:$0xff]  }
  0x23   : > { %971 = vmatprep.subr.bf16.mxu0 %v1385_v23  ;;  %1053 = vmatprep.subr.bf16.mxu1 %v1387_v24  ;;  %v1441_v60 = vld [vmem:[%s1601_s19 + $0x1cc] ss:$16 sps:$4 sm:$0xff]   ;;  %v1443_v61 = vld [vmem:[%s1601_s19 + $0x1c0] ss:$16 sps:$4 sm:$0xff]   ;;  %v1444_v62 = vld [vmem:[%s1601_s19 + $0x1c8] ss:$16 sps:$4 sm:$0xff]  }
  0x24   : > { %v1445_v63 = vld [vmem:[%s1601_s19 + $0x1e4] ss:$16 sps:$4 sm:$0xff]   ;;  %v1447_v1 = vld [vmem:[%s1601_s19 + $0x1ec] ss:$16 sps:$4 sm:$0xff]   ;;  %v1449_v2 = vld [vmem:[%s1601_s19 + $0x1e0] ss:$16 sps:$4 sm:$0xff]  }
  0x25   : > { %v1450_v3 = vld [vmem:[%s1601_s19 + $0x1e8] ss:$16 sps:$4 sm:$0xff]   ;;  %v1455_v4 = vld [vmem:[%s1601_s19 + $0x204] ss:$16 sps:$4 sm:$0xff]   ;;  %v1458_v5 = vld [vmem:[%s1601_s19 + $0x20c] ss:$16 sps:$4 sm:$0xff]  }
  0x26   : > { %972 = vmatpush1.bf16.msra.mxu0 %v1389_v25  ;;  %1054 = vmatpush1.bf16.msra.mxu1 %v1390_v26  ;;  %v1672_v6 = vld [vmem:[%s1753_s1 + $0x8] sm:$0xff]  ;;  %v1453_v8 = vld [vmem:[%s1601_s19 + $0x200] ss:$16 sps:$4 sm:$0xff]   ;;  %v1461_v10 = vld [vmem:[%s1601_s19 + $0x224] ss:$16 sps:$4 sm:$0xff]  }
  0x27   : > { %973 = vmatprep.subr.bf16.mxu0 %v1391_v27  ;;  %1055 = vmatprep.subr.bf16.mxu1 %v1393_v28  ;;  %v1456_v9 = vld [vmem:[%s1601_s19 + $0x208] ss:$16 sps:$4 sm:$0xff]   ;;  %v1464_v11 = vld [vmem:[%s1601_s19 + $0x22c] ss:$16 sps:$4 sm:$0xff]   ;;  %v1200_v12 = vcombine.high %v1672_v6, %v1672_v6  ;;  %v1459_v13 = vld [vmem:[%s1601_s19 + $0x220] ss:$16 sps:$4 sm:$0xff]  }
  0x28   : > { %v1462_v0 = vld [vmem:[%s1601_s19 + $0x228] ss:$16 sps:$4 sm:$0xff]   ;;  %v1467_v14 = vld [vmem:[%s1601_s19 + $0x244] ss:$16 sps:$4 sm:$0xff]   ;;  %v1470_v15 = vld [vmem:[%s1601_s19 + $0x24c] ss:$16 sps:$4 sm:$0xff]  }
  0x29   : > { %v1465_v16 = vld [vmem:[%s1601_s19 + $0x240] ss:$16 sps:$4 sm:$0xff]   ;;  %v1468_v17 = vld [vmem:[%s1601_s19 + $0x248] ss:$16 sps:$4 sm:$0xff]   ;;  %v1473_v18 = vld [vmem:[%s1601_s19 + $0x264] ss:$16 sps:$4 sm:$0xff]  }
  0x2a   : > { %974 = vmatpush1.bf16.msra.mxu0 %v1395_v29  ;;  %1056 = vmatpush1.bf16.msra.mxu1 %v1396_v30  ;;  %v1476_v19 = vld [vmem:[%s1601_s19 + $0x26c] ss:$16 sps:$4 sm:$0xff]   ;;  %v1471_v20 = vld [vmem:[%s1601_s19 + $0x260] ss:$16 sps:$4 sm:$0xff]   ;;  %v1474_v21 = vld [vmem:[%s1601_s19 + $0x268] ss:$16 sps:$4 sm:$0xff]  }
  0x2b   : > { %975 = vmatprep.subr.bf16.mxu0 %v1397_v31  ;;  %1057 = vmatprep.subr.bf16.mxu1 %v1399_v32  ;;  %v1479_v22 = vld [vmem:[%s1601_s19 + $0x284] ss:$16 sps:$4 sm:$0xff]   ;;  %v1482_v23 = vld [vmem:[%s1601_s19 + $0x28c] ss:$16 sps:$4 sm:$0xff]   ;;  %v1477_v24 = vld [vmem:[%s1601_s19 + $0x280] ss:$16 sps:$4 sm:$0xff]  }
  0x2c   : > { %v1480_v25 = vld [vmem:[%s1601_s19 + $0x288] ss:$16 sps:$4 sm:$0xff]   ;;  %v1485_v26 = vld [vmem:[%s1601_s19 + $0x2a4] ss:$16 sps:$4 sm:$0xff]   ;;  %v1488_v27 = vld [vmem:[%s1601_s19 + $0x2ac] ss:$16 sps:$4 sm:$0xff]  }
  0x2d   : > { %v1483_v28 = vld [vmem:[%s1601_s19 + $0x2a0] ss:$16 sps:$4 sm:$0xff]   ;;  %v1486_v29 = vld [vmem:[%s1601_s19 + $0x2a8] ss:$16 sps:$4 sm:$0xff]   ;;  %v1491_v30 = vld [vmem:[%s1601_s19 + $0x2c4] ss:$16 sps:$4 sm:$0xff]  }
  0x2e   : > { %976 = vmatpush1.bf16.msra.mxu0 %v1401_v33  ;;  %1058 = vmatpush1.bf16.msra.mxu1 %v1402_v34  ;;  %v1494_v31 = vld [vmem:[%s1601_s19 + $0x2cc] ss:$16 sps:$4 sm:$0xff]   ;;  %v301_v32 = vld [vmem:[%s1754_s2] sm:$0xff]  ;;  %v1492_v34 = vld [vmem:[%s1601_s19 + $0x2c8] ss:$16 sps:$4 sm:$0xff]  }
  0x2f   : > { %977 = vmatprep.subr.bf16.mxu0 %v1403_v35  ;;  %1059 = vmatprep.subr.bf16.mxu1 %v1405_v36  ;;  %v1489_v33 = vld [vmem:[%s1601_s19 + $0x2c0] ss:$16 sps:$4 sm:$0xff]   ;;  %v1497_v35 = vld [vmem:[%s1601_s19 + $0x2e4] ss:$16 sps:$4 sm:$0xff]   ;;  %v1500_v36 = vld [vmem:[%s1601_s19 + $0x2ec] ss:$16 sps:$4 sm:$0xff]  }
  0x30   : > { %304 = vperm.xlu0 %1354, %v301_v32  }
  0x32   : > { %978 = vmatpush1.bf16.msra.mxu0 %v1407_v37  ;;  %1060 = vmatpush1.bf16.msra.mxu1 %v1408_v38  ;;  %v1495_v37 = vld [vmem:[%s1601_s19 + $0x2e0] ss:$16 sps:$4 sm:$0xff]   ;;  %v1498_v38 = vld [vmem:[%s1601_s19 + $0x2e8] ss:$16 sps:$4 sm:$0xff]  }
  0x33   : > { %979 = vmatprep.subr.bf16.mxu0 %v1409_v39  ;;  %1061 = vmatprep.subr.bf16.mxu1 %v1411_v40  ;;  %v1503_v39 = vld [vmem:[%s1601_s19 + $0x304] ss:$16 sps:$4 sm:$0xff]   ;;  %v1506_v40 = vld [vmem:[%s1601_s19 + $0x30c] ss:$16 sps:$4 sm:$0xff]  }
  0x36   : > { %980 = vmatpush1.bf16.msra.mxu0 %v1413_v41  ;;  %1062 = vmatpush1.bf16.msra.mxu1 %v1414_v42  ;;  %v1501_v41 = vld [vmem:[%s1601_s19 + $0x300] ss:$16 sps:$4 sm:$0xff]   ;;  %v1504_v42 = vld [vmem:[%s1601_s19 + $0x308] ss:$16 sps:$4 sm:$0xff]  }
  0x37   : > { %981 = vmatprep.subr.bf16.mxu0 %v1415_v43  ;;  %1063 = vmatprep.subr.bf16.mxu1 %v1417_v44  ;;  %v1509_v43 = vld [vmem:[%s1601_s19 + $0x324] ss:$16 sps:$4 sm:$0xff]   ;;  %v1512_v44 = vld [vmem:[%s1601_s19 + $0x32c] ss:$16 sps:$4 sm:$0xff]  }
  0x3a   : > { %982 = vmatpush1.bf16.msra.mxu0 %v1419_v45  ;;  %1064 = vmatpush1.bf16.msra.mxu1 %v1420_v46  ;;  %v1507_v45 = vld [vmem:[%s1601_s19 + $0x320] ss:$16 sps:$4 sm:$0xff]   ;;  %v1510_v46 = vld [vmem:[%s1601_s19 + $0x328] ss:$16 sps:$4 sm:$0xff]  }
  0x3b   : > { %983 = vmatprep.subr.bf16.mxu0 %v1421_v47  ;;  %1065 = vmatprep.subr.bf16.mxu1 %v1423_v48  ;;  %v1515_v47 = vld [vmem:[%s1601_s19 + $0x344] ss:$16 sps:$4 sm:$0xff]   ;;  %v1518_v48 = vld [vmem:[%s1601_s19 + $0x34c] ss:$16 sps:$4 sm:$0xff]  }
  0x3e   : > { %984 = vmatpush1.bf16.msra.mxu0 %v1425_v49  ;;  %1066 = vmatpush1.bf16.msra.mxu1 %v1426_v50  ;;  %v1513_v49 = vld [vmem:[%s1601_s19 + $0x340] ss:$16 sps:$4 sm:$0xff]   ;;  %v1516_v50 = vld [vmem:[%s1601_s19 + $0x348] ss:$16 sps:$4 sm:$0xff]  }
  0x3f   : > { %985 = vmatprep.subr.bf16.mxu0 %v1427_v51  ;;  %1067 = vmatprep.subr.bf16.mxu1 %v1429_v52  ;;  %v1521_v51 = vld [vmem:[%s1601_s19 + $0x364] ss:$16 sps:$4 sm:$0xff]   ;;  %v1524_v52 = vld [vmem:[%s1601_s19 + $0x36c] ss:$16 sps:$4 sm:$0xff]  }
  0x42   : > { %986 = vmatpush1.bf16.msra.mxu0 %v1431_v53  ;;  %1068 = vmatpush1.bf16.msra.mxu1 %v1432_v54  ;;  %v1519_v53 = vld [vmem:[%s1601_s19 + $0x360] ss:$16 sps:$4 sm:$0xff]   ;;  %v1522_v54 = vld [vmem:[%s1601_s19 + $0x368] ss:$16 sps:$4 sm:$0xff]  }
  0x43   : > { %987 = vmatprep.subr.bf16.mxu0 %v1433_v55  ;;  %1069 = vmatprep.subr.bf16.mxu1 %v1435_v56  ;;  %v1527_v55 = vld [vmem:[%s1601_s19 + $0x384] ss:$16 sps:$4 sm:$0xff]   ;;  %v1530_v56 = vld [vmem:[%s1601_s19 + $0x38c] ss:$16 sps:$4 sm:$0xff]  }
  0x46   : > { %988 = vmatpush1.bf16.msra.mxu0 %v1437_v57  ;;  %1070 = vmatpush1.bf16.msra.mxu1 %v1438_v58  ;;  %v1525_v57 = vld [vmem:[%s1601_s19 + $0x380] ss:$16 sps:$4 sm:$0xff]   ;;  %v1528_v58 = vld [vmem:[%s1601_s19 + $0x388] ss:$16 sps:$4 sm:$0xff]  }
  0x47   : > { %989 = vmatprep.subr.bf16.mxu0 %v1439_v59  ;;  %1071 = vmatprep.subr.bf16.mxu1 %v1441_v60  ;;  %v1533_v59 = vld [vmem:[%s1601_s19 + $0x3a4] ss:$16 sps:$4 sm:$0xff]   ;;  %v1536_v60 = vld [vmem:[%s1601_s19 + $0x3ac] ss:$16 sps:$4 sm:$0xff]  }
  0x4a   : > { %990 = vmatpush1.bf16.msra.mxu0 %v1443_v61  ;;  %1072 = vmatpush1.bf16.msra.mxu1 %v1444_v62  ;;  %v1531_v61 = vld [vmem:[%s1601_s19 + $0x3a0] ss:$16 sps:$4 sm:$0xff]   ;;  %v1534_v62 = vld [vmem:[%s1601_s19 + $0x3a8] ss:$16 sps:$4 sm:$0xff]  }
  0x4b   : > { %991 = vmatprep.subr.bf16.mxu0 %v1445_v63  ;;  %1073 = vmatprep.subr.bf16.mxu1 %v1447_v1  ;;  %v1539_v63 = vld [vmem:[%s1601_s19 + $0x3c4] ss:$16 sps:$4 sm:$0xff]   ;;  %v1542_v1 = vld [vmem:[%s1601_s19 + $0x3cc] ss:$16 sps:$4 sm:$0xff]  }
  0x4e   : > { %992 = vmatpush1.bf16.msra.mxu0 %v1449_v2  ;;  %1074 = vmatpush1.bf16.msra.mxu1 %v1450_v3  ;;  %v1537_v2 = vld [vmem:[%s1601_s19 + $0x3c0] ss:$16 sps:$4 sm:$0xff]   ;;  %v1540_v3 = vld [vmem:[%s1601_s19 + $0x3c8] ss:$16 sps:$4 sm:$0xff]  }
  0x4f   : > { %1002 = vmatprep.subr.bf16.mxu0 %v1455_v4  ;;  %1084 = vmatprep.subr.bf16.mxu1 %v1458_v5  ;;  %v1545_v4 = vld [vmem:[%s1601_s19 + $0x3e4] ss:$16 sps:$4 sm:$0xff]   ;;  %v1548_v5 = vld [vmem:[%s1601_s19 + $0x3ec] ss:$16 sps:$4 sm:$0xff]  }
  0x51   : > { %994 = vmatmul.mubr.bf16.vlgmr.msra.gmra.mrb[0].mxu0 %v1197_v7  ;;  %1076 = vmatmul.mubr.bf16.vlgmr.msra.gmra.mrb[0].mxu1 %v1197_v7  ;;  %v1543_v7 = vld [vmem:[%s1601_s19 + $0x3e0] ss:$16 sps:$4 sm:$0xff]  }
  0x52   : > { %1003 = vmatpush1.bf16.msra.mxu0 %v1453_v8  ;;  %1085 = vmatpush1.bf16.msra.mxu1 %v1456_v9  ;;  %v1546_v8 = vld [vmem:[%s1601_s19 + $0x3e8] ss:$16 sps:$4 sm:$0xff]   ;;  %v1199_v9 = vcombine.low %v1672_v6, %v1672_v6 }
  0x53   : > { %1004 = vmatprep.subr.bf16.mxu0 %v1461_v10  ;;  %1086 = vmatprep.subr.bf16.mxu1 %v1464_v11 }
  0x54   : > { %1034 = vmatprep.mubr.bf16.mxu0 %v1200_v12  ;;  %1116 = vmatprep.mubr.bf16.mxu1 %v1200_v12 }
  0x56   : > { %1005 = vmatpush1.bf16.msra.mxu0 %v1459_v13  ;;  %1087 = vmatpush1.bf16.msra.mxu1 %v1462_v0 }
  0x57   : > { %1006 = vmatprep.subr.bf16.mxu0 %v1467_v14  ;;  %1088 = vmatprep.subr.bf16.mxu1 %v1470_v15 }
  0x5a   : > { %1007 = vmatpush1.bf16.msra.mxu0 %v1465_v16  ;;  %1089 = vmatpush1.bf16.msra.mxu1 %v1468_v17 }
  0x5b   : > { %1008 = vmatprep.subr.bf16.mxu0 %v1473_v18  ;;  %1090 = vmatprep.subr.bf16.mxu1 %v1476_v19 }
  0x5e   : > { %1009 = vmatpush1.bf16.msra.mxu0 %v1471_v20  ;;  %1091 = vmatpush1.bf16.msra.mxu1 %v1474_v21 }
  0x5f   : > { %1010 = vmatprep.subr.bf16.mxu0 %v1479_v22  ;;  %1092 = vmatprep.subr.bf16.mxu1 %v1482_v23 }
  0x62   : > { %1011 = vmatpush1.bf16.msra.mxu0 %v1477_v24  ;;  %1093 = vmatpush1.bf16.msra.mxu1 %v1480_v25 }
  0x63   : > { %1012 = vmatprep.subr.bf16.mxu0 %v1485_v26  ;;  %1094 = vmatprep.subr.bf16.mxu1 %v1488_v27 }
  0x66   : > { %1013 = vmatpush1.bf16.msra.mxu0 %v1483_v28  ;;  %1095 = vmatpush1.bf16.msra.mxu1 %v1486_v29 }
  0x67   : > { %1014 = vmatprep.subr.bf16.mxu0 %v1491_v30  ;;  %1096 = vmatprep.subr.bf16.mxu1 %v1494_v31 }
  0x6a   : > { %1015 = vmatpush1.bf16.msra.mxu0 %v1489_v33  ;;  %1097 = vmatpush1.bf16.msra.mxu1 %v1492_v34 }
  0x6b   : > { %1016 = vmatprep.subr.bf16.mxu0 %v1497_v35  ;;  %1098 = vmatprep.subr.bf16.mxu1 %v1500_v36 }
  0x6e   : > { %1017 = vmatpush1.bf16.msra.mxu0 %v1495_v37  ;;  %1099 = vmatpush1.bf16.msra.mxu1 %v1498_v38 }
  0x6f   : > { %1018 = vmatprep.subr.bf16.mxu0 %v1503_v39  ;;  %1100 = vmatprep.subr.bf16.mxu1 %v1506_v40 }
  0x72   : > { %1019 = vmatpush1.bf16.msra.mxu0 %v1501_v41  ;;  %1101 = vmatpush1.bf16.msra.mxu1 %v1504_v42 }
  0x73   : > { %1020 = vmatprep.subr.bf16.mxu0 %v1509_v43  ;;  %1102 = vmatprep.subr.bf16.mxu1 %v1512_v44 }
  0x76   : > { %1021 = vmatpush1.bf16.msra.mxu0 %v1507_v45  ;;  %1103 = vmatpush1.bf16.msra.mxu1 %v1510_v46 }
  0x77   : > { %1022 = vmatprep.subr.bf16.mxu0 %v1515_v47  ;;  %1104 = vmatprep.subr.bf16.mxu1 %v1518_v48 }
  0x7a   : > { %1023 = vmatpush1.bf16.msra.mxu0 %v1513_v49  ;;  %1105 = vmatpush1.bf16.msra.mxu1 %v1516_v50 }
  0x7b   : > { %1024 = vmatprep.subr.bf16.mxu0 %v1521_v51  ;;  %1106 = vmatprep.subr.bf16.mxu1 %v1524_v52 }
  0x7e   : > { %1025 = vmatpush1.bf16.msra.mxu0 %v1519_v53  ;;  %1107 = vmatpush1.bf16.msra.mxu1 %v1522_v54 }
  0x7f   : > { %1026 = vmatprep.subr.bf16.mxu0 %v1527_v55  ;;  %1108 = vmatprep.subr.bf16.mxu1 %v1530_v56 }
  0x82   : > { %1027 = vmatpush1.bf16.msra.mxu0 %v1525_v57  ;;  %1109 = vmatpush1.bf16.msra.mxu1 %v1528_v58 }
  0x83   : > { %1028 = vmatprep.subr.bf16.mxu0 %v1533_v59  ;;  %1110 = vmatprep.subr.bf16.mxu1 %v1536_v60 }
  0x86   : > { %1029 = vmatpush1.bf16.msra.mxu0 %v1531_v61  ;;  %1111 = vmatpush1.bf16.msra.mxu1 %v1534_v62 }
  0x87   : > { %1030 = vmatprep.subr.bf16.mxu0 %v1539_v63  ;;  %1112 = vmatprep.subr.bf16.mxu1 %v1542_v1 }
  0x8a   : > { %1031 = vmatpush1.bf16.msra.mxu0 %v1537_v2  ;;  %1113 = vmatpush1.bf16.msra.mxu1 %v1540_v3 }
  0x8b   : > { %1032 = vmatprep.subr.bf16.mxu0 %v1545_v4  ;;  %1114 = vmatprep.subr.bf16.mxu1 %v1548_v5 }
  0x8e   : > { %1033 = vmatpush1.bf16.msra.mxu0 %v1543_v7  ;;  %1115 = vmatpush1.bf16.msra.mxu1 %v1546_v8 }
  0x91   : > { %1035 = vmatmul.mubr.bf16.vlgmr.msra.gmra.mrb[0].mxu0 %v1199_v9  ;;  %1117 = vmatmul.mubr.bf16.vlgmr.msra.gmra.mrb[0].mxu1 %v1199_v9 }
  0xaf   : > { %v305_v10 = vpop.permute.xlu0 %304 }
 0x164   : > { %v1036_v11 = vpop.f32.mrb[0].mxu0  ;;  %v1118_v12 = vpop.f32.mrb[0].mxu1 }
 0x165   : > { %v1333_v13 = vadd.f32 %v1036_v11, %v305_v10  ;;  %v1335_v0 = vadd.f32 %v1118_v12, %v305_v10  ;;  %v1038_v14 = vpop.f32.mrb[1].mxu0  ;;  %v1120_v15 = vpop.f32.mrb[1].mxu1 }
 0x166   : > { %v1334_v16 = vadd.f32 %v1038_v14, %v305_v10  ;;  %v1336_v17 = vadd.f32 %v1120_v15, %v305_v10  ;;  %v1040_v18 = vpop.f32.mrb[2].mxu0  ;;  %v1122_v19 = vpop.f32.mrb[2].mxu1 }
 0x167   : > { %v1125_v20 = vmax.f32 %v1333_v13, 0.0  ;;  %v1127_v21 = vmax.f32 %v1335_v0, 0.0  ;;  %v1041_v22 = vpop.f32.mrb[3].mxu0  ;;  %v1123_v6 = vpop.f32.mrb[3].mxu1 }
 0x168   : > { %v1126_v23 = vmax.f32 %v1334_v16, 0.0  ;;  %v1128_v24 = vmax.f32 %v1336_v17, 0.0 }
 0x169   : > { %v1129_v25 = vmax.f32 %v1125_v20, %v1127_v21 }
 0x16a   : > { %v1130_v26 = vmax.f32 %v1126_v23, %v1128_v24 }
 0x16b   : > { %1131 = vst [vmem:[%s170_s27] sm:$0xff] %v1129_v25 }
 0x16c   : > { %1132 = vst [vmem:[%s170_s27 + $0x8] sm:$0xff] %v1130_v26 }
 0x16d PF: > { %s13_s12 = sadd.s32 1, %s1557_s12  }
 0x16e   : > { %p10_p4 = scmp.ge.s32.totalorder %s13_s12, 4  }
 0x170   :  { %12 = sbr.rel (!%p10_p4) target bundleno = 1 (0x1), region = 62 }

// kernel: cnn_model_forward.8
= control target key start
LH: loop header
LB: loop body
LE: loop exit
PB: predicated region body
PF: predicated region fallthrough
CT: control target
= control target key end

     0   :  { %s1630_s12 = smov 0   ;;  %s1849_s0 = inlined_call_operand.vmem [shape: bf16[2,1024,256], index: 0, kind: input, shape index: {}]   ;;  %s1850_s1 = inlined_call_operand.vmem [shape: bf16[16,1024], index: 1, kind: input, shape index: {}]   ;;  %s1851_s2 = inlined_call_operand.vmem [shape: f32[16,1], index: 2, kind: input, shape index: {}]   ;;  %s1852_s3 = inlined_call_operand.vmem [shape: f32[2,16,128], index: 3, kind: output, shape index: {}]  }
   0x1 LB: > { %s1234_s13 = sadd.s32 4294967295, %s1607_s12   ;;  %p1238_p0 = scmp.ge.s32.totalorder %s1607_s12, 1  ;;  %s1607_s12 = sphi %s1630_s12, %s13_s12  }
   0x2   : > { %p137_p1 = scmp.lt.s32.totalorder %s1607_s12, 3 }
   0x4   : > { %p138_p2 = pnand %p1238_p0, %p137_p1 }
   0x5   : > { %p161_p3 = scmp.lt.s32.totalorder (!%p138_p2), %s1234_s13, 1  ;;  %v1641_v0 = vld [vmem:[%s1850_s1] sm:$0xff] (!%p138_p2)  ;;  %v1651_v2 = vld [vmem:[%s1850_s1 + $0x10] sm:$0xff] (!%p138_p2)  ;;  %v1609_v16 = vmov (!%p138_p2), 0  }
   0x6   : > { %141 = sbr.rel (%p138_p2) target bundleno = 369 (0x171), region = 32  ;;  %v1646_v1 = vld [vmem:[%s1850_s1 + $0x20] sm:$0xff] (!%p138_p2)  ;;  %v1660_v5 = vld [vmem:[%s1850_s1 + $0x30] sm:$0xff] (!%p138_p2)  ;;  %1408 = vset.pattern.permute.xlu0 (!%p138_p2), %v1609_v16 }
   0x7   : > { %v1243_v3 = vcombine.low (!%p138_p2), %v1641_v0, %v1646_v1  ;;  %v1244_v4 = vcombine.high (!%p138_p2), %v1641_v0, %v1646_v1  ;;  %v1247_v6 = vcombine.low (!%p138_p2), %v1651_v2, %v1660_v5  ;;  %v1248_v7 = vcombine.high (!%p138_p2), %v1651_v2, %v1660_v5 }
   0x9   : > { %1031 = vmatprep.mubr.bf16.mxu1 (!%p138_p2), %v1244_v4  ;;  %1117 = vmatprep.mubr.bf16.mxu0 (!%p138_p2), %v1248_v7 }
   0xd   : > { %s1854_s13 = smov (!%p161_p3, %s1234_s13), 1 }
   0xe   : > { %s1381_s22 = sshll.u32 %s1854_s13, 10  ;;  %s1382_s11 = sshll.u32 %s1854_s13, 4 }
   0xf   : > { %s1672_s25 = scalar_lea.vmem %s1849_s0, %s1381_s22  ;;  %s170_s16 = scalar_lea.vmem %s1852_s3, %s1382_s11 }
  0x10   : > { %v1409_v8 = vld [vmem:[%s1672_s25 + $0x4] ss:$8 sps:$4 sm:$0xff]   ;;  %v1413_v10 = vld [vmem:[%s1672_s25] ss:$8 sps:$4 sm:$0xff]   ;;  %v1415_v12 = vld [vmem:[%s1672_s25 + $0x14] ss:$8 sps:$4 sm:$0xff]  }
  0x11   : > { %v1411_v9 = vld [vmem:[%s1672_s25 + $0x204] ss:$8 sps:$4 sm:$0xff]   ;;  %999 = vmatprep.subr.bf16.mxu1 %v1409_v8  ;;  %v1414_v11 = vld [vmem:[%s1672_s25 + $0x200] ss:$8 sps:$4 sm:$0xff]   ;;  %v1417_v13 = vld [vmem:[%s1672_s25 + $0x214] ss:$8 sps:$4 sm:$0xff]  }
  0x12   : > { %1085 = vmatprep.subr.bf16.mxu0 %v1411_v9  ;;  %1000 = vmatpush1.bf16.msra.mxu1 %v1413_v10  ;;  %v1419_v14 = vld [vmem:[%s1672_s25 + $0x10] ss:$8 sps:$4 sm:$0xff]   ;;  %v1421_v17 = vld [vmem:[%s1672_s25 + $0x24] ss:$8 sps:$4 sm:$0xff]   ;;  %v1425_v19 = vld [vmem:[%s1672_s25 + $0x20] ss:$8 sps:$4 sm:$0xff]  }
  0x13   : > { %1086 = vmatpush1.bf16.msra.mxu0 %v1414_v11  ;;  %1001 = vmatprep.subr.bf16.mxu1 %v1415_v12  ;;  %v1420_v15 = vld [vmem:[%s1672_s25 + $0x210] ss:$8 sps:$4 sm:$0xff]   ;;  %v1423_v18 = vld [vmem:[%s1672_s25 + $0x224] ss:$8 sps:$4 sm:$0xff]   ;;  %v1426_v20 = vld [vmem:[%s1672_s25 + $0x220] ss:$8 sps:$4 sm:$0xff]  }
  0x14   : > { %1087 = vmatprep.subr.bf16.mxu0 %v1417_v13  ;;  %v1427_v21 = vld [vmem:[%s1672_s25 + $0x34] ss:$8 sps:$4 sm:$0xff]   ;;  %v1431_v23 = vld [vmem:[%s1672_s25 + $0x30] ss:$8 sps:$4 sm:$0xff]   ;;  %v1433_v25 = vld [vmem:[%s1672_s25 + $0x44] ss:$8 sps:$4 sm:$0xff]  }
  0x15   : > { %v1429_v22 = vld [vmem:[%s1672_s25 + $0x234] ss:$8 sps:$4 sm:$0xff]   ;;  %v1432_v24 = vld [vmem:[%s1672_s25 + $0x230] ss:$8 sps:$4 sm:$0xff]   ;;  %v1435_v26 = vld [vmem:[%s1672_s25 + $0x244] ss:$8 sps:$4 sm:$0xff]  }
  0x16   : > { %1002 = vmatpush1.bf16.msra.mxu1 %v1419_v14  ;;  %v1437_v27 = vld [vmem:[%s1672_s25 + $0x40] ss:$8 sps:$4 sm:$0xff]   ;;  %v1439_v29 = vld [vmem:[%s1672_s25 + $0x54] ss:$8 sps:$4 sm:$0xff]   ;;  %v1443_v31 = vld [vmem:[%s1672_s25 + $0x50] ss:$8 sps:$4 sm:$0xff]  }
  0x17   : > { %1088 = vmatpush1.bf16.msra.mxu0 %v1420_v15  ;;  %1003 = vmatprep.subr.bf16.mxu1 %v1421_v17  ;;  %v1438_v28 = vld [vmem:[%s1672_s25 + $0x240] ss:$8 sps:$4 sm:$0xff]   ;;  %v1441_v30 = vld [vmem:[%s1672_s25 + $0x254] ss:$8 sps:$4 sm:$0xff]   ;;  %v1444_v32 = vld [vmem:[%s1672_s25 + $0x250] ss:$8 sps:$4 sm:$0xff]  }
  0x18   : > { %1089 = vmatprep.subr.bf16.mxu0 %v1423_v18  ;;  %v1445_v33 = vld [vmem:[%s1672_s25 + $0x64] ss:$8 sps:$4 sm:$0xff]   ;;  %v1449_v35 = vld [vmem:[%s1672_s25 + $0x60] ss:$8 sps:$4 sm:$0xff]   ;;  %v1451_v37 = vld [vmem:[%s1672_s25 + $0x74] ss:$8 sps:$4 sm:$0xff]  }
  0x19   : > { %v1447_v34 = vld [vmem:[%s1672_s25 + $0x264] ss:$8 sps:$4 sm:$0xff]   ;;  %v1450_v36 = vld [vmem:[%s1672_s25 + $0x260] ss:$8 sps:$4 sm:$0xff]   ;;  %v1453_v38 = vld [vmem:[%s1672_s25 + $0x274] ss:$8 sps:$4 sm:$0xff]  }
  0x1a   : > { %1004 = vmatpush1.bf16.msra.mxu1 %v1425_v19  ;;  %v1455_v39 = vld [vmem:[%s1672_s25 + $0x70] ss:$8 sps:$4 sm:$0xff]   ;;  %v1457_v41 = vld [vmem:[%s1672_s25 + $0x84] ss:$8 sps:$4 sm:$0xff]   ;;  %v1461_v43 = vld [vmem:[%s1672_s25 + $0x80] ss:$8 sps:$4 sm:$0xff]  }
  0x1b   : > { %1090 = vmatpush1.bf16.msra.mxu0 %v1426_v20  ;;  %1005 = vmatprep.subr.bf16.mxu1 %v1427_v21  ;;  %v1456_v40 = vld [vmem:[%s1672_s25 + $0x270] ss:$8 sps:$4 sm:$0xff]   ;;  %v1459_v42 = vld [vmem:[%s1672_s25 + $0x284] ss:$8 sps:$4 sm:$0xff]   ;;  %v1462_v44 = vld [vmem:[%s1672_s25 + $0x280] ss:$8 sps:$4 sm:$0xff]  }
  0x1c   : > { %1091 = vmatprep.subr.bf16.mxu0 %v1429_v22  ;;  %v1463_v45 = vld [vmem:[%s1672_s25 + $0x94] ss:$8 sps:$4 sm:$0xff]   ;;  %v1467_v47 = vld [vmem:[%s1672_s25 + $0x90] ss:$8 sps:$4 sm:$0xff]   ;;  %v1469_v49 = vld [vmem:[%s1672_s25 + $0xa4] ss:$8 sps:$4 sm:$0xff]  }
  0x1d   : > { %v1465_v46 = vld [vmem:[%s1672_s25 + $0x294] ss:$8 sps:$4 sm:$0xff]   ;;  %v1468_v48 = vld [vmem:[%s1672_s25 + $0x290] ss:$8 sps:$4 sm:$0xff]   ;;  %v1471_v50 = vld [vmem:[%s1672_s25 + $0x2a4] ss:$8 sps:$4 sm:$0xff]  }
  0x1e   : > { %1006 = vmatpush1.bf16.msra.mxu1 %v1431_v23  ;;  %v1473_v51 = vld [vmem:[%s1672_s25 + $0xa0] ss:$8 sps:$4 sm:$0xff]   ;;  %v1475_v53 = vld [vmem:[%s1672_s25 + $0xb4] ss:$8 sps:$4 sm:$0xff]   ;;  %v1479_v55 = vld [vmem:[%s1672_s25 + $0xb0] ss:$8 sps:$4 sm:$0xff]  }
  0x1f   : > { %1092 = vmatpush1.bf16.msra.mxu0 %v1432_v24  ;;  %1007 = vmatprep.subr.bf16.mxu1 %v1433_v25  ;;  %v1474_v52 = vld [vmem:[%s1672_s25 + $0x2a0] ss:$8 sps:$4 sm:$0xff]   ;;  %v1477_v54 = vld [vmem:[%s1672_s25 + $0x2b4] ss:$8 sps:$4 sm:$0xff]   ;;  %v1480_v56 = vld [vmem:[%s1672_s25 + $0x2b0] ss:$8 sps:$4 sm:$0xff]  }
  0x20   : > { %1093 = vmatprep.subr.bf16.mxu0 %v1435_v26  ;;  %v1481_v57 = vld [vmem:[%s1672_s25 + $0xc4] ss:$8 sps:$4 sm:$0xff]   ;;  %v1485_v59 = vld [vmem:[%s1672_s25 + $0xc0] ss:$8 sps:$4 sm:$0xff]   ;;  %v1487_v61 = vld [vmem:[%s1672_s25 + $0xd4] ss:$8 sps:$4 sm:$0xff]  }
  0x21   : > { %v1483_v58 = vld [vmem:[%s1672_s25 + $0x2c4] ss:$8 sps:$4 sm:$0xff]   ;;  %v1486_v60 = vld [vmem:[%s1672_s25 + $0x2c0] ss:$8 sps:$4 sm:$0xff]   ;;  %v1489_v62 = vld [vmem:[%s1672_s25 + $0x2d4] ss:$8 sps:$4 sm:$0xff]  }
  0x22   : > { %1008 = vmatpush1.bf16.msra.mxu1 %v1437_v27  ;;  %v1491_v63 = vld [vmem:[%s1672_s25 + $0xd0] ss:$8 sps:$4 sm:$0xff]   ;;  %v1493_v7 = vld [vmem:[%s1672_s25 + $0xe4] ss:$8 sps:$4 sm:$0xff]   ;;  %v1497_v9 = vld [vmem:[%s1672_s25 + $0xe0] ss:$8 sps:$4 sm:$0xff]  }
  0x23   : > { %1094 = vmatpush1.bf16.msra.mxu0 %v1438_v28  ;;  %1009 = vmatprep.subr.bf16.mxu1 %v1439_v29  ;;  %v1492_v4 = vld [vmem:[%s1672_s25 + $0x2d0] ss:$8 sps:$4 sm:$0xff]   ;;  %v1495_v8 = vld [vmem:[%s1672_s25 + $0x2e4] ss:$8 sps:$4 sm:$0xff]   ;;  %v1498_v10 = vld [vmem:[%s1672_s25 + $0x2e0] ss:$8 sps:$4 sm:$0xff]  }
  0x24   : > { %1095 = vmatprep.subr.bf16.mxu0 %v1441_v30  ;;  %v1499_v11 = vld [vmem:[%s1672_s25 + $0xf4] ss:$8 sps:$4 sm:$0xff]   ;;  %v1503_v13 = vld [vmem:[%s1672_s25 + $0xf0] ss:$8 sps:$4 sm:$0xff]   ;;  %v1507_v15 = vld [vmem:[%s1672_s25 + $0x104] ss:$8 sps:$4 sm:$0xff]  }
  0x25   : > { %v1501_v12 = vld [vmem:[%s1672_s25 + $0x2f4] ss:$8 sps:$4 sm:$0xff]   ;;  %v1504_v14 = vld [vmem:[%s1672_s25 + $0x2f0] ss:$8 sps:$4 sm:$0xff]   ;;  %v1510_v16 = vld [vmem:[%s1672_s25 + $0x304] ss:$8 sps:$4 sm:$0xff]  }
  0x26   : > { %1010 = vmatpush1.bf16.msra.mxu1 %v1443_v31  ;;  %v1743_v17 = vld [vmem:[%s1850_s1 + $0x8] sm:$0xff]  ;;  %v1513_v21 = vld [vmem:[%s1672_s25 + $0x114] ss:$8 sps:$4 sm:$0xff]   ;;  %v1511_v24 = vld [vmem:[%s1672_s25 + $0x110] ss:$8 sps:$4 sm:$0xff]  }
  0x27   : > { %1096 = vmatpush1.bf16.msra.mxu0 %v1444_v32  ;;  %1011 = vmatprep.subr.bf16.mxu1 %v1445_v33  ;;  %v1748_v18 = vld [vmem:[%s1850_s1 + $0x28] sm:$0xff]  ;;  %v1516_v22 = vld [vmem:[%s1672_s25 + $0x314] ss:$8 sps:$4 sm:$0xff]   ;;  %v1514_v25 = vld [vmem:[%s1672_s25 + $0x310] ss:$8 sps:$4 sm:$0xff]  }
  0x28   : > { %1097 = vmatprep.subr.bf16.mxu0 %v1447_v34  ;;  %v1505_v19 = vld [vmem:[%s1672_s25 + $0x100] ss:$8 sps:$4 sm:$0xff]   ;;  %v1246_v23 = vcombine.high %v1743_v17, %v1748_v18  ;;  %v1519_v26 = vld [vmem:[%s1672_s25 + $0x124] ss:$8 sps:$4 sm:$0xff]   ;;  %v1525_v2 = vld [vmem:[%s1672_s25 + $0x134] ss:$8 sps:$4 sm:$0xff]  }
  0x29   : > { %v1508_v20 = vld [vmem:[%s1672_s25 + $0x300] ss:$8 sps:$4 sm:$0xff]   ;;  %v1522_v27 = vld [vmem:[%s1672_s25 + $0x324] ss:$8 sps:$4 sm:$0xff]   ;;  %v1523_v5 = vld [vmem:[%s1672_s25 + $0x130] ss:$8 sps:$4 sm:$0xff]  }
  0x2a   : > { %1012 = vmatpush1.bf16.msra.mxu1 %v1449_v35  ;;  %v1517_v0 = vld [vmem:[%s1672_s25 + $0x120] ss:$8 sps:$4 sm:$0xff]   ;;  %v1531_v28 = vld [vmem:[%s1672_s25 + $0x144] ss:$8 sps:$4 sm:$0xff]   ;;  %v1537_v32 = vld [vmem:[%s1672_s25 + $0x154] ss:$8 sps:$4 sm:$0xff]  }
  0x2b   : > { %1098 = vmatpush1.bf16.msra.mxu0 %v1450_v36  ;;  %1013 = vmatprep.subr.bf16.mxu1 %v1451_v37  ;;  %v1520_v1 = vld [vmem:[%s1672_s25 + $0x320] ss:$8 sps:$4 sm:$0xff]   ;;  %v1534_v29 = vld [vmem:[%s1672_s25 + $0x344] ss:$8 sps:$4 sm:$0xff]   ;;  %v1540_v33 = vld [vmem:[%s1672_s25 + $0x354] ss:$8 sps:$4 sm:$0xff]  }
  0x2c   : > { %1099 = vmatprep.subr.bf16.mxu0 %v1453_v38  ;;  %v1529_v30 = vld [vmem:[%s1672_s25 + $0x140] ss:$8 sps:$4 sm:$0xff]   ;;  %v1781_v34 = vld [vmem:[%s1850_s1 + $0x18] sm:$0xff]  ;;  %v1543_v37 = vld [vmem:[%s1672_s25 + $0x164] ss:$8 sps:$4 sm:$0xff]  }
  0x2d   : > { %v1532_v31 = vld [vmem:[%s1672_s25 + $0x340] ss:$8 sps:$4 sm:$0xff]   ;;  %v1535_v35 = vld [vmem:[%s1672_s25 + $0x150] ss:$8 sps:$4 sm:$0xff]   ;;  %v1546_v38 = vld [vmem:[%s1672_s25 + $0x364] ss:$8 sps:$4 sm:$0xff]  }
  0x2e   : > { %1014 = vmatpush1.bf16.msra.mxu1 %v1455_v39  ;;  %v1538_v36 = vld [vmem:[%s1672_s25 + $0x350] ss:$8 sps:$4 sm:$0xff]  }
  0x2f   : > { %1100 = vmatpush1.bf16.msra.mxu0 %v1456_v40  ;;  %1015 = vmatprep.subr.bf16.mxu1 %v1457_v41  ;;  %v1790_v39 = vld [vmem:[%s1850_s1 + $0x38] sm:$0xff]  ;;  %v307_v40 = vld [vmem:[%s1851_s2] sm:$0xff] }
  0x30   : > { %1101 = vmatprep.subr.bf16.mxu0 %v1459_v42  ;;  %v1250_v41 = vcombine.high %v1781_v34, %v1790_v39  ;;  %311 = vperm.xlu0 %1408, %v307_v40   ;;  %v308_v42 = vld [vmem:[%s1851_s2 + $0x8] sm:$0xff] }
  0x32   : > { %1016 = vmatpush1.bf16.msra.mxu1 %v1461_v43  ;;  %v1541_v43 = vld [vmem:[%s1672_s25 + $0x160] ss:$8 sps:$4 sm:$0xff]  }
  0x33   : > { %1102 = vmatpush1.bf16.msra.mxu0 %v1462_v44  ;;  %1017 = vmatprep.subr.bf16.mxu1 %v1463_v45  ;;  %v1544_v44 = vld [vmem:[%s1672_s25 + $0x360] ss:$8 sps:$4 sm:$0xff]   ;;  %v1549_v45 = vld [vmem:[%s1672_s25 + $0x174] ss:$8 sps:$4 sm:$0xff]  }
  0x34   : > { %1103 = vmatprep.subr.bf16.mxu0 %v1465_v46  ;;  %v1552_v46 = vld [vmem:[%s1672_s25 + $0x374] ss:$8 sps:$4 sm:$0xff]   ;;  %316 = vperm.xlu0 %1408, %v308_v42  }
  0x36   : > { %1018 = vmatpush1.bf16.msra.mxu1 %v1467_v47  ;;  %v1547_v47 = vld [vmem:[%s1672_s25 + $0x170] ss:$8 sps:$4 sm:$0xff]  }
  0x37   : > { %1104 = vmatpush1.bf16.msra.mxu0 %v1468_v48  ;;  %1019 = vmatprep.subr.bf16.mxu1 %v1469_v49  ;;  %v1550_v48 = vld [vmem:[%s1672_s25 + $0x370] ss:$8 sps:$4 sm:$0xff]   ;;  %v1555_v49 = vld [vmem:[%s1672_s25 + $0x184] ss:$8 sps:$4 sm:$0xff]  }
  0x38   : > { %1105 = vmatprep.subr.bf16.mxu0 %v1471_v50  ;;  %v1558_v50 = vld [vmem:[%s1672_s25 + $0x384] ss:$8 sps:$4 sm:$0xff]  }
  0x3a   : > { %1020 = vmatpush1.bf16.msra.mxu1 %v1473_v51  ;;  %v1553_v51 = vld [vmem:[%s1672_s25 + $0x180] ss:$8 sps:$4 sm:$0xff]  }
  0x3b   : > { %1106 = vmatpush1.bf16.msra.mxu0 %v1474_v52  ;;  %1021 = vmatprep.subr.bf16.mxu1 %v1475_v53  ;;  %v1556_v52 = vld [vmem:[%s1672_s25 + $0x380] ss:$8 sps:$4 sm:$0xff]   ;;  %v1561_v53 = vld [vmem:[%s1672_s25 + $0x194] ss:$8 sps:$4 sm:$0xff]  }
  0x3c   : > { %1107 = vmatprep.subr.bf16.mxu0 %v1477_v54  ;;  %v1564_v54 = vld [vmem:[%s1672_s25 + $0x394] ss:$8 sps:$4 sm:$0xff]  }
  0x3e   : > { %1022 = vmatpush1.bf16.msra.mxu1 %v1479_v55  ;;  %v1559_v55 = vld [vmem:[%s1672_s25 + $0x190] ss:$8 sps:$4 sm:$0xff]  }
  0x3f   : > { %1108 = vmatpush1.bf16.msra.mxu0 %v1480_v56  ;;  %1023 = vmatprep.subr.bf16.mxu1 %v1481_v57  ;;  %v1562_v56 = vld [vmem:[%s1672_s25 + $0x390] ss:$8 sps:$4 sm:$0xff]   ;;  %v1567_v57 = vld [vmem:[%s1672_s25 + $0x1a4] ss:$8 sps:$4 sm:$0xff]  }
  0x40   : > { %1109 = vmatprep.subr.bf16.mxu0 %v1483_v58  ;;  %v1570_v58 = vld [vmem:[%s1672_s25 + $0x3a4] ss:$8 sps:$4 sm:$0xff]  }
  0x42   : > { %1024 = vmatpush1.bf16.msra.mxu1 %v1485_v59  ;;  %v1565_v59 = vld [vmem:[%s1672_s25 + $0x1a0] ss:$8 sps:$4 sm:$0xff]  }
  0x43   : > { %1110 = vmatpush1.bf16.msra.mxu0 %v1486_v60  ;;  %1025 = vmatprep.subr.bf16.mxu1 %v1487_v61  ;;  %v1568_v60 = vld [vmem:[%s1672_s25 + $0x3a0] ss:$8 sps:$4 sm:$0xff]   ;;  %v1573_v61 = vld [vmem:[%s1672_s25 + $0x1b4] ss:$8 sps:$4 sm:$0xff]  }
  0x44   : > { %1111 = vmatprep.subr.bf16.mxu0 %v1489_v62  ;;  %v1576_v62 = vld [vmem:[%s1672_s25 + $0x3b4] ss:$8 sps:$4 sm:$0xff]  }
  0x46   : > { %1026 = vmatpush1.bf16.msra.mxu1 %v1491_v63  ;;  %v1571_v63 = vld [vmem:[%s1672_s25 + $0x1b0] ss:$8 sps:$4 sm:$0xff]  }
  0x47   : > { %1112 = vmatpush1.bf16.msra.mxu0 %v1492_v4  ;;  %1027 = vmatprep.subr.bf16.mxu1 %v1493_v7  ;;  %v1574_v4 = vld [vmem:[%s1672_s25 + $0x3b0] ss:$8 sps:$4 sm:$0xff]   ;;  %v1579_v7 = vld [vmem:[%s1672_s25 + $0x1c4] ss:$8 sps:$4 sm:$0xff]  }
  0x48   : > { %1113 = vmatprep.subr.bf16.mxu0 %v1495_v8  ;;  %v1582_v8 = vld [vmem:[%s1672_s25 + $0x3c4] ss:$8 sps:$4 sm:$0xff]  }
  0x4a   : > { %1028 = vmatpush1.bf16.msra.mxu1 %v1497_v9  ;;  %v1577_v9 = vld [vmem:[%s1672_s25 + $0x1c0] ss:$8 sps:$4 sm:$0xff]  }
  0x4b   : > { %1114 = vmatpush1.bf16.msra.mxu0 %v1498_v10  ;;  %1029 = vmatprep.subr.bf16.mxu1 %v1499_v11  ;;  %v1580_v10 = vld [vmem:[%s1672_s25 + $0x3c0] ss:$8 sps:$4 sm:$0xff]   ;;  %v1585_v11 = vld [vmem:[%s1672_s25 + $0x1d4] ss:$8 sps:$4 sm:$0xff]  }
  0x4c   : > { %1115 = vmatprep.subr.bf16.mxu0 %v1501_v12  ;;  %v1588_v12 = vld [vmem:[%s1672_s25 + $0x3d4] ss:$8 sps:$4 sm:$0xff]  }
  0x4e   : > { %1030 = vmatpush1.bf16.msra.mxu1 %v1503_v13  ;;  %v1583_v13 = vld [vmem:[%s1672_s25 + $0x1d0] ss:$8 sps:$4 sm:$0xff]  }
  0x4f   : > { %1116 = vmatpush1.bf16.msra.mxu0 %v1504_v14  ;;  %1042 = vmatprep.subr.bf16.mxu1 %v1507_v15  ;;  %v1586_v14 = vld [vmem:[%s1672_s25 + $0x3d0] ss:$8 sps:$4 sm:$0xff]   ;;  %v1591_v15 = vld [vmem:[%s1672_s25 + $0x1e4] ss:$8 sps:$4 sm:$0xff]  }
  0x50   : > { %1128 = vmatprep.subr.bf16.mxu0 %v1510_v16  ;;  %v1594_v16 = vld [vmem:[%s1672_s25 + $0x3e4] ss:$8 sps:$4 sm:$0xff]  }
  0x51   : > { %1032 = vmatmul.mubr.bf16.vlgmr.msra.gmra.mrb[0].mxu1 %v1243_v3  ;;  %v1528_v3 = vld [vmem:[%s1672_s25 + $0x334] ss:$8 sps:$4 sm:$0xff]  }
  0x52   : > { %1118 = vmatmul.mubr.bf16.vlgmr.msra.gmra.mrb[0].mxu0 %v1247_v6  ;;  %1043 = vmatpush1.bf16.msra.mxu1 %v1505_v19  ;;  %v1526_v6 = vld [vmem:[%s1672_s25 + $0x330] ss:$8 sps:$4 sm:$0xff]   ;;  %v1589_v19 = vld [vmem:[%s1672_s25 + $0x1e0] ss:$8 sps:$4 sm:$0xff]  }
  0x53   : > { %1129 = vmatpush1.bf16.msra.mxu0 %v1508_v20  ;;  %1044 = vmatprep.subr.bf16.mxu1 %v1513_v21  ;;  %v1592_v20 = vld [vmem:[%s1672_s25 + $0x3e0] ss:$8 sps:$4 sm:$0xff]   ;;  %v1597_v21 = vld [vmem:[%s1672_s25 + $0x1f4] ss:$8 sps:$4 sm:$0xff]  }
  0x54   : > { %1130 = vmatprep.subr.bf16.mxu0 %v1516_v22  ;;  %1074 = vmatprep.mubr.bf16.mxu1 %v1246_v23  ;;  %v1600_v22 = vld [vmem:[%s1672_s25 + $0x3f4] ss:$8 sps:$4 sm:$0xff]   ;;  %v1595_v23 = vld [vmem:[%s1672_s25 + $0x1f0] ss:$8 sps:$4 sm:$0xff]  }
  0x55   : > { %1160 = vmatprep.mubr.bf16.mxu0 %v1250_v41 }
  0x56   : > { %1045 = vmatpush1.bf16.msra.mxu1 %v1511_v24  ;;  %v1598_v24 = vld [vmem:[%s1672_s25 + $0x3f0] ss:$8 sps:$4 sm:$0xff]  }
  0x57   : > { %1131 = vmatpush1.bf16.msra.mxu0 %v1514_v25  ;;  %1046 = vmatprep.subr.bf16.mxu1 %v1519_v26  ;;  %v1245_v25 = vcombine.low %v1743_v17, %v1748_v18  ;;  %v1249_v26 = vcombine.low %v1781_v34, %v1790_v39 }
  0x58   : > { %1132 = vmatprep.subr.bf16.mxu0 %v1522_v27 }
  0x5a   : > { %1047 = vmatpush1.bf16.msra.mxu1 %v1517_v0 }
  0x5b   : > { %1133 = vmatpush1.bf16.msra.mxu0 %v1520_v1  ;;  %1048 = vmatprep.subr.bf16.mxu1 %v1525_v2 }
  0x5c   : > { %1134 = vmatprep.subr.bf16.mxu0 %v1528_v3 }
  0x5e   : > { %1049 = vmatpush1.bf16.msra.mxu1 %v1523_v5 }
  0x5f   : > { %1135 = vmatpush1.bf16.msra.mxu0 %v1526_v6  ;;  %1050 = vmatprep.subr.bf16.mxu1 %v1531_v28 }
  0x60   : > { %1136 = vmatprep.subr.bf16.mxu0 %v1534_v29 }
  0x62   : > { %1051 = vmatpush1.bf16.msra.mxu1 %v1529_v30 }
  0x63   : > { %1137 = vmatpush1.bf16.msra.mxu0 %v1532_v31  ;;  %1052 = vmatprep.subr.bf16.mxu1 %v1537_v32 }
  0x64   : > { %1138 = vmatprep.subr.bf16.mxu0 %v1540_v33 }
  0x66   : > { %1053 = vmatpush1.bf16.msra.mxu1 %v1535_v35 }
  0x67   : > { %1139 = vmatpush1.bf16.msra.mxu0 %v1538_v36  ;;  %1054 = vmatprep.subr.bf16.mxu1 %v1543_v37 }
  0x68   : > { %1140 = vmatprep.subr.bf16.mxu0 %v1546_v38 }
  0x6a   : > { %1055 = vmatpush1.bf16.msra.mxu1 %v1541_v43 }
  0x6b   : > { %1141 = vmatpush1.bf16.msra.mxu0 %v1544_v44  ;;  %1056 = vmatprep.subr.bf16.mxu1 %v1549_v45 }
  0x6c   : > { %1142 = vmatprep.subr.bf16.mxu0 %v1552_v46 }
  0x6e   : > { %1057 = vmatpush1.bf16.msra.mxu1 %v1547_v47 }
  0x6f   : > { %1143 = vmatpush1.bf16.msra.mxu0 %v1550_v48  ;;  %1058 = vmatprep.subr.bf16.mxu1 %v1555_v49 }
  0x70   : > { %1144 = vmatprep.subr.bf16.mxu0 %v1558_v50 }
  0x72   : > { %1059 = vmatpush1.bf16.msra.mxu1 %v1553_v51 }
  0x73   : > { %1145 = vmatpush1.bf16.msra.mxu0 %v1556_v52  ;;  %1060 = vmatprep.subr.bf16.mxu1 %v1561_v53 }
  0x74   : > { %1146 = vmatprep.subr.bf16.mxu0 %v1564_v54 }
  0x76   : > { %1061 = vmatpush1.bf16.msra.mxu1 %v1559_v55 }
  0x77   : > { %1147 = vmatpush1.bf16.msra.mxu0 %v1562_v56  ;;  %1062 = vmatprep.subr.bf16.mxu1 %v1567_v57 }
  0x78   : > { %1148 = vmatprep.subr.bf16.mxu0 %v1570_v58 }
  0x7a   : > { %1063 = vmatpush1.bf16.msra.mxu1 %v1565_v59 }
  0x7b   : > { %1149 = vmatpush1.bf16.msra.mxu0 %v1568_v60  ;;  %1064 = vmatprep.subr.bf16.mxu1 %v1573_v61 }
  0x7c   : > { %1150 = vmatprep.subr.bf16.mxu0 %v1576_v62 }
  0x7e   : > { %1065 = vmatpush1.bf16.msra.mxu1 %v1571_v63 }
  0x7f   : > { %1151 = vmatpush1.bf16.msra.mxu0 %v1574_v4  ;;  %1066 = vmatprep.subr.bf16.mxu1 %v1579_v7 }
  0x80   : > { %1152 = vmatprep.subr.bf16.mxu0 %v1582_v8 }
  0x82   : > { %1067 = vmatpush1.bf16.msra.mxu1 %v1577_v9 }
  0x83   : > { %1153 = vmatpush1.bf16.msra.mxu0 %v1580_v10  ;;  %1068 = vmatprep.subr.bf16.mxu1 %v1585_v11 }
  0x84   : > { %1154 = vmatprep.subr.bf16.mxu0 %v1588_v12 }
  0x86   : > { %1069 = vmatpush1.bf16.msra.mxu1 %v1583_v13 }
  0x87   : > { %1155 = vmatpush1.bf16.msra.mxu0 %v1586_v14  ;;  %1070 = vmatprep.subr.bf16.mxu1 %v1591_v15 }
  0x88   : > { %1156 = vmatprep.subr.bf16.mxu0 %v1594_v16 }
  0x8a   : > { %1071 = vmatpush1.bf16.msra.mxu1 %v1589_v19 }
  0x8b   : > { %1157 = vmatpush1.bf16.msra.mxu0 %v1592_v20  ;;  %1072 = vmatprep.subr.bf16.mxu1 %v1597_v21 }
  0x8c   : > { %1158 = vmatprep.subr.bf16.mxu0 %v1600_v22 }
  0x8e   : > { %1073 = vmatpush1.bf16.msra.mxu1 %v1595_v23 }
  0x8f   : > { %1159 = vmatpush1.bf16.msra.mxu0 %v1598_v24 }
  0x91   : > { %1075 = vmatmul.mubr.bf16.vlgmr.msra.gmra.mrb[0].mxu1 %v1245_v25 }
  0x92   : > { %1161 = vmatmul.mubr.bf16.vlgmr.msra.gmra.mrb[0].mxu0 %v1249_v26 }
  0xaf   : > { %v312_v27 = vpop.permute.xlu0 %311 }
  0xb3   : > { %v317_v0 = vpop.permute.xlu0 %316 }
 0x164   : > { %v1076_v1 = vpop.f32.mrb[0].mxu1 }
 0x165   : > { %v1162_v2 = vpop.f32.mrb[0].mxu0  ;;  %v1383_v3 = vadd.f32 %v1076_v1, %v312_v27  ;;  %v1078_v5 = vpop.f32.mrb[1].mxu1 }
 0x166   : > { %v1164_v6 = vpop.f32.mrb[1].mxu0  ;;  %v1385_v28 = vadd.f32 %v1078_v5, %v312_v27  ;;  %v1080_v29 = vpop.f32.mrb[2].mxu1 }
 0x167   : > { %v1166_v30 = vpop.f32.mrb[2].mxu0  ;;  %v1384_v31 = vadd.f32 %v1383_v3, %v1162_v2  ;;  %v1387_v17 = vadd.f32 %v1080_v29, %v317_v0  ;;  %v1082_v18 = vpop.f32.mrb[3].mxu1 }
 0x168   : > { %v1168_v32 = vpop.f32.mrb[3].mxu0  ;;  %v1386_v33 = vadd.f32 %v1385_v28, %v1164_v6  ;;  %v1389_v34 = vadd.f32 %v1082_v18, %v317_v0 }
 0x169   : > { %v1171_v35 = vmax.f32 %v1384_v31, 0.0  ;;  %v1388_v36 = vadd.f32 %v1387_v17, %v1166_v30 }
 0x16a   : > { %v1172_v37 = vmax.f32 %v1386_v33, 0.0  ;;  %v1390_v38 = vadd.f32 %v1389_v34, %v1168_v32 }
 0x16b   : > { %v1173_v39 = vmax.f32 %v1388_v36, 0.0 }
 0x16c   : > { %v1175_v40 = vmax.f32 %v1171_v35, %v1172_v37  ;;  %v1174_v41 = vmax.f32 %v1390_v38, 0.0 }
 0x16e   : > { %1177 = vst [vmem:[%s170_s16] sm:$0xff] %v1175_v40  ;;  %v1176_v42 = vmax.f32 %v1173_v39, %v1174_v41 }
 0x170   : > { %1178 = vst [vmem:[%s170_s16 + $0x8] sm:$0xff] %v1176_v42 }
 0x171 PF: > { %s13_s12 = sadd.s32 1, %s1607_s12  }
 0x172   : > { %p10_p4 = scmp.ge.s32.totalorder %s13_s12, 4  }
 0x174   :  { %12 = sbr.rel (!%p10_p4) target bundleno = 1 (0x1), region = 62 }

// kernel: cnn_model_forward.9
= control target key start
LH: loop header
LB: loop body
LE: loop exit
PB: predicated region body
PF: predicated region fallthrough
CT: control target
= control target key end

     0   :  { %12 = vsyncpa [#allocation3], 0  ;;  %s18647_s0 = inlined_call_operand.vmem [shape: f32[2,2048], index: 0, kind: input, shape index: {}]   ;;  %s18648_s1 = inlined_call_operand.vmem [shape: bf16[1024,2048], index: 1, kind: input, shape index: {}]   ;;  %s18649_s2 = inlined_call_operand.vmem [shape: f32[1,1024], index: 2, kind: input, shape index: {}]   ;;  %s18650_s3 = inlined_call_operand.vmem [shape: bf16[512,1024], index: 3, kind: input, shape index: {}]   ;;  %s18651_s4 = inlined_call_operand.vmem [shape: f32[1,512], index: 4, kind: input, shape index: {}]   ;;  %s18652_s5 = inlined_call_operand.vmem [shape: bf16[2048,512], index: 5, kind: input, shape index: {}]   ;;  %s18653_s6 = inlined_call_operand.vmem [shape: f32[1,2048], index: 6, kind: input, shape index: {}]   ;;  %s18654_s7 = inlined_call_operand.hbm [shape: f32[2,2048], index: 7, kind: output, shape index: {}]  }
   0x1   :  { %14 = vsyncpa [#allocation3 + $0x1], 0  ;;  %s14112_s24 = smov 0   ;;  %s14114_s25 = smov 0  }
   0x2   :  { %s14116_s26 = smov 0   ;;  %s14118_s27 = smov 0  }
   0x3 LB: > { %s14133_s28 = sadd.s32 4294967295, %s14068_s27   ;;  %s11853_s29 = sadd.s32 4294967294, %s14068_s27   ;;  %s14068_s27 = sphi %s14118_s27, %s18660_s27   ;;  %s14064_s26 = sphi %s14116_s26, %s18659_s26   ;;  %s14060_s25 = sphi %s14114_s25, %s18658_s25   ;;  %s14056_s24 = sphi %s14112_s24, %s18657_s24  }
   0x4   : > { %s14137_s30 = sadd.s32 1, %s14068_s27   ;;  %s184_s8 = sadd.s32 1, %s14064_s26 }
   0x5   : > { %s181_s9 = ssub.s32 %s14068_s27, %s14137_s30  ;;  %p194_p0 = scmp.ne.s32.totalorder %s14064_s26, %s14060_s25 }
   0x6   : > { %p182_p1 = scmp.eq.s32.totalorder %s181_s9, 0  ;;  %p195_p2 = scmp.eq.s32.totalorder %s14133_s28, 1 }
   0x7   : > { %p200_p3 = scmp.ne.s32.totalorder %s14060_s25, %s14056_s24  ;;  %p201_p4 = scmp.eq.s32.totalorder %s11853_s29, 1 }
   0x8   : > { %s14148_s10 = scalar_select %p182_p1, %s14064_s26, %s184_s8  }
   0x9   : > { %p14150_p5 = por %p195_p2, %p194_p0  ;;  %p14154_p6 = por %p201_p4, %p200_p3 }
   0xa   : > { %p11856_p7 = scmp.ge.s32.totalorder %s14068_s27, 1  ;;  %p252_p8 = scmp.lt.s32.totalorder %s14068_s27, 3 }
   0xc   : > { %p253_p9 = pnand %p11856_p7, %p252_p8 }
   0xd   : > { %v410_v0 = vld [vmem:[%s18648_s1] sm:$0xff] (!%p253_p9)  ;;  %v14070_v22 = vmov (!%p253_p9), 1983009808   ;;  %v314_v24 = vlaneseq (!%p253_p9)  ;;  %s11858_s23 = sshll.u32 (!%p253_p9), %s14133_s28, 7  ;;  %s11861_s8 = sshll.u32 (!%p253_p9), %s14133_s28, 3 }
   0xe   : > { %256 = sbr.rel (%p253_p9) target bundleno = 3417 (0xd59), region = 48  ;;  %v418_v1 = vld [vmem:[%s18648_s1 + $0x40] sm:$0xff] (!%p253_p9)  ;;  %v312_v23 = vunpack.c.l.s4 (!%p253_p9), %v14070_v22  ;;  %p290_p10 = scmp.lt.s32.totalorder (!%p253_p9), %s11858_s23, 255 }
   0xf   : > { %v666_v2 = vld [vmem:[%s18648_s1 + $0x800] sm:$0xff] (!%p253_p9)  ;;  %v11863_v3 = vcombine.high (!%p253_p9), %v410_v0, %v418_v1  ;;  %v11862_v5 = vcombine.low (!%p253_p9), %v410_v0, %v418_v1  ;;  %v14202_v28 = vshrl.u32 (!%p253_p9), %v314_v24, 7  ;;  %p297_p11 = scmp.lt.s32.totalorder (!%p253_p9), %s11861_s8, 15  ;;  %s286_s14 = sand.u32 (!%p253_p9), 1, %s14060_s25  }
  0x10   : > { %v674_v4 = vld [vmem:[%s18648_s1 + $0x840] sm:$0xff] (!%p253_p9)  ;;  %v313_v27 = vunpack.c.0.s8 (!%p253_p9), %v312_v23  ;;  %s11857_s15 = sshll.u32 (!%p253_p9), %s286_s14, 4  ;;  %s11771_s22 = scalar_lea.sflag (!%p253_p9), [#allocation3], %s286_s14 }
  0x11   : > { %v426_v6 = vld [vmem:[%s18648_s1 + $0x80] sm:$0xff] (!%p253_p9)  ;;  %v12119_v8 = vcombine.high (!%p253_p9), %v666_v2, %v674_v4  ;;  %v12118_v9 = vcombine.low (!%p253_p9), %v666_v2, %v674_v4  ;;  %6596 = vmatprep.subr.bf16.mxu0 (!%p253_p9), %v11863_v3  ;;  %s18565_s16 = scalar_lea.vmem (!%p253_p9), [#allocation2], %s11857_s15 }
  0x12   : > { %v434_v7 = vld [vmem:[%s18648_s1 + $0xc0] sm:$0xff] (!%p253_p9)  ;;  %6597 = vmatpush1.bf16.xpose.msra.mxu0 (!%p253_p9), %v11862_v5  ;;  %v14211_v35 = vsub.s32 (!%p253_p9), %v313_v27, %v14202_v28  ;;  %s11785_s17 = sshll.u32 (!%p253_p9), %s18565_s16, 4  ;;  %s18604_s17 = int_to_ptr.vmem [resolvable:$true] %s11785_s17 }
  0x13   : > { %v11879_v10 = vcombine.high (!%p253_p9), %v426_v6, %v434_v7  ;;  %v682_v11 = vld [vmem:[%s18648_s1 + $0x880] sm:$0xff] (!%p253_p9)  ;;  %6924 = vmatprep.subr.bf16.mxu1 (!%p253_p9), %v12119_v8  ;;  %v11878_v18 = vcombine.low (!%p253_p9), %v426_v6, %v434_v7  ;;  %s14006_s29 = scalar_lea.vmem (!%p253_p9), %s18604_s17, 256 }
  0x14   : > { %v690_v12 = vld [vmem:[%s18648_s1 + $0x8c0] sm:$0xff] (!%p253_p9)  ;;  %6925 = vmatpush1.bf16.xpose.msra.mxu1 (!%p253_p9), %v12118_v9  ;;  %p14007_p12 = scmp.ne.s32.totalorder (!%p253_p9), %s18604_s17, %s14006_s29 }
  0x15   : > { %v12135_v13 = vcombine.high %v682_v11, %v690_v12  ;;  %6598 = vmatprep.subr.bf16.mxu0 %v11879_v10  ;;  %v442_v14 = vld [vmem:[%s18648_s1 + $0x100] sm:$0xff]  ;;  %v12134_v19 = vcombine.low %v682_v11, %v690_v12  ;;  %s18662_s23 = smov (!%p290_p10, %s11858_s23), 255  ;;  %s18664_s8 = smov (!%p297_p11, %s11861_s8), 15 }
  0x16   : > { %v450_v15 = vld [vmem:[%s18648_s1 + $0x140] sm:$0xff]  ;;  %s13403_s18 = sshll.u32 %s18662_s23, 4  ;;  %s299_s23 = scalar_lea.vmem %s18653_s6, %s18664_s8 }
  0x17   : > { %6926 = vmatprep.subr.bf16.mxu1 %v12135_v13  ;;  %v698_v16 = vld [vmem:[%s18648_s1 + $0x900] sm:$0xff]  ;;  %v11895_v20 = vcombine.high %v442_v14, %v450_v15  ;;  %v11894_v31 = vcombine.low %v442_v14, %v450_v15  ;;  %s18102_s21 = scalar_lea.vmem %s18652_s5, %s13403_s18  ;;  %p14008_p13 = pnand %p14007_p12, %p14150_p5 }
  0x18   : > { %v706_v17 = vld [vmem:[%s18648_s1 + $0x940] sm:$0xff] }
  0x19   : > { %v12151_v21 = vcombine.high %v698_v16, %v706_v17  ;;  %v458_v25 = vld [vmem:[%s18648_s1 + $0x180] sm:$0xff]  ;;  %v12150_v32 = vcombine.low %v698_v16, %v706_v17  ;;  %p14009_p0 = pneg %p14008_p13 }
  0x1a   : > { %6599 = vmatpush1.bf16.xpose.msra.mxu0 %v11878_v18  ;;  %v466_v26 = vld [vmem:[%s18648_s1 + $0x1c0] sm:$0xff] }
  0x1b   : > { %6600 = vmatprep.subr.bf16.mxu0 %v11895_v20  ;;  %v714_v29 = vld [vmem:[%s18648_s1 + $0x980] sm:$0xff]  ;;  %v11911_v33 = vcombine.high %v458_v25, %v466_v26  ;;  %v11910_v42 = vcombine.low %v458_v25, %v466_v26 }
  0x1c   : > { %6927 = vmatpush1.bf16.xpose.msra.mxu1 %v12134_v19  ;;  %v722_v30 = vld [vmem:[%s18648_s1 + $0x9c0] sm:$0xff] }
  0x1d   : > { %6928 = vmatprep.subr.bf16.mxu1 %v12151_v21  ;;  %v12167_v34 = vcombine.high %v714_v29, %v722_v30  ;;  %v14216_v36 = vld [vmem:[%s18647_s0] sm:$0xff]  ;;  %v12166_v44 = vcombine.low %v714_v29, %v722_v30 }
  0x1e   : > { %v474_v37 = vld [vmem:[%s18648_s1 + $0x200] sm:$0xff]  ;;  %v14226_v39 = vrot.slane %v14216_v36, %v14211_v35 }
  0x1f   : > { %v482_v38 = vld [vmem:[%s18648_s1 + $0x240] sm:$0xff] }
  0x20   : > { %v730_v40 = vld [vmem:[%s18648_s1 + $0xa00] sm:$0xff]  ;;  %v325_v43 = vcombine.high %v14226_v39, %v14226_v39  ;;  %v11927_v45 = vcombine.high %v474_v37, %v482_v38  ;;  %v11926_v52 = vcombine.low %v474_v37, %v482_v38 }
  0x21   : > { %v738_v41 = vld [vmem:[%s18648_s1 + $0xa40] sm:$0xff] }
  0x22   : > { %6601 = vmatpush1.bf16.xpose.msra.mxu0 %v11894_v31  ;;  %v12183_v46 = vcombine.high %v730_v40, %v738_v41  ;;  %v14236_v47 = vpack.c.bf16 %v325_v43, %v325_v43  ;;  %v490_v48 = vld [vmem:[%s18648_s1 + $0x280] sm:$0xff]  ;;  %v12182_v53 = vcombine.low %v730_v40, %v738_v41 }
  0x23   : > { %6602 = vmatprep.subr.bf16.mxu0 %v11911_v33  ;;  %v498_v49 = vld [vmem:[%s18648_s1 + $0x2c0] sm:$0xff] }
  0x24   : > { %6929 = vmatpush1.bf16.xpose.msra.mxu1 %v12150_v32  ;;  %6628 = vmatprep.mubr.bf16.mxu0 %v14236_v47  ;;  %v746_v50 = vld [vmem:[%s18648_s1 + $0xa80] sm:$0xff]  ;;  %v11943_v54 = vcombine.high %v490_v48, %v498_v49  ;;  %v11942_v60 = vcombine.low %v490_v48, %v498_v49 }
  0x25   : > { %6930 = vmatprep.subr.bf16.mxu1 %v12167_v34  ;;  %6956 = vmatprep.mubr.bf16.mxu1 %v14236_v47  ;;  %v754_v51 = vld [vmem:[%s18648_s1 + $0xac0] sm:$0xff] }
  0x26   : > { %v12199_v55 = vcombine.high %v746_v50, %v754_v51  ;;  %v506_v56 = vld [vmem:[%s18648_s1 + $0x300] sm:$0xff]  ;;  %v12198_v61 = vcombine.low %v746_v50, %v754_v51 }
  0x27   : > { %v514_v57 = vld [vmem:[%s18648_s1 + $0x340] sm:$0xff] }
  0x28   : > { %v762_v58 = vld [vmem:[%s18648_s1 + $0xb00] sm:$0xff]  ;;  %v11959_v62 = vcombine.high %v506_v56, %v514_v57  ;;  %v11958_v4 = vcombine.low %v506_v56, %v514_v57 }
  0x29   : > { %v770_v59 = vld [vmem:[%s18648_s1 + $0xb40] sm:$0xff] }
  0x2a   : > { %6603 = vmatpush1.bf16.xpose.msra.mxu0 %v11910_v42  ;;  %v12215_v63 = vcombine.high %v762_v58, %v770_v59  ;;  %v522_v0 = vld [vmem:[%s18648_s1 + $0x380] sm:$0xff]  ;;  %v12214_v5 = vcombine.low %v762_v58, %v770_v59 }
  0x2b   : > { %6604 = vmatprep.subr.bf16.mxu0 %v11927_v45  ;;  %v530_v1 = vld [vmem:[%s18648_s1 + $0x3c0] sm:$0xff] }
  0x2c   : > { %6931 = vmatpush1.bf16.xpose.msra.mxu1 %v12166_v44  ;;  %v778_v2 = vld [vmem:[%s18648_s1 + $0xb80] sm:$0xff]  ;;  %v11975_v6 = vcombine.high %v522_v0, %v530_v1  ;;  %v11974_v12 = vcombine.low %v522_v0, %v530_v1 }
  0x2d   : > { %6932 = vmatprep.subr.bf16.mxu1 %v12183_v46  ;;  %v786_v3 = vld [vmem:[%s18648_s1 + $0xbc0] sm:$0xff] }
  0x2e   : > { %v12231_v7 = vcombine.high %v778_v2, %v786_v3  ;;  %v538_v8 = vld [vmem:[%s18648_s1 + $0x400] sm:$0xff]  ;;  %v12230_v13 = vcombine.low %v778_v2, %v786_v3 }
  0x2f   : > { %v546_v9 = vld [vmem:[%s18648_s1 + $0x440] sm:$0xff] }
  0x30   : > { %v794_v10 = vld [vmem:[%s18648_s1 + $0xc00] sm:$0xff]  ;;  %v11991_v14 = vcombine.high %v538_v8, %v546_v9  ;;  %v11990_v20 = vcombine.low %v538_v8, %v546_v9 }
  0x31   : > { %v802_v11 = vld [vmem:[%s18648_s1 + $0xc40] sm:$0xff] }
  0x32   : > { %6605 = vmatpush1.bf16.xpose.msra.mxu0 %v11926_v52  ;;  %v12247_v15 = vcombine.high %v794_v10, %v802_v11  ;;  %v554_v16 = vld [vmem:[%s18648_s1 + $0x480] sm:$0xff]  ;;  %v12246_v21 = vcombine.low %v794_v10, %v802_v11 }
  0x33   : > { %6606 = vmatprep.subr.bf16.mxu0 %v11943_v54  ;;  %v562_v17 = vld [vmem:[%s18648_s1 + $0x4c0] sm:$0xff] }
  0x34   : > { %6933 = vmatpush1.bf16.xpose.msra.mxu1 %v12182_v53  ;;  %v810_v18 = vld [vmem:[%s18648_s1 + $0xc80] sm:$0xff]  ;;  %v12007_v22 = vcombine.high %v554_v16, %v562_v17  ;;  %v12006_v29 = vcombine.low %v554_v16, %v562_v17  ;;  %v675_v16 = vld [vmem:[%s18648_s1 + $0x848] sm:$0xff] }
  0x35   : > { %6934 = vmatprep.subr.bf16.mxu1 %v12199_v55  ;;  %v818_v19 = vld [vmem:[%s18648_s1 + $0xcc0] sm:$0xff] }
  0x36   : > { %v12263_v23 = vcombine.high %v810_v18, %v818_v19  ;;  %v570_v24 = vld [vmem:[%s18648_s1 + $0x500] sm:$0xff]  ;;  %v12262_v30 = vcombine.low %v810_v18, %v818_v19 }
  0x37   : > { %v578_v25 = vld [vmem:[%s18648_s1 + $0x540] sm:$0xff] }
  0x38   : > { %v826_v26 = vld [vmem:[%s18648_s1 + $0xd00] sm:$0xff]  ;;  %v12023_v31 = vcombine.high %v570_v24, %v578_v25  ;;  %v12022_v40 = vcombine.low %v570_v24, %v578_v25  ;;  %v14397_v25 = vpack.c.bf16 %v14226_v39, %v14226_v39  ;;  %v443_v39 = vld [vmem:[%s18648_s1 + $0x108] sm:$0xff] }
  0x39   : > { %v834_v27 = vld [vmem:[%s18648_s1 + $0xd40] sm:$0xff] }
  0x3a   : > { %6607 = vmatpush1.bf16.xpose.msra.mxu0 %v11942_v60  ;;  %v12279_v32 = vcombine.high %v826_v26, %v834_v27  ;;  %v586_v33 = vld [vmem:[%s18648_s1 + $0x580] sm:$0xff]  ;;  %v12278_v41 = vcombine.low %v826_v26, %v834_v27  ;;  %v691_v26 = vld [vmem:[%s18648_s1 + $0x8c8] sm:$0xff] }
  0x3b   : > { %6608 = vmatprep.subr.bf16.mxu0 %v11959_v62  ;;  %v594_v34 = vld [vmem:[%s18648_s1 + $0x5c0] sm:$0xff] }
  0x3c   : > { %6935 = vmatpush1.bf16.xpose.msra.mxu1 %v12198_v61  ;;  %v842_v37 = vld [vmem:[%s18648_s1 + $0xd80] sm:$0xff]  ;;  %v12039_v42 = vcombine.high %v586_v33, %v594_v34  ;;  %v12038_v49 = vcombine.low %v586_v33, %v594_v34  ;;  %v451_v34 = vld [vmem:[%s18648_s1 + $0x148] sm:$0xff] }
  0x3d   : > { %6936 = vmatprep.subr.bf16.mxu1 %v12215_v63  ;;  %v850_v38 = vld [vmem:[%s18648_s1 + $0xdc0] sm:$0xff] }
  0x3e   : > { %v12295_v43 = vcombine.high %v842_v37, %v850_v38  ;;  %v602_v44 = vld [vmem:[%s18648_s1 + $0x600] sm:$0xff]  ;;  %v12294_v50 = vcombine.low %v842_v37, %v850_v38  ;;  %v699_v37 = vld [vmem:[%s18648_s1 + $0x908] sm:$0xff] }
  0x3f   : > { %v610_v45 = vld [vmem:[%s18648_s1 + $0x640] sm:$0xff]  ;;  %v707_v38 = vld [vmem:[%s18648_s1 + $0x948] sm:$0xff] }
  0x40   : > { %v858_v46 = vld [vmem:[%s18648_s1 + $0xe00] sm:$0xff]  ;;  %v12055_v51 = vcombine.high %v602_v44, %v610_v45  ;;  %v12054_v57 = vcombine.low %v602_v44, %v610_v45  ;;  %v459_v44 = vld [vmem:[%s18648_s1 + $0x188] sm:$0xff] }
  0x41   : > { %v866_v48 = vld [vmem:[%s18648_s1 + $0xe40] sm:$0xff]  ;;  %v467_v45 = vld [vmem:[%s18648_s1 + $0x1c8] sm:$0xff] }
  0x42   : > { %6609 = vmatpush1.bf16.xpose.msra.mxu0 %v11958_v4  ;;  %v12311_v52 = vcombine.high %v858_v46, %v866_v48  ;;  %v618_v53 = vld [vmem:[%s18648_s1 + $0x680] sm:$0xff]  ;;  %v12310_v58 = vcombine.low %v858_v46, %v866_v48  ;;  %v715_v46 = vld [vmem:[%s18648_s1 + $0x988] sm:$0xff] }
  0x43   : > { %6610 = vmatprep.subr.bf16.mxu0 %v11975_v6  ;;  %v626_v54 = vld [vmem:[%s18648_s1 + $0x6c0] sm:$0xff]  ;;  %v723_v48 = vld [vmem:[%s18648_s1 + $0x9c8] sm:$0xff] }
  0x44   : > { %6937 = vmatpush1.bf16.xpose.msra.mxu1 %v12214_v5  ;;  %v874_v55 = vld [vmem:[%s18648_s1 + $0xe80] sm:$0xff]  ;;  %v12071_v59 = vcombine.high %v618_v53, %v626_v54  ;;  %v12070_v1 = vcombine.low %v618_v53, %v626_v54  ;;  %v475_v53 = vld [vmem:[%s18648_s1 + $0x208] sm:$0xff] }
  0x45   : > { %6938 = vmatprep.subr.bf16.mxu1 %v12231_v7  ;;  %v882_v56 = vld [vmem:[%s18648_s1 + $0xec0] sm:$0xff]  ;;  %v483_v54 = vld [vmem:[%s18648_s1 + $0x248] sm:$0xff] }
  0x46   : > { %v12327_v60 = vcombine.high %v874_v55, %v882_v56  ;;  %v634_v61 = vld [vmem:[%s18648_s1 + $0x700] sm:$0xff]  ;;  %v12326_v2 = vcombine.low %v874_v55, %v882_v56  ;;  %v731_v55 = vld [vmem:[%s18648_s1 + $0xa08] sm:$0xff] }
  0x47   : > { %v642_v62 = vld [vmem:[%s18648_s1 + $0x740] sm:$0xff]  ;;  %v739_v56 = vld [vmem:[%s18648_s1 + $0xa48] sm:$0xff] }
  0x48   : > { %v890_v63 = vld [vmem:[%s18648_s1 + $0xf00] sm:$0xff]  ;;  %v12087_v3 = vcombine.high %v634_v61, %v642_v62  ;;  %v12086_v9 = vcombine.low %v634_v61, %v642_v62  ;;  %v491_v61 = vld [vmem:[%s18648_s1 + $0x288] sm:$0xff] }
  0x49   : > { %v898_v0 = vld [vmem:[%s18648_s1 + $0xf40] sm:$0xff]  ;;  %v499_v62 = vld [vmem:[%s18648_s1 + $0x2c8] sm:$0xff] }
  0x4a   : > { %6611 = vmatpush1.bf16.xpose.msra.mxu0 %v11974_v12  ;;  %v12343_v4 = vcombine.high %v890_v63, %v898_v0  ;;  %v650_v5 = vld [vmem:[%s18648_s1 + $0x780] sm:$0xff]  ;;  %v12342_v10 = vcombine.low %v890_v63, %v898_v0  ;;  %v747_v63 = vld [vmem:[%s18648_s1 + $0xa88] sm:$0xff] }
  0x4b   : > { %6612 = vmatprep.subr.bf16.mxu0 %v11991_v14  ;;  %v658_v6 = vld [vmem:[%s18648_s1 + $0x7c0] sm:$0xff]  ;;  %v419_v14 = vld [vmem:[%s18648_s1 + $0x48] sm:$0xff] }
  0x4c   : > { %6939 = vmatpush1.bf16.xpose.msra.mxu1 %v12230_v13  ;;  %v906_v7 = vld [vmem:[%s18648_s1 + $0xf80] sm:$0xff]  ;;  %v12103_v11 = vcombine.high %v650_v5, %v658_v6  ;;  %v411_v13 = vld [vmem:[%s18648_s1 + $0x8] sm:$0xff]  ;;  %v12102_v17 = vcombine.low %v650_v5, %v658_v6 }
  0x4d   : > { %6940 = vmatprep.subr.bf16.mxu1 %v12247_v15  ;;  %v914_v8 = vld [vmem:[%s18648_s1 + $0xfc0] sm:$0xff]  ;;  %v667_v15 = vld [vmem:[%s18648_s1 + $0x808] sm:$0xff]  ;;  %v11865_v19 = vcombine.high %v411_v13, %v419_v14  ;;  %v11864_v27 = vcombine.low %v411_v13, %v419_v14 }
  0x4e   : > { %v12359_v12 = vcombine.high %v906_v7, %v914_v8  ;;  %v12358_v18 = vcombine.low %v906_v7, %v914_v8  ;;  %v755_v0 = vld [vmem:[%s18648_s1 + $0xac8] sm:$0xff] }
  0x4f   : > { %v507_v5 = vld [vmem:[%s18648_s1 + $0x308] sm:$0xff] }
  0x50   : > { %v515_v6 = vld [vmem:[%s18648_s1 + $0x348] sm:$0xff] }
  0x51   : > { %v763_v7 = vld [vmem:[%s18648_s1 + $0xb08] sm:$0xff] }
  0x52   : > { %6613 = vmatpush1.bf16.xpose.msra.mxu0 %v11990_v20  ;;  %v12121_v20 = vcombine.high %v667_v15, %v675_v16  ;;  %v771_v8 = vld [vmem:[%s18648_s1 + $0xb48] sm:$0xff] }
  0x53   : > { %6614 = vmatprep.subr.bf16.mxu0 %v12007_v22  ;;  %v427_v22 = vld [vmem:[%s18648_s1 + $0x88] sm:$0xff] }
  0x54   : > { %6941 = vmatpush1.bf16.xpose.msra.mxu1 %v12246_v21  ;;  %v310_v21 = vcombine.high %v14216_v36, %v14216_v36  ;;  %v683_v36 = vld [vmem:[%s18648_s1 + $0x888] sm:$0xff] }
  0x55   : > { %6942 = vmatprep.subr.bf16.mxu1 %v12263_v23  ;;  %v435_v23 = vld [vmem:[%s18648_s1 + $0xc8] sm:$0xff] }
  0x56   : > { %v14393_v24 = vrot.slane %v310_v21, %v14211_v35  ;;  %v523_v13 = vld [vmem:[%s18648_s1 + $0x388] sm:$0xff] }
  0x57   : > { %v531_v14 = vld [vmem:[%s18648_s1 + $0x3c8] sm:$0xff] }
  0x58   : > { %v539_v21 = vld [vmem:[%s18648_s1 + $0x408] sm:$0xff] }
  0x5a   : > { %6615 = vmatpush1.bf16.xpose.msra.mxu0 %v12006_v29  ;;  %v326_v29 = vcombine.high %v14393_v24, %v14393_v24 }
  0x5b   : > { %6616 = vmatprep.subr.bf16.mxu0 %v12023_v31  ;;  %v11881_v31 = vcombine.high %v427_v22, %v435_v23 }
  0x5c   : > { %6943 = vmatpush1.bf16.xpose.msra.mxu1 %v12262_v30  ;;  %v12120_v30 = vcombine.low %v667_v15, %v675_v16  ;;  %v14407_v33 = vpack.c.bf16 %v326_v29, %v326_v29  ;;  %v779_v15 = vld [vmem:[%s18648_s1 + $0xb88] sm:$0xff] }
  0x5d   : > { %6944 = vmatprep.subr.bf16.mxu1 %v12279_v32  ;;  %v12137_v32 = vcombine.high %v683_v36, %v691_v26  ;;  %v787_v16 = vld [vmem:[%s18648_s1 + $0xbc8] sm:$0xff] }
  0x62   : > { %6617 = vmatpush1.bf16.xpose.msra.mxu0 %v12022_v40  ;;  %v11880_v40 = vcombine.low %v427_v22, %v435_v23  ;;  %v547_v22 = vld [vmem:[%s18648_s1 + $0x448] sm:$0xff] }
  0x63   : > { %6618 = vmatprep.subr.bf16.mxu0 %v12039_v42  ;;  %v11897_v42 = vcombine.high %v443_v39, %v451_v34  ;;  %v795_v23 = vld [vmem:[%s18648_s1 + $0xc08] sm:$0xff]  ;;  %v11993_v29 = vcombine.high %v539_v21, %v547_v22 }
  0x64   : > { %6945 = vmatpush1.bf16.xpose.msra.mxu1 %v12278_v41  ;;  %v12136_v41 = vcombine.low %v683_v36, %v691_v26  ;;  %v803_v36 = vld [vmem:[%s18648_s1 + $0xc48] sm:$0xff]  ;;  %v11976_v26 = vcombine.low %v523_v13, %v531_v14 }
  0x65   : > { %6946 = vmatprep.subr.bf16.mxu1 %v12295_v43  ;;  %v12153_v43 = vcombine.high %v699_v37, %v707_v38 }
  0x6a   : > { %6619 = vmatpush1.bf16.xpose.msra.mxu0 %v12038_v49  ;;  %v11896_v49 = vcombine.low %v443_v39, %v451_v34  ;;  %v811_v39 = vld [vmem:[%s18648_s1 + $0xc88] sm:$0xff] }
  0x6b   : > { %6620 = vmatprep.subr.bf16.mxu0 %v12055_v51  ;;  %v11913_v51 = vcombine.high %v459_v44, %v467_v45  ;;  %v819_v34 = vld [vmem:[%s18648_s1 + $0xcc8] sm:$0xff] }
  0x6c   : > { %6947 = vmatpush1.bf16.xpose.msra.mxu1 %v12294_v50  ;;  %v12152_v50 = vcombine.low %v699_v37, %v707_v38  ;;  %v11992_v37 = vcombine.low %v539_v21, %v547_v22  ;;  %v12248_v38 = vcombine.low %v795_v23, %v803_v36  ;;  %v907_v21 = vld [vmem:[%s18648_s1 + $0xf88] sm:$0xff] }
  0x6d   : > { %6948 = vmatprep.subr.bf16.mxu1 %v12311_v52  ;;  %v12169_v52 = vcombine.high %v715_v46, %v723_v48  ;;  %v915_v22 = vld [vmem:[%s18648_s1 + $0xfc8] sm:$0xff] }
  0x72   : > { %6621 = vmatpush1.bf16.xpose.msra.mxu0 %v12054_v57  ;;  %v11912_v57 = vcombine.low %v459_v44, %v467_v45  ;;  %v827_v44 = vld [vmem:[%s18648_s1 + $0xd08] sm:$0xff] }
  0x73   : > { %6622 = vmatprep.subr.bf16.mxu0 %v12071_v59  ;;  %v11929_v59 = vcombine.high %v475_v53, %v483_v54  ;;  %v835_v45 = vld [vmem:[%s18648_s1 + $0xd48] sm:$0xff] }
  0x74   : > { %6949 = vmatpush1.bf16.xpose.msra.mxu1 %v12310_v58  ;;  %v12168_v58 = vcombine.low %v715_v46, %v723_v48  ;;  %v12264_v48 = vcombine.low %v811_v39, %v819_v34 }
  0x75   : > { %6950 = vmatprep.subr.bf16.mxu1 %v12327_v60  ;;  %v12185_v60 = vcombine.high %v731_v55, %v739_v56 }
  0x7a   : > { %6623 = vmatpush1.bf16.xpose.msra.mxu0 %v12070_v1  ;;  %v11928_v1 = vcombine.low %v475_v53, %v483_v54  ;;  %v843_v53 = vld [vmem:[%s18648_s1 + $0xd88] sm:$0xff] }
  0x7b   : > { %6624 = vmatprep.subr.bf16.mxu0 %v12087_v3  ;;  %v11945_v3 = vcombine.high %v491_v61, %v499_v62  ;;  %v851_v54 = vld [vmem:[%s18648_s1 + $0xdc8] sm:$0xff] }
  0x7c   : > { %6951 = vmatpush1.bf16.xpose.msra.mxu1 %v12326_v2  ;;  %v12184_v2 = vcombine.low %v731_v55, %v739_v56  ;;  %v12280_v56 = vcombine.low %v827_v44, %v835_v45 }
  0x7d   : > { %6952 = vmatprep.subr.bf16.mxu1 %v12343_v4  ;;  %v12201_v4 = vcombine.high %v747_v63, %v755_v0 }
  0x82   : > { %6625 = vmatpush1.bf16.xpose.msra.mxu0 %v12086_v9  ;;  %v11944_v9 = vcombine.low %v491_v61, %v499_v62  ;;  %v859_v61 = vld [vmem:[%s18648_s1 + $0xe08] sm:$0xff] }
  0x83   : > { %6626 = vmatprep.subr.bf16.mxu0 %v12103_v11  ;;  %v11961_v11 = vcombine.high %v507_v5, %v515_v6  ;;  %v867_v62 = vld [vmem:[%s18648_s1 + $0xe48] sm:$0xff] }
  0x84   : > { %6953 = vmatpush1.bf16.xpose.msra.mxu1 %v12342_v10  ;;  %v12200_v10 = vcombine.low %v747_v63, %v755_v0  ;;  %v12296_v0 = vcombine.low %v843_v53, %v851_v54 }
  0x85   : > { %6954 = vmatprep.subr.bf16.mxu1 %v12359_v12  ;;  %v12217_v12 = vcombine.high %v763_v7, %v771_v8 }
  0x8a   : > { %6627 = vmatpush1.bf16.xpose.msra.mxu0 %v12102_v17  ;;  %v11960_v17 = vcombine.low %v507_v5, %v515_v6  ;;  %v875_v5 = vld [vmem:[%s18648_s1 + $0xe88] sm:$0xff] }
  0x8b   : > { %6637 = vmatprep.subr.bf16.mxu0 %v11865_v19  ;;  %v11977_v19 = vcombine.high %v523_v13, %v531_v14  ;;  %v883_v6 = vld [vmem:[%s18648_s1 + $0xec8] sm:$0xff] }
  0x8c   : > { %6955 = vmatpush1.bf16.xpose.msra.mxu1 %v12358_v18  ;;  %v12216_v18 = vcombine.low %v763_v7, %v771_v8  ;;  %v12312_v8 = vcombine.low %v859_v61, %v867_v62  ;;  %v891_v13 = vld [vmem:[%s18648_s1 + $0xf08] sm:$0xff] }
  0x8d   : > { %6965 = vmatprep.subr.bf16.mxu1 %v12121_v20  ;;  %v12233_v20 = vcombine.high %v779_v15, %v787_v16  ;;  %v899_v14 = vld [vmem:[%s18648_s1 + $0xf48] sm:$0xff] }
  0x91   : > { %6629 = vmatmul.mubr.bf16.vlgmr.msra.gmra.mrb[0].mxu0 %v14397_v25 }
  0x92   : > { %6638 = vmatpush1.bf16.xpose.msra.mxu0 %v11864_v27  ;;  %6669 = vmatprep.mubr.bf16.mxu0 %v14407_v33  ;;  %v12232_v27 = vcombine.low %v779_v15, %v787_v16  ;;  %v12328_v16 = vcombine.low %v875_v5, %v883_v6 }
  0x93   : > { %6957 = vmatmul.mubr.bf16.vlgmr.msra.gmra.mrb[0].mxu1 %v14397_v25  ;;  %6639 = vmatprep.subr.bf16.mxu0 %v11881_v31  ;;  %v555_v31 = vld [vmem:[%s18648_s1 + $0x488] sm:$0xff] }
  0x94   : > { %6966 = vmatpush1.bf16.xpose.msra.mxu1 %v12120_v30  ;;  %6997 = vmatprep.mubr.bf16.mxu1 %v14407_v33  ;;  %v12249_v30 = vcombine.high %v795_v23, %v803_v36  ;;  %v12344_v36 = vcombine.low %v891_v13, %v899_v14 }
  0x95   : > { %6967 = vmatprep.subr.bf16.mxu1 %v12137_v32  ;;  %v563_v32 = vld [vmem:[%s18648_s1 + $0x4c8] sm:$0xff] }
  0x96   : > { %v12008_v46 = vcombine.low %v555_v31, %v563_v32 }
  0x9a   : > { %6640 = vmatpush1.bf16.xpose.msra.mxu0 %v11880_v40  ;;  %v12009_v40 = vcombine.high %v555_v31, %v563_v32  ;;  %v668_v31 = vld [vmem:[%s18648_s1 + $0x810] sm:$0xff] }
  0x9b   : > { %6641 = vmatprep.subr.bf16.mxu0 %v11897_v42  ;;  %v571_v42 = vld [vmem:[%s18648_s1 + $0x508] sm:$0xff]  ;;  %v676_v32 = vld [vmem:[%s18648_s1 + $0x850] sm:$0xff] }
  0x9c   : > { %6968 = vmatpush1.bf16.xpose.msra.mxu1 %v12136_v41  ;;  %v12265_v41 = vcombine.high %v811_v39, %v819_v34  ;;  %v12360_v34 = vcombine.low %v907_v21, %v915_v22 }
  0x9d   : > { %6969 = vmatprep.subr.bf16.mxu1 %v12153_v43  ;;  %v579_v43 = vld [vmem:[%s18648_s1 + $0x548] sm:$0xff] }
  0x9e   : > { %v12024_v55 = vcombine.low %v571_v42, %v579_v43 }
  0xa2   : > { %6642 = vmatpush1.bf16.xpose.msra.mxu0 %v11896_v49  ;;  %v12025_v49 = vcombine.high %v571_v42, %v579_v43  ;;  %v436_v42 = vld [vmem:[%s18648_s1 + $0xd0] sm:$0xff] }
  0xa3   : > { %6643 = vmatprep.subr.bf16.mxu0 %v11913_v51  ;;  %v587_v51 = vld [vmem:[%s18648_s1 + $0x588] sm:$0xff] }
  0xa4   : > { %6970 = vmatpush1.bf16.xpose.msra.mxu1 %v12152_v50  ;;  %v12281_v50 = vcombine.high %v827_v44, %v835_v45  ;;  %v14610_v44 = vpack.c.bf16 %v14393_v24, %v14393_v24  ;;  %v684_v45 = vld [vmem:[%s18648_s1 + $0x890] sm:$0xff] }
  0xa5   : > { %6971 = vmatprep.subr.bf16.mxu1 %v12169_v52  ;;  %v595_v52 = vld [vmem:[%s18648_s1 + $0x5c8] sm:$0xff]  ;;  %v444_v24 = vld [vmem:[%s18648_s1 + $0x110] sm:$0xff] }
  0xa6   : > { %v12040_v63 = vcombine.low %v587_v51, %v595_v52 }
  0xaa   : > { %6644 = vmatpush1.bf16.xpose.msra.mxu0 %v11912_v57  ;;  %v12041_v57 = vcombine.high %v587_v51, %v595_v52 }
  0xab   : > { %6645 = vmatprep.subr.bf16.mxu0 %v11929_v59  ;;  %v603_v59 = vld [vmem:[%s18648_s1 + $0x608] sm:$0xff] }
  0xac   : > { %6972 = vmatpush1.bf16.xpose.msra.mxu1 %v12168_v58  ;;  %v12297_v58 = vcombine.high %v843_v53, %v851_v54  ;;  %v452_v54 = vld [vmem:[%s18648_s1 + $0x150] sm:$0xff] }
  0xad   : > { %6973 = vmatprep.subr.bf16.mxu1 %v12185_v60  ;;  %v611_v60 = vld [vmem:[%s18648_s1 + $0x648] sm:$0xff] }
  0xae   : > { %v12056_v7 = vcombine.low %v603_v59, %v611_v60 }
  0xb2   : > { %6646 = vmatpush1.bf16.xpose.msra.mxu0 %v11928_v1  ;;  %v12057_v1 = vcombine.high %v603_v59, %v611_v60  ;;  %v11899_v59 = vcombine.high %v444_v24, %v452_v54 }
  0xb3   : > { %6647 = vmatprep.subr.bf16.mxu0 %v11945_v3  ;;  %v619_v3 = vld [vmem:[%s18648_s1 + $0x688] sm:$0xff] }
  0xb4   : > { %6974 = vmatpush1.bf16.xpose.msra.mxu1 %v12184_v2  ;;  %v12313_v2 = vcombine.high %v859_v61, %v867_v62  ;;  %v460_v61 = vld [vmem:[%s18648_s1 + $0x190] sm:$0xff] }
  0xb5   : > { %6975 = vmatprep.subr.bf16.mxu1 %v12201_v4  ;;  %v627_v4 = vld [vmem:[%s18648_s1 + $0x6c8] sm:$0xff]  ;;  %v468_v62 = vld [vmem:[%s18648_s1 + $0x1d0] sm:$0xff] }
  0xb6   : > { %v12072_v15 = vcombine.low %v619_v3, %v627_v4 }
  0xba   : > { %6648 = vmatpush1.bf16.xpose.msra.mxu0 %v11944_v9  ;;  %v12073_v9 = vcombine.high %v619_v3, %v627_v4  ;;  %v11915_v3 = vcombine.high %v460_v61, %v468_v62 }
  0xbb   : > { %6649 = vmatprep.subr.bf16.mxu0 %v11961_v11  ;;  %v635_v11 = vld [vmem:[%s18648_s1 + $0x708] sm:$0xff] }
  0xbc   : > { %6976 = vmatpush1.bf16.xpose.msra.mxu1 %v12200_v10  ;;  %v12329_v10 = vcombine.high %v875_v5, %v883_v6  ;;  %v476_v5 = vld [vmem:[%s18648_s1 + $0x210] sm:$0xff] }
  0xbd   : > { %6977 = vmatprep.subr.bf16.mxu1 %v12217_v12  ;;  %v643_v12 = vld [vmem:[%s18648_s1 + $0x748] sm:$0xff]  ;;  %v484_v6 = vld [vmem:[%s18648_s1 + $0x250] sm:$0xff] }
  0xbe   : > { %v12088_v23 = vcombine.low %v635_v11, %v643_v12 }
  0xc2   : > { %6650 = vmatpush1.bf16.xpose.msra.mxu0 %v11960_v17  ;;  %v12089_v17 = vcombine.high %v635_v11, %v643_v12  ;;  %v11931_v11 = vcombine.high %v476_v5, %v484_v6 }
  0xc3   : > { %6651 = vmatprep.subr.bf16.mxu0 %v11977_v19  ;;  %v651_v19 = vld [vmem:[%s18648_s1 + $0x788] sm:$0xff] }
  0xc4   : > { %6978 = vmatpush1.bf16.xpose.msra.mxu1 %v12216_v18  ;;  %v12345_v18 = vcombine.high %v891_v13, %v899_v14  ;;  %v492_v13 = vld [vmem:[%s18648_s1 + $0x290] sm:$0xff] }
  0xc5   : > { %6979 = vmatprep.subr.bf16.mxu1 %v12233_v20  ;;  %v659_v20 = vld [vmem:[%s18648_s1 + $0x7c8] sm:$0xff]  ;;  %v500_v14 = vld [vmem:[%s18648_s1 + $0x2d0] sm:$0xff] }
  0xc6   : > { %v12104_v39 = vcombine.low %v651_v19, %v659_v20 }
  0xca   : > { %6652 = vmatpush1.bf16.xpose.msra.mxu0 %v11976_v26  ;;  %v12105_v26 = vcombine.high %v651_v19, %v659_v20  ;;  %v11947_v19 = vcombine.high %v492_v13, %v500_v14 }
  0xcb   : > { %6653 = vmatprep.subr.bf16.mxu0 %v11993_v29  ;;  %v412_v29 = vld [vmem:[%s18648_s1 + $0x10] sm:$0xff] }
  0xcc   : > { %6980 = vmatpush1.bf16.xpose.msra.mxu1 %v12232_v27  ;;  %v12361_v27 = vcombine.high %v907_v21, %v915_v22  ;;  %v508_v21 = vld [vmem:[%s18648_s1 + $0x310] sm:$0xff] }
  0xcd   : > { %6981 = vmatprep.subr.bf16.mxu1 %v12249_v30  ;;  %v420_v30 = vld [vmem:[%s18648_s1 + $0x50] sm:$0xff] }
  0xce   : > { %v516_v22 = vld [vmem:[%s18648_s1 + $0x350] sm:$0xff] }
  0xd2   : > { %6654 = vmatpush1.bf16.xpose.msra.mxu0 %v11992_v37  ;;  %v11867_v37 = vcombine.high %v412_v29, %v420_v30 }
  0xd3   : > { %6655 = vmatprep.subr.bf16.mxu0 %v12009_v40  ;;  %v14596_v40 = vld [vmem:[%s18647_s0 + $0x8] sm:$0xff] }
  0xd4   : > { %6982 = vmatpush1.bf16.xpose.msra.mxu1 %v12248_v38  ;;  %v12123_v38 = vcombine.high %v668_v31, %v676_v32  ;;  %v14606_v43 = vrot.slane %v14596_v40, %v14211_v35 }
  0xd5   : > { %6983 = vmatprep.subr.bf16.mxu1 %v12265_v41  ;;  %v428_v41 = vld [vmem:[%s18648_s1 + $0x90] sm:$0xff] }
  0xd6   : > { %v11883_v51 = vcombine.high %v428_v41, %v436_v42 }
  0xda   : > { %6656 = vmatpush1.bf16.xpose.msra.mxu0 %v12008_v46  ;;  %v692_v46 = vld [vmem:[%s18648_s1 + $0x8d0] sm:$0xff] }
  0xdb   : > { %6657 = vmatprep.subr.bf16.mxu0 %v12025_v49  ;;  %v342_v49 = vcombine.high %v14606_v43, %v14606_v43  ;;  %v12139_v52 = vcombine.high %v684_v45, %v692_v46 }
  0xdc   : > { %6984 = vmatpush1.bf16.xpose.msra.mxu1 %v12264_v48  ;;  %v11866_v48 = vcombine.low %v412_v29, %v420_v30  ;;  %v11963_v29 = vcombine.high %v508_v21, %v516_v22 }
  0xdd   : > { %6985 = vmatprep.subr.bf16.mxu1 %v12281_v50  ;;  %v12122_v50 = vcombine.low %v668_v31, %v676_v32  ;;  %v14620_v53 = vpack.c.bf16 %v342_v49, %v342_v49  ;;  %v524_v31 = vld [vmem:[%s18648_s1 + $0x390] sm:$0xff] }
  0xde   : > { %v532_v32 = vld [vmem:[%s18648_s1 + $0x3d0] sm:$0xff] }
  0xdf   : > { %v804_v49 = vld [vmem:[%s18648_s1 + $0xc50] sm:$0xff] }
  0xe2   : > { %6658 = vmatpush1.bf16.xpose.msra.mxu0 %v12024_v55  ;;  %v700_v55 = vld [vmem:[%s18648_s1 + $0x910] sm:$0xff] }
  0xe3   : > { %6659 = vmatprep.subr.bf16.mxu0 %v12041_v57  ;;  %v11882_v57 = vcombine.low %v428_v41, %v436_v42  ;;  %v11979_v41 = vcombine.high %v524_v31, %v532_v32 }
  0xe4   : > { %6986 = vmatpush1.bf16.xpose.msra.mxu1 %v12280_v56  ;;  %v708_v56 = vld [vmem:[%s18648_s1 + $0x950] sm:$0xff] }
  0xe5   : > { %6987 = vmatprep.subr.bf16.mxu1 %v12297_v58  ;;  %v12138_v58 = vcombine.low %v684_v45, %v692_v46  ;;  %v12155_v60 = vcombine.high %v700_v55, %v708_v56  ;;  %v540_v45 = vld [vmem:[%s18648_s1 + $0x410] sm:$0xff] }
  0xe6   : > { %v548_v46 = vld [vmem:[%s18648_s1 + $0x450] sm:$0xff] }
  0xea   : > { %6660 = vmatpush1.bf16.xpose.msra.mxu0 %v12040_v63  ;;  %v716_v63 = vld [vmem:[%s18648_s1 + $0x990] sm:$0xff] }
  0xeb   : > { %6661 = vmatprep.subr.bf16.mxu0 %v12057_v1  ;;  %v11898_v1 = vcombine.low %v444_v24, %v452_v54  ;;  %v556_v54 = vld [vmem:[%s18648_s1 + $0x490] sm:$0xff] }
  0xec   : > { %6988 = vmatpush1.bf16.xpose.msra.mxu1 %v12296_v0  ;;  %v724_v0 = vld [vmem:[%s18648_s1 + $0x9d0] sm:$0xff] }
  0xed   : > { %6989 = vmatprep.subr.bf16.mxu1 %v12313_v2  ;;  %v12154_v2 = vcombine.low %v700_v55, %v708_v56  ;;  %v12171_v4 = vcombine.high %v716_v63, %v724_v0  ;;  %v564_v55 = vld [vmem:[%s18648_s1 + $0x4d0] sm:$0xff] }
  0xee   : > { %v812_v56 = vld [vmem:[%s18648_s1 + $0xc90] sm:$0xff] }
  0xf2   : > { %6662 = vmatpush1.bf16.xpose.msra.mxu0 %v12056_v7  ;;  %v732_v7 = vld [vmem:[%s18648_s1 + $0xa10] sm:$0xff] }
  0xf3   : > { %6663 = vmatprep.subr.bf16.mxu0 %v12073_v9  ;;  %v11914_v9 = vcombine.low %v460_v61, %v468_v62  ;;  %v572_v62 = vld [vmem:[%s18648_s1 + $0x510] sm:$0xff] }
  0xf4   : > { %6990 = vmatpush1.bf16.xpose.msra.mxu1 %v12312_v8  ;;  %v740_v8 = vld [vmem:[%s18648_s1 + $0xa50] sm:$0xff] }
  0xf5   : > { %6991 = vmatprep.subr.bf16.mxu1 %v12329_v10  ;;  %v12170_v10 = vcombine.low %v716_v63, %v724_v0  ;;  %v12187_v12 = vcombine.high %v732_v7, %v740_v8  ;;  %v580_v63 = vld [vmem:[%s18648_s1 + $0x550] sm:$0xff] }
  0xf6   : > { %v828_v0 = vld [vmem:[%s18648_s1 + $0xd10] sm:$0xff] }
  0xfa   : > { %6664 = vmatpush1.bf16.xpose.msra.mxu0 %v12072_v15  ;;  %v748_v15 = vld [vmem:[%s18648_s1 + $0xa90] sm:$0xff] }
  0xfb   : > { %6665 = vmatprep.subr.bf16.mxu0 %v12089_v17  ;;  %v11930_v17 = vcombine.low %v476_v5, %v484_v6  ;;  %v588_v6 = vld [vmem:[%s18648_s1 + $0x590] sm:$0xff] }
  0xfc   : > { %6992 = vmatpush1.bf16.xpose.msra.mxu1 %v12328_v16  ;;  %v756_v16 = vld [vmem:[%s18648_s1 + $0xad0] sm:$0xff] }
  0xfd   : > { %6993 = vmatprep.subr.bf16.mxu1 %v12345_v18  ;;  %v12186_v18 = vcombine.low %v732_v7, %v740_v8  ;;  %v12203_v20 = vcombine.high %v748_v15, %v756_v16  ;;  %v596_v7 = vld [vmem:[%s18648_s1 + $0x5d0] sm:$0xff] }
  0xfe   : > { %v844_v8 = vld [vmem:[%s18648_s1 + $0xd90] sm:$0xff] }
 0x102   : > { %6666 = vmatpush1.bf16.xpose.msra.mxu0 %v12088_v23  ;;  %v764_v23 = vld [vmem:[%s18648_s1 + $0xb10] sm:$0xff] }
 0x103   : > { %6667 = vmatprep.subr.bf16.mxu0 %v12105_v26  ;;  %v11946_v26 = vcombine.low %v492_v13, %v500_v14  ;;  %v604_v14 = vld [vmem:[%s18648_s1 + $0x610] sm:$0xff] }
 0x104   : > { %6994 = vmatpush1.bf16.xpose.msra.mxu1 %v12344_v36  ;;  %v772_v36 = vld [vmem:[%s18648_s1 + $0xb50] sm:$0xff] }
 0x105   : > { %6995 = vmatprep.subr.bf16.mxu1 %v12361_v27  ;;  %v12202_v27 = vcombine.low %v748_v15, %v756_v16  ;;  %v12219_v30 = vcombine.high %v764_v23, %v772_v36  ;;  %v612_v15 = vld [vmem:[%s18648_s1 + $0x650] sm:$0xff] }
 0x106   : > { %v860_v16 = vld [vmem:[%s18648_s1 + $0xe10] sm:$0xff] }
 0x10a   : > { %6668 = vmatpush1.bf16.xpose.msra.mxu0 %v12104_v39  ;;  %v780_v39 = vld [vmem:[%s18648_s1 + $0xb90] sm:$0xff] }
 0x10b   : > { %6678 = vmatprep.subr.bf16.mxu0 %v11867_v37  ;;  %v11962_v37 = vcombine.low %v508_v21, %v516_v22  ;;  %v620_v22 = vld [vmem:[%s18648_s1 + $0x690] sm:$0xff] }
 0x10c   : > { %6996 = vmatpush1.bf16.xpose.msra.mxu1 %v12360_v34  ;;  %v788_v34 = vld [vmem:[%s18648_s1 + $0xbd0] sm:$0xff] }
 0x10d   : > { %7006 = vmatprep.subr.bf16.mxu1 %v12123_v38  ;;  %v12218_v38 = vcombine.low %v764_v23, %v772_v36  ;;  %v12235_v42 = vcombine.high %v780_v39, %v788_v34  ;;  %v628_v23 = vld [vmem:[%s18648_s1 + $0x6d0] sm:$0xff] }
 0x10e   : > { %v876_v36 = vld [vmem:[%s18648_s1 + $0xe90] sm:$0xff] }
 0x111   : > { %6670 = vmatmul.mubr.bf16.vlgmr.msra.gmra.mrb[0].mxu0 %v14610_v44 }
 0x112   : > { %6679 = vmatpush1.bf16.xpose.msra.mxu0 %v11866_v48  ;;  %6710 = vmatprep.mubr.bf16.mxu0 %v14620_v53  ;;  %v796_v48 = vld [vmem:[%s18648_s1 + $0xc10] sm:$0xff] }
 0x113   : > { %6998 = vmatmul.mubr.bf16.vlgmr.msra.gmra.mrb[0].mxu1 %v14610_v44  ;;  %6680 = vmatprep.subr.bf16.mxu0 %v11883_v51  ;;  %v12234_v51 = vcombine.low %v780_v39, %v788_v34  ;;  %v12251_v24 = vcombine.high %v796_v48, %v804_v49  ;;  %v644_v39 = vld [vmem:[%s18648_s1 + $0x750] sm:$0xff] }
 0x114   : > { %7007 = vmatpush1.bf16.xpose.msra.mxu1 %v12122_v50  ;;  %7038 = vmatprep.mubr.bf16.mxu1 %v14620_v53  ;;  %v11978_v50 = vcombine.low %v524_v31, %v532_v32  ;;  %v636_v32 = vld [vmem:[%s18648_s1 + $0x710] sm:$0xff] }
 0x115   : > { %7008 = vmatprep.subr.bf16.mxu1 %v12139_v52  ;;  %v11995_v52 = vcombine.high %v540_v45, %v548_v46  ;;  %v892_v34 = vld [vmem:[%s18648_s1 + $0xf10] sm:$0xff] }
 0x11a   : > { %6681 = vmatpush1.bf16.xpose.msra.mxu0 %v11882_v57  ;;  %v820_v57 = vld [vmem:[%s18648_s1 + $0xcd0] sm:$0xff] }
 0x11b   : > { %6682 = vmatprep.subr.bf16.mxu0 %v11899_v59  ;;  %v12250_v59 = vcombine.low %v796_v48, %v804_v49  ;;  %v12267_v61 = vcombine.high %v812_v56, %v820_v57  ;;  %v660_v48 = vld [vmem:[%s18648_s1 + $0x7d0] sm:$0xff] }
 0x11c   : > { %7009 = vmatpush1.bf16.xpose.msra.mxu1 %v12138_v58  ;;  %v11994_v58 = vcombine.low %v540_v45, %v548_v46  ;;  %v652_v46 = vld [vmem:[%s18648_s1 + $0x790] sm:$0xff] }
 0x11d   : > { %7010 = vmatprep.subr.bf16.mxu1 %v12155_v60  ;;  %v12011_v60 = vcombine.high %v556_v54, %v564_v55  ;;  %v908_v49 = vld [vmem:[%s18648_s1 + $0xf90] sm:$0xff] }
 0x122   : > { %6683 = vmatpush1.bf16.xpose.msra.mxu0 %v11898_v1  ;;  %v836_v1 = vld [vmem:[%s18648_s1 + $0xd50] sm:$0xff] }
 0x123   : > { %6684 = vmatprep.subr.bf16.mxu0 %v11915_v3  ;;  %v12266_v3 = vcombine.low %v812_v56, %v820_v57  ;;  %v12283_v5 = vcombine.high %v828_v0, %v836_v1  ;;  %v421_v56 = vld [vmem:[%s18648_s1 + $0x58] sm:$0xff] }
 0x124   : > { %7011 = vmatpush1.bf16.xpose.msra.mxu1 %v12154_v2  ;;  %v12010_v2 = vcombine.low %v556_v54, %v564_v55  ;;  %v413_v55 = vld [vmem:[%s18648_s1 + $0x18] sm:$0xff] }
 0x125   : > { %7012 = vmatprep.subr.bf16.mxu1 %v12171_v4  ;;  %v12027_v4 = vcombine.high %v572_v62, %v580_v63  ;;  %v669_v57 = vld [vmem:[%s18648_s1 + $0x818] sm:$0xff] }
 0x12a   : > { %6685 = vmatpush1.bf16.xpose.msra.mxu0 %v11914_v9  ;;  %v852_v9 = vld [vmem:[%s18648_s1 + $0xdd0] sm:$0xff] }
 0x12b   : > { %6686 = vmatprep.subr.bf16.mxu0 %v11931_v11  ;;  %v12282_v11 = vcombine.low %v828_v0, %v836_v1  ;;  %v12299_v13 = vcombine.high %v844_v8, %v852_v9  ;;  %v429_v0 = vld [vmem:[%s18648_s1 + $0x98] sm:$0xff] }
 0x12c   : > { %7013 = vmatpush1.bf16.xpose.msra.mxu1 %v12170_v10  ;;  %v12026_v10 = vcombine.low %v572_v62, %v580_v63  ;;  %v327_v63 = vcombine.high %v14596_v40, %v14596_v40  ;;  %v437_v1 = vld [vmem:[%s18648_s1 + $0xd8] sm:$0xff] }
 0x12d   : > { %7014 = vmatprep.subr.bf16.mxu1 %v12187_v12  ;;  %v12043_v12 = vcombine.high %v588_v6, %v596_v7  ;;  %v685_v40 = vld [vmem:[%s18648_s1 + $0x898] sm:$0xff] }
 0x132   : > { %6687 = vmatpush1.bf16.xpose.msra.mxu0 %v11930_v17  ;;  %v868_v17 = vld [vmem:[%s18648_s1 + $0xe50] sm:$0xff] }
 0x133   : > { %6688 = vmatprep.subr.bf16.mxu0 %v11947_v19  ;;  %v12298_v19 = vcombine.low %v844_v8, %v852_v9  ;;  %v12315_v21 = vcombine.high %v860_v16, %v868_v17  ;;  %v11885_v8 = vcombine.high %v429_v0, %v437_v1 }
 0x134   : > { %7015 = vmatpush1.bf16.xpose.msra.mxu1 %v12186_v18  ;;  %v12042_v18 = vcombine.low %v588_v6, %v596_v7 }
 0x135   : > { %7016 = vmatprep.subr.bf16.mxu1 %v12203_v20  ;;  %v12059_v20 = vcombine.high %v604_v14, %v612_v15 }
 0x13a   : > { %6689 = vmatpush1.bf16.xpose.msra.mxu0 %v11946_v26  ;;  %v884_v26 = vld [vmem:[%s18648_s1 + $0xed0] sm:$0xff] }
 0x13b   : > { %6690 = vmatprep.subr.bf16.mxu0 %v11963_v29  ;;  %v12314_v29 = vcombine.low %v860_v16, %v868_v17  ;;  %v12331_v31 = vcombine.high %v876_v36, %v884_v26 }
 0x13c   : > { %7017 = vmatpush1.bf16.xpose.msra.mxu1 %v12202_v27  ;;  %v12058_v27 = vcombine.low %v604_v14, %v612_v15  ;;  %v11884_v14 = vcombine.low %v429_v0, %v437_v1 }
 0x13d   : > { %7018 = vmatprep.subr.bf16.mxu1 %v12219_v30  ;;  %v12075_v30 = vcombine.high %v620_v22, %v628_v23 }
 0x142   : > { %6691 = vmatpush1.bf16.xpose.msra.mxu0 %v11962_v37  ;;  %v900_v37 = vld [vmem:[%s18648_s1 + $0xf50] sm:$0xff] }
 0x143   : > { %6692 = vmatprep.subr.bf16.mxu0 %v11979_v41  ;;  %v12330_v41 = vcombine.low %v876_v36, %v884_v26  ;;  %v12347_v45 = vcombine.high %v892_v34, %v900_v37 }
 0x144   : > { %7019 = vmatpush1.bf16.xpose.msra.mxu1 %v12218_v38  ;;  %v12074_v38 = vcombine.low %v620_v22, %v628_v23 }
 0x145   : > { %7020 = vmatprep.subr.bf16.mxu1 %v12235_v42  ;;  %v12091_v42 = vcombine.high %v636_v32, %v644_v39 }
 0x14a   : > { %6693 = vmatpush1.bf16.xpose.msra.mxu0 %v11978_v50  ;;  %v916_v50 = vld [vmem:[%s18648_s1 + $0xfd0] sm:$0xff] }
 0x14b   : > { %6694 = vmatprep.subr.bf16.mxu0 %v11995_v52  ;;  %v12346_v52 = vcombine.low %v892_v34, %v900_v37  ;;  %v12363_v54 = vcombine.high %v908_v49, %v916_v50 }
 0x14c   : > { %7021 = vmatpush1.bf16.xpose.msra.mxu1 %v12234_v51  ;;  %v12090_v51 = vcombine.low %v636_v32, %v644_v39 }
 0x14d   : > { %7022 = vmatprep.subr.bf16.mxu1 %v12251_v24  ;;  %v12107_v24 = vcombine.high %v652_v46, %v660_v48 }
 0x152   : > { %6695 = vmatpush1.bf16.xpose.msra.mxu0 %v11994_v58  ;;  %v677_v58 = vld [vmem:[%s18648_s1 + $0x858] sm:$0xff] }
 0x153   : > { %6696 = vmatprep.subr.bf16.mxu0 %v12011_v60  ;;  %v12362_v60 = vcombine.low %v908_v49, %v916_v50  ;;  %v12125_v62 = vcombine.high %v669_v57, %v677_v58  ;;  %v12124_v7 = vcombine.low %v669_v57, %v677_v58 }
 0x154   : > { %7023 = vmatpush1.bf16.xpose.msra.mxu1 %v12250_v59  ;;  %v12106_v59 = vcombine.low %v652_v46, %v660_v48 }
 0x155   : > { %7024 = vmatprep.subr.bf16.mxu1 %v12267_v61  ;;  %v11869_v61 = vcombine.high %v413_v55, %v421_v56 }
 0x15a   : > { %6697 = vmatpush1.bf16.xpose.msra.mxu0 %v12010_v2  ;;  %v14815_v2 = vrot.slane %v327_v63, %v14211_v35 }
 0x15b   : > { %6698 = vmatprep.subr.bf16.mxu0 %v12027_v4  ;;  %v693_v4 = vld [vmem:[%s18648_s1 + $0x8d8] sm:$0xff] }
 0x15c   : > { %7025 = vmatpush1.bf16.xpose.msra.mxu1 %v12266_v3  ;;  %v14819_v3 = vpack.c.bf16 %v14606_v43, %v14606_v43  ;;  %v343_v6 = vcombine.high %v14815_v2, %v14815_v2  ;;  %v12141_v9 = vcombine.high %v685_v40, %v693_v4  ;;  %v445_v43 = vld [vmem:[%s18648_s1 + $0x118] sm:$0xff]  ;;  %v12140_v15 = vcombine.low %v685_v40, %v693_v4 }
 0x15d   : > { %7026 = vmatprep.subr.bf16.mxu1 %v12283_v5  ;;  %v11868_v5 = vcombine.low %v413_v55, %v421_v56  ;;  %v541_v4 = vld [vmem:[%s18648_s1 + $0x418] sm:$0xff] }
 0x162   : > { %6699 = vmatpush1.bf16.xpose.msra.mxu0 %v12026_v10  ;;  %v14829_v10 = vpack.c.bf16 %v343_v6, %v343_v6  ;;  %v797_v6 = vld [vmem:[%s18648_s1 + $0xc18] sm:$0xff] }
 0x163   : > { %6700 = vmatprep.subr.bf16.mxu0 %v12043_v12  ;;  %v701_v12 = vld [vmem:[%s18648_s1 + $0x918] sm:$0xff] }
 0x164   : > { %7027 = vmatpush1.bf16.xpose.msra.mxu1 %v12282_v11  ;;  %v453_v11 = vld [vmem:[%s18648_s1 + $0x158] sm:$0xff] }
 0x165   : > { %7028 = vmatprep.subr.bf16.mxu1 %v12299_v13  ;;  %v709_v13 = vld [vmem:[%s18648_s1 + $0x958] sm:$0xff]  ;;  %v11901_v16 = vcombine.high %v445_v43, %v453_v11  ;;  %v11900_v22 = vcombine.low %v445_v43, %v453_v11 }
 0x166   : > { %v12157_v17 = vcombine.high %v701_v12, %v709_v13  ;;  %v12156_v23 = vcombine.low %v701_v12, %v709_v13  ;;  %v557_v12 = vld [vmem:[%s18648_s1 + $0x498] sm:$0xff] }
 0x167   : > { %v565_v13 = vld [vmem:[%s18648_s1 + $0x4d8] sm:$0xff] }
 0x16a   : > { %6701 = vmatpush1.bf16.xpose.msra.mxu0 %v12042_v18  ;;  %v461_v18 = vld [vmem:[%s18648_s1 + $0x198] sm:$0xff] }
 0x16b   : > { %6702 = vmatprep.subr.bf16.mxu0 %v12059_v20  ;;  %v717_v20 = vld [vmem:[%s18648_s1 + $0x998] sm:$0xff] }
 0x16c   : > { %7029 = vmatpush1.bf16.xpose.msra.mxu1 %v12298_v19  ;;  %v469_v19 = vld [vmem:[%s18648_s1 + $0x1d8] sm:$0xff] }
 0x16d   : > { %7030 = vmatprep.subr.bf16.mxu1 %v12315_v21  ;;  %v725_v21 = vld [vmem:[%s18648_s1 + $0x9d8] sm:$0xff]  ;;  %v11917_v36 = vcombine.high %v461_v18, %v469_v19  ;;  %v11916_v32 = vcombine.low %v461_v18, %v469_v19  ;;  %v12013_v18 = vcombine.high %v557_v12, %v565_v13 }
 0x16e   : > { %v12173_v26 = vcombine.high %v717_v20, %v725_v21  ;;  %v12172_v39 = vcombine.low %v717_v20, %v725_v21  ;;  %v573_v20 = vld [vmem:[%s18648_s1 + $0x518] sm:$0xff] }
 0x16f   : > { %v581_v21 = vld [vmem:[%s18648_s1 + $0x558] sm:$0xff] }
 0x172   : > { %6703 = vmatpush1.bf16.xpose.msra.mxu0 %v12058_v27  ;;  %v477_v27 = vld [vmem:[%s18648_s1 + $0x218] sm:$0xff] }
 0x173   : > { %6704 = vmatprep.subr.bf16.mxu0 %v12075_v30  ;;  %v733_v30 = vld [vmem:[%s18648_s1 + $0xa18] sm:$0xff] }
 0x174   : > { %7031 = vmatpush1.bf16.xpose.msra.mxu1 %v12314_v29  ;;  %v485_v29 = vld [vmem:[%s18648_s1 + $0x258] sm:$0xff] }
 0x175   : > { %7032 = vmatprep.subr.bf16.mxu1 %v12331_v31  ;;  %v741_v31 = vld [vmem:[%s18648_s1 + $0xa58] sm:$0xff]  ;;  %v11933_v34 = vcombine.high %v477_v27, %v485_v29  ;;  %v11932_v46 = vcombine.low %v477_v27, %v485_v29  ;;  %v12029_v27 = vcombine.high %v573_v20, %v581_v21 }
 0x176   : > { %v12189_v37 = vcombine.high %v733_v30, %v741_v31  ;;  %v12188_v48 = vcombine.low %v733_v30, %v741_v31  ;;  %v589_v30 = vld [vmem:[%s18648_s1 + $0x598] sm:$0xff] }
 0x177   : > { %v597_v31 = vld [vmem:[%s18648_s1 + $0x5d8] sm:$0xff] }
 0x17a   : > { %6705 = vmatpush1.bf16.xpose.msra.mxu0 %v12074_v38  ;;  %v493_v38 = vld [vmem:[%s18648_s1 + $0x298] sm:$0xff] }
 0x17b   : > { %6706 = vmatprep.subr.bf16.mxu0 %v12091_v42  ;;  %v749_v42 = vld [vmem:[%s18648_s1 + $0xa98] sm:$0xff] }
 0x17c   : > { %7033 = vmatpush1.bf16.xpose.msra.mxu1 %v12330_v41  ;;  %v501_v41 = vld [vmem:[%s18648_s1 + $0x2d8] sm:$0xff] }
 0x17d   : > { %7034 = vmatprep.subr.bf16.mxu1 %v12347_v45  ;;  %v757_v45 = vld [vmem:[%s18648_s1 + $0xad8] sm:$0xff]  ;;  %v11949_v49 = vcombine.high %v493_v38, %v501_v41  ;;  %v11948_v55 = vcombine.low %v493_v38, %v501_v41  ;;  %v12045_v38 = vcombine.high %v589_v30, %v597_v31 }
 0x17e   : > { %v12205_v50 = vcombine.high %v749_v42, %v757_v45  ;;  %v12204_v56 = vcombine.low %v749_v42, %v757_v45  ;;  %v605_v42 = vld [vmem:[%s18648_s1 + $0x618] sm:$0xff] }
 0x17f   : > { %v613_v45 = vld [vmem:[%s18648_s1 + $0x658] sm:$0xff] }
 0x182   : > { %6707 = vmatpush1.bf16.xpose.msra.mxu0 %v12090_v51  ;;  %v509_v51 = vld [vmem:[%s18648_s1 + $0x318] sm:$0xff] }
 0x183   : > { %6708 = vmatprep.subr.bf16.mxu0 %v12107_v24  ;;  %v765_v24 = vld [vmem:[%s18648_s1 + $0xb18] sm:$0xff] }
 0x184   : > { %7035 = vmatpush1.bf16.xpose.msra.mxu1 %v12346_v52  ;;  %v517_v52 = vld [vmem:[%s18648_s1 + $0x358] sm:$0xff] }
 0x185   : > { %7036 = vmatprep.subr.bf16.mxu1 %v12363_v54  ;;  %v773_v54 = vld [vmem:[%s18648_s1 + $0xb58] sm:$0xff]  ;;  %v11965_v57 = vcombine.high %v509_v51, %v517_v52  ;;  %v11964_v63 = vcombine.low %v509_v51, %v517_v52  ;;  %v12061_v51 = vcombine.high %v605_v42, %v613_v45 }
 0x186   : > { %v12221_v58 = vcombine.high %v765_v24, %v773_v54  ;;  %v12220_v0 = vcombine.low %v765_v24, %v773_v54  ;;  %v621_v24 = vld [vmem:[%s18648_s1 + $0x698] sm:$0xff] }
 0x187   : > { %v629_v54 = vld [vmem:[%s18648_s1 + $0x6d8] sm:$0xff] }
 0x18a   : > { %6709 = vmatpush1.bf16.xpose.msra.mxu0 %v12106_v59  ;;  %v525_v59 = vld [vmem:[%s18648_s1 + $0x398] sm:$0xff] }
 0x18b   : > { %6719 = vmatprep.subr.bf16.mxu0 %v11869_v61  ;;  %v781_v61 = vld [vmem:[%s18648_s1 + $0xb98] sm:$0xff] }
 0x18c   : > { %7037 = vmatpush1.bf16.xpose.msra.mxu1 %v12362_v60  ;;  %v533_v60 = vld [vmem:[%s18648_s1 + $0x3d8] sm:$0xff] }
 0x18d   : > { %7047 = vmatprep.subr.bf16.mxu1 %v12125_v62  ;;  %v789_v62 = vld [vmem:[%s18648_s1 + $0xbd8] sm:$0xff]  ;;  %v11981_v1 = vcombine.high %v525_v59, %v533_v60 }
 0x18e   : > { %v12237_v40 = vcombine.high %v781_v61, %v789_v62 }
 0x191   : > { %6711 = vmatmul.mubr.bf16.vlgmr.msra.gmra.mrb[0].mxu0 %v14819_v3 }
 0x192   : > { %6720 = vmatpush1.bf16.xpose.msra.mxu0 %v11868_v5  ;;  %6751 = vmatprep.mubr.bf16.mxu0 %v14829_v10  ;;  %v549_v5 = vld [vmem:[%s18648_s1 + $0x458] sm:$0xff] }
 0x193   : > { %7039 = vmatmul.mubr.bf16.vlgmr.msra.gmra.mrb[0].mxu1 %v14819_v3  ;;  %6721 = vmatprep.subr.bf16.mxu0 %v11885_v8  ;;  %v11980_v8 = vcombine.low %v525_v59, %v533_v60  ;;  %v11997_v43 = vcombine.high %v541_v4, %v549_v5  ;;  %v12077_v59 = vcombine.high %v621_v24, %v629_v54 }
 0x194   : > { %7048 = vmatpush1.bf16.xpose.msra.mxu1 %v12124_v7  ;;  %7079 = vmatprep.mubr.bf16.mxu1 %v14829_v10  ;;  %v805_v7 = vld [vmem:[%s18648_s1 + $0xc58] sm:$0xff] }
 0x195   : > { %7049 = vmatprep.subr.bf16.mxu1 %v12141_v9  ;;  %v12236_v9 = vcombine.low %v781_v61, %v789_v62  ;;  %v12253_v11 = vcombine.high %v797_v6, %v805_v7  ;;  %v637_v61 = vld [vmem:[%s18648_s1 + $0x718] sm:$0xff] }
 0x196   : > { %v645_v62 = vld [vmem:[%s18648_s1 + $0x758] sm:$0xff] }
 0x19a   : > { %6722 = vmatpush1.bf16.xpose.msra.mxu0 %v11884_v14  ;;  %v813_v14 = vld [vmem:[%s18648_s1 + $0xc98] sm:$0xff] }
 0x19b   : > { %6723 = vmatprep.subr.bf16.mxu0 %v11901_v16  ;;  %v11996_v16 = vcombine.low %v541_v4, %v549_v5  ;;  %v12093_v4 = vcombine.high %v637_v61, %v645_v62 }
 0x19c   : > { %7050 = vmatpush1.bf16.xpose.msra.mxu1 %v12140_v15  ;;  %v821_v15 = vld [vmem:[%s18648_s1 + $0xcd8] sm:$0xff] }
 0x19d   : > { %7051 = vmatprep.subr.bf16.mxu1 %v12157_v17  ;;  %v12252_v17 = vcombine.low %v797_v6, %v805_v7  ;;  %v12269_v19 = vcombine.high %v813_v14, %v821_v15  ;;  %v653_v6 = vld [vmem:[%s18648_s1 + $0x798] sm:$0xff] }
 0x19e   : > { %v661_v7 = vld [vmem:[%s18648_s1 + $0x7d8] sm:$0xff] }
 0x1a2   : > { %6724 = vmatpush1.bf16.xpose.msra.mxu0 %v11900_v22  ;;  %v829_v22 = vld [vmem:[%s18648_s1 + $0xd18] sm:$0xff] }
 0x1a3   : > { %6725 = vmatprep.subr.bf16.mxu0 %v11917_v36  ;;  %v12012_v36 = vcombine.low %v557_v12, %v565_v13  ;;  %v12109_v12 = vcombine.high %v653_v6, %v661_v7 }
 0x1a4   : > { %7052 = vmatpush1.bf16.xpose.msra.mxu1 %v12156_v23  ;;  %v837_v23 = vld [vmem:[%s18648_s1 + $0xd58] sm:$0xff] }
 0x1a5   : > { %7053 = vmatprep.subr.bf16.mxu1 %v12173_v26  ;;  %v12268_v26 = vcombine.low %v813_v14, %v821_v15  ;;  %v12285_v29 = vcombine.high %v829_v22, %v837_v23  ;;  %v414_v14 = vld [vmem:[%s18648_s1 + $0x20] sm:$0xff] }
 0x1a6   : > { %v422_v15 = vld [vmem:[%s18648_s1 + $0x60] sm:$0xff] }
 0x1aa   : > { %6726 = vmatpush1.bf16.xpose.msra.mxu0 %v11916_v32  ;;  %v845_v32 = vld [vmem:[%s18648_s1 + $0xd98] sm:$0xff] }
 0x1ab   : > { %6727 = vmatprep.subr.bf16.mxu0 %v11933_v34  ;;  %v12028_v34 = vcombine.low %v573_v20, %v581_v21  ;;  %v11871_v20 = vcombine.high %v414_v14, %v422_v15 }
 0x1ac   : > { %7054 = vmatpush1.bf16.xpose.msra.mxu1 %v12172_v39  ;;  %v853_v39 = vld [vmem:[%s18648_s1 + $0xdd8] sm:$0xff] }
 0x1ad   : > { %7055 = vmatprep.subr.bf16.mxu1 %v12189_v37  ;;  %v12284_v37 = vcombine.low %v829_v22, %v837_v23  ;;  %v12301_v41 = vcombine.high %v845_v32, %v853_v39  ;;  %v15018_v22 = vld [vmem:[%s18647_s0 + $0x10] sm:$0xff]  ;;  %v430_v23 = vld [vmem:[%s18648_s1 + $0xa0] sm:$0xff] }
 0x1b2   : > { %6728 = vmatpush1.bf16.xpose.msra.mxu0 %v11932_v46  ;;  %v861_v46 = vld [vmem:[%s18648_s1 + $0xe18] sm:$0xff] }
 0x1b3   : > { %6729 = vmatprep.subr.bf16.mxu0 %v11949_v49  ;;  %v12044_v49 = vcombine.low %v589_v30, %v597_v31  ;;  %v694_v30 = vld [vmem:[%s18648_s1 + $0x8e0] sm:$0xff]  ;;  %v11870_v31 = vcombine.low %v414_v14, %v422_v15 }
 0x1b4   : > { %7056 = vmatpush1.bf16.xpose.msra.mxu1 %v12188_v48  ;;  %v869_v48 = vld [vmem:[%s18648_s1 + $0xe58] sm:$0xff]  ;;  %v766_v14 = vld [vmem:[%s18648_s1 + $0xb20] sm:$0xff] }
 0x1b5   : > { %7057 = vmatprep.subr.bf16.mxu1 %v12205_v50  ;;  %v12300_v50 = vcombine.low %v845_v32, %v853_v39  ;;  %v12317_v52 = vcombine.high %v861_v46, %v869_v48  ;;  %v774_v15 = vld [vmem:[%s18648_s1 + $0xb60] sm:$0xff] }
 0x1ba   : > { %6730 = vmatpush1.bf16.xpose.msra.mxu0 %v11948_v55  ;;  %v877_v55 = vld [vmem:[%s18648_s1 + $0xe98] sm:$0xff] }
 0x1bb   : > { %6731 = vmatprep.subr.bf16.mxu0 %v11965_v57  ;;  %v12060_v57 = vcombine.low %v605_v42, %v613_v45  ;;  %v702_v42 = vld [vmem:[%s18648_s1 + $0x920] sm:$0xff] }
 0x1bc   : > { %7058 = vmatpush1.bf16.xpose.msra.mxu1 %v12204_v56  ;;  %v885_v56 = vld [vmem:[%s18648_s1 + $0xed8] sm:$0xff]  ;;  %v710_v45 = vld [vmem:[%s18648_s1 + $0x960] sm:$0xff] }
 0x1bd   : > { %7059 = vmatprep.subr.bf16.mxu1 %v12221_v58  ;;  %v12316_v58 = vcombine.low %v861_v46, %v869_v48  ;;  %v12333_v60 = vcombine.high %v877_v55, %v885_v56 }
 0x1c2   : > { %6732 = vmatpush1.bf16.xpose.msra.mxu0 %v11964_v63  ;;  %v893_v63 = vld [vmem:[%s18648_s1 + $0xf18] sm:$0xff] }
 0x1c3   : > { %6733 = vmatprep.subr.bf16.mxu0 %v11981_v1  ;;  %v12076_v1 = vcombine.low %v621_v24, %v629_v54  ;;  %v718_v24 = vld [vmem:[%s18648_s1 + $0x9a0] sm:$0xff] }
 0x1c4   : > { %7060 = vmatpush1.bf16.xpose.msra.mxu1 %v12220_v0  ;;  %v901_v0 = vld [vmem:[%s18648_s1 + $0xf58] sm:$0xff]  ;;  %v726_v54 = vld [vmem:[%s18648_s1 + $0x9e0] sm:$0xff] }
 0x1c5   : > { %7061 = vmatprep.subr.bf16.mxu1 %v12237_v40  ;;  %v12332_v40 = vcombine.low %v877_v55, %v885_v56  ;;  %v12349_v5 = vcombine.high %v893_v63, %v901_v0  ;;  %v12158_v56 = vcombine.low %v702_v42, %v710_v45 }
 0x1ca   : > { %6734 = vmatpush1.bf16.xpose.msra.mxu0 %v11980_v8  ;;  %v909_v8 = vld [vmem:[%s18648_s1 + $0xf98] sm:$0xff] }
 0x1cb   : > { %6735 = vmatprep.subr.bf16.mxu0 %v11997_v43  ;;  %v12092_v43 = vcombine.low %v637_v61, %v645_v62  ;;  %v734_v61 = vld [vmem:[%s18648_s1 + $0xa20] sm:$0xff] }
 0x1cc   : > { %7062 = vmatpush1.bf16.xpose.msra.mxu1 %v12236_v9  ;;  %v917_v9 = vld [vmem:[%s18648_s1 + $0xfd8] sm:$0xff]  ;;  %v742_v62 = vld [vmem:[%s18648_s1 + $0xa60] sm:$0xff] }
 0x1cd   : > { %7063 = vmatprep.subr.bf16.mxu1 %v12253_v11  ;;  %v12348_v11 = vcombine.low %v893_v63, %v901_v0  ;;  %v12365_v13 = vcombine.high %v909_v8, %v917_v9  ;;  %v12174_v0 = vcombine.low %v718_v24, %v726_v54 }
 0x1d2   : > { %6736 = vmatpush1.bf16.xpose.msra.mxu0 %v11996_v16  ;;  %v670_v16 = vld [vmem:[%s18648_s1 + $0x820] sm:$0xff] }
 0x1d3   : > { %6737 = vmatprep.subr.bf16.mxu0 %v12013_v18  ;;  %v12108_v18 = vcombine.low %v653_v6, %v661_v7  ;;  %v750_v6 = vld [vmem:[%s18648_s1 + $0xaa0] sm:$0xff] }
 0x1d4   : > { %7064 = vmatpush1.bf16.xpose.msra.mxu1 %v12252_v17  ;;  %v678_v17 = vld [vmem:[%s18648_s1 + $0x860] sm:$0xff] }
 0x1d5   : > { %7065 = vmatprep.subr.bf16.mxu1 %v12269_v19  ;;  %v12364_v19 = vcombine.low %v909_v8, %v917_v9  ;;  %v12127_v21 = vcombine.high %v670_v16, %v678_v17  ;;  %v12126_v39 = vcombine.low %v670_v16, %v678_v17  ;;  %v758_v7 = vld [vmem:[%s18648_s1 + $0xae0] sm:$0xff]  ;;  %v12190_v9 = vcombine.low %v734_v61, %v742_v62 }
 0x1d6   : > { %v12206_v17 = vcombine.low %v750_v6, %v758_v7 }
 0x1da   : > { %6738 = vmatpush1.bf16.xpose.msra.mxu0 %v12012_v36  ;;  %v438_v36 = vld [vmem:[%s18648_s1 + $0xe0] sm:$0xff] }
 0x1db   : > { %6739 = vmatprep.subr.bf16.mxu0 %v12029_v27  ;;  %v15032_v27 = vpack.c.bf16 %v14815_v2, %v14815_v2  ;;  %v446_v2 = vld [vmem:[%s18648_s1 + $0x120] sm:$0xff]  ;;  %v11886_v46 = vcombine.low %v430_v23, %v438_v36 }
 0x1dc   : > { %7066 = vmatpush1.bf16.xpose.msra.mxu1 %v12268_v26  ;;  %v15028_v26 = vrot.slane %v15018_v22, %v14211_v35 }
 0x1dd   : > { %7067 = vmatprep.subr.bf16.mxu1 %v12285_v29  ;;  %v686_v29 = vld [vmem:[%s18648_s1 + $0x8a0] sm:$0xff] }
 0x1de   : > { %v359_v32 = vcombine.high %v15028_v26, %v15028_v26  ;;  %v12142_v48 = vcombine.low %v686_v29, %v694_v30 }
 0x1e2   : > { %6740 = vmatpush1.bf16.xpose.msra.mxu0 %v12028_v34  ;;  %v11887_v34 = vcombine.high %v430_v23, %v438_v36  ;;  %v782_v23 = vld [vmem:[%s18648_s1 + $0xba0] sm:$0xff] }
 0x1e3   : > { %6741 = vmatprep.subr.bf16.mxu0 %v12045_v38  ;;  %v15042_v38 = vpack.c.bf16 %v359_v32, %v359_v32  ;;  %v790_v36 = vld [vmem:[%s18648_s1 + $0xbe0] sm:$0xff] }
 0x1e4   : > { %7068 = vmatpush1.bf16.xpose.msra.mxu1 %v12284_v37  ;;  %v12143_v37 = vcombine.high %v686_v29, %v694_v30  ;;  %v12222_v30 = vcombine.low %v766_v14, %v774_v15  ;;  %v12239_v32 = vcombine.high %v782_v23, %v790_v36 }
 0x1e5   : > { %7069 = vmatprep.subr.bf16.mxu1 %v12301_v41  ;;  %v454_v41 = vld [vmem:[%s18648_s1 + $0x160] sm:$0xff] }
 0x1e6   : > { %v11902_v55 = vcombine.low %v446_v2, %v454_v41 }
 0x1ea   : > { %6742 = vmatpush1.bf16.xpose.msra.mxu0 %v12044_v49  ;;  %v11903_v49 = vcombine.high %v446_v2, %v454_v41  ;;  %v806_v2 = vld [vmem:[%s18648_s1 + $0xc60] sm:$0xff] }
 0x1eb   : > { %6743 = vmatprep.subr.bf16.mxu0 %v12061_v51  ;;  %v462_v51 = vld [vmem:[%s18648_s1 + $0x1a0] sm:$0xff] }
 0x1ec   : > { %7070 = vmatpush1.bf16.xpose.msra.mxu1 %v12300_v50  ;;  %v12159_v50 = vcombine.high %v702_v42, %v710_v45  ;;  %v12238_v42 = vcombine.low %v782_v23, %v790_v36 }
 0x1ed   : > { %7071 = vmatprep.subr.bf16.mxu1 %v12317_v52  ;;  %v470_v52 = vld [vmem:[%s18648_s1 + $0x1e0] sm:$0xff] }
 0x1ee   : > { %v11918_v63 = vcombine.low %v462_v51, %v470_v52 }
 0x1f2   : > { %6744 = vmatpush1.bf16.xpose.msra.mxu0 %v12060_v57  ;;  %v11919_v57 = vcombine.high %v462_v51, %v470_v52  ;;  %v822_v51 = vld [vmem:[%s18648_s1 + $0xce0] sm:$0xff] }
 0x1f3   : > { %6745 = vmatprep.subr.bf16.mxu0 %v12077_v59  ;;  %v478_v59 = vld [vmem:[%s18648_s1 + $0x220] sm:$0xff] }
 0x1f4   : > { %7072 = vmatpush1.bf16.xpose.msra.mxu1 %v12316_v58  ;;  %v12175_v58 = vcombine.high %v718_v24, %v726_v54 }
 0x1f5   : > { %7073 = vmatprep.subr.bf16.mxu1 %v12333_v60  ;;  %v486_v60 = vld [vmem:[%s18648_s1 + $0x260] sm:$0xff] }
 0x1f6   : > { %v11934_v8 = vcombine.low %v478_v59, %v486_v60 }
 0x1fa   : > { %6746 = vmatpush1.bf16.xpose.msra.mxu0 %v12076_v1  ;;  %v11935_v1 = vcombine.high %v478_v59, %v486_v60  ;;  %v838_v59 = vld [vmem:[%s18648_s1 + $0xd60] sm:$0xff] }
 0x1fb   : > { %6747 = vmatprep.subr.bf16.mxu0 %v12093_v4  ;;  %v494_v4 = vld [vmem:[%s18648_s1 + $0x2a0] sm:$0xff] }
 0x1fc   : > { %7074 = vmatpush1.bf16.xpose.msra.mxu1 %v12332_v40  ;;  %v12191_v40 = vcombine.high %v734_v61, %v742_v62 }
 0x1fd   : > { %7075 = vmatprep.subr.bf16.mxu1 %v12349_v5  ;;  %v502_v5 = vld [vmem:[%s18648_s1 + $0x2e0] sm:$0xff] }
 0x1fe   : > { %v11950_v16 = vcombine.low %v494_v4, %v502_v5 }
 0x202   : > { %6748 = vmatpush1.bf16.xpose.msra.mxu0 %v12092_v43  ;;  %v11951_v43 = vcombine.high %v494_v4, %v502_v5  ;;  %v854_v4 = vld [vmem:[%s18648_s1 + $0xde0] sm:$0xff] }
 0x203   : > { %6749 = vmatprep.subr.bf16.mxu0 %v12109_v12  ;;  %v510_v12 = vld [vmem:[%s18648_s1 + $0x320] sm:$0xff] }
 0x204   : > { %7076 = vmatpush1.bf16.xpose.msra.mxu1 %v12348_v11  ;;  %v12207_v11 = vcombine.high %v750_v6, %v758_v7 }
 0x205   : > { %7077 = vmatprep.subr.bf16.mxu1 %v12365_v13  ;;  %v518_v13 = vld [vmem:[%s18648_s1 + $0x360] sm:$0xff] }
 0x206   : > { %v11966_v29 = vcombine.low %v510_v12, %v518_v13 }
 0x20a   : > { %6750 = vmatpush1.bf16.xpose.msra.mxu0 %v12108_v18  ;;  %v11967_v18 = vcombine.high %v510_v12, %v518_v13  ;;  %v870_v12 = vld [vmem:[%s18648_s1 + $0xe60] sm:$0xff] }
 0x20b   : > { %6760 = vmatprep.subr.bf16.mxu0 %v11871_v20  ;;  %v526_v20 = vld [vmem:[%s18648_s1 + $0x3a0] sm:$0xff] }
 0x20c   : > { %7078 = vmatpush1.bf16.xpose.msra.mxu1 %v12364_v19  ;;  %v12223_v19 = vcombine.high %v766_v14, %v774_v15 }
 0x20d   : > { %7088 = vmatprep.subr.bf16.mxu1 %v12127_v21  ;;  %v534_v21 = vld [vmem:[%s18648_s1 + $0x3e0] sm:$0xff] }
 0x20e   : > { %v11982_v41 = vcombine.low %v526_v20, %v534_v21 }
 0x211   : > { %6752 = vmatmul.mubr.bf16.vlgmr.msra.gmra.mrb[0].mxu0 %v15032_v27 }
 0x212   : > { %6761 = vmatpush1.bf16.xpose.msra.mxu0 %v11870_v31  ;;  %6792 = vmatprep.mubr.bf16.mxu0 %v15042_v38  ;;  %v11983_v31 = vcombine.high %v526_v20, %v534_v21  ;;  %v886_v20 = vld [vmem:[%s18648_s1 + $0xee0] sm:$0xff] }
 0x213   : > { %7080 = vmatmul.mubr.bf16.vlgmr.msra.gmra.mrb[0].mxu1 %v15032_v27  ;;  %6762 = vmatprep.subr.bf16.mxu0 %v11887_v34  ;;  %v550_v34 = vld [vmem:[%s18648_s1 + $0x460] sm:$0xff] }
 0x214   : > { %7089 = vmatpush1.bf16.xpose.msra.mxu1 %v12126_v39  ;;  %7120 = vmatprep.mubr.bf16.mxu1 %v15042_v38  ;;  %v542_v39 = vld [vmem:[%s18648_s1 + $0x420] sm:$0xff] }
 0x215   : > { %7090 = vmatprep.subr.bf16.mxu1 %v12143_v37  ;;  %v798_v37 = vld [vmem:[%s18648_s1 + $0xc20] sm:$0xff]  ;;  %v11999_v45 = vcombine.high %v542_v39, %v550_v34  ;;  %v11998_v52 = vcombine.low %v542_v39, %v550_v34 }
 0x216   : > { %v12254_v24 = vcombine.low %v798_v37, %v806_v2  ;;  %v902_v39 = vld [vmem:[%s18648_s1 + $0xf60] sm:$0xff] }
 0x21a   : > { %6763 = vmatpush1.bf16.xpose.msra.mxu0 %v11886_v46  ;;  %v12255_v46 = vcombine.high %v798_v37, %v806_v2 }
 0x21b   : > { %6764 = vmatprep.subr.bf16.mxu0 %v11903_v49  ;;  %v566_v49 = vld [vmem:[%s18648_s1 + $0x4e0] sm:$0xff] }
 0x21c   : > { %7091 = vmatpush1.bf16.xpose.msra.mxu1 %v12142_v48  ;;  %v558_v48 = vld [vmem:[%s18648_s1 + $0x4a0] sm:$0xff] }
 0x21d   : > { %7092 = vmatprep.subr.bf16.mxu1 %v12159_v50  ;;  %v814_v50 = vld [vmem:[%s18648_s1 + $0xca0] sm:$0xff]  ;;  %v12015_v54 = vcombine.high %v558_v48, %v566_v49  ;;  %v12014_v60 = vcombine.low %v558_v48, %v566_v49 }
 0x21e   : > { %v12270_v61 = vcombine.low %v814_v50, %v822_v51  ;;  %v918_v48 = vld [vmem:[%s18648_s1 + $0xfe0] sm:$0xff] }
 0x222   : > { %6765 = vmatpush1.bf16.xpose.msra.mxu0 %v11902_v55  ;;  %v12271_v55 = vcombine.high %v814_v50, %v822_v51 }
 0x223   : > { %6766 = vmatprep.subr.bf16.mxu0 %v11919_v57  ;;  %v582_v57 = vld [vmem:[%s18648_s1 + $0x560] sm:$0xff] }
 0x224   : > { %7093 = vmatpush1.bf16.xpose.msra.mxu1 %v12158_v56  ;;  %v574_v56 = vld [vmem:[%s18648_s1 + $0x520] sm:$0xff] }
 0x225   : > { %7094 = vmatprep.subr.bf16.mxu1 %v12175_v58  ;;  %v830_v58 = vld [vmem:[%s18648_s1 + $0xd20] sm:$0xff]  ;;  %v12031_v62 = vcombine.high %v574_v56, %v582_v57  ;;  %v12030_v5 = vcombine.low %v574_v56, %v582_v57  ;;  %v679_v56 = vld [vmem:[%s18648_s1 + $0x868] sm:$0xff] }
 0x226   : > { %v12286_v6 = vcombine.low %v830_v58, %v838_v59 }
 0x22a   : > { %6767 = vmatpush1.bf16.xpose.msra.mxu0 %v11918_v63  ;;  %v12287_v63 = vcombine.high %v830_v58, %v838_v59 }
 0x22b   : > { %6768 = vmatprep.subr.bf16.mxu0 %v11935_v1  ;;  %v598_v1 = vld [vmem:[%s18648_s1 + $0x5e0] sm:$0xff] }
 0x22c   : > { %7095 = vmatpush1.bf16.xpose.msra.mxu1 %v12174_v0  ;;  %v590_v0 = vld [vmem:[%s18648_s1 + $0x5a0] sm:$0xff] }
 0x22d   : > { %7096 = vmatprep.subr.bf16.mxu1 %v12191_v40  ;;  %v846_v40 = vld [vmem:[%s18648_s1 + $0xda0] sm:$0xff]  ;;  %v12047_v7 = vcombine.high %v590_v0, %v598_v1  ;;  %v12046_v13 = vcombine.low %v590_v0, %v598_v1  ;;  %v15241_v1 = vpack.c.bf16 %v15028_v26, %v15028_v26  ;;  %v447_v26 = vld [vmem:[%s18648_s1 + $0x128] sm:$0xff] }
 0x22e   : > { %v12302_v14 = vcombine.low %v846_v40, %v854_v4 }
 0x232   : > { %6769 = vmatpush1.bf16.xpose.msra.mxu0 %v11934_v8  ;;  %v12303_v8 = vcombine.high %v846_v40, %v854_v4  ;;  %v695_v40 = vld [vmem:[%s18648_s1 + $0x8e8] sm:$0xff] }
 0x233   : > { %6770 = vmatprep.subr.bf16.mxu0 %v11951_v43  ;;  %v614_v43 = vld [vmem:[%s18648_s1 + $0x660] sm:$0xff] }
 0x234   : > { %7097 = vmatpush1.bf16.xpose.msra.mxu1 %v12190_v9  ;;  %v606_v9 = vld [vmem:[%s18648_s1 + $0x620] sm:$0xff] }
 0x235   : > { %7098 = vmatprep.subr.bf16.mxu1 %v12207_v11  ;;  %v862_v11 = vld [vmem:[%s18648_s1 + $0xe20] sm:$0xff]  ;;  %v12063_v15 = vcombine.high %v606_v9, %v614_v43  ;;  %v12062_v21 = vcombine.low %v606_v9, %v614_v43  ;;  %v455_v43 = vld [vmem:[%s18648_s1 + $0x168] sm:$0xff] }
 0x236   : > { %v12318_v23 = vcombine.low %v862_v11, %v870_v12 }
 0x23a   : > { %6771 = vmatpush1.bf16.xpose.msra.mxu0 %v11950_v16  ;;  %v12319_v16 = vcombine.high %v862_v11, %v870_v12  ;;  %v703_v11 = vld [vmem:[%s18648_s1 + $0x928] sm:$0xff] }
 0x23b   : > { %6772 = vmatprep.subr.bf16.mxu0 %v11967_v18  ;;  %v630_v18 = vld [vmem:[%s18648_s1 + $0x6e0] sm:$0xff]  ;;  %v711_v12 = vld [vmem:[%s18648_s1 + $0x968] sm:$0xff] }
 0x23c   : > { %7099 = vmatpush1.bf16.xpose.msra.mxu1 %v12206_v17  ;;  %v622_v17 = vld [vmem:[%s18648_s1 + $0x6a0] sm:$0xff] }
 0x23d   : > { %7100 = vmatprep.subr.bf16.mxu1 %v12223_v19  ;;  %v878_v19 = vld [vmem:[%s18648_s1 + $0xea0] sm:$0xff]  ;;  %v12079_v36 = vcombine.high %v622_v17, %v630_v18  ;;  %v12078_v34 = vcombine.low %v622_v17, %v630_v18  ;;  %v463_v17 = vld [vmem:[%s18648_s1 + $0x1a8] sm:$0xff] }
 0x23e   : > { %v12334_v37 = vcombine.low %v878_v19, %v886_v20  ;;  %v471_v18 = vld [vmem:[%s18648_s1 + $0x1e8] sm:$0xff] }
 0x242   : > { %6773 = vmatpush1.bf16.xpose.msra.mxu0 %v11966_v29  ;;  %v12335_v29 = vcombine.high %v878_v19, %v886_v20  ;;  %v719_v19 = vld [vmem:[%s18648_s1 + $0x9a8] sm:$0xff] }
 0x243   : > { %6774 = vmatprep.subr.bf16.mxu0 %v11983_v31  ;;  %v646_v31 = vld [vmem:[%s18648_s1 + $0x760] sm:$0xff]  ;;  %v727_v20 = vld [vmem:[%s18648_s1 + $0x9e8] sm:$0xff] }
 0x244   : > { %7101 = vmatpush1.bf16.xpose.msra.mxu1 %v12222_v30  ;;  %v638_v30 = vld [vmem:[%s18648_s1 + $0x720] sm:$0xff] }
 0x245   : > { %7102 = vmatprep.subr.bf16.mxu1 %v12239_v32  ;;  %v894_v32 = vld [vmem:[%s18648_s1 + $0xf20] sm:$0xff]  ;;  %v12095_v2 = vcombine.high %v638_v30, %v646_v31  ;;  %v12094_v49 = vcombine.low %v638_v30, %v646_v31  ;;  %v479_v30 = vld [vmem:[%s18648_s1 + $0x228] sm:$0xff] }
 0x246   : > { %v12350_v50 = vcombine.low %v894_v32, %v902_v39  ;;  %v487_v31 = vld [vmem:[%s18648_s1 + $0x268] sm:$0xff] }
 0x24a   : > { %6775 = vmatpush1.bf16.xpose.msra.mxu0 %v11982_v41  ;;  %v12351_v41 = vcombine.high %v894_v32, %v902_v39  ;;  %v735_v32 = vld [vmem:[%s18648_s1 + $0xa28] sm:$0xff] }
 0x24b   : > { %6776 = vmatprep.subr.bf16.mxu0 %v11999_v45  ;;  %v662_v45 = vld [vmem:[%s18648_s1 + $0x7e0] sm:$0xff]  ;;  %v743_v39 = vld [vmem:[%s18648_s1 + $0xa68] sm:$0xff] }
 0x24c   : > { %7103 = vmatpush1.bf16.xpose.msra.mxu1 %v12238_v42  ;;  %v654_v42 = vld [vmem:[%s18648_s1 + $0x7a0] sm:$0xff] }
 0x24d   : > { %7104 = vmatprep.subr.bf16.mxu1 %v12255_v46  ;;  %v910_v46 = vld [vmem:[%s18648_s1 + $0xfa0] sm:$0xff]  ;;  %v12111_v51 = vcombine.high %v654_v42, %v662_v45  ;;  %v12110_v57 = vcombine.low %v654_v42, %v662_v45  ;;  %v495_v42 = vld [vmem:[%s18648_s1 + $0x2a8] sm:$0xff] }
 0x24e   : > { %v12366_v58 = vcombine.low %v910_v46, %v918_v48  ;;  %v503_v45 = vld [vmem:[%s18648_s1 + $0x2e8] sm:$0xff] }
 0x252   : > { %6777 = vmatpush1.bf16.xpose.msra.mxu0 %v11998_v52  ;;  %v12367_v52 = vcombine.high %v910_v46, %v918_v48  ;;  %v751_v46 = vld [vmem:[%s18648_s1 + $0xaa8] sm:$0xff] }
 0x253   : > { %6778 = vmatprep.subr.bf16.mxu0 %v12015_v54  ;;  %v423_v54 = vld [vmem:[%s18648_s1 + $0x68] sm:$0xff] }
 0x254   : > { %7105 = vmatpush1.bf16.xpose.msra.mxu1 %v12254_v24  ;;  %v415_v24 = vld [vmem:[%s18648_s1 + $0x28] sm:$0xff] }
 0x255   : > { %7106 = vmatprep.subr.bf16.mxu1 %v12271_v55  ;;  %v671_v55 = vld [vmem:[%s18648_s1 + $0x828] sm:$0xff]  ;;  %v11873_v59 = vcombine.high %v415_v24, %v423_v54  ;;  %v11872_v4 = vcombine.low %v415_v24, %v423_v54 }
 0x256   : > { %v759_v48 = vld [vmem:[%s18648_s1 + $0xae8] sm:$0xff] }
 0x257   : > { %v511_v24 = vld [vmem:[%s18648_s1 + $0x328] sm:$0xff] }
 0x258   : > { %v519_v54 = vld [vmem:[%s18648_s1 + $0x368] sm:$0xff] }
 0x25a   : > { %6779 = vmatpush1.bf16.xpose.msra.mxu0 %v12014_v60  ;;  %v12129_v60 = vcombine.high %v671_v55, %v679_v56 }
 0x25b   : > { %6780 = vmatprep.subr.bf16.mxu0 %v12031_v62  ;;  %v431_v62 = vld [vmem:[%s18648_s1 + $0xa8] sm:$0xff] }
 0x25c   : > { %7107 = vmatpush1.bf16.xpose.msra.mxu1 %v12270_v61  ;;  %v344_v61 = vcombine.high %v15018_v22, %v15018_v22  ;;  %v687_v22 = vld [vmem:[%s18648_s1 + $0x8a8] sm:$0xff] }
 0x25d   : > { %7108 = vmatprep.subr.bf16.mxu1 %v12287_v63  ;;  %v439_v63 = vld [vmem:[%s18648_s1 + $0xe8] sm:$0xff] }
 0x25e   : > { %v15237_v0 = vrot.slane %v344_v61, %v14211_v35  ;;  %v527_v61 = vld [vmem:[%s18648_s1 + $0x3a8] sm:$0xff] }
 0x262   : > { %6781 = vmatpush1.bf16.xpose.msra.mxu0 %v12030_v5  ;;  %v360_v5 = vcombine.high %v15237_v0, %v15237_v0 }
 0x263   : > { %6782 = vmatprep.subr.bf16.mxu0 %v12047_v7  ;;  %v11889_v7 = vcombine.high %v431_v62, %v439_v63 }
 0x264   : > { %7109 = vmatpush1.bf16.xpose.msra.mxu1 %v12286_v6  ;;  %v12128_v6 = vcombine.low %v671_v55, %v679_v56  ;;  %v15251_v9 = vpack.c.bf16 %v360_v5, %v360_v5  ;;  %v767_v55 = vld [vmem:[%s18648_s1 + $0xb28] sm:$0xff] }
 0x265   : > { %7110 = vmatprep.subr.bf16.mxu1 %v12303_v8  ;;  %v12145_v8 = vcombine.high %v687_v22, %v695_v40  ;;  %v775_v56 = vld [vmem:[%s18648_s1 + $0xb68] sm:$0xff] }
 0x26a   : > { %6783 = vmatpush1.bf16.xpose.msra.mxu0 %v12046_v13  ;;  %v11888_v13 = vcombine.low %v431_v62, %v439_v63  ;;  %v535_v62 = vld [vmem:[%s18648_s1 + $0x3e8] sm:$0xff] }
 0x26b   : > { %6784 = vmatprep.subr.bf16.mxu0 %v12063_v15  ;;  %v11905_v15 = vcombine.high %v447_v26, %v455_v43  ;;  %v783_v63 = vld [vmem:[%s18648_s1 + $0xba8] sm:$0xff]  ;;  %v11985_v5 = vcombine.high %v527_v61, %v535_v62 }
 0x26c   : > { %7111 = vmatpush1.bf16.xpose.msra.mxu1 %v12302_v14  ;;  %v12144_v14 = vcombine.low %v687_v22, %v695_v40  ;;  %v791_v22 = vld [vmem:[%s18648_s1 + $0xbe8] sm:$0xff]  ;;  %v11968_v40 = vcombine.low %v511_v24, %v519_v54 }
 0x26d   : > { %7112 = vmatprep.subr.bf16.mxu1 %v12319_v16  ;;  %v12161_v16 = vcombine.high %v703_v11, %v711_v12 }
 0x272   : > { %6785 = vmatpush1.bf16.xpose.msra.mxu0 %v12062_v21  ;;  %v11904_v21 = vcombine.low %v447_v26, %v455_v43  ;;  %v799_v26 = vld [vmem:[%s18648_s1 + $0xc28] sm:$0xff] }
 0x273   : > { %6786 = vmatprep.subr.bf16.mxu0 %v12079_v36  ;;  %v11921_v36 = vcombine.high %v463_v17, %v471_v18  ;;  %v807_v43 = vld [vmem:[%s18648_s1 + $0xc68] sm:$0xff] }
 0x274   : > { %7113 = vmatpush1.bf16.xpose.msra.mxu1 %v12318_v23  ;;  %v12160_v23 = vcombine.low %v703_v11, %v711_v12  ;;  %v11984_v11 = vcombine.low %v527_v61, %v535_v62  ;;  %v12240_v12 = vcombine.low %v783_v63, %v791_v22  ;;  %v879_v61 = vld [vmem:[%s18648_s1 + $0xea8] sm:$0xff] }
 0x275   : > { %7114 = vmatprep.subr.bf16.mxu1 %v12335_v29  ;;  %v12177_v29 = vcombine.high %v719_v19, %v727_v20  ;;  %v887_v62 = vld [vmem:[%s18648_s1 + $0xee8] sm:$0xff] }
 0x27a   : > { %6787 = vmatpush1.bf16.xpose.msra.mxu0 %v12078_v34  ;;  %v11920_v34 = vcombine.low %v463_v17, %v471_v18  ;;  %v815_v17 = vld [vmem:[%s18648_s1 + $0xca8] sm:$0xff] }
 0x27b   : > { %6788 = vmatprep.subr.bf16.mxu0 %v12095_v2  ;;  %v11937_v2 = vcombine.high %v479_v30, %v487_v31  ;;  %v823_v18 = vld [vmem:[%s18648_s1 + $0xce8] sm:$0xff] }
 0x27c   : > { %7115 = vmatpush1.bf16.xpose.msra.mxu1 %v12334_v37  ;;  %v12176_v37 = vcombine.low %v719_v19, %v727_v20  ;;  %v12256_v20 = vcombine.low %v799_v26, %v807_v43 }
 0x27d   : > { %7116 = vmatprep.subr.bf16.mxu1 %v12351_v41  ;;  %v12193_v41 = vcombine.high %v735_v32, %v743_v39 }
 0x282   : > { %6789 = vmatpush1.bf16.xpose.msra.mxu0 %v12094_v49  ;;  %v11936_v49 = vcombine.low %v479_v30, %v487_v31  ;;  %v831_v30 = vld [vmem:[%s18648_s1 + $0xd28] sm:$0xff] }
 0x283   : > { %6790 = vmatprep.subr.bf16.mxu0 %v12111_v51  ;;  %v11953_v51 = vcombine.high %v495_v42, %v503_v45  ;;  %v839_v31 = vld [vmem:[%s18648_s1 + $0xd68] sm:$0xff] }
 0x284   : > { %7117 = vmatpush1.bf16.xpose.msra.mxu1 %v12350_v50  ;;  %v12192_v50 = vcombine.low %v735_v32, %v743_v39  ;;  %v12272_v39 = vcombine.low %v815_v17, %v823_v18 }
 0x285   : > { %7118 = vmatprep.subr.bf16.mxu1 %v12367_v52  ;;  %v12209_v52 = vcombine.high %v751_v46, %v759_v48 }
 0x28a   : > { %6791 = vmatpush1.bf16.xpose.msra.mxu0 %v12110_v57  ;;  %v11952_v57 = vcombine.low %v495_v42, %v503_v45  ;;  %v847_v42 = vld [vmem:[%s18648_s1 + $0xda8] sm:$0xff] }
 0x28b   : > { %6801 = vmatprep.subr.bf16.mxu0 %v11873_v59  ;;  %v11969_v59 = vcombine.high %v511_v24, %v519_v54  ;;  %v855_v45 = vld [vmem:[%s18648_s1 + $0xde8] sm:$0xff] }
 0x28c   : > { %7119 = vmatpush1.bf16.xpose.msra.mxu1 %v12366_v58  ;;  %v12208_v58 = vcombine.low %v751_v46, %v759_v48  ;;  %v12288_v48 = vcombine.low %v831_v30, %v839_v31  ;;  %v863_v24 = vld [vmem:[%s18648_s1 + $0xe28] sm:$0xff] }
 0x28d   : > { %7129 = vmatprep.subr.bf16.mxu1 %v12129_v60  ;;  %v12225_v60 = vcombine.high %v767_v55, %v775_v56  ;;  %v871_v54 = vld [vmem:[%s18648_s1 + $0xe68] sm:$0xff] }
 0x291   : > { %6793 = vmatmul.mubr.bf16.vlgmr.msra.gmra.mrb[0].mxu0 %v15241_v1 }
 0x292   : > { %6802 = vmatpush1.bf16.xpose.msra.mxu0 %v11872_v4  ;;  %6833 = vmatprep.mubr.bf16.mxu0 %v15251_v9  ;;  %v12224_v4 = vcombine.low %v767_v55, %v775_v56  ;;  %v12304_v56 = vcombine.low %v847_v42, %v855_v45 }
 0x293   : > { %7121 = vmatmul.mubr.bf16.vlgmr.msra.gmra.mrb[0].mxu1 %v15241_v1  ;;  %6803 = vmatprep.subr.bf16.mxu0 %v11889_v7  ;;  %v543_v7 = vld [vmem:[%s18648_s1 + $0x428] sm:$0xff] }
 0x294   : > { %7130 = vmatpush1.bf16.xpose.msra.mxu1 %v12128_v6  ;;  %7161 = vmatprep.mubr.bf16.mxu1 %v15251_v9  ;;  %v12241_v6 = vcombine.high %v783_v63, %v791_v22  ;;  %v12320_v22 = vcombine.low %v863_v24, %v871_v54 }
 0x295   : > { %7131 = vmatprep.subr.bf16.mxu1 %v12145_v8  ;;  %v551_v8 = vld [vmem:[%s18648_s1 + $0x468] sm:$0xff] }
 0x296   : > { %v12000_v19 = vcombine.low %v543_v7, %v551_v8 }
 0x29a   : > { %6804 = vmatpush1.bf16.xpose.msra.mxu0 %v11888_v13  ;;  %v12001_v13 = vcombine.high %v543_v7, %v551_v8  ;;  %v895_v7 = vld [vmem:[%s18648_s1 + $0xf28] sm:$0xff] }
 0x29b   : > { %6805 = vmatprep.subr.bf16.mxu0 %v11905_v15  ;;  %v559_v15 = vld [vmem:[%s18648_s1 + $0x4a8] sm:$0xff] }
 0x29c   : > { %7132 = vmatpush1.bf16.xpose.msra.mxu1 %v12144_v14  ;;  %v12257_v14 = vcombine.high %v799_v26, %v807_v43  ;;  %v903_v8 = vld [vmem:[%s18648_s1 + $0xf68] sm:$0xff]  ;;  %v12336_v43 = vcombine.low %v879_v61, %v887_v62 }
 0x29d   : > { %7133 = vmatprep.subr.bf16.mxu1 %v12161_v16  ;;  %v567_v16 = vld [vmem:[%s18648_s1 + $0x4e8] sm:$0xff] }
 0x29e   : > { %v12016_v32 = vcombine.low %v559_v15, %v567_v16 }
 0x2a2   : > { %6806 = vmatpush1.bf16.xpose.msra.mxu0 %v11904_v21  ;;  %v12017_v21 = vcombine.high %v559_v15, %v567_v16  ;;  %v911_v15 = vld [vmem:[%s18648_s1 + $0xfa8] sm:$0xff] }
 0x2a3   : > { %6807 = vmatprep.subr.bf16.mxu0 %v11921_v36  ;;  %v575_v36 = vld [vmem:[%s18648_s1 + $0x528] sm:$0xff] }
 0x2a4   : > { %7134 = vmatpush1.bf16.xpose.msra.mxu1 %v12160_v23  ;;  %v12273_v23 = vcombine.high %v815_v17, %v823_v18  ;;  %v919_v16 = vld [vmem:[%s18648_s1 + $0xfe8] sm:$0xff]  ;;  %v12352_v18 = vcombine.low %v895_v7, %v903_v8 }
 0x2a5   : > { %7135 = vmatprep.subr.bf16.mxu1 %v12177_v29  ;;  %v583_v29 = vld [vmem:[%s18648_s1 + $0x568] sm:$0xff] }
 0x2a6   : > { %v12032_v46 = vcombine.low %v575_v36, %v583_v29 }
 0x2aa   : > { %6808 = vmatpush1.bf16.xpose.msra.mxu0 %v11920_v34  ;;  %v12033_v34 = vcombine.high %v575_v36, %v583_v29  ;;  %v672_v36 = vld [vmem:[%s18648_s1 + $0x830] sm:$0xff] }
 0x2ab   : > { %6809 = vmatprep.subr.bf16.mxu0 %v11937_v2  ;;  %v591_v2 = vld [vmem:[%s18648_s1 + $0x5a8] sm:$0xff]  ;;  %v680_v29 = vld [vmem:[%s18648_s1 + $0x870] sm:$0xff] }
 0x2ac   : > { %7136 = vmatpush1.bf16.xpose.msra.mxu1 %v12176_v37  ;;  %v12289_v37 = vcombine.high %v831_v30, %v839_v31  ;;  %v12368_v31 = vcombine.low %v911_v15, %v919_v16 }
 0x2ad   : > { %7137 = vmatprep.subr.bf16.mxu1 %v12193_v41  ;;  %v599_v41 = vld [vmem:[%s18648_s1 + $0x5e8] sm:$0xff] }
 0x2ae   : > { %v12048_v55 = vcombine.low %v591_v2, %v599_v41 }
 0x2b2   : > { %6810 = vmatpush1.bf16.xpose.msra.mxu0 %v11936_v49  ;;  %v12049_v49 = vcombine.high %v591_v2, %v599_v41  ;;  %v440_v2 = vld [vmem:[%s18648_s1 + $0xf0] sm:$0xff] }
 0x2b3   : > { %6811 = vmatprep.subr.bf16.mxu0 %v11953_v51  ;;  %v607_v51 = vld [vmem:[%s18648_s1 + $0x628] sm:$0xff] }
 0x2b4   : > { %7138 = vmatpush1.bf16.xpose.msra.mxu1 %v12192_v50  ;;  %v12305_v50 = vcombine.high %v847_v42, %v855_v45  ;;  %v15454_v42 = vpack.c.bf16 %v15237_v0, %v15237_v0  ;;  %v688_v45 = vld [vmem:[%s18648_s1 + $0x8b0] sm:$0xff] }
 0x2b5   : > { %7139 = vmatprep.subr.bf16.mxu1 %v12209_v52  ;;  %v615_v52 = vld [vmem:[%s18648_s1 + $0x668] sm:$0xff]  ;;  %v448_v0 = vld [vmem:[%s18648_s1 + $0x130] sm:$0xff] }
 0x2b6   : > { %v12064_v63 = vcombine.low %v607_v51, %v615_v52 }
 0x2ba   : > { %6812 = vmatpush1.bf16.xpose.msra.mxu0 %v11952_v57  ;;  %v12065_v57 = vcombine.high %v607_v51, %v615_v52 }
 0x2bb   : > { %6813 = vmatprep.subr.bf16.mxu0 %v11969_v59  ;;  %v623_v59 = vld [vmem:[%s18648_s1 + $0x6a8] sm:$0xff] }
 0x2bc   : > { %7140 = vmatpush1.bf16.xpose.msra.mxu1 %v12208_v58  ;;  %v12321_v58 = vcombine.high %v863_v24, %v871_v54  ;;  %v456_v54 = vld [vmem:[%s18648_s1 + $0x170] sm:$0xff] }
 0x2bd   : > { %7141 = vmatprep.subr.bf16.mxu1 %v12225_v60  ;;  %v631_v60 = vld [vmem:[%s18648_s1 + $0x6e8] sm:$0xff] }
 0x2be   : > { %v12080_v26 = vcombine.low %v623_v59, %v631_v60 }
 0x2c2   : > { %6814 = vmatpush1.bf16.xpose.msra.mxu0 %v11968_v40  ;;  %v12081_v40 = vcombine.high %v623_v59, %v631_v60  ;;  %v11907_v59 = vcombine.high %v448_v0, %v456_v54 }
 0x2c3   : > { %6815 = vmatprep.subr.bf16.mxu0 %v11985_v5  ;;  %v639_v5 = vld [vmem:[%s18648_s1 + $0x728] sm:$0xff] }
 0x2c4   : > { %7142 = vmatpush1.bf16.xpose.msra.mxu1 %v12224_v4  ;;  %v12337_v4 = vcombine.high %v879_v61, %v887_v62  ;;  %v464_v61 = vld [vmem:[%s18648_s1 + $0x1b0] sm:$0xff] }
 0x2c5   : > { %7143 = vmatprep.subr.bf16.mxu1 %v12241_v6  ;;  %v647_v6 = vld [vmem:[%s18648_s1 + $0x768] sm:$0xff]  ;;  %v472_v62 = vld [vmem:[%s18648_s1 + $0x1f0] sm:$0xff] }
 0x2c6   : > { %v12096_v17 = vcombine.low %v639_v5, %v647_v6 }
 0x2ca   : > { %6816 = vmatpush1.bf16.xpose.msra.mxu0 %v11984_v11  ;;  %v12097_v11 = vcombine.high %v639_v5, %v647_v6  ;;  %v11923_v5 = vcombine.high %v464_v61, %v472_v62 }
 0x2cb   : > { %6817 = vmatprep.subr.bf16.mxu0 %v12001_v13  ;;  %v655_v13 = vld [vmem:[%s18648_s1 + $0x7a8] sm:$0xff] }
 0x2cc   : > { %7144 = vmatpush1.bf16.xpose.msra.mxu1 %v12240_v12  ;;  %v12353_v12 = vcombine.high %v895_v7, %v903_v8  ;;  %v480_v7 = vld [vmem:[%s18648_s1 + $0x230] sm:$0xff] }
 0x2cd   : > { %7145 = vmatprep.subr.bf16.mxu1 %v12257_v14  ;;  %v663_v14 = vld [vmem:[%s18648_s1 + $0x7e8] sm:$0xff]  ;;  %v488_v8 = vld [vmem:[%s18648_s1 + $0x270] sm:$0xff] }
 0x2ce   : > { %v12112_v30 = vcombine.low %v655_v13, %v663_v14 }
 0x2d2   : > { %6818 = vmatpush1.bf16.xpose.msra.mxu0 %v12000_v19  ;;  %v12113_v19 = vcombine.high %v655_v13, %v663_v14  ;;  %v11939_v13 = vcombine.high %v480_v7, %v488_v8 }
 0x2d3   : > { %6819 = vmatprep.subr.bf16.mxu0 %v12017_v21  ;;  %v416_v21 = vld [vmem:[%s18648_s1 + $0x30] sm:$0xff] }
 0x2d4   : > { %7146 = vmatpush1.bf16.xpose.msra.mxu1 %v12256_v20  ;;  %v12369_v20 = vcombine.high %v911_v15, %v919_v16  ;;  %v496_v15 = vld [vmem:[%s18648_s1 + $0x2b0] sm:$0xff] }
 0x2d5   : > { %7147 = vmatprep.subr.bf16.mxu1 %v12273_v23  ;;  %v424_v23 = vld [vmem:[%s18648_s1 + $0x70] sm:$0xff] }
 0x2d6   : > { %v504_v16 = vld [vmem:[%s18648_s1 + $0x2f0] sm:$0xff] }
 0x2da   : > { %6820 = vmatpush1.bf16.xpose.msra.mxu0 %v12016_v32  ;;  %v11875_v32 = vcombine.high %v416_v21, %v424_v23 }
 0x2db   : > { %6821 = vmatprep.subr.bf16.mxu0 %v12033_v34  ;;  %v15440_v34 = vld [vmem:[%s18647_s0 + $0x18] sm:$0xff] }
 0x2dc   : > { %7148 = vmatpush1.bf16.xpose.msra.mxu1 %v12272_v39  ;;  %v12131_v39 = vcombine.high %v672_v36, %v680_v29  ;;  %v15450_v41 = vrot.slane %v15440_v34, %v14211_v35 }
 0x2dd   : > { %7149 = vmatprep.subr.bf16.mxu1 %v12289_v37  ;;  %v432_v37 = vld [vmem:[%s18648_s1 + $0xb0] sm:$0xff] }
 0x2de   : > { %v11891_v51 = vcombine.high %v432_v37, %v440_v2 }
 0x2e2   : > { %6822 = vmatpush1.bf16.xpose.msra.mxu0 %v12032_v46  ;;  %v696_v46 = vld [vmem:[%s18648_s1 + $0x8f0] sm:$0xff] }
 0x2e3   : > { %6823 = vmatprep.subr.bf16.mxu0 %v12049_v49  ;;  %v376_v49 = vcombine.high %v15450_v41, %v15450_v41  ;;  %v12147_v52 = vcombine.high %v688_v45, %v696_v46 }
 0x2e4   : > { %7150 = vmatpush1.bf16.xpose.msra.mxu1 %v12288_v48  ;;  %v11874_v48 = vcombine.low %v416_v21, %v424_v23  ;;  %v11955_v21 = vcombine.high %v496_v15, %v504_v16 }
 0x2e5   : > { %7151 = vmatprep.subr.bf16.mxu1 %v12305_v50  ;;  %v12130_v50 = vcombine.low %v672_v36, %v680_v29  ;;  %v15464_v24 = vpack.c.bf16 %v376_v49, %v376_v49  ;;  %v512_v36 = vld [vmem:[%s18648_s1 + $0x330] sm:$0xff] }
 0x2e6   : > { %v520_v29 = vld [vmem:[%s18648_s1 + $0x370] sm:$0xff] }
 0x2e7   : > { %v792_v49 = vld [vmem:[%s18648_s1 + $0xbf0] sm:$0xff] }
 0x2ea   : > { %6824 = vmatpush1.bf16.xpose.msra.mxu0 %v12048_v55  ;;  %v704_v55 = vld [vmem:[%s18648_s1 + $0x930] sm:$0xff] }
 0x2eb   : > { %6825 = vmatprep.subr.bf16.mxu0 %v12065_v57  ;;  %v11890_v57 = vcombine.low %v432_v37, %v440_v2  ;;  %v11971_v37 = vcombine.high %v512_v36, %v520_v29 }
 0x2ec   : > { %7152 = vmatpush1.bf16.xpose.msra.mxu1 %v12304_v56  ;;  %v712_v56 = vld [vmem:[%s18648_s1 + $0x970] sm:$0xff] }
 0x2ed   : > { %7153 = vmatprep.subr.bf16.mxu1 %v12321_v58  ;;  %v12146_v58 = vcombine.low %v688_v45, %v696_v46  ;;  %v12163_v60 = vcombine.high %v704_v55, %v712_v56  ;;  %v528_v45 = vld [vmem:[%s18648_s1 + $0x3b0] sm:$0xff] }
 0x2ee   : > { %v536_v46 = vld [vmem:[%s18648_s1 + $0x3f0] sm:$0xff] }
 0x2f2   : > { %6826 = vmatpush1.bf16.xpose.msra.mxu0 %v12064_v63  ;;  %v720_v63 = vld [vmem:[%s18648_s1 + $0x9b0] sm:$0xff] }
 0x2f3   : > { %6827 = vmatprep.subr.bf16.mxu0 %v12081_v40  ;;  %v11906_v40 = vcombine.low %v448_v0, %v456_v54  ;;  %v544_v54 = vld [vmem:[%s18648_s1 + $0x430] sm:$0xff] }
 0x2f4   : > { %7154 = vmatpush1.bf16.xpose.msra.mxu1 %v12320_v22  ;;  %v728_v22 = vld [vmem:[%s18648_s1 + $0x9f0] sm:$0xff] }
 0x2f5   : > { %7155 = vmatprep.subr.bf16.mxu1 %v12337_v4  ;;  %v12162_v4 = vcombine.low %v704_v55, %v712_v56  ;;  %v12179_v6 = vcombine.high %v720_v63, %v728_v22  ;;  %v552_v55 = vld [vmem:[%s18648_s1 + $0x470] sm:$0xff] }
 0x2f6   : > { %v800_v56 = vld [vmem:[%s18648_s1 + $0xc30] sm:$0xff] }
 0x2fa   : > { %6828 = vmatpush1.bf16.xpose.msra.mxu0 %v12080_v26  ;;  %v736_v26 = vld [vmem:[%s18648_s1 + $0xa30] sm:$0xff] }
 0x2fb   : > { %6829 = vmatprep.subr.bf16.mxu0 %v12097_v11  ;;  %v11922_v11 = vcombine.low %v464_v61, %v472_v62  ;;  %v560_v62 = vld [vmem:[%s18648_s1 + $0x4b0] sm:$0xff] }
 0x2fc   : > { %7156 = vmatpush1.bf16.xpose.msra.mxu1 %v12336_v43  ;;  %v744_v43 = vld [vmem:[%s18648_s1 + $0xa70] sm:$0xff] }
 0x2fd   : > { %7157 = vmatprep.subr.bf16.mxu1 %v12353_v12  ;;  %v12178_v12 = vcombine.low %v720_v63, %v728_v22  ;;  %v12195_v14 = vcombine.high %v736_v26, %v744_v43  ;;  %v568_v63 = vld [vmem:[%s18648_s1 + $0x4f0] sm:$0xff] }
 0x2fe   : > { %v816_v22 = vld [vmem:[%s18648_s1 + $0xcb0] sm:$0xff] }
 0x302   : > { %6830 = vmatpush1.bf16.xpose.msra.mxu0 %v12096_v17  ;;  %v752_v17 = vld [vmem:[%s18648_s1 + $0xab0] sm:$0xff] }
 0x303   : > { %6831 = vmatprep.subr.bf16.mxu0 %v12113_v19  ;;  %v11938_v19 = vcombine.low %v480_v7, %v488_v8  ;;  %v576_v8 = vld [vmem:[%s18648_s1 + $0x530] sm:$0xff] }
 0x304   : > { %7158 = vmatpush1.bf16.xpose.msra.mxu1 %v12352_v18  ;;  %v760_v18 = vld [vmem:[%s18648_s1 + $0xaf0] sm:$0xff] }
 0x305   : > { %7159 = vmatprep.subr.bf16.mxu1 %v12369_v20  ;;  %v12194_v20 = vcombine.low %v736_v26, %v744_v43  ;;  %v12211_v23 = vcombine.high %v752_v17, %v760_v18  ;;  %v584_v26 = vld [vmem:[%s18648_s1 + $0x570] sm:$0xff] }
 0x306   : > { %v832_v43 = vld [vmem:[%s18648_s1 + $0xd30] sm:$0xff] }
 0x30a   : > { %6832 = vmatpush1.bf16.xpose.msra.mxu0 %v12112_v30  ;;  %v768_v30 = vld [vmem:[%s18648_s1 + $0xb30] sm:$0xff] }
 0x30b   : > { %6842 = vmatprep.subr.bf16.mxu0 %v11875_v32  ;;  %v11954_v32 = vcombine.low %v496_v15, %v504_v16  ;;  %v592_v16 = vld [vmem:[%s18648_s1 + $0x5b0] sm:$0xff] }
 0x30c   : > { %7160 = vmatpush1.bf16.xpose.msra.mxu1 %v12368_v31  ;;  %v776_v31 = vld [vmem:[%s18648_s1 + $0xb70] sm:$0xff] }
 0x30d   : > { %7170 = vmatprep.subr.bf16.mxu1 %v12131_v39  ;;  %v12210_v39 = vcombine.low %v752_v17, %v760_v18  ;;  %v12227_v2 = vcombine.high %v768_v30, %v776_v31  ;;  %v600_v17 = vld [vmem:[%s18648_s1 + $0x5f0] sm:$0xff] }
 0x30e   : > { %v848_v18 = vld [vmem:[%s18648_s1 + $0xdb0] sm:$0xff] }
 0x311   : > { %6834 = vmatmul.mubr.bf16.vlgmr.msra.gmra.mrb[0].mxu0 %v15454_v42 }
 0x312   : > { %6843 = vmatpush1.bf16.xpose.msra.mxu0 %v11874_v48  ;;  %6874 = vmatprep.mubr.bf16.mxu0 %v15464_v24  ;;  %v784_v48 = vld [vmem:[%s18648_s1 + $0xbb0] sm:$0xff] }
 0x313   : > { %7162 = vmatmul.mubr.bf16.vlgmr.msra.gmra.mrb[0].mxu1 %v15454_v42  ;;  %6844 = vmatprep.subr.bf16.mxu0 %v11891_v51  ;;  %v12226_v51 = vcombine.low %v768_v30, %v776_v31  ;;  %v12243_v0 = vcombine.high %v784_v48, %v792_v49  ;;  %v616_v30 = vld [vmem:[%s18648_s1 + $0x670] sm:$0xff] }
 0x314   : > { %7171 = vmatpush1.bf16.xpose.msra.mxu1 %v12130_v50  ;;  %7202 = vmatprep.mubr.bf16.mxu1 %v15464_v24  ;;  %v11970_v50 = vcombine.low %v512_v36, %v520_v29  ;;  %v608_v29 = vld [vmem:[%s18648_s1 + $0x630] sm:$0xff] }
 0x315   : > { %7172 = vmatprep.subr.bf16.mxu1 %v12147_v52  ;;  %v11987_v52 = vcombine.high %v528_v45, %v536_v46  ;;  %v864_v31 = vld [vmem:[%s18648_s1 + $0xe30] sm:$0xff] }
 0x31a   : > { %6845 = vmatpush1.bf16.xpose.msra.mxu0 %v11890_v57  ;;  %v808_v57 = vld [vmem:[%s18648_s1 + $0xc70] sm:$0xff] }
 0x31b   : > { %6846 = vmatprep.subr.bf16.mxu0 %v11907_v59  ;;  %v12242_v59 = vcombine.low %v784_v48, %v792_v49  ;;  %v12259_v61 = vcombine.high %v800_v56, %v808_v57  ;;  %v632_v48 = vld [vmem:[%s18648_s1 + $0x6f0] sm:$0xff] }
 0x31c   : > { %7173 = vmatpush1.bf16.xpose.msra.mxu1 %v12146_v58  ;;  %v11986_v58 = vcombine.low %v528_v45, %v536_v46  ;;  %v624_v46 = vld [vmem:[%s18648_s1 + $0x6b0] sm:$0xff] }
 0x31d   : > { %7174 = vmatprep.subr.bf16.mxu1 %v12163_v60  ;;  %v12003_v60 = vcombine.high %v544_v54, %v552_v55  ;;  %v880_v49 = vld [vmem:[%s18648_s1 + $0xeb0] sm:$0xff] }
 0x322   : > { %6847 = vmatpush1.bf16.xpose.msra.mxu0 %v11906_v40  ;;  %v824_v40 = vld [vmem:[%s18648_s1 + $0xcf0] sm:$0xff] }
 0x323   : > { %6848 = vmatprep.subr.bf16.mxu0 %v11923_v5  ;;  %v12258_v5 = vcombine.low %v800_v56, %v808_v57  ;;  %v12275_v7 = vcombine.high %v816_v22, %v824_v40  ;;  %v648_v56 = vld [vmem:[%s18648_s1 + $0x770] sm:$0xff] }
 0x324   : > { %7175 = vmatpush1.bf16.xpose.msra.mxu1 %v12162_v4  ;;  %v12002_v4 = vcombine.low %v544_v54, %v552_v55  ;;  %v640_v55 = vld [vmem:[%s18648_s1 + $0x730] sm:$0xff] }
 0x325   : > { %7176 = vmatprep.subr.bf16.mxu1 %v12179_v6  ;;  %v12019_v6 = vcombine.high %v560_v62, %v568_v63  ;;  %v896_v57 = vld [vmem:[%s18648_s1 + $0xf30] sm:$0xff] }
 0x32a   : > { %6849 = vmatpush1.bf16.xpose.msra.mxu0 %v11922_v11  ;;  %v840_v11 = vld [vmem:[%s18648_s1 + $0xd70] sm:$0xff] }
 0x32b   : > { %6850 = vmatprep.subr.bf16.mxu0 %v11939_v13  ;;  %v12274_v13 = vcombine.low %v816_v22, %v824_v40  ;;  %v12291_v15 = vcombine.high %v832_v43, %v840_v11  ;;  %v664_v22 = vld [vmem:[%s18648_s1 + $0x7f0] sm:$0xff] }
 0x32c   : > { %7177 = vmatpush1.bf16.xpose.msra.mxu1 %v12178_v12  ;;  %v12018_v12 = vcombine.low %v560_v62, %v568_v63  ;;  %v656_v63 = vld [vmem:[%s18648_s1 + $0x7b0] sm:$0xff] }
 0x32d   : > { %7178 = vmatprep.subr.bf16.mxu1 %v12195_v14  ;;  %v12035_v14 = vcombine.high %v576_v8, %v584_v26  ;;  %v912_v40 = vld [vmem:[%s18648_s1 + $0xfb0] sm:$0xff] }
 0x332   : > { %6851 = vmatpush1.bf16.xpose.msra.mxu0 %v11938_v19  ;;  %v856_v19 = vld [vmem:[%s18648_s1 + $0xdf0] sm:$0xff] }
 0x333   : > { %6852 = vmatprep.subr.bf16.mxu0 %v11955_v21  ;;  %v12290_v21 = vcombine.low %v832_v43, %v840_v11  ;;  %v12307_v36 = vcombine.high %v848_v18, %v856_v19  ;;  %v425_v43 = vld [vmem:[%s18648_s1 + $0x78] sm:$0xff] }
 0x334   : > { %7179 = vmatpush1.bf16.xpose.msra.mxu1 %v12194_v20  ;;  %v12034_v20 = vcombine.low %v576_v8, %v584_v26  ;;  %v417_v26 = vld [vmem:[%s18648_s1 + $0x38] sm:$0xff] }
 0x335   : > { %7180 = vmatprep.subr.bf16.mxu1 %v12211_v23  ;;  %v12051_v23 = vcombine.high %v592_v16, %v600_v17  ;;  %v673_v11 = vld [vmem:[%s18648_s1 + $0x838] sm:$0xff] }
 0x33a   : > { %6853 = vmatpush1.bf16.xpose.msra.mxu0 %v11954_v32  ;;  %v872_v32 = vld [vmem:[%s18648_s1 + $0xe70] sm:$0xff] }
 0x33b   : > { %6854 = vmatprep.subr.bf16.mxu0 %v11971_v37  ;;  %v12306_v37 = vcombine.low %v848_v18, %v856_v19  ;;  %v12323_v45 = vcombine.high %v864_v31, %v872_v32  ;;  %v433_v19 = vld [vmem:[%s18648_s1 + $0xb8] sm:$0xff] }
 0x33c   : > { %7181 = vmatpush1.bf16.xpose.msra.mxu1 %v12210_v39  ;;  %v12050_v39 = vcombine.low %v592_v16, %v600_v17  ;;  %v361_v17 = vcombine.high %v15440_v34, %v15440_v34  ;;  %v689_v34 = vld [vmem:[%s18648_s1 + $0x8b8] sm:$0xff] }
 0x33d   : > { %7182 = vmatprep.subr.bf16.mxu1 %v12227_v2  ;;  %v12067_v2 = vcombine.high %v608_v29, %v616_v30 }
 0x33e   : > { %v15653_v18 = vrot.slane %v361_v17, %v14211_v35 }
 0x342   : > { %6855 = vmatpush1.bf16.xpose.msra.mxu0 %v11970_v50  ;;  %v888_v50 = vld [vmem:[%s18648_s1 + $0xef0] sm:$0xff] }
 0x343   : > { %6856 = vmatprep.subr.bf16.mxu0 %v11987_v52  ;;  %v12322_v52 = vcombine.low %v864_v31, %v872_v32  ;;  %v12339_v54 = vcombine.high %v880_v49, %v888_v50 }
 0x344   : > { %7183 = vmatpush1.bf16.xpose.msra.mxu1 %v12226_v51  ;;  %v12066_v51 = vcombine.low %v608_v29, %v616_v30  ;;  %v11876_v29 = vcombine.low %v417_v26, %v425_v43 }
 0x345   : > { %7184 = vmatprep.subr.bf16.mxu1 %v12243_v0  ;;  %v12083_v0 = vcombine.high %v624_v46, %v632_v48 }
 0x34a   : > { %6857 = vmatpush1.bf16.xpose.msra.mxu0 %v11986_v58  ;;  %v904_v58 = vld [vmem:[%s18648_s1 + $0xf70] sm:$0xff] }
 0x34b   : > { %6858 = vmatprep.subr.bf16.mxu0 %v12003_v60  ;;  %v12338_v60 = vcombine.low %v880_v49, %v888_v50  ;;  %v12355_v62 = vcombine.high %v896_v57, %v904_v58 }
 0x34c   : > { %7185 = vmatpush1.bf16.xpose.msra.mxu1 %v12242_v59  ;;  %v12082_v59 = vcombine.low %v624_v46, %v632_v48 }
 0x34d   : > { %7186 = vmatprep.subr.bf16.mxu1 %v12259_v61  ;;  %v12099_v61 = vcombine.high %v640_v55, %v648_v56 }
 0x352   : > { %6859 = vmatpush1.bf16.xpose.msra.mxu0 %v12002_v4  ;;  %v920_v4 = vld [vmem:[%s18648_s1 + $0xff0] sm:$0xff] }
 0x353   : > { %6860 = vmatprep.subr.bf16.mxu0 %v12019_v6  ;;  %v12354_v6 = vcombine.low %v896_v57, %v904_v58  ;;  %v12371_v8 = vcombine.high %v912_v40, %v920_v4 }
 0x354   : > { %7187 = vmatpush1.bf16.xpose.msra.mxu1 %v12258_v5  ;;  %v12098_v5 = vcombine.low %v640_v55, %v648_v56 }
 0x355   : > { %7188 = vmatprep.subr.bf16.mxu1 %v12275_v7  ;;  %v12115_v7 = vcombine.high %v656_v63, %v664_v22 }
 0x35a   : > { %6861 = vmatpush1.bf16.xpose.msra.mxu0 %v12018_v12  ;;  %v681_v12 = vld [vmem:[%s18648_s1 + $0x878] sm:$0xff] }
 0x35b   : > { %6862 = vmatprep.subr.bf16.mxu0 %v12035_v14  ;;  %v12370_v14 = vcombine.low %v912_v40, %v920_v4  ;;  %v12133_v16 = vcombine.high %v673_v11, %v681_v12  ;;  %v12132_v30 = vcombine.low %v673_v11, %v681_v12 }
 0x35c   : > { %7189 = vmatpush1.bf16.xpose.msra.mxu1 %v12274_v13  ;;  %v12114_v13 = vcombine.low %v656_v63, %v664_v22 }
 0x35d   : > { %7190 = vmatprep.subr.bf16.mxu1 %v12291_v15  ;;  %v11877_v15 = vcombine.high %v417_v26, %v425_v43 }
 0x362   : > { %6863 = vmatpush1.bf16.xpose.msra.mxu0 %v12034_v20  ;;  %v441_v20 = vld [vmem:[%s18648_s1 + $0xf8] sm:$0xff] }
 0x363   : > { %6864 = vmatprep.subr.bf16.mxu0 %v12051_v23  ;;  %v697_v23 = vld [vmem:[%s18648_s1 + $0x8f8] sm:$0xff]  ;;  %v11893_v31 = vcombine.high %v433_v19, %v441_v20  ;;  %v11892_v46 = vcombine.low %v433_v19, %v441_v20 }
 0x364   : > { %7191 = vmatpush1.bf16.xpose.msra.mxu1 %v12290_v21  ;;  %v15663_v21 = vpack.c.bf16 %v15450_v41, %v15450_v41  ;;  %v12149_v32 = vcombine.high %v689_v34, %v697_v23  ;;  %v449_v41 = vld [vmem:[%s18648_s1 + $0x138] sm:$0xff]  ;;  %v12148_v48 = vcombine.low %v689_v34, %v697_v23 }
 0x365   : > { %7192 = vmatprep.subr.bf16.mxu1 %v12307_v36  ;;  %v377_v36 = vcombine.high %v15653_v18, %v15653_v18  ;;  %v529_v23 = vld [vmem:[%s18648_s1 + $0x3b8] sm:$0xff] }
 0x36a   : > { %6865 = vmatpush1.bf16.xpose.msra.mxu0 %v12050_v39  ;;  %v15673_v39 = vpack.c.bf16 %v377_v36, %v377_v36  ;;  %v537_v36 = vld [vmem:[%s18648_s1 + $0x3f8] sm:$0xff] }
 0x36b   : > { %6866 = vmatprep.subr.bf16.mxu0 %v12067_v2  ;;  %v705_v2 = vld [vmem:[%s18648_s1 + $0x938] sm:$0xff] }
 0x36c   : > { %7193 = vmatpush1.bf16.xpose.msra.mxu1 %v12306_v37  ;;  %v457_v37 = vld [vmem:[%s18648_s1 + $0x178] sm:$0xff] }
 0x36d   : > { %7194 = vmatprep.subr.bf16.mxu1 %v12323_v45  ;;  %v713_v45 = vld [vmem:[%s18648_s1 + $0x978] sm:$0xff]  ;;  %v11909_v49 = vcombine.high %v449_v41, %v457_v37  ;;  %v11908_v55 = vcombine.low %v449_v41, %v457_v37  ;;  %v11989_v41 = vcombine.high %v529_v23, %v537_v36 }
 0x36e   : > { %v12165_v50 = vcombine.high %v705_v2, %v713_v45  ;;  %v12164_v56 = vcombine.low %v705_v2, %v713_v45  ;;  %v545_v2 = vld [vmem:[%s18648_s1 + $0x438] sm:$0xff] }
 0x36f   : > { %v553_v45 = vld [vmem:[%s18648_s1 + $0x478] sm:$0xff] }
 0x372   : > { %6867 = vmatpush1.bf16.xpose.msra.mxu0 %v12066_v51  ;;  %v465_v51 = vld [vmem:[%s18648_s1 + $0x1b8] sm:$0xff] }
 0x373   : > { %6868 = vmatprep.subr.bf16.mxu0 %v12083_v0  ;;  %v721_v0 = vld [vmem:[%s18648_s1 + $0x9b8] sm:$0xff] }
 0x374   : > { %7195 = vmatpush1.bf16.xpose.msra.mxu1 %v12322_v52  ;;  %v473_v52 = vld [vmem:[%s18648_s1 + $0x1f8] sm:$0xff] }
 0x375   : > { %7196 = vmatprep.subr.bf16.mxu1 %v12339_v54  ;;  %v729_v54 = vld [vmem:[%s18648_s1 + $0x9f8] sm:$0xff]  ;;  %v11925_v57 = vcombine.high %v465_v51, %v473_v52  ;;  %v11924_v63 = vcombine.low %v465_v51, %v473_v52  ;;  %v12005_v51 = vcombine.high %v545_v2, %v553_v45 }
 0x376   : > { %v12181_v58 = vcombine.high %v721_v0, %v729_v54  ;;  %v12180_v22 = vcombine.low %v721_v0, %v729_v54  ;;  %v561_v0 = vld [vmem:[%s18648_s1 + $0x4b8] sm:$0xff] }
 0x377   : > { %v569_v54 = vld [vmem:[%s18648_s1 + $0x4f8] sm:$0xff] }
 0x37a   : > { %6869 = vmatpush1.bf16.xpose.msra.mxu0 %v12082_v59  ;;  %v481_v59 = vld [vmem:[%s18648_s1 + $0x238] sm:$0xff] }
 0x37b   : > { %6870 = vmatprep.subr.bf16.mxu0 %v12099_v61  ;;  %v737_v61 = vld [vmem:[%s18648_s1 + $0xa38] sm:$0xff] }
 0x37c   : > { %7197 = vmatpush1.bf16.xpose.msra.mxu1 %v12338_v60  ;;  %v489_v60 = vld [vmem:[%s18648_s1 + $0x278] sm:$0xff] }
 0x37d   : > { %7198 = vmatprep.subr.bf16.mxu1 %v12355_v62  ;;  %v745_v62 = vld [vmem:[%s18648_s1 + $0xa78] sm:$0xff]  ;;  %v11941_v40 = vcombine.high %v481_v59, %v489_v60  ;;  %v11940_v26 = vcombine.low %v481_v59, %v489_v60  ;;  %v12021_v59 = vcombine.high %v561_v0, %v569_v54 }
 0x37e   : > { %v12197_v4 = vcombine.high %v737_v61, %v745_v62  ;;  %v12196_v43 = vcombine.low %v737_v61, %v745_v62  ;;  %v577_v61 = vld [vmem:[%s18648_s1 + $0x538] sm:$0xff] }
 0x37f   : > { %v585_v62 = vld [vmem:[%s18648_s1 + $0x578] sm:$0xff] }
 0x382   : > { %6871 = vmatpush1.bf16.xpose.msra.mxu0 %v12098_v5  ;;  %v497_v5 = vld [vmem:[%s18648_s1 + $0x2b8] sm:$0xff] }
 0x383   : > { %6872 = vmatprep.subr.bf16.mxu0 %v12115_v7  ;;  %v753_v7 = vld [vmem:[%s18648_s1 + $0xab8] sm:$0xff] }
 0x384   : > { %7199 = vmatpush1.bf16.xpose.msra.mxu1 %v12354_v6  ;;  %v505_v6 = vld [vmem:[%s18648_s1 + $0x2f8] sm:$0xff] }
 0x385   : > { %7200 = vmatprep.subr.bf16.mxu1 %v12371_v8  ;;  %v761_v8 = vld [vmem:[%s18648_s1 + $0xaf8] sm:$0xff]  ;;  %v11957_v11 = vcombine.high %v497_v5, %v505_v6  ;;  %v11956_v17 = vcombine.low %v497_v5, %v505_v6  ;;  %v12037_v5 = vcombine.high %v577_v61, %v585_v62 }
 0x386   : > { %v12213_v12 = vcombine.high %v753_v7, %v761_v8  ;;  %v12212_v19 = vcombine.low %v753_v7, %v761_v8  ;;  %v593_v7 = vld [vmem:[%s18648_s1 + $0x5b8] sm:$0xff] }
 0x387   : > { %v601_v8 = vld [vmem:[%s18648_s1 + $0x5f8] sm:$0xff] }
 0x38a   : > { %6873 = vmatpush1.bf16.xpose.msra.mxu0 %v12114_v13  ;;  %v513_v13 = vld [vmem:[%s18648_s1 + $0x338] sm:$0xff] }
 0x38b   : > { %6883 = vmatprep.subr.bf16.mxu0 %v11877_v15  ;;  %v769_v15 = vld [vmem:[%s18648_s1 + $0xb38] sm:$0xff] }
 0x38c   : > { %7201 = vmatpush1.bf16.xpose.msra.mxu1 %v12370_v14  ;;  %v521_v14 = vld [vmem:[%s18648_s1 + $0x378] sm:$0xff] }
 0x38d   : > { %7211 = vmatprep.subr.bf16.mxu1 %v12133_v16  ;;  %v777_v16 = vld [vmem:[%s18648_s1 + $0xb78] sm:$0xff]  ;;  %v11973_v20 = vcombine.high %v513_v13, %v521_v14 }
 0x38e   : > { %v12229_v34 = vcombine.high %v769_v15, %v777_v16 }
 0x391   : > { %6875 = vmatmul.mubr.bf16.vlgmr.msra.gmra.mrb[0].mxu0 %v15663_v21 }
 0x392   : > { %6884 = vmatpush1.bf16.xpose.msra.mxu0 %v11876_v29  ;;  %6915 = vmatprep.mubr.bf16.mxu0 %v15673_v39  ;;  %v785_v29 = vld [vmem:[%s18648_s1 + $0xbb8] sm:$0xff] }
 0x393   : > { %7203 = vmatmul.mubr.bf16.vlgmr.msra.gmra.mrb[0].mxu1 %v15663_v21  ;;  %6885 = vmatprep.subr.bf16.mxu0 %v11893_v31  ;;  %v11972_v31 = vcombine.low %v513_v13, %v521_v14  ;;  %v12053_v13 = vcombine.high %v593_v7, %v601_v8 }
 0x394   : > { %7212 = vmatpush1.bf16.xpose.msra.mxu1 %v12132_v30  ;;  %7243 = vmatprep.mubr.bf16.mxu1 %v15673_v39  ;;  %v793_v30 = vld [vmem:[%s18648_s1 + $0xbf8] sm:$0xff] }
 0x395   : > { %7213 = vmatprep.subr.bf16.mxu1 %v12149_v32  ;;  %v12228_v32 = vcombine.low %v769_v15, %v777_v16  ;;  %v12245_v37 = vcombine.high %v785_v29, %v793_v30  ;;  %v609_v15 = vld [vmem:[%s18648_s1 + $0x638] sm:$0xff] }
 0x396   : > { %v617_v16 = vld [vmem:[%s18648_s1 + $0x678] sm:$0xff] }
 0x39a   : > { %6886 = vmatpush1.bf16.xpose.msra.mxu0 %v11892_v46  ;;  %v801_v46 = vld [vmem:[%s18648_s1 + $0xc38] sm:$0xff] }
 0x39b   : > { %6887 = vmatprep.subr.bf16.mxu0 %v11909_v49  ;;  %v11988_v49 = vcombine.low %v529_v23, %v537_v36  ;;  %v12069_v23 = vcombine.high %v609_v15, %v617_v16 }
 0x39c   : > { %7214 = vmatpush1.bf16.xpose.msra.mxu1 %v12148_v48  ;;  %v809_v48 = vld [vmem:[%s18648_s1 + $0xc78] sm:$0xff] }
 0x39d   : > { %7215 = vmatprep.subr.bf16.mxu1 %v12165_v50  ;;  %v12244_v50 = vcombine.low %v785_v29, %v793_v30  ;;  %v12261_v52 = vcombine.high %v801_v46, %v809_v48  ;;  %v625_v29 = vld [vmem:[%s18648_s1 + $0x6b8] sm:$0xff] }
 0x39e   : > { %v633_v30 = vld [vmem:[%s18648_s1 + $0x6f8] sm:$0xff] }
 0x3a2   : > { %6888 = vmatpush1.bf16.xpose.msra.mxu0 %v11908_v55  ;;  %v817_v55 = vld [vmem:[%s18648_s1 + $0xcb8] sm:$0xff] }
 0x3a3   : > { %6889 = vmatprep.subr.bf16.mxu0 %v11925_v57  ;;  %v12004_v57 = vcombine.low %v545_v2, %v553_v45  ;;  %v12085_v2 = vcombine.high %v625_v29, %v633_v30 }
 0x3a4   : > { %7216 = vmatpush1.bf16.xpose.msra.mxu1 %v12164_v56  ;;  %v825_v56 = vld [vmem:[%s18648_s1 + $0xcf8] sm:$0xff] }
 0x3a5   : > { %7217 = vmatprep.subr.bf16.mxu1 %v12181_v58  ;;  %v12260_v58 = vcombine.low %v801_v46, %v809_v48  ;;  %v12277_v60 = vcombine.high %v817_v55, %v825_v56  ;;  %v641_v46 = vld [vmem:[%s18648_s1 + $0x738] sm:$0xff] }
 0x3a6   : > { %v649_v48 = vld [vmem:[%s18648_s1 + $0x778] sm:$0xff] }
 0x3aa   : > { %6890 = vmatpush1.bf16.xpose.msra.mxu0 %v11924_v63  ;;  %v833_v63 = vld [vmem:[%s18648_s1 + $0xd38] sm:$0xff] }
 0x3ab   : > { %6891 = vmatprep.subr.bf16.mxu0 %v11941_v40  ;;  %v12020_v40 = vcombine.low %v561_v0, %v569_v54  ;;  %v12101_v0 = vcombine.high %v641_v46, %v649_v48 }
 0x3ac   : > { %7218 = vmatpush1.bf16.xpose.msra.mxu1 %v12180_v22  ;;  %v841_v22 = vld [vmem:[%s18648_s1 + $0xd78] sm:$0xff] }
 0x3ad   : > { %7219 = vmatprep.subr.bf16.mxu1 %v12197_v4  ;;  %v12276_v4 = vcombine.low %v817_v55, %v825_v56  ;;  %v12293_v6 = vcombine.high %v833_v63, %v841_v22  ;;  %v657_v55 = vld [vmem:[%s18648_s1 + $0x7b8] sm:$0xff] }
 0x3ae   : > { %v665_v56 = vld [vmem:[%s18648_s1 + $0x7f8] sm:$0xff] }
 0x3b2   : > { %6892 = vmatpush1.bf16.xpose.msra.mxu0 %v11940_v26  ;;  %v849_v26 = vld [vmem:[%s18648_s1 + $0xdb8] sm:$0xff] }
 0x3b3   : > { %6893 = vmatprep.subr.bf16.mxu0 %v11957_v11  ;;  %v12036_v11 = vcombine.low %v577_v61, %v585_v62  ;;  %v12117_v61 = vcombine.high %v657_v55, %v665_v56 }
 0x3b4   : > { %7220 = vmatpush1.bf16.xpose.msra.mxu1 %v12196_v43  ;;  %v857_v43 = vld [vmem:[%s18648_s1 + $0xdf8] sm:$0xff] }
 0x3b5   : > { %7221 = vmatprep.subr.bf16.mxu1 %v12213_v12  ;;  %v12292_v12 = vcombine.low %v833_v63, %v841_v22  ;;  %v12309_v14 = vcombine.high %v849_v26, %v857_v43  ;;  %v922_v63 = vld [vmem:[%s18648_s1 + $0x1000] sm:$0xff] }
 0x3b6   : > { %v930_v22 = vld [vmem:[%s18648_s1 + $0x1040] sm:$0xff] }
 0x3ba   : > { %6894 = vmatpush1.bf16.xpose.msra.mxu0 %v11956_v17  ;;  %v865_v17 = vld [vmem:[%s18648_s1 + $0xe38] sm:$0xff] }
 0x3bb   : > { %6895 = vmatprep.subr.bf16.mxu0 %v11973_v20  ;;  %v12052_v20 = vcombine.low %v593_v7, %v601_v8  ;;  %v12375_v7 = vcombine.high %v922_v63, %v930_v22 }
 0x3bc   : > { %7222 = vmatpush1.bf16.xpose.msra.mxu1 %v12212_v19  ;;  %v873_v19 = vld [vmem:[%s18648_s1 + $0xe78] sm:$0xff] }
 0x3bd   : > { %7223 = vmatprep.subr.bf16.mxu1 %v12229_v34  ;;  %v12308_v34 = vcombine.low %v849_v26, %v857_v43  ;;  %v12325_v36 = vcombine.high %v865_v17, %v873_v19  ;;  %v938_v26 = vld [vmem:[%s18648_s1 + $0x1080] sm:$0xff] }
 0x3be   : > { %v946_v43 = vld [vmem:[%s18648_s1 + $0x10c0] sm:$0xff] }
 0x3c2   : > { %6896 = vmatpush1.bf16.xpose.msra.mxu0 %v11972_v31  ;;  %v881_v31 = vld [vmem:[%s18648_s1 + $0xeb8] sm:$0xff] }
 0x3c3   : > { %6897 = vmatprep.subr.bf16.mxu0 %v11989_v41  ;;  %v12068_v41 = vcombine.low %v609_v15, %v617_v16  ;;  %v12391_v16 = vcombine.high %v938_v26, %v946_v43 }
 0x3c4   : > { %7224 = vmatpush1.bf16.xpose.msra.mxu1 %v12228_v32  ;;  %v889_v32 = vld [vmem:[%s18648_s1 + $0xef8] sm:$0xff] }
 0x3c5   : > { %7225 = vmatprep.subr.bf16.mxu1 %v12245_v37  ;;  %v12324_v37 = vcombine.low %v865_v17, %v873_v19  ;;  %v12341_v45 = vcombine.high %v881_v31, %v889_v32  ;;  %v962_v19 = vld [vmem:[%s18648_s1 + $0x1140] sm:$0xff] }
 0x3ca   : > { %6898 = vmatpush1.bf16.xpose.msra.mxu0 %v11988_v49  ;;  %v897_v49 = vld [vmem:[%s18648_s1 + $0xf38] sm:$0xff] }
 0x3cb   : > { %6899 = vmatprep.subr.bf16.mxu0 %v12005_v51  ;;  %v12084_v51 = vcombine.low %v625_v29, %v633_v30 }
 0x3cc   : > { %7226 = vmatpush1.bf16.xpose.msra.mxu1 %v12244_v50  ;;  %v905_v50 = vld [vmem:[%s18648_s1 + $0xf78] sm:$0xff] }
 0x3cd   : > { %7227 = vmatprep.subr.bf16.mxu1 %v12261_v52  ;;  %v12340_v52 = vcombine.low %v881_v31, %v889_v32  ;;  %v12357_v54 = vcombine.high %v897_v49, %v905_v50  ;;  %v970_v31 = vld [vmem:[%s18648_s1 + $0x1180] sm:$0xff] }
 0x3ce   : > { %v978_v32 = vld [vmem:[%s18648_s1 + $0x11c0] sm:$0xff] }
 0x3d2   : > { %6900 = vmatpush1.bf16.xpose.msra.mxu0 %v12004_v57  ;;  %v913_v57 = vld [vmem:[%s18648_s1 + $0xfb8] sm:$0xff] }
 0x3d3   : > { %6901 = vmatprep.subr.bf16.mxu0 %v12021_v59  ;;  %v12100_v59 = vcombine.low %v641_v46, %v649_v48  ;;  %v986_v48 = vld [vmem:[%s18648_s1 + $0x1200] sm:$0xff] }
 0x3d4   : > { %7228 = vmatpush1.bf16.xpose.msra.mxu1 %v12260_v58  ;;  %v921_v58 = vld [vmem:[%s18648_s1 + $0xff8] sm:$0xff] }
 0x3d5   : > { %7229 = vmatprep.subr.bf16.mxu1 %v12277_v60  ;;  %v12356_v60 = vcombine.low %v897_v49, %v905_v50  ;;  %v12373_v62 = vcombine.high %v913_v57, %v921_v58  ;;  %v994_v49 = vld [vmem:[%s18648_s1 + $0x1240] sm:$0xff] }
 0x3d6   : > { %v1242_v50 = vld [vmem:[%s18648_s1 + $0x1a00] sm:$0xff] }
 0x3da   : > { %6902 = vmatpush1.bf16.xpose.msra.mxu0 %v12020_v40  ;;  %v1178_v40 = vld [vmem:[%s18648_s1 + $0x1800] sm:$0xff] }
 0x3db   : > { %6903 = vmatprep.subr.bf16.mxu0 %v12037_v5  ;;  %v12116_v5 = vcombine.low %v657_v55, %v665_v56  ;;  %v1002_v56 = vld [vmem:[%s18648_s1 + $0x1280] sm:$0xff] }
 0x3dc   : > { %7230 = vmatpush1.bf16.xpose.msra.mxu1 %v12276_v4  ;;  %v1186_v4 = vld [vmem:[%s18648_s1 + $0x1840] sm:$0xff] }
 0x3dd   : > { %7231 = vmatprep.subr.bf16.mxu1 %v12293_v6  ;;  %v12372_v6 = vcombine.low %v913_v57, %v921_v58  ;;  %v12631_v8 = vcombine.high %v1178_v40, %v1186_v4  ;;  %v12630_v15 = vcombine.low %v1178_v40, %v1186_v4  ;;  %v1010_v57 = vld [vmem:[%s18648_s1 + $0x12c0] sm:$0xff] }
 0x3de   : > { %v1258_v58 = vld [vmem:[%s18648_s1 + $0x1a80] sm:$0xff] }
 0x3df   : > { %v1026_v40 = vld [vmem:[%s18648_s1 + $0x1340] sm:$0xff] }
 0x3e0   : > { %v1274_v4 = vld [vmem:[%s18648_s1 + $0x1b00] sm:$0xff] }
 0x3e2   : > { %6904 = vmatpush1.bf16.xpose.msra.mxu0 %v12036_v11  ;;  %v15867_v11 = vpack.c.bf16 %v15653_v18, %v15653_v18  ;;  %v954_v18 = vld [vmem:[%s18648_s1 + $0x1100] sm:$0xff] }
 0x3e3   : > { %6905 = vmatprep.subr.bf16.mxu0 %v12053_v13  ;;  %v1202_v13 = vld [vmem:[%s18648_s1 + $0x18c0] sm:$0xff]  ;;  %v12407_v29 = vcombine.high %v954_v18, %v962_v19 }
 0x3e4   : > { %7232 = vmatpush1.bf16.xpose.msra.mxu1 %v12292_v12  ;;  %v1194_v12 = vld [vmem:[%s18648_s1 + $0x1880] sm:$0xff] }
 0x3e5   : > { %7233 = vmatprep.subr.bf16.mxu1 %v12309_v14  ;;  %v12374_v14 = vcombine.low %v922_v63, %v930_v22  ;;  %v12647_v17 = vcombine.high %v1194_v12, %v1202_v13  ;;  %v1018_v22 = vld [vmem:[%s18648_s1 + $0x1300] sm:$0xff] }
 0x3ea   : > { %6906 = vmatpush1.bf16.xpose.msra.mxu0 %v12052_v20  ;;  %v1210_v20 = vld [vmem:[%s18648_s1 + $0x1900] sm:$0xff] }
 0x3eb   : > { %6907 = vmatprep.subr.bf16.mxu0 %v12069_v23  ;;  %v12390_v23 = vcombine.low %v938_v26, %v946_v43  ;;  %v1034_v43 = vld [vmem:[%s18648_s1 + $0x1380] sm:$0xff] }
 0x3ec   : > { %7234 = vmatpush1.bf16.xpose.msra.mxu1 %v12308_v34  ;;  %v1218_v34 = vld [vmem:[%s18648_s1 + $0x1940] sm:$0xff] }
 0x3ed   : > { %7235 = vmatprep.subr.bf16.mxu1 %v12325_v36  ;;  %v12646_v36 = vcombine.low %v1194_v12, %v1202_v13  ;;  %v12663_v30 = vcombine.high %v1210_v20, %v1218_v34  ;;  %v1042_v12 = vld [vmem:[%s18648_s1 + $0x13c0] sm:$0xff] }
 0x3ee   : > { %v1290_v13 = vld [vmem:[%s18648_s1 + $0x1b80] sm:$0xff] }
 0x3f2   : > { %6908 = vmatpush1.bf16.xpose.msra.mxu0 %v12068_v41  ;;  %v1234_v41 = vld [vmem:[%s18648_s1 + $0x19c0] sm:$0xff] }
 0x3f3   : > { %6909 = vmatprep.subr.bf16.mxu0 %v12085_v2  ;;  %v12662_v2 = vcombine.low %v1210_v20, %v1218_v34  ;;  %v1058_v20 = vld [vmem:[%s18648_s1 + $0x1440] sm:$0xff] }
 0x3f4   : > { %7236 = vmatpush1.bf16.xpose.msra.mxu1 %v12324_v37  ;;  %v12406_v37 = vcombine.low %v954_v18, %v962_v19  ;;  %v1050_v19 = vld [vmem:[%s18648_s1 + $0x1400] sm:$0xff] }
 0x3f5   : > { %7237 = vmatprep.subr.bf16.mxu1 %v12341_v45  ;;  %v12423_v45 = vcombine.high %v970_v31, %v978_v32  ;;  %v1306_v34 = vld [vmem:[%s18648_s1 + $0x1c00] sm:$0xff] }
 0x3fa   : > { %6910 = vmatpush1.bf16.xpose.msra.mxu0 %v12084_v51  ;;  %v1250_v51 = vld [vmem:[%s18648_s1 + $0x1a40] sm:$0xff] }
 0x3fb   : > { %6911 = vmatprep.subr.bf16.mxu0 %v12101_v0  ;;  %v12695_v55 = vcombine.high %v1242_v50, %v1250_v51 }
 0x3fc   : > { %7238 = vmatpush1.bf16.xpose.msra.mxu1 %v12340_v52  ;;  %v12422_v52 = vcombine.low %v970_v31, %v978_v32  ;;  %v1066_v32 = vld [vmem:[%s18648_s1 + $0x1480] sm:$0xff] }
 0x3fd   : > { %7239 = vmatprep.subr.bf16.mxu1 %v12357_v54  ;;  %v12439_v54 = vcombine.high %v986_v48, %v994_v49 }
 0x402   : > { %6912 = vmatpush1.bf16.xpose.msra.mxu0 %v12100_v59  ;;  %v1266_v59 = vld [vmem:[%s18648_s1 + $0x1ac0] sm:$0xff] }
 0x403   : > { %6913 = vmatprep.subr.bf16.mxu0 %v12117_v61  ;;  %v12694_v61 = vcombine.low %v1242_v50, %v1250_v51  ;;  %v12711_v63 = vcombine.high %v1258_v58, %v1266_v59  ;;  %v1090_v50 = vld [vmem:[%s18648_s1 + $0x1540] sm:$0xff] }
 0x404   : > { %7240 = vmatpush1.bf16.xpose.msra.mxu1 %v12356_v60  ;;  %v12438_v60 = vcombine.low %v986_v48, %v994_v49  ;;  %v1082_v49 = vld [vmem:[%s18648_s1 + $0x1500] sm:$0xff] }
 0x405   : > { %7241 = vmatprep.subr.bf16.mxu1 %v12373_v62  ;;  %v12455_v62 = vcombine.high %v1002_v56, %v1010_v57  ;;  %v1338_v51 = vld [vmem:[%s18648_s1 + $0x1d00] sm:$0xff] }
 0x40a   : > { %6914 = vmatpush1.bf16.xpose.msra.mxu0 %v12116_v5  ;;  %v1282_v5 = vld [vmem:[%s18648_s1 + $0x1b40] sm:$0xff] }
 0x40b   : > { %7252 = vmatprep.subr.bf16.mxu0 %v12375_v7  ;;  %v12710_v7 = vcombine.low %v1258_v58, %v1266_v59  ;;  %v12727_v26 = vcombine.high %v1274_v4, %v1282_v5  ;;  %v1106_v58 = vld [vmem:[%s18648_s1 + $0x15c0] sm:$0xff] }
 0x40c   : > { %7242 = vmatpush1.bf16.xpose.msra.mxu1 %v12372_v6  ;;  %v12454_v6 = vcombine.low %v1002_v56, %v1010_v57  ;;  %v1098_v57 = vld [vmem:[%s18648_s1 + $0x1580] sm:$0xff] }
 0x40d   : > { %7580 = vmatprep.subr.bf16.mxu1 %v12631_v8  ;;  %v12471_v8 = vcombine.high %v1018_v22, %v1026_v40  ;;  %v1354_v59 = vld [vmem:[%s18648_s1 + $0x1d80] sm:$0xff] }
 0x411   : > { %6916 = vmatmul.mubr.bf16.vlgmr.msra.gmra.mrb[0].mxu0 %v15867_v11 }
 0x412   : > { %7253 = vmatpush1.bf16.xpose.msra.mxu0 %v12374_v14  ;;  %7284 = vmatprep.mubr.bf16.mxu0 %v14236_v47  ;;  %v1298_v14 = vld [vmem:[%s18648_s1 + $0x1bc0] sm:$0xff] }
 0x413   : > { %7244 = vmatmul.mubr.bf16.vlgmr.msra.gmra.mrb[0].mxu1 %v15867_v11  ;;  %7254 = vmatprep.subr.bf16.mxu0 %v12391_v16  ;;  %v12726_v16 = vcombine.low %v1274_v4, %v1282_v5  ;;  %v12743_v18 = vcombine.high %v1290_v13, %v1298_v14  ;;  %v1122_v4 = vld [vmem:[%s18648_s1 + $0x1640] sm:$0xff] }
 0x414   : > { %7581 = vmatpush1.bf16.xpose.msra.mxu1 %v12630_v15  ;;  %7612 = vmatprep.mubr.bf16.mxu1 %v14236_v47  ;;  %v1226_v47 = vld [vmem:[%s18648_s1 + $0x1980] sm:$0xff]  ;;  %v12470_v15 = vcombine.low %v1018_v22, %v1026_v40 }
 0x415   : > { %7582 = vmatprep.subr.bf16.mxu1 %v12647_v17  ;;  %v12679_v46 = vcombine.high %v1226_v47, %v1234_v41  ;;  %v12678_v0 = vcombine.low %v1226_v47, %v1234_v41  ;;  %v12487_v17 = vcombine.high %v1034_v43, %v1042_v12  ;;  %v1074_v47 = vld [vmem:[%s18648_s1 + $0x14c0] sm:$0xff] }
 0x416   : > { %v1322_v41 = vld [vmem:[%s18648_s1 + $0x1c80] sm:$0xff] }
 0x417   : > { %v1114_v40 = vld [vmem:[%s18648_s1 + $0x1600] sm:$0xff] }
 0x418   : > { %v1370_v5 = vld [vmem:[%s18648_s1 + $0x1e00] sm:$0xff] }
 0x41a   : > { %7255 = vmatpush1.bf16.xpose.msra.mxu0 %v12390_v23  ;;  %v1314_v23 = vld [vmem:[%s18648_s1 + $0x1c40] sm:$0xff] }
 0x41b   : > { %7256 = vmatprep.subr.bf16.mxu0 %v12407_v29  ;;  %v12742_v29 = vcombine.low %v1290_v13, %v1298_v14  ;;  %v12759_v31 = vcombine.high %v1306_v34, %v1314_v23  ;;  %v1138_v13 = vld [vmem:[%s18648_s1 + $0x16c0] sm:$0xff] }
 0x41c   : > { %7583 = vmatpush1.bf16.xpose.msra.mxu1 %v12646_v36  ;;  %v12486_v36 = vcombine.low %v1034_v43, %v1042_v12  ;;  %v1130_v12 = vld [vmem:[%s18648_s1 + $0x1680] sm:$0xff] }
 0x41d   : > { %7584 = vmatprep.subr.bf16.mxu1 %v12663_v30  ;;  %v12503_v30 = vcombine.high %v1050_v19, %v1058_v20  ;;  %v1386_v14 = vld [vmem:[%s18648_s1 + $0x1e80] sm:$0xff] }
 0x422   : > { %7257 = vmatpush1.bf16.xpose.msra.mxu0 %v12406_v37  ;;  %v1330_v37 = vld [vmem:[%s18648_s1 + $0x1cc0] sm:$0xff] }
 0x423   : > { %7258 = vmatprep.subr.bf16.mxu0 %v12423_v45  ;;  %v12758_v45 = vcombine.low %v1306_v34, %v1314_v23  ;;  %v12775_v48 = vcombine.high %v1322_v41, %v1330_v37  ;;  %v1154_v34 = vld [vmem:[%s18648_s1 + $0x1740] sm:$0xff] }
 0x424   : > { %7585 = vmatpush1.bf16.xpose.msra.mxu1 %v12662_v2  ;;  %v12502_v2 = vcombine.low %v1050_v19, %v1058_v20  ;;  %v1146_v20 = vld [vmem:[%s18648_s1 + $0x1700] sm:$0xff] }
 0x425   : > { %7586 = vmatprep.subr.bf16.mxu1 %v12679_v46  ;;  %v12519_v46 = vcombine.high %v1066_v32, %v1074_v47  ;;  %v1402_v23 = vld [vmem:[%s18648_s1 + $0x1f00] sm:$0xff] }
 0x42a   : > { %7259 = vmatpush1.bf16.xpose.msra.mxu0 %v12422_v52  ;;  %v1346_v52 = vld [vmem:[%s18648_s1 + $0x1d40] sm:$0xff] }
 0x42b   : > { %7260 = vmatprep.subr.bf16.mxu0 %v12439_v54  ;;  %v12774_v54 = vcombine.low %v1322_v41, %v1330_v37  ;;  %v12791_v56 = vcombine.high %v1338_v51, %v1346_v52  ;;  %v1170_v41 = vld [vmem:[%s18648_s1 + $0x17c0] sm:$0xff] }
 0x42c   : > { %7587 = vmatpush1.bf16.xpose.msra.mxu1 %v12678_v0  ;;  %v12518_v0 = vcombine.low %v1066_v32, %v1074_v47  ;;  %v1162_v47 = vld [vmem:[%s18648_s1 + $0x1780] sm:$0xff] }
 0x42d   : > { %7588 = vmatprep.subr.bf16.mxu1 %v12695_v55  ;;  %v12535_v55 = vcombine.high %v1082_v49, %v1090_v50  ;;  %v1418_v37 = vld [vmem:[%s18648_s1 + $0x1f80] sm:$0xff] }
 0x432   : > { %7261 = vmatpush1.bf16.xpose.msra.mxu0 %v12438_v60  ;;  %v1362_v60 = vld [vmem:[%s18648_s1 + $0x1dc0] sm:$0xff] }
 0x433   : > { %7262 = vmatprep.subr.bf16.mxu0 %v12455_v62  ;;  %v12790_v62 = vcombine.low %v1338_v51, %v1346_v52  ;;  %v12807_v22 = vcombine.high %v1354_v59, %v1362_v60  ;;  %v931_v51 = vld [vmem:[%s18648_s1 + $0x1048] sm:$0xff] }
 0x434   : > { %7589 = vmatpush1.bf16.xpose.msra.mxu1 %v12694_v61  ;;  %v12534_v61 = vcombine.low %v1082_v49, %v1090_v50  ;;  %v923_v50 = vld [vmem:[%s18648_s1 + $0x1008] sm:$0xff] }
 0x435   : > { %7590 = vmatprep.subr.bf16.mxu1 %v12711_v63  ;;  %v12551_v63 = vcombine.high %v1098_v57, %v1106_v58  ;;  %v1179_v52 = vld [vmem:[%s18648_s1 + $0x1808] sm:$0xff] }
 0x43a   : > { %7263 = vmatpush1.bf16.xpose.msra.mxu0 %v12454_v6  ;;  %v1378_v6 = vld [vmem:[%s18648_s1 + $0x1e40] sm:$0xff] }
 0x43b   : > { %7264 = vmatprep.subr.bf16.mxu0 %v12471_v8  ;;  %v12806_v8 = vcombine.low %v1354_v59, %v1362_v60  ;;  %v12823_v43 = vcombine.high %v1370_v5, %v1378_v6  ;;  %v947_v59 = vld [vmem:[%s18648_s1 + $0x10c8] sm:$0xff] }
 0x43c   : > { %7591 = vmatpush1.bf16.xpose.msra.mxu1 %v12710_v7  ;;  %v12550_v7 = vcombine.low %v1098_v57, %v1106_v58  ;;  %v939_v58 = vld [vmem:[%s18648_s1 + $0x1088] sm:$0xff] }
 0x43d   : > { %7592 = vmatprep.subr.bf16.mxu1 %v12727_v26  ;;  %v12567_v26 = vcombine.high %v1114_v40, %v1122_v4  ;;  %v1195_v60 = vld [vmem:[%s18648_s1 + $0x1888] sm:$0xff] }
 0x442   : > { %7265 = vmatpush1.bf16.xpose.msra.mxu0 %v12470_v15  ;;  %v1394_v15 = vld [vmem:[%s18648_s1 + $0x1ec0] sm:$0xff] }
 0x443   : > { %7266 = vmatprep.subr.bf16.mxu0 %v12487_v17  ;;  %v12822_v17 = vcombine.low %v1370_v5, %v1378_v6  ;;  %v12839_v19 = vcombine.high %v1386_v14, %v1394_v15  ;;  %v963_v5 = vld [vmem:[%s18648_s1 + $0x1148] sm:$0xff] }
 0x444   : > { %7593 = vmatpush1.bf16.xpose.msra.mxu1 %v12726_v16  ;;  %v12566_v16 = vcombine.low %v1114_v40, %v1122_v4  ;;  %v955_v4 = vld [vmem:[%s18648_s1 + $0x1108] sm:$0xff] }
 0x445   : > { %7594 = vmatprep.subr.bf16.mxu1 %v12743_v18  ;;  %v12583_v18 = vcombine.high %v1130_v12, %v1138_v13  ;;  %v1211_v6 = vld [vmem:[%s18648_s1 + $0x1908] sm:$0xff] }
 0x44a   : > { %7267 = vmatpush1.bf16.xpose.msra.mxu0 %v12486_v36  ;;  %v1410_v36 = vld [vmem:[%s18648_s1 + $0x1f40] sm:$0xff] }
 0x44b   : > { %7268 = vmatprep.subr.bf16.mxu0 %v12503_v30  ;;  %v12838_v30 = vcombine.low %v1386_v14, %v1394_v15  ;;  %v12855_v32 = vcombine.high %v1402_v23, %v1410_v36  ;;  %v1235_v14 = vld [vmem:[%s18648_s1 + $0x19c8] sm:$0xff]  ;;  %v12408_v15 = vcombine.low %v955_v4, %v963_v5 }
 0x44c   : > { %7595 = vmatpush1.bf16.xpose.msra.mxu1 %v12742_v29  ;;  %v12582_v29 = vcombine.low %v1130_v12, %v1138_v13  ;;  %v971_v12 = vld [vmem:[%s18648_s1 + $0x1188] sm:$0xff] }
 0x44d   : > { %7596 = vmatprep.subr.bf16.mxu1 %v12759_v31  ;;  %v12599_v31 = vcombine.high %v1146_v20, %v1154_v34  ;;  %v979_v13 = vld [vmem:[%s18648_s1 + $0x11c8] sm:$0xff] }
 0x452   : > { %7269 = vmatpush1.bf16.xpose.msra.mxu0 %v12502_v2  ;;  %v1426_v2 = vld [vmem:[%s18648_s1 + $0x1fc0] sm:$0xff] }
 0x453   : > { %7270 = vmatprep.subr.bf16.mxu0 %v12519_v46  ;;  %v12854_v46 = vcombine.low %v1402_v23, %v1410_v36  ;;  %v12871_v49 = vcombine.high %v1418_v37, %v1426_v2  ;;  %v1251_v23 = vld [vmem:[%s18648_s1 + $0x1a48] sm:$0xff]  ;;  %v12424_v36 = vcombine.low %v971_v12, %v979_v13 }
 0x454   : > { %7597 = vmatpush1.bf16.xpose.msra.mxu1 %v12758_v45  ;;  %v12598_v45 = vcombine.low %v1146_v20, %v1154_v34  ;;  %v995_v20 = vld [vmem:[%s18648_s1 + $0x1248] sm:$0xff] }
 0x455   : > { %7598 = vmatprep.subr.bf16.mxu1 %v12775_v48  ;;  %v12615_v48 = vcombine.high %v1162_v47, %v1170_v41  ;;  %v1243_v34 = vld [vmem:[%s18648_s1 + $0x1a08] sm:$0xff] }
 0x45a   : > { %7271 = vmatpush1.bf16.xpose.msra.mxu0 %v12518_v0  ;;  %v1187_v0 = vld [vmem:[%s18648_s1 + $0x1848] sm:$0xff] }
 0x45b   : > { %7272 = vmatprep.subr.bf16.mxu0 %v12535_v55  ;;  %v12870_v55 = vcombine.low %v1418_v37, %v1426_v2  ;;  %v12633_v57 = vcombine.high %v1179_v52, %v1187_v0  ;;  %v1267_v37 = vld [vmem:[%s18648_s1 + $0x1ac8] sm:$0xff] }
 0x45c   : > { %7599 = vmatpush1.bf16.xpose.msra.mxu1 %v12774_v54  ;;  %v12614_v54 = vcombine.low %v1162_v47, %v1170_v41  ;;  %v1011_v47 = vld [vmem:[%s18648_s1 + $0x12c8] sm:$0xff] }
 0x45d   : > { %7600 = vmatprep.subr.bf16.mxu1 %v12791_v56  ;;  %v12377_v56 = vcombine.high %v923_v50, %v931_v51  ;;  %v1259_v41 = vld [vmem:[%s18648_s1 + $0x1a88] sm:$0xff] }
 0x462   : > { %7273 = vmatpush1.bf16.xpose.msra.mxu0 %v12534_v61  ;;  %v1203_v61 = vld [vmem:[%s18648_s1 + $0x18c8] sm:$0xff] }
 0x463   : > { %7274 = vmatprep.subr.bf16.mxu0 %v12551_v63  ;;  %v12632_v63 = vcombine.low %v1179_v52, %v1187_v0  ;;  %v12649_v40 = vcombine.high %v1195_v60, %v1203_v61  ;;  %v1283_v52 = vld [vmem:[%s18648_s1 + $0x1b48] sm:$0xff] }
 0x464   : > { %7601 = vmatpush1.bf16.xpose.msra.mxu1 %v12790_v62  ;;  %v12376_v62 = vcombine.low %v923_v50, %v931_v51  ;;  %v1027_v50 = vld [vmem:[%s18648_s1 + $0x1348] sm:$0xff] }
 0x465   : > { %7602 = vmatprep.subr.bf16.mxu1 %v12807_v22  ;;  %v12393_v22 = vcombine.high %v939_v58, %v947_v59  ;;  %v1275_v51 = vld [vmem:[%s18648_s1 + $0x1b08] sm:$0xff] }
 0x46a   : > { %7275 = vmatpush1.bf16.xpose.msra.mxu0 %v12550_v7  ;;  %v12392_v7 = vcombine.low %v939_v58, %v947_v59  ;;  %v1043_v58 = vld [vmem:[%s18648_s1 + $0x13c8] sm:$0xff] }
 0x46b   : > { %7276 = vmatprep.subr.bf16.mxu0 %v12567_v26  ;;  %v12409_v26 = vcombine.high %v955_v4, %v963_v5  ;;  %v1291_v59 = vld [vmem:[%s18648_s1 + $0x1b88] sm:$0xff] }
 0x46c   : > { %7603 = vmatpush1.bf16.xpose.msra.mxu1 %v12806_v8  ;;  %v12648_v8 = vcombine.low %v1195_v60, %v1203_v61  ;;  %v1299_v60 = vld [vmem:[%s18648_s1 + $0x1bc8] sm:$0xff] }
 0x46d   : > { %7604 = vmatprep.subr.bf16.mxu1 %v12823_v43  ;;  %v1059_v4 = vld [vmem:[%s18648_s1 + $0x1448] sm:$0xff] }
 0x46e   : > { %v1307_v5 = vld [vmem:[%s18648_s1 + $0x1c08] sm:$0xff] }
 0x472   : > { %7277 = vmatpush1.bf16.xpose.msra.mxu0 %v12566_v16 }
 0x473   : > { %7278 = vmatprep.subr.bf16.mxu0 %v12583_v18 }
 0x474   : > { %7605 = vmatpush1.bf16.xpose.msra.mxu1 %v12822_v17  ;;  %v12425_v17 = vcombine.high %v971_v12, %v979_v13  ;;  %v1075_v12 = vld [vmem:[%s18648_s1 + $0x14c8] sm:$0xff] }
 0x475   : > { %7606 = vmatprep.subr.bf16.mxu1 %v12839_v19  ;;  %v987_v19 = vld [vmem:[%s18648_s1 + $0x1208] sm:$0xff] }
 0x476   : > { %v12440_v2 = vcombine.low %v987_v19, %v995_v20  ;;  %v1323_v13 = vld [vmem:[%s18648_s1 + $0x1c88] sm:$0xff] }
 0x47a   : > { %7279 = vmatpush1.bf16.xpose.msra.mxu0 %v12582_v29 }
 0x47b   : > { %7280 = vmatprep.subr.bf16.mxu0 %v12599_v31  ;;  %v12697_v31 = vcombine.high %v1243_v34, %v1251_v23 }
 0x47c   : > { %7607 = vmatpush1.bf16.xpose.msra.mxu1 %v12838_v30  ;;  %v12441_v30 = vcombine.high %v987_v19, %v995_v20  ;;  %v1091_v19 = vld [vmem:[%s18648_s1 + $0x1548] sm:$0xff] }
 0x47d   : > { %7608 = vmatprep.subr.bf16.mxu1 %v12855_v32  ;;  %v1003_v32 = vld [vmem:[%s18648_s1 + $0x1288] sm:$0xff] }
 0x47e   : > { %v12456_v0 = vcombine.low %v1003_v32, %v1011_v47  ;;  %v1339_v20 = vld [vmem:[%s18648_s1 + $0x1d08] sm:$0xff] }
 0x482   : > { %7281 = vmatpush1.bf16.xpose.msra.mxu0 %v12598_v45  ;;  %v12696_v45 = vcombine.low %v1243_v34, %v1251_v23  ;;  %v1347_v34 = vld [vmem:[%s18648_s1 + $0x1d48] sm:$0xff] }
 0x483   : > { %7282 = vmatprep.subr.bf16.mxu0 %v12615_v48  ;;  %v12713_v48 = vcombine.high %v1259_v41, %v1267_v37 }
 0x484   : > { %7609 = vmatpush1.bf16.xpose.msra.mxu1 %v12854_v46  ;;  %v12457_v46 = vcombine.high %v1003_v32, %v1011_v47  ;;  %v1107_v32 = vld [vmem:[%s18648_s1 + $0x15c8] sm:$0xff] }
 0x485   : > { %7610 = vmatprep.subr.bf16.mxu1 %v12871_v49  ;;  %v1019_v49 = vld [vmem:[%s18648_s1 + $0x1308] sm:$0xff] }
 0x486   : > { %v12472_v61 = vcombine.low %v1019_v49, %v1027_v50  ;;  %v1355_v47 = vld [vmem:[%s18648_s1 + $0x1d88] sm:$0xff] }
 0x48a   : > { %7283 = vmatpush1.bf16.xpose.msra.mxu0 %v12614_v54  ;;  %v12712_v54 = vcombine.low %v1259_v41, %v1267_v37  ;;  %v1363_v41 = vld [vmem:[%s18648_s1 + $0x1dc8] sm:$0xff] }
 0x48b   : > { %7293 = vmatprep.subr.bf16.mxu0 %v12377_v56  ;;  %v12729_v56 = vcombine.high %v1275_v51, %v1283_v52 }
 0x48c   : > { %7611 = vmatpush1.bf16.xpose.msra.mxu1 %v12870_v55  ;;  %v12473_v55 = vcombine.high %v1019_v49, %v1027_v50  ;;  %v1115_v49 = vld [vmem:[%s18648_s1 + $0x1608] sm:$0xff] }
 0x48d   : > { %7621 = vmatprep.subr.bf16.mxu1 %v12633_v57  ;;  %v1035_v57 = vld [vmem:[%s18648_s1 + $0x1388] sm:$0xff] }
 0x48e   : > { %v1123_v50 = vld [vmem:[%s18648_s1 + $0x1648] sm:$0xff] }
 0x491   : > { %7285 = vmatmul.mubr.bf16.vlgmr.msra.gmra.mrb[4].mxu0 %v14397_v25 }
 0x492   : > { %7294 = vmatpush1.bf16.xpose.msra.mxu0 %v12376_v62  ;;  %7325 = vmatprep.mubr.bf16.mxu0 %v14407_v33  ;;  %v12728_v62 = vcombine.low %v1275_v51, %v1283_v52 }
 0x493   : > { %7613 = vmatmul.mubr.bf16.vlgmr.msra.gmra.mrb[4].mxu1 %v14397_v25  ;;  %7295 = vmatprep.subr.bf16.mxu0 %v12393_v22  ;;  %v1219_v25 = vld [vmem:[%s18648_s1 + $0x1948] sm:$0xff]  ;;  %v12745_v22 = vcombine.high %v1291_v59, %v1299_v60 }
 0x494   : > { %7622 = vmatpush1.bf16.xpose.msra.mxu1 %v12632_v63  ;;  %7653 = vmatprep.mubr.bf16.mxu1 %v14407_v33  ;;  %v12665_v43 = vcombine.high %v1211_v6, %v1219_v25  ;;  %v1227_v33 = vld [vmem:[%s18648_s1 + $0x1988] sm:$0xff]  ;;  %v12664_v16 = vcombine.low %v1211_v6, %v1219_v25  ;;  %v12489_v63 = vcombine.high %v1035_v57, %v1043_v58 }
 0x495   : > { %7623 = vmatprep.subr.bf16.mxu1 %v12649_v40  ;;  %v12681_v18 = vcombine.high %v1227_v33, %v1235_v14  ;;  %v12680_v29 = vcombine.low %v1227_v33, %v1235_v14  ;;  %v1051_v40 = vld [vmem:[%s18648_s1 + $0x1408] sm:$0xff]  ;;  %v12488_v25 = vcombine.low %v1035_v57, %v1043_v58 }
 0x496   : > { %v1315_v6 = vld [vmem:[%s18648_s1 + $0x1c48] sm:$0xff]  ;;  %v12504_v14 = vcombine.low %v1051_v40, %v1059_v4 }
 0x497   : > { %v1331_v33 = vld [vmem:[%s18648_s1 + $0x1cc8] sm:$0xff] }
 0x49a   : > { %7296 = vmatpush1.bf16.xpose.msra.mxu0 %v12392_v7  ;;  %v12744_v7 = vcombine.low %v1291_v59, %v1299_v60  ;;  %v12808_v60 = vcombine.low %v1355_v47, %v1363_v41 }
 0x49b   : > { %7297 = vmatprep.subr.bf16.mxu0 %v12409_v26  ;;  %v12761_v26 = vcombine.high %v1307_v5, %v1315_v6 }
 0x49c   : > { %7624 = vmatpush1.bf16.xpose.msra.mxu1 %v12648_v8  ;;  %v12505_v8 = vcombine.high %v1051_v40, %v1059_v4  ;;  %v1139_v40 = vld [vmem:[%s18648_s1 + $0x16c8] sm:$0xff] }
 0x49d   : > { %7625 = vmatprep.subr.bf16.mxu1 %v12665_v43  ;;  %v1067_v43 = vld [vmem:[%s18648_s1 + $0x1488] sm:$0xff] }
 0x49e   : > { %v12520_v23 = vcombine.low %v1067_v43, %v1075_v12  ;;  %v1387_v4 = vld [vmem:[%s18648_s1 + $0x1e88] sm:$0xff] }
 0x4a2   : > { %7298 = vmatpush1.bf16.xpose.msra.mxu0 %v12408_v15  ;;  %v12760_v15 = vcombine.low %v1307_v5, %v1315_v6  ;;  %v1395_v5 = vld [vmem:[%s18648_s1 + $0x1ec8] sm:$0xff]  ;;  %v12568_v6 = vcombine.low %v1115_v49, %v1123_v50 }
 0x4a3   : > { %7299 = vmatprep.subr.bf16.mxu0 %v12425_v17  ;;  %v12777_v17 = vcombine.high %v1323_v13, %v1331_v33 }
 0x4a4   : > { %7626 = vmatpush1.bf16.xpose.msra.mxu1 %v12664_v16  ;;  %v12521_v16 = vcombine.high %v1067_v43, %v1075_v12  ;;  %v1155_v43 = vld [vmem:[%s18648_s1 + $0x1748] sm:$0xff] }
 0x4a5   : > { %7627 = vmatprep.subr.bf16.mxu1 %v12681_v18  ;;  %v1083_v18 = vld [vmem:[%s18648_s1 + $0x1508] sm:$0xff] }
 0x4a6   : > { %v12536_v37 = vcombine.low %v1083_v18, %v1091_v19  ;;  %v1403_v12 = vld [vmem:[%s18648_s1 + $0x1f08] sm:$0xff] }
 0x4aa   : > { %7300 = vmatpush1.bf16.xpose.msra.mxu0 %v12424_v36  ;;  %v12776_v36 = vcombine.low %v1323_v13, %v1331_v33  ;;  %v1411_v13 = vld [vmem:[%s18648_s1 + $0x1f48] sm:$0xff] }
 0x4ab   : > { %7301 = vmatprep.subr.bf16.mxu0 %v12441_v30  ;;  %v12793_v30 = vcombine.high %v1339_v20, %v1347_v34 }
 0x4ac   : > { %7628 = vmatpush1.bf16.xpose.msra.mxu1 %v12680_v29  ;;  %v12537_v29 = vcombine.high %v1083_v18, %v1091_v19  ;;  %v1171_v18 = vld [vmem:[%s18648_s1 + $0x17c8] sm:$0xff] }
 0x4ad   : > { %7629 = vmatprep.subr.bf16.mxu1 %v12697_v31  ;;  %v1099_v31 = vld [vmem:[%s18648_s1 + $0x1588] sm:$0xff] }
 0x4ae   : > { %v12552_v57 = vcombine.low %v1099_v31, %v1107_v32  ;;  %v1419_v19 = vld [vmem:[%s18648_s1 + $0x1f88] sm:$0xff] }
 0x4b2   : > { %7302 = vmatpush1.bf16.xpose.msra.mxu0 %v12440_v2  ;;  %v12792_v2 = vcombine.low %v1339_v20, %v1347_v34  ;;  %v1427_v20 = vld [vmem:[%s18648_s1 + $0x1fc8] sm:$0xff] }
 0x4b3   : > { %7303 = vmatprep.subr.bf16.mxu0 %v12457_v46  ;;  %v12809_v46 = vcombine.high %v1355_v47, %v1363_v41  ;;  %v1188_v47 = vld [vmem:[%s18648_s1 + $0x1850] sm:$0xff] }
 0x4b4   : > { %7630 = vmatpush1.bf16.xpose.msra.mxu1 %v12696_v45  ;;  %v12553_v45 = vcombine.high %v1099_v31, %v1107_v32  ;;  %v932_v31 = vld [vmem:[%s18648_s1 + $0x1050] sm:$0xff] }
 0x4b5   : > { %7631 = vmatprep.subr.bf16.mxu1 %v12713_v48  ;;  %v1180_v32 = vld [vmem:[%s18648_s1 + $0x1810] sm:$0xff] }
 0x4ba   : > { %7304 = vmatpush1.bf16.xpose.msra.mxu0 %v12456_v0  ;;  %v1371_v0 = vld [vmem:[%s18648_s1 + $0x1e08] sm:$0xff] }
 0x4bb   : > { %7305 = vmatprep.subr.bf16.mxu0 %v12473_v55 }
 0x4bc   : > { %7632 = vmatpush1.bf16.xpose.msra.mxu1 %v12712_v54  ;;  %v1379_v54 = vld [vmem:[%s18648_s1 + $0x1e48] sm:$0xff] }
 0x4bd   : > { %7633 = vmatprep.subr.bf16.mxu1 %v12729_v56 }
 0x4c2   : > { %7306 = vmatpush1.bf16.xpose.msra.mxu0 %v12472_v61  ;;  %v12569_v61 = vcombine.high %v1115_v49, %v1123_v50  ;;  %v948_v49 = vld [vmem:[%s18648_s1 + $0x10d0] sm:$0xff] }
 0x4c3   : > { %7307 = vmatprep.subr.bf16.mxu0 %v12489_v63  ;;  %v12825_v63 = vcombine.high %v1371_v0, %v1379_v54  ;;  %v1196_v50 = vld [vmem:[%s18648_s1 + $0x1890] sm:$0xff] }
 0x4c4   : > { %7634 = vmatpush1.bf16.xpose.msra.mxu1 %v12728_v62 }
 0x4c5   : > { %7635 = vmatprep.subr.bf16.mxu1 %v12745_v22  ;;  %v1131_v22 = vld [vmem:[%s18648_s1 + $0x1688] sm:$0xff] }
 0x4c6   : > { %v12584_v33 = vcombine.low %v1131_v22, %v1139_v40 }
 0x4ca   : > { %7308 = vmatpush1.bf16.xpose.msra.mxu0 %v12488_v25  ;;  %v12824_v25 = vcombine.low %v1371_v0, %v1379_v54  ;;  %v1204_v0 = vld [vmem:[%s18648_s1 + $0x18d0] sm:$0xff] }
 0x4cb   : > { %7309 = vmatprep.subr.bf16.mxu0 %v12505_v8  ;;  %v12841_v8 = vcombine.high %v1387_v4, %v1395_v5 }
 0x4cc   : > { %7636 = vmatpush1.bf16.xpose.msra.mxu1 %v12744_v7  ;;  %v12585_v7 = vcombine.high %v1131_v22, %v1139_v40 }
 0x4cd   : > { %7637 = vmatprep.subr.bf16.mxu1 %v12761_v26  ;;  %v1147_v26 = vld [vmem:[%s18648_s1 + $0x1708] sm:$0xff] }
 0x4ce   : > { %v12600_v34 = vcombine.low %v1147_v26, %v1155_v43 }
 0x4d2   : > { %7310 = vmatpush1.bf16.xpose.msra.mxu0 %v12504_v14  ;;  %v12840_v14 = vcombine.low %v1387_v4, %v1395_v5  ;;  %v972_v4 = vld [vmem:[%s18648_s1 + $0x1190] sm:$0xff] }
 0x4d3   : > { %7311 = vmatprep.subr.bf16.mxu0 %v12521_v16  ;;  %v12857_v16 = vcombine.high %v1403_v12, %v1411_v13  ;;  %v980_v5 = vld [vmem:[%s18648_s1 + $0x11d0] sm:$0xff] }
 0x4d4   : > { %7638 = vmatpush1.bf16.xpose.msra.mxu1 %v12760_v15  ;;  %v12601_v15 = vcombine.high %v1147_v26, %v1155_v43  ;;  %v988_v43 = vld [vmem:[%s18648_s1 + $0x1210] sm:$0xff] }
 0x4d5   : > { %7639 = vmatprep.subr.bf16.mxu1 %v12777_v17  ;;  %v1163_v17 = vld [vmem:[%s18648_s1 + $0x1788] sm:$0xff] }
 0x4d6   : > { %v12616_v41 = vcombine.low %v1163_v17, %v1171_v18 }
 0x4da   : > { %7312 = vmatpush1.bf16.xpose.msra.mxu0 %v12520_v23  ;;  %v12856_v23 = vcombine.low %v1403_v12, %v1411_v13  ;;  %v996_v12 = vld [vmem:[%s18648_s1 + $0x1250] sm:$0xff] }
 0x4db   : > { %7313 = vmatprep.subr.bf16.mxu0 %v12537_v29  ;;  %v12873_v29 = vcombine.high %v1419_v19, %v1427_v20  ;;  %v1244_v13 = vld [vmem:[%s18648_s1 + $0x1a10] sm:$0xff] }
 0x4dc   : > { %7640 = vmatpush1.bf16.xpose.msra.mxu1 %v12776_v36  ;;  %v12617_v36 = vcombine.high %v1163_v17, %v1171_v18  ;;  %v1004_v18 = vld [vmem:[%s18648_s1 + $0x1290] sm:$0xff] }
 0x4dd   : > { %7641 = vmatprep.subr.bf16.mxu1 %v12793_v30  ;;  %v924_v30 = vld [vmem:[%s18648_s1 + $0x1010] sm:$0xff] }
 0x4de   : > { %v12378_v54 = vcombine.low %v924_v30, %v932_v31 }
 0x4e2   : > { %7314 = vmatpush1.bf16.xpose.msra.mxu0 %v12536_v37  ;;  %v12872_v37 = vcombine.low %v1419_v19, %v1427_v20  ;;  %v1012_v19 = vld [vmem:[%s18648_s1 + $0x12d0] sm:$0xff] }
 0x4e3   : > { %7315 = vmatprep.subr.bf16.mxu0 %v12553_v45  ;;  %v12635_v45 = vcombine.high %v1180_v32, %v1188_v47  ;;  %v1260_v20 = vld [vmem:[%s18648_s1 + $0x1a90] sm:$0xff] }
 0x4e4   : > { %7642 = vmatpush1.bf16.xpose.msra.mxu1 %v12792_v2  ;;  %v16195_v48 = vpop.f32.mrb[0].mxu0  ;;  %v12379_v2 = vcombine.high %v924_v30, %v932_v31  ;;  %v1020_v31 = vld [vmem:[%s18648_s1 + $0x1310] sm:$0xff] }
 0x4e5   : > { %7643 = vmatprep.subr.bf16.mxu1 %v12809_v46  ;;  %v16205_v52 = vpop.f32.mrb[1].mxu0  ;;  %v940_v46 = vld [vmem:[%s18648_s1 + $0x1090] sm:$0xff] }
 0x4e6   : > { %v16203_v51 = vpop.f32.mrb[0].mxu1  ;;  %v6921_v56 = vpop.f32.mrb[2].mxu0 }
 0x4e7   : > { %v16213_v55 = vpop.f32.mrb[1].mxu1  ;;  %v6922_v59 = vpop.f32.mrb[3].mxu0  ;;  %v12634_v56 = vcombine.low %v1180_v32, %v1188_v47  ;;  %v1028_v32 = vld [vmem:[%s18648_s1 + $0x1350] sm:$0xff] }
 0x4e8   : > { %v7249_v58 = vpop.f32.mrb[2].mxu1  ;;  %v956_v59 = vld [vmem:[%s18648_s1 + $0x1110] sm:$0xff] }
 0x4e9   : > { %v7250_v62 = vpop.f32.mrb[3].mxu1  ;;  %v12651_v58 = vcombine.high %v1196_v50, %v1204_v0  ;;  %v1276_v47 = vld [vmem:[%s18648_s1 + $0x1b10] sm:$0xff] }
 0x4ea   : > { %7316 = vmatpush1.bf16.xpose.msra.mxu0 %v12552_v57  ;;  %v12395_v57 = vcombine.high %v940_v46, %v948_v49  ;;  %v12394_v62 = vcombine.low %v940_v46, %v948_v49  ;;  %v1036_v49 = vld [vmem:[%s18648_s1 + $0x1390] sm:$0xff] }
 0x4eb   : > { %7317 = vmatprep.subr.bf16.mxu0 %v12569_v61  ;;  %v1212_v61 = vld [vmem:[%s18648_s1 + $0x1910] sm:$0xff] }
 0x4ec   : > { %7644 = vmatpush1.bf16.xpose.msra.mxu1 %v12808_v60  ;;  %v964_v60 = vld [vmem:[%s18648_s1 + $0x1150] sm:$0xff] }
 0x4ed   : > { %7645 = vmatprep.subr.bf16.mxu1 %v12825_v63  ;;  %v12650_v63 = vcombine.low %v1196_v50, %v1204_v0  ;;  %v12411_v22 = vcombine.high %v956_v59, %v964_v60  ;;  %v1044_v50 = vld [vmem:[%s18648_s1 + $0x13d0] sm:$0xff] }
 0x4ee   : > { %v1292_v0 = vld [vmem:[%s18648_s1 + $0x1b90] sm:$0xff] }
 0x4f2   : > { %7318 = vmatpush1.bf16.xpose.msra.mxu0 %v12568_v6  ;;  %v1236_v6 = vld [vmem:[%s18648_s1 + $0x19d0] sm:$0xff] }
 0x4f3   : > { %7319 = vmatprep.subr.bf16.mxu0 %v12585_v7 }
 0x4f4   : > { %7646 = vmatpush1.bf16.xpose.msra.mxu1 %v12824_v25  ;;  %v12410_v25 = vcombine.low %v956_v59, %v964_v60  ;;  %v1052_v60 = vld [vmem:[%s18648_s1 + $0x1410] sm:$0xff] }
 0x4f5   : > { %7647 = vmatprep.subr.bf16.mxu1 %v12841_v8  ;;  %v12427_v8 = vcombine.high %v972_v4, %v980_v5 }
 0x4fa   : > { %7320 = vmatpush1.bf16.xpose.msra.mxu0 %v12584_v33  ;;  %v1252_v33 = vld [vmem:[%s18648_s1 + $0x1a50] sm:$0xff] }
 0x4fb   : > { %7321 = vmatprep.subr.bf16.mxu0 %v12601_v15  ;;  %v12699_v17 = vcombine.high %v1244_v13, %v1252_v33 }
 0x4fc   : > { %7648 = vmatpush1.bf16.xpose.msra.mxu1 %v12840_v14  ;;  %v12426_v14 = vcombine.low %v972_v4, %v980_v5  ;;  %v1068_v5 = vld [vmem:[%s18648_s1 + $0x1490] sm:$0xff] }
 0x4fd   : > { %7649 = vmatprep.subr.bf16.mxu1 %v12857_v16  ;;  %v12443_v16 = vcombine.high %v988_v43, %v996_v12 }
 0x502   : > { %7322 = vmatpush1.bf16.xpose.msra.mxu0 %v12600_v34  ;;  %v1268_v34 = vld [vmem:[%s18648_s1 + $0x1ad0] sm:$0xff] }
 0x503   : > { %7323 = vmatprep.subr.bf16.mxu0 %v12617_v36  ;;  %v12698_v36 = vcombine.low %v1244_v13, %v1252_v33  ;;  %v12715_v30 = vcombine.high %v1260_v20, %v1268_v34  ;;  %v1092_v13 = vld [vmem:[%s18648_s1 + $0x1550] sm:$0xff] }
 0x504   : > { %7650 = vmatpush1.bf16.xpose.msra.mxu1 %v12856_v23  ;;  %v12442_v23 = vcombine.low %v988_v43, %v996_v12  ;;  %v1084_v12 = vld [vmem:[%s18648_s1 + $0x1510] sm:$0xff] }
 0x505   : > { %7651 = vmatprep.subr.bf16.mxu1 %v12873_v29  ;;  %v12459_v29 = vcombine.high %v1004_v18, %v1012_v19  ;;  %v1340_v33 = vld [vmem:[%s18648_s1 + $0x1d10] sm:$0xff] }
 0x50a   : > { %7324 = vmatpush1.bf16.xpose.msra.mxu0 %v12616_v41  ;;  %v1284_v41 = vld [vmem:[%s18648_s1 + $0x1b50] sm:$0xff] }
 0x50b   : > { %7334 = vmatprep.subr.bf16.mxu0 %v12379_v2  ;;  %v12714_v2 = vcombine.low %v1260_v20, %v1268_v34  ;;  %v12731_v46 = vcombine.high %v1276_v47, %v1284_v41  ;;  %v1108_v20 = vld [vmem:[%s18648_s1 + $0x15d0] sm:$0xff] }
 0x50c   : > { %7652 = vmatpush1.bf16.xpose.msra.mxu1 %v12872_v37  ;;  %v12458_v37 = vcombine.low %v1004_v18, %v1012_v19  ;;  %v1100_v19 = vld [vmem:[%s18648_s1 + $0x1590] sm:$0xff] }
 0x50d   : > { %7662 = vmatprep.subr.bf16.mxu1 %v12635_v45  ;;  %v12475_v45 = vcombine.high %v1020_v31, %v1028_v32  ;;  %v1356_v34 = vld [vmem:[%s18648_s1 + $0x1d90] sm:$0xff] }
 0x511   : > { %7326 = vmatmul.mubr.bf16.vlgmr.msra.gmra.mrb[4].mxu0 %v14610_v44 }
 0x512   : > { %7335 = vmatpush1.bf16.xpose.msra.mxu0 %v12378_v54  ;;  %7366 = vmatprep.mubr.bf16.mxu0 %v14620_v53  ;;  %v1300_v54 = vld [vmem:[%s18648_s1 + $0x1bd0] sm:$0xff] }
 0x513   : > { %7654 = vmatmul.mubr.bf16.vlgmr.msra.gmra.mrb[4].mxu1 %v14610_v44  ;;  %7336 = vmatprep.subr.bf16.mxu0 %v12395_v57  ;;  %v1220_v44 = vld [vmem:[%s18648_s1 + $0x1950] sm:$0xff]  ;;  %v12730_v57 = vcombine.low %v1276_v47, %v1284_v41  ;;  %v12747_v59 = vcombine.high %v1292_v0, %v1300_v54 }
 0x514   : > { %7663 = vmatpush1.bf16.xpose.msra.mxu1 %v12634_v56  ;;  %7694 = vmatprep.mubr.bf16.mxu1 %v14620_v53  ;;  %v12667_v40 = vcombine.high %v1212_v61, %v1220_v44  ;;  %v1228_v53 = vld [vmem:[%s18648_s1 + $0x1990] sm:$0xff]  ;;  %v12666_v7 = vcombine.low %v1212_v61, %v1220_v44  ;;  %v12474_v56 = vcombine.low %v1020_v31, %v1028_v32 }
 0x515   : > { %7664 = vmatprep.subr.bf16.mxu1 %v12651_v58  ;;  %v12683_v26 = vcombine.high %v1228_v53, %v1236_v6  ;;  %v12682_v15 = vcombine.low %v1228_v53, %v1236_v6  ;;  %v12491_v58 = vcombine.high %v1036_v49, %v1044_v50  ;;  %v1060_v61 = vld [vmem:[%s18648_s1 + $0x1450] sm:$0xff] }
 0x516   : > { %v1308_v44 = vld [vmem:[%s18648_s1 + $0x1c10] sm:$0xff] }
 0x517   : > { %v1076_v53 = vld [vmem:[%s18648_s1 + $0x14d0] sm:$0xff] }
 0x518   : > { %v1324_v6 = vld [vmem:[%s18648_s1 + $0x1c90] sm:$0xff] }
 0x519   : > { %v1116_v32 = vld [vmem:[%s18648_s1 + $0x1610] sm:$0xff] }
 0x51a   : > { %7337 = vmatpush1.bf16.xpose.msra.mxu0 %v12394_v62  ;;  %v1316_v62 = vld [vmem:[%s18648_s1 + $0x1c50] sm:$0xff] }
 0x51b   : > { %7338 = vmatprep.subr.bf16.mxu0 %v12411_v22  ;;  %v12746_v22 = vcombine.low %v1292_v0, %v1300_v54  ;;  %v12763_v4 = vcombine.high %v1308_v44, %v1316_v62  ;;  %v1124_v47 = vld [vmem:[%s18648_s1 + $0x1650] sm:$0xff] }
 0x51c   : > { %7665 = vmatpush1.bf16.xpose.msra.mxu1 %v12650_v63  ;;  %v12490_v63 = vcombine.low %v1036_v49, %v1044_v50  ;;  %v1372_v41 = vld [vmem:[%s18648_s1 + $0x1e10] sm:$0xff] }
 0x51d   : > { %7666 = vmatprep.subr.bf16.mxu1 %v12667_v40  ;;  %v12507_v40 = vcombine.high %v1052_v60, %v1060_v61  ;;  %v1132_v50 = vld [vmem:[%s18648_s1 + $0x1690] sm:$0xff] }
 0x51e   : > { %v1140_v0 = vld [vmem:[%s18648_s1 + $0x16d0] sm:$0xff] }
 0x51f   : > { %v1388_v54 = vld [vmem:[%s18648_s1 + $0x1e90] sm:$0xff] }
 0x522   : > { %7339 = vmatpush1.bf16.xpose.msra.mxu0 %v12410_v25  ;;  %v1332_v25 = vld [vmem:[%s18648_s1 + $0x1cd0] sm:$0xff] }
 0x523   : > { %7340 = vmatprep.subr.bf16.mxu0 %v12427_v8  ;;  %v12762_v8 = vcombine.low %v1308_v44, %v1316_v62  ;;  %v12779_v43 = vcombine.high %v1324_v6, %v1332_v25  ;;  %v1156_v44 = vld [vmem:[%s18648_s1 + $0x1750] sm:$0xff] }
 0x524   : > { %7667 = vmatpush1.bf16.xpose.msra.mxu1 %v12666_v7  ;;  %v12506_v7 = vcombine.low %v1052_v60, %v1060_v61  ;;  %v1148_v61 = vld [vmem:[%s18648_s1 + $0x1710] sm:$0xff] }
 0x525   : > { %7668 = vmatprep.subr.bf16.mxu1 %v12683_v26  ;;  %v12523_v26 = vcombine.high %v1068_v5, %v1076_v53  ;;  %v1404_v62 = vld [vmem:[%s18648_s1 + $0x1f10] sm:$0xff] }
 0x52a   : > { %7341 = vmatpush1.bf16.xpose.msra.mxu0 %v12426_v14  ;;  %v1348_v14 = vld [vmem:[%s18648_s1 + $0x1d50] sm:$0xff] }
 0x52b   : > { %7342 = vmatprep.subr.bf16.mxu0 %v12443_v16  ;;  %v12778_v16 = vcombine.low %v1324_v6, %v1332_v25  ;;  %v12795_v18 = vcombine.high %v1340_v33, %v1348_v14  ;;  %v1172_v6 = vld [vmem:[%s18648_s1 + $0x17d0] sm:$0xff] }
 0x52c   : > { %7669 = vmatpush1.bf16.xpose.msra.mxu1 %v12682_v15  ;;  %v12522_v15 = vcombine.low %v1068_v5, %v1076_v53  ;;  %v1164_v53 = vld [vmem:[%s18648_s1 + $0x1790] sm:$0xff] }
 0x52d   : > { %7670 = vmatprep.subr.bf16.mxu1 %v12699_v17  ;;  %v12539_v17 = vcombine.high %v1084_v12, %v1092_v13  ;;  %v1420_v25 = vld [vmem:[%s18648_s1 + $0x1f90] sm:$0xff] }
 0x532   : > { %7343 = vmatpush1.bf16.xpose.msra.mxu0 %v12442_v23  ;;  %v1364_v23 = vld [vmem:[%s18648_s1 + $0x1dd0] sm:$0xff] }
 0x533   : > { %7344 = vmatprep.subr.bf16.mxu0 %v12459_v29  ;;  %v12794_v29 = vcombine.low %v1340_v33, %v1348_v14  ;;  %v12811_v31 = vcombine.high %v1356_v34, %v1364_v23  ;;  %v933_v33 = vld [vmem:[%s18648_s1 + $0x1058] sm:$0xff] }
 0x534   : > { %7671 = vmatpush1.bf16.xpose.msra.mxu1 %v12698_v36  ;;  %v12538_v36 = vcombine.low %v1084_v12, %v1092_v13  ;;  %v925_v13 = vld [vmem:[%s18648_s1 + $0x1018] sm:$0xff] }
 0x535   : > { %7672 = vmatprep.subr.bf16.mxu1 %v12715_v30  ;;  %v12555_v30 = vcombine.high %v1100_v19, %v1108_v20  ;;  %v1181_v14 = vld [vmem:[%s18648_s1 + $0x1818] sm:$0xff] }
 0x53a   : > { %7345 = vmatpush1.bf16.xpose.msra.mxu0 %v12458_v37  ;;  %v1380_v37 = vld [vmem:[%s18648_s1 + $0x1e50] sm:$0xff] }
 0x53b   : > { %7346 = vmatprep.subr.bf16.mxu0 %v12475_v45  ;;  %v12810_v45 = vcombine.low %v1356_v34, %v1364_v23  ;;  %v12827_v49 = vcombine.high %v1372_v41, %v1380_v37  ;;  %v949_v34 = vld [vmem:[%s18648_s1 + $0x10d8] sm:$0xff] }
 0x53c   : > { %7673 = vmatpush1.bf16.xpose.msra.mxu1 %v12714_v2  ;;  %v12554_v2 = vcombine.low %v1100_v19, %v1108_v20  ;;  %v941_v20 = vld [vmem:[%s18648_s1 + $0x1098] sm:$0xff] }
 0x53d   : > { %7674 = vmatprep.subr.bf16.mxu1 %v12731_v46  ;;  %v12571_v46 = vcombine.high %v1116_v32, %v1124_v47  ;;  %v1197_v23 = vld [vmem:[%s18648_s1 + $0x1898] sm:$0xff] }
 0x542   : > { %7347 = vmatpush1.bf16.xpose.msra.mxu0 %v12474_v56  ;;  %v1396_v56 = vld [vmem:[%s18648_s1 + $0x1ed0] sm:$0xff] }
 0x543   : > { %7348 = vmatprep.subr.bf16.mxu0 %v12491_v58  ;;  %v12826_v58 = vcombine.low %v1372_v41, %v1380_v37  ;;  %v12843_v60 = vcombine.high %v1388_v54, %v1396_v56  ;;  %v965_v41 = vld [vmem:[%s18648_s1 + $0x1158] sm:$0xff] }
 0x544   : > { %7675 = vmatpush1.bf16.xpose.msra.mxu1 %v12730_v57  ;;  %v12570_v57 = vcombine.low %v1116_v32, %v1124_v47  ;;  %v957_v47 = vld [vmem:[%s18648_s1 + $0x1118] sm:$0xff] }
 0x545   : > { %7676 = vmatprep.subr.bf16.mxu1 %v12747_v59  ;;  %v12587_v59 = vcombine.high %v1132_v50, %v1140_v0  ;;  %v1213_v37 = vld [vmem:[%s18648_s1 + $0x1918] sm:$0xff] }
 0x54a   : > { %7349 = vmatpush1.bf16.xpose.msra.mxu0 %v12490_v63  ;;  %v1412_v63 = vld [vmem:[%s18648_s1 + $0x1f50] sm:$0xff] }
 0x54b   : > { %7350 = vmatprep.subr.bf16.mxu0 %v12507_v40  ;;  %v12842_v40 = vcombine.low %v1388_v54, %v1396_v56  ;;  %v12859_v5 = vcombine.high %v1404_v62, %v1412_v63  ;;  %v1237_v54 = vld [vmem:[%s18648_s1 + $0x19d8] sm:$0xff]  ;;  %v12412_v56 = vcombine.low %v957_v47, %v965_v41 }
 0x54c   : > { %7677 = vmatpush1.bf16.xpose.msra.mxu1 %v12746_v22  ;;  %v12586_v22 = vcombine.low %v1132_v50, %v1140_v0  ;;  %v973_v50 = vld [vmem:[%s18648_s1 + $0x1198] sm:$0xff] }
 0x54d   : > { %7678 = vmatprep.subr.bf16.mxu1 %v12763_v4  ;;  %v12603_v4 = vcombine.high %v1148_v61, %v1156_v44  ;;  %v981_v0 = vld [vmem:[%s18648_s1 + $0x11d8] sm:$0xff] }
 0x552   : > { %7351 = vmatpush1.bf16.xpose.msra.mxu0 %v12506_v7  ;;  %v1428_v7 = vld [vmem:[%s18648_s1 + $0x1fd0] sm:$0xff] }
 0x553   : > { %7352 = vmatprep.subr.bf16.mxu0 %v12523_v26  ;;  %v12858_v26 = vcombine.low %v1404_v62, %v1412_v63  ;;  %v12875_v12 = vcombine.high %v1420_v25, %v1428_v7  ;;  %v1253_v62 = vld [vmem:[%s18648_s1 + $0x1a58] sm:$0xff]  ;;  %v12428_v63 = vcombine.low %v973_v50, %v981_v0 }
 0x554   : > { %7679 = vmatpush1.bf16.xpose.msra.mxu1 %v12762_v8  ;;  %v12602_v8 = vcombine.low %v1148_v61, %v1156_v44  ;;  %v997_v61 = vld [vmem:[%s18648_s1 + $0x1258] sm:$0xff] }
 0x555   : > { %7680 = vmatprep.subr.bf16.mxu1 %v12779_v43  ;;  %v12619_v43 = vcombine.high %v1164_v53, %v1172_v6  ;;  %v1245_v44 = vld [vmem:[%s18648_s1 + $0x1a18] sm:$0xff] }
 0x55a   : > { %7353 = vmatpush1.bf16.xpose.msra.mxu0 %v12522_v15  ;;  %v1189_v15 = vld [vmem:[%s18648_s1 + $0x1858] sm:$0xff] }
 0x55b   : > { %7354 = vmatprep.subr.bf16.mxu0 %v12539_v17  ;;  %v12874_v17 = vcombine.low %v1420_v25, %v1428_v7  ;;  %v12637_v19 = vcombine.high %v1181_v14, %v1189_v15  ;;  %v1269_v25 = vld [vmem:[%s18648_s1 + $0x1ad8] sm:$0xff] }
 0x55c   : > { %7681 = vmatpush1.bf16.xpose.msra.mxu1 %v12778_v16  ;;  %v12618_v16 = vcombine.low %v1164_v53, %v1172_v6  ;;  %v1013_v53 = vld [vmem:[%s18648_s1 + $0x12d8] sm:$0xff] }
 0x55d   : > { %7682 = vmatprep.subr.bf16.mxu1 %v12795_v18  ;;  %v12381_v18 = vcombine.high %v925_v13, %v933_v33  ;;  %v1261_v6 = vld [vmem:[%s18648_s1 + $0x1a98] sm:$0xff] }
 0x562   : > { %7355 = vmatpush1.bf16.xpose.msra.mxu0 %v12538_v36  ;;  %v1205_v36 = vld [vmem:[%s18648_s1 + $0x18d8] sm:$0xff] }
 0x563   : > { %7356 = vmatprep.subr.bf16.mxu0 %v12555_v30  ;;  %v12636_v30 = vcombine.low %v1181_v14, %v1189_v15  ;;  %v12653_v32 = vcombine.high %v1197_v23, %v1205_v36  ;;  %v1285_v14 = vld [vmem:[%s18648_s1 + $0x1b58] sm:$0xff] }
 0x564   : > { %7683 = vmatpush1.bf16.xpose.msra.mxu1 %v12794_v29  ;;  %v12380_v29 = vcombine.low %v925_v13, %v933_v33  ;;  %v1029_v13 = vld [vmem:[%s18648_s1 + $0x1358] sm:$0xff] }
 0x565   : > { %7684 = vmatprep.subr.bf16.mxu1 %v12811_v31  ;;  %v12397_v31 = vcombine.high %v941_v20, %v949_v34  ;;  %v1277_v33 = vld [vmem:[%s18648_s1 + $0x1b18] sm:$0xff] }
 0x56a   : > { %7357 = vmatpush1.bf16.xpose.msra.mxu0 %v12554_v2  ;;  %v12396_v2 = vcombine.low %v941_v20, %v949_v34  ;;  %v1045_v20 = vld [vmem:[%s18648_s1 + $0x13d8] sm:$0xff] }
 0x56b   : > { %7358 = vmatprep.subr.bf16.mxu0 %v12571_v46  ;;  %v12413_v46 = vcombine.high %v957_v47, %v965_v41  ;;  %v1293_v34 = vld [vmem:[%s18648_s1 + $0x1b98] sm:$0xff] }
 0x56c   : > { %7685 = vmatpush1.bf16.xpose.msra.mxu1 %v12810_v45  ;;  %v12652_v45 = vcombine.low %v1197_v23, %v1205_v36  ;;  %v1301_v23 = vld [vmem:[%s18648_s1 + $0x1bd8] sm:$0xff] }
 0x56d   : > { %7686 = vmatprep.subr.bf16.mxu1 %v12827_v49  ;;  %v1061_v47 = vld [vmem:[%s18648_s1 + $0x1458] sm:$0xff] }
 0x56e   : > { %v1309_v41 = vld [vmem:[%s18648_s1 + $0x1c18] sm:$0xff] }
 0x572   : > { %7359 = vmatpush1.bf16.xpose.msra.mxu0 %v12570_v57 }
 0x573   : > { %7360 = vmatprep.subr.bf16.mxu0 %v12587_v59 }
 0x574   : > { %7687 = vmatpush1.bf16.xpose.msra.mxu1 %v12826_v58  ;;  %v12429_v58 = vcombine.high %v973_v50, %v981_v0  ;;  %v1077_v50 = vld [vmem:[%s18648_s1 + $0x14d8] sm:$0xff] }
 0x575   : > { %7688 = vmatprep.subr.bf16.mxu1 %v12843_v60  ;;  %v989_v60 = vld [vmem:[%s18648_s1 + $0x1218] sm:$0xff] }
 0x576   : > { %v12444_v7 = vcombine.low %v989_v60, %v997_v61  ;;  %v1325_v0 = vld [vmem:[%s18648_s1 + $0x1c98] sm:$0xff] }
 0x57a   : > { %7361 = vmatpush1.bf16.xpose.msra.mxu0 %v12586_v22 }
 0x57b   : > { %7362 = vmatprep.subr.bf16.mxu0 %v12603_v4  ;;  %v12701_v4 = vcombine.high %v1245_v44, %v1253_v62 }
 0x57c   : > { %7689 = vmatpush1.bf16.xpose.msra.mxu1 %v12842_v40  ;;  %v12445_v40 = vcombine.high %v989_v60, %v997_v61  ;;  %v1093_v60 = vld [vmem:[%s18648_s1 + $0x1558] sm:$0xff] }
 0x57d   : > { %7690 = vmatprep.subr.bf16.mxu1 %v12859_v5  ;;  %v1005_v5 = vld [vmem:[%s18648_s1 + $0x1298] sm:$0xff] }
 0x57e   : > { %v12460_v15 = vcombine.low %v1005_v5, %v1013_v53  ;;  %v1341_v61 = vld [vmem:[%s18648_s1 + $0x1d18] sm:$0xff] }
 0x582   : > { %7363 = vmatpush1.bf16.xpose.msra.mxu0 %v12602_v8  ;;  %v12700_v8 = vcombine.low %v1245_v44, %v1253_v62  ;;  %v1349_v44 = vld [vmem:[%s18648_s1 + $0x1d58] sm:$0xff] }
 0x583   : > { %7364 = vmatprep.subr.bf16.mxu0 %v12619_v43  ;;  %v12717_v43 = vcombine.high %v1261_v6, %v1269_v25 }
 0x584   : > { %7691 = vmatpush1.bf16.xpose.msra.mxu1 %v12858_v26  ;;  %v12461_v26 = vcombine.high %v1005_v5, %v1013_v53  ;;  %v1109_v5 = vld [vmem:[%s18648_s1 + $0x15d8] sm:$0xff] }
 0x585   : > { %7692 = vmatprep.subr.bf16.mxu1 %v12875_v12  ;;  %v1021_v12 = vld [vmem:[%s18648_s1 + $0x1318] sm:$0xff] }
 0x586   : > { %v12476_v36 = vcombine.low %v1021_v12, %v1029_v13  ;;  %v1357_v53 = vld [vmem:[%s18648_s1 + $0x1d98] sm:$0xff] }
 0x58a   : > { %7365 = vmatpush1.bf16.xpose.msra.mxu0 %v12618_v16  ;;  %v12716_v16 = vcombine.low %v1261_v6, %v1269_v25  ;;  %v1365_v6 = vld [vmem:[%s18648_s1 + $0x1dd8] sm:$0xff] }
 0x58b   : > { %7375 = vmatprep.subr.bf16.mxu0 %v12381_v18  ;;  %v12733_v18 = vcombine.high %v1277_v33, %v1285_v14 }
 0x58c   : > { %7693 = vmatpush1.bf16.xpose.msra.mxu1 %v12874_v17  ;;  %v12477_v17 = vcombine.high %v1021_v12, %v1029_v13  ;;  %v1125_v12 = vld [vmem:[%s18648_s1 + $0x1658] sm:$0xff] }
 0x58d   : > { %7703 = vmatprep.subr.bf16.mxu1 %v12637_v19  ;;  %v1037_v19 = vld [vmem:[%s18648_s1 + $0x1398] sm:$0xff] }
 0x58e   : > { %v1373_v13 = vld [vmem:[%s18648_s1 + $0x1e18] sm:$0xff] }
 0x591   : > { %7367 = vmatmul.mubr.bf16.vlgmr.msra.gmra.mrb[4].mxu0 %v14819_v3 }
 0x592   : > { %7376 = vmatpush1.bf16.xpose.msra.mxu0 %v12380_v29  ;;  %7407 = vmatprep.mubr.bf16.mxu0 %v14829_v10  ;;  %v12732_v29 = vcombine.low %v1277_v33, %v1285_v14  ;;  %v1381_v33 = vld [vmem:[%s18648_s1 + $0x1e58] sm:$0xff] }
 0x593   : > { %7695 = vmatmul.mubr.bf16.vlgmr.msra.gmra.mrb[4].mxu1 %v14819_v3  ;;  %7377 = vmatprep.subr.bf16.mxu0 %v12397_v31  ;;  %v1221_v3 = vld [vmem:[%s18648_s1 + $0x1958] sm:$0xff]  ;;  %v12749_v31 = vcombine.high %v1293_v34, %v1301_v23 }
 0x594   : > { %7704 = vmatpush1.bf16.xpose.msra.mxu1 %v12636_v30  ;;  %7735 = vmatprep.mubr.bf16.mxu1 %v14829_v10  ;;  %v12669_v49 = vcombine.high %v1213_v37, %v1221_v3  ;;  %v1229_v10 = vld [vmem:[%s18648_s1 + $0x1998] sm:$0xff]  ;;  %v12668_v57 = vcombine.low %v1213_v37, %v1221_v3  ;;  %v12493_v30 = vcombine.high %v1037_v19, %v1045_v20 }
 0x595   : > { %7705 = vmatprep.subr.bf16.mxu1 %v12653_v32  ;;  %v12685_v59 = vcombine.high %v1229_v10, %v1237_v54  ;;  %v12684_v22 = vcombine.low %v1229_v10, %v1237_v54  ;;  %v1053_v32 = vld [vmem:[%s18648_s1 + $0x1418] sm:$0xff]  ;;  %v12492_v3 = vcombine.low %v1037_v19, %v1045_v20 }
 0x596   : > { %v1317_v37 = vld [vmem:[%s18648_s1 + $0x1c58] sm:$0xff]  ;;  %v12508_v54 = vcombine.low %v1053_v32, %v1061_v47 }
 0x597   : > { %v1333_v10 = vld [vmem:[%s18648_s1 + $0x1cd8] sm:$0xff] }
 0x598   : > { %v1141_v19 = vld [vmem:[%s18648_s1 + $0x16d8] sm:$0xff] }
 0x599   : > { %v1389_v20 = vld [vmem:[%s18648_s1 + $0x1e98] sm:$0xff] }
 0x59a   : > { %7378 = vmatpush1.bf16.xpose.msra.mxu0 %v12396_v2  ;;  %v12748_v2 = vcombine.low %v1293_v34, %v1301_v23  ;;  %v1397_v34 = vld [vmem:[%s18648_s1 + $0x1ed8] sm:$0xff] }
 0x59b   : > { %7379 = vmatprep.subr.bf16.mxu0 %v12413_v46  ;;  %v12765_v46 = vcombine.high %v1309_v41, %v1317_v37 }
 0x59c   : > { %7706 = vmatpush1.bf16.xpose.msra.mxu1 %v12652_v45  ;;  %v12509_v45 = vcombine.high %v1053_v32, %v1061_v47  ;;  %v1157_v32 = vld [vmem:[%s18648_s1 + $0x1758] sm:$0xff] }
 0x59d   : > { %7707 = vmatprep.subr.bf16.mxu1 %v12669_v49  ;;  %v1069_v49 = vld [vmem:[%s18648_s1 + $0x1498] sm:$0xff] }
 0x59e   : > { %v12524_v62 = vcombine.low %v1069_v49, %v1077_v50  ;;  %v1405_v47 = vld [vmem:[%s18648_s1 + $0x1f18] sm:$0xff] }
 0x5a2   : > { %7380 = vmatpush1.bf16.xpose.msra.mxu0 %v12412_v56  ;;  %v12764_v56 = vcombine.low %v1309_v41, %v1317_v37  ;;  %v1413_v41 = vld [vmem:[%s18648_s1 + $0x1f58] sm:$0xff] }
 0x5a3   : > { %7381 = vmatprep.subr.bf16.mxu0 %v12429_v58  ;;  %v12781_v58 = vcombine.high %v1325_v0, %v1333_v10 }
 0x5a4   : > { %7708 = vmatpush1.bf16.xpose.msra.mxu1 %v12668_v57  ;;  %v12525_v57 = vcombine.high %v1069_v49, %v1077_v50  ;;  %v1173_v49 = vld [vmem:[%s18648_s1 + $0x17d8] sm:$0xff] }
 0x5a5   : > { %7709 = vmatprep.subr.bf16.mxu1 %v12685_v59  ;;  %v1085_v59 = vld [vmem:[%s18648_s1 + $0x1518] sm:$0xff] }
 0x5a6   : > { %v12540_v25 = vcombine.low %v1085_v59, %v1093_v60  ;;  %v1421_v50 = vld [vmem:[%s18648_s1 + $0x1f98] sm:$0xff] }
 0x5aa   : > { %7382 = vmatpush1.bf16.xpose.msra.mxu0 %v12428_v63  ;;  %v12780_v63 = vcombine.low %v1325_v0, %v1333_v10  ;;  %v1429_v0 = vld [vmem:[%s18648_s1 + $0x1fd8] sm:$0xff] }
 0x5ab   : > { %7383 = vmatprep.subr.bf16.mxu0 %v12445_v40  ;;  %v12797_v40 = vcombine.high %v1341_v61, %v1349_v44 }
 0x5ac   : > { %7710 = vmatpush1.bf16.xpose.msra.mxu1 %v12684_v22  ;;  %v12541_v22 = vcombine.high %v1085_v59, %v1093_v60  ;;  %v934_v59 = vld [vmem:[%s18648_s1 + $0x1060] sm:$0xff] }
 0x5ad   : > { %7711 = vmatprep.subr.bf16.mxu1 %v12701_v4  ;;  %v1101_v4 = vld [vmem:[%s18648_s1 + $0x1598] sm:$0xff]  ;;  %v1182_v60 = vld [vmem:[%s18648_s1 + $0x1820] sm:$0xff] }
 0x5ae   : > { %v12556_v14 = vcombine.low %v1101_v4, %v1109_v5 }
 0x5b2   : > { %7384 = vmatpush1.bf16.xpose.msra.mxu0 %v12444_v7  ;;  %v12796_v7 = vcombine.low %v1341_v61, %v1349_v44  ;;  %v1190_v61 = vld [vmem:[%s18648_s1 + $0x1860] sm:$0xff] }
 0x5b3   : > { %7385 = vmatprep.subr.bf16.mxu0 %v12461_v26  ;;  %v12813_v26 = vcombine.high %v1357_v53, %v1365_v6 }
 0x5b4   : > { %7712 = vmatpush1.bf16.xpose.msra.mxu1 %v12700_v8  ;;  %v12557_v8 = vcombine.high %v1101_v4, %v1109_v5  ;;  %v950_v4 = vld [vmem:[%s18648_s1 + $0x10e0] sm:$0xff] }
 0x5b5   : > { %7713 = vmatprep.subr.bf16.mxu1 %v12717_v43  ;;  %v1117_v43 = vld [vmem:[%s18648_s1 + $0x1618] sm:$0xff]  ;;  %v1198_v5 = vld [vmem:[%s18648_s1 + $0x18a0] sm:$0xff] }
 0x5b6   : > { %v12572_v23 = vcombine.low %v1117_v43, %v1125_v12 }
 0x5ba   : > { %7386 = vmatpush1.bf16.xpose.msra.mxu0 %v12460_v15  ;;  %v12812_v15 = vcombine.low %v1357_v53, %v1365_v6  ;;  %v1206_v53 = vld [vmem:[%s18648_s1 + $0x18e0] sm:$0xff] }
 0x5bb   : > { %7387 = vmatprep.subr.bf16.mxu0 %v12477_v17  ;;  %v12829_v17 = vcombine.high %v1373_v13, %v1381_v33 }
 0x5bc   : > { %7714 = vmatpush1.bf16.xpose.msra.mxu1 %v12716_v16  ;;  %v12573_v16 = vcombine.high %v1117_v43, %v1125_v12  ;;  %v966_v43 = vld [vmem:[%s18648_s1 + $0x1160] sm:$0xff] }
 0x5bd   : > { %7715 = vmatprep.subr.bf16.mxu1 %v12733_v18  ;;  %v1133_v18 = vld [vmem:[%s18648_s1 + $0x1698] sm:$0xff]  ;;  %v1214_v12 = vld [vmem:[%s18648_s1 + $0x1920] sm:$0xff] }
 0x5be   : > { %v12588_v37 = vcombine.low %v1133_v18, %v1141_v19 }
 0x5c2   : > { %7388 = vmatpush1.bf16.xpose.msra.mxu0 %v12476_v36  ;;  %v12828_v36 = vcombine.low %v1373_v13, %v1381_v33  ;;  %v12654_v33 = vcombine.low %v1198_v5, %v1206_v53 }
 0x5c3   : > { %7389 = vmatprep.subr.bf16.mxu0 %v12493_v30  ;;  %v12845_v30 = vcombine.high %v1389_v20, %v1397_v34 }
 0x5c4   : > { %7716 = vmatpush1.bf16.xpose.msra.mxu1 %v12732_v29  ;;  %v12589_v29 = vcombine.high %v1133_v18, %v1141_v19  ;;  %v1238_v18 = vld [vmem:[%s18648_s1 + $0x19e0] sm:$0xff] }
 0x5c5   : > { %7717 = vmatprep.subr.bf16.mxu1 %v12749_v31  ;;  %v1149_v31 = vld [vmem:[%s18648_s1 + $0x1718] sm:$0xff] }
 0x5c6   : > { %v12604_v10 = vcombine.low %v1149_v31, %v1157_v32 }
 0x5ca   : > { %7390 = vmatpush1.bf16.xpose.msra.mxu0 %v12492_v3  ;;  %v12844_v3 = vcombine.low %v1389_v20, %v1397_v34 }
 0x5cb   : > { %7391 = vmatprep.subr.bf16.mxu0 %v12509_v45  ;;  %v12861_v45 = vcombine.high %v1405_v47, %v1413_v41 }
 0x5cc   : > { %7718 = vmatpush1.bf16.xpose.msra.mxu1 %v12748_v2  ;;  %v12605_v2 = vcombine.high %v1149_v31, %v1157_v32  ;;  %v1254_v31 = vld [vmem:[%s18648_s1 + $0x1a60] sm:$0xff] }
 0x5cd   : > { %7719 = vmatprep.subr.bf16.mxu1 %v12765_v46  ;;  %v1165_v46 = vld [vmem:[%s18648_s1 + $0x1798] sm:$0xff] }
 0x5ce   : > { %v12620_v44 = vcombine.low %v1165_v46, %v1173_v49 }
 0x5d2   : > { %7392 = vmatpush1.bf16.xpose.msra.mxu0 %v12508_v54  ;;  %v12860_v54 = vcombine.low %v1405_v47, %v1413_v41 }
 0x5d3   : > { %7393 = vmatprep.subr.bf16.mxu0 %v12525_v57  ;;  %v12877_v57 = vcombine.high %v1421_v50, %v1429_v0 }
 0x5d4   : > { %7720 = vmatpush1.bf16.xpose.msra.mxu1 %v12764_v56  ;;  %v12621_v56 = vcombine.high %v1165_v46, %v1173_v49  ;;  %v1270_v46 = vld [vmem:[%s18648_s1 + $0x1ae0] sm:$0xff] }
 0x5d5   : > { %7721 = vmatprep.subr.bf16.mxu1 %v12781_v58  ;;  %v926_v58 = vld [vmem:[%s18648_s1 + $0x1020] sm:$0xff] }
 0x5d6   : > { %v12382_v6 = vcombine.low %v926_v58, %v934_v59 }
 0x5da   : > { %7394 = vmatpush1.bf16.xpose.msra.mxu0 %v12524_v62  ;;  %v12876_v62 = vcombine.low %v1421_v50, %v1429_v0 }
 0x5db   : > { %7395 = vmatprep.subr.bf16.mxu0 %v12541_v22  ;;  %v12639_v22 = vcombine.high %v1182_v60, %v1190_v61 }
 0x5dc   : > { %7722 = vmatpush1.bf16.xpose.msra.mxu1 %v12780_v63  ;;  %v12383_v63 = vcombine.high %v926_v58, %v934_v59  ;;  %v1286_v58 = vld [vmem:[%s18648_s1 + $0x1b60] sm:$0xff] }
 0x5dd   : > { %7723 = vmatprep.subr.bf16.mxu1 %v12797_v40  ;;  %v942_v40 = vld [vmem:[%s18648_s1 + $0x10a0] sm:$0xff] }
 0x5de   : > { %v12398_v13 = vcombine.low %v942_v40, %v950_v4 }
 0x5e2   : > { %7396 = vmatpush1.bf16.xpose.msra.mxu0 %v12540_v25  ;;  %v12638_v25 = vcombine.low %v1182_v60, %v1190_v61 }
 0x5e3   : > { %7397 = vmatprep.subr.bf16.mxu0 %v12557_v8  ;;  %v12655_v8 = vcombine.high %v1198_v5, %v1206_v53 }
 0x5e4   : > { %7724 = vmatpush1.bf16.xpose.msra.mxu1 %v12796_v7  ;;  %v12399_v7 = vcombine.high %v942_v40, %v950_v4  ;;  %v1302_v40 = vld [vmem:[%s18648_s1 + $0x1be0] sm:$0xff] }
 0x5e5   : > { %7725 = vmatprep.subr.bf16.mxu1 %v12813_v26  ;;  %v958_v26 = vld [vmem:[%s18648_s1 + $0x1120] sm:$0xff] }
 0x5e6   : > { %v12414_v19 = vcombine.low %v958_v26, %v966_v43 }
 0x5ea   : > { %7398 = vmatpush1.bf16.xpose.msra.mxu0 %v12556_v14  ;;  %v12415_v14 = vcombine.high %v958_v26, %v966_v43  ;;  %v1318_v26 = vld [vmem:[%s18648_s1 + $0x1c60] sm:$0xff] }
 0x5eb   : > { %7399 = vmatprep.subr.bf16.mxu0 %v12573_v16  ;;  %v974_v16 = vld [vmem:[%s18648_s1 + $0x11a0] sm:$0xff] }
 0x5ec   : > { %7726 = vmatpush1.bf16.xpose.msra.mxu1 %v12812_v15 }
 0x5ed   : > { %7727 = vmatprep.subr.bf16.mxu1 %v12829_v17  ;;  %v982_v17 = vld [vmem:[%s18648_s1 + $0x11e0] sm:$0xff] }
 0x5ee   : > { %v12431_v34 = vcombine.high %v974_v16, %v982_v17  ;;  %v12430_v32 = vcombine.low %v974_v16, %v982_v17  ;;  %v1334_v16 = vld [vmem:[%s18648_s1 + $0x1ce0] sm:$0xff] }
 0x5f2   : > { %7400 = vmatpush1.bf16.xpose.msra.mxu0 %v12572_v23 }
 0x5f3   : > { %7401 = vmatprep.subr.bf16.mxu0 %v12589_v29  ;;  %v998_v29 = vld [vmem:[%s18648_s1 + $0x1260] sm:$0xff] }
 0x5f4   : > { %7728 = vmatpush1.bf16.xpose.msra.mxu1 %v12828_v36  ;;  %v990_v36 = vld [vmem:[%s18648_s1 + $0x1220] sm:$0xff] }
 0x5f5   : > { %7729 = vmatprep.subr.bf16.mxu1 %v12845_v30  ;;  %v1246_v30 = vld [vmem:[%s18648_s1 + $0x1a20] sm:$0xff]  ;;  %v12447_v41 = vcombine.high %v990_v36, %v998_v29  ;;  %v12446_v49 = vcombine.low %v990_v36, %v998_v29 }
 0x5f6   : > { %v12702_v50 = vcombine.low %v1246_v30, %v1254_v31  ;;  %v1350_v36 = vld [vmem:[%s18648_s1 + $0x1d60] sm:$0xff] }
 0x5fa   : > { %7402 = vmatpush1.bf16.xpose.msra.mxu0 %v12588_v37  ;;  %v12703_v37 = vcombine.high %v1246_v30, %v1254_v31 }
 0x5fb   : > { %7403 = vmatprep.subr.bf16.mxu0 %v12605_v2  ;;  %v1014_v2 = vld [vmem:[%s18648_s1 + $0x12e0] sm:$0xff] }
 0x5fc   : > { %7730 = vmatpush1.bf16.xpose.msra.mxu1 %v12844_v3  ;;  %v1006_v3 = vld [vmem:[%s18648_s1 + $0x12a0] sm:$0xff] }
 0x5fd   : > { %7731 = vmatprep.subr.bf16.mxu1 %v12861_v45  ;;  %v1262_v45 = vld [vmem:[%s18648_s1 + $0x1aa0] sm:$0xff]  ;;  %v12463_v0 = vcombine.high %v1006_v3, %v1014_v2  ;;  %v12462_v59 = vcombine.low %v1006_v3, %v1014_v2 }
 0x5fe   : > { %v12718_v60 = vcombine.low %v1262_v45, %v1270_v46  ;;  %v1366_v3 = vld [vmem:[%s18648_s1 + $0x1de0] sm:$0xff] }
 0x602   : > { %7404 = vmatpush1.bf16.xpose.msra.mxu0 %v12604_v10  ;;  %v12719_v10 = vcombine.high %v1262_v45, %v1270_v46 }
 0x603   : > { %7405 = vmatprep.subr.bf16.mxu0 %v12621_v56  ;;  %v1030_v56 = vld [vmem:[%s18648_s1 + $0x1360] sm:$0xff] }
 0x604   : > { %7732 = vmatpush1.bf16.xpose.msra.mxu1 %v12860_v54  ;;  %v1022_v54 = vld [vmem:[%s18648_s1 + $0x1320] sm:$0xff] }
 0x605   : > { %7733 = vmatprep.subr.bf16.mxu1 %v12877_v57  ;;  %v1278_v57 = vld [vmem:[%s18648_s1 + $0x1b20] sm:$0xff]  ;;  %v12479_v61 = vcombine.high %v1022_v54, %v1030_v56  ;;  %v12478_v4 = vcombine.low %v1022_v54, %v1030_v56 }
 0x606   : > { %v12734_v5 = vcombine.low %v1278_v57, %v1286_v58  ;;  %v1382_v54 = vld [vmem:[%s18648_s1 + $0x1e60] sm:$0xff] }
 0x60a   : > { %7406 = vmatpush1.bf16.xpose.msra.mxu0 %v12620_v44  ;;  %v12735_v44 = vcombine.high %v1278_v57, %v1286_v58 }
 0x60b   : > { %7416 = vmatprep.subr.bf16.mxu0 %v12383_v63  ;;  %v1046_v63 = vld [vmem:[%s18648_s1 + $0x13e0] sm:$0xff] }
 0x60c   : > { %7734 = vmatpush1.bf16.xpose.msra.mxu1 %v12876_v62  ;;  %v1038_v62 = vld [vmem:[%s18648_s1 + $0x13a0] sm:$0xff] }
 0x60d   : > { %7744 = vmatprep.subr.bf16.mxu1 %v12639_v22  ;;  %v1294_v22 = vld [vmem:[%s18648_s1 + $0x1ba0] sm:$0xff]  ;;  %v12495_v53 = vcombine.high %v1038_v62, %v1046_v63  ;;  %v12494_v43 = vcombine.low %v1038_v62, %v1046_v63 }
 0x60e   : > { %v1398_v62 = vld [vmem:[%s18648_s1 + $0x1ee0] sm:$0xff] }
 0x611   : > { %7408 = vmatmul.mubr.bf16.vlgmr.msra.gmra.mrb[4].mxu0 %v15032_v27 }
 0x612   : > { %7417 = vmatpush1.bf16.xpose.msra.mxu0 %v12382_v6  ;;  %7448 = vmatprep.mubr.bf16.mxu0 %v15042_v38  ;;  %v12751_v6 = vcombine.high %v1294_v22, %v1302_v40 }
 0x613   : > { %7736 = vmatmul.mubr.bf16.vlgmr.msra.gmra.mrb[4].mxu1 %v15032_v27  ;;  %7418 = vmatprep.subr.bf16.mxu0 %v12399_v7  ;;  %v1222_v27 = vld [vmem:[%s18648_s1 + $0x1960] sm:$0xff] }
 0x614   : > { %7745 = vmatpush1.bf16.xpose.msra.mxu1 %v12638_v25  ;;  %7776 = vmatprep.mubr.bf16.mxu1 %v15042_v38  ;;  %v12671_v15 = vcombine.high %v1214_v12, %v1222_v27  ;;  %v1230_v38 = vld [vmem:[%s18648_s1 + $0x19a0] sm:$0xff]  ;;  %v12670_v20 = vcombine.low %v1214_v12, %v1222_v27  ;;  %v12750_v12 = vcombine.low %v1294_v22, %v1302_v40 }
 0x615   : > { %7746 = vmatprep.subr.bf16.mxu1 %v12655_v8  ;;  %v12687_v23 = vcombine.high %v1230_v38, %v1238_v18  ;;  %v12686_v47 = vcombine.low %v1230_v38, %v1238_v18  ;;  %v1054_v25 = vld [vmem:[%s18648_s1 + $0x1420] sm:$0xff] }
 0x616   : > { %v1062_v7 = vld [vmem:[%s18648_s1 + $0x1460] sm:$0xff] }
 0x617   : > { %v1310_v8 = vld [vmem:[%s18648_s1 + $0x1c20] sm:$0xff]  ;;  %v12511_v27 = vcombine.high %v1054_v25, %v1062_v7  ;;  %v12510_v17 = vcombine.low %v1054_v25, %v1062_v7 }
 0x618   : > { %v12766_v38 = vcombine.low %v1310_v8, %v1318_v26  ;;  %v1414_v25 = vld [vmem:[%s18648_s1 + $0x1f60] sm:$0xff] }
 0x61a   : > { %7419 = vmatpush1.bf16.xpose.msra.mxu0 %v12398_v13  ;;  %v12767_v13 = vcombine.high %v1310_v8, %v1318_v26 }
 0x61b   : > { %7420 = vmatprep.subr.bf16.mxu0 %v12415_v14  ;;  %v1078_v14 = vld [vmem:[%s18648_s1 + $0x14e0] sm:$0xff] }
 0x61c   : > { %7747 = vmatpush1.bf16.xpose.msra.mxu1 %v12654_v33  ;;  %v1070_v33 = vld [vmem:[%s18648_s1 + $0x14a0] sm:$0xff] }
 0x61d   : > { %7748 = vmatprep.subr.bf16.mxu1 %v12671_v15  ;;  %v1326_v15 = vld [vmem:[%s18648_s1 + $0x1ca0] sm:$0xff]  ;;  %v12527_v18 = vcombine.high %v1070_v33, %v1078_v14  ;;  %v12526_v29 = vcombine.low %v1070_v33, %v1078_v14 }
 0x61e   : > { %v12782_v30 = vcombine.low %v1326_v15, %v1334_v16  ;;  %v1430_v33 = vld [vmem:[%s18648_s1 + $0x1fe0] sm:$0xff] }
 0x622   : > { %7421 = vmatpush1.bf16.xpose.msra.mxu0 %v12414_v19  ;;  %v12783_v19 = vcombine.high %v1326_v15, %v1334_v16 }
 0x623   : > { %7422 = vmatprep.subr.bf16.mxu0 %v12431_v34  ;;  %v1094_v34 = vld [vmem:[%s18648_s1 + $0x1560] sm:$0xff] }
 0x624   : > { %7749 = vmatpush1.bf16.xpose.msra.mxu1 %v12670_v20  ;;  %v1086_v20 = vld [vmem:[%s18648_s1 + $0x1520] sm:$0xff] }
 0x625   : > { %7750 = vmatprep.subr.bf16.mxu1 %v12687_v23  ;;  %v1342_v23 = vld [vmem:[%s18648_s1 + $0x1d20] sm:$0xff]  ;;  %v12543_v31 = vcombine.high %v1086_v20, %v1094_v34  ;;  %v12542_v2 = vcombine.low %v1086_v20, %v1094_v34  ;;  %v1191_v20 = vld [vmem:[%s18648_s1 + $0x1868] sm:$0xff] }
 0x626   : > { %v12798_v45 = vcombine.low %v1342_v23, %v1350_v36 }
 0x62a   : > { %7423 = vmatpush1.bf16.xpose.msra.mxu0 %v12430_v32  ;;  %v12799_v32 = vcombine.high %v1342_v23, %v1350_v36 }
 0x62b   : > { %7424 = vmatprep.subr.bf16.mxu0 %v12447_v41  ;;  %v1110_v41 = vld [vmem:[%s18648_s1 + $0x15e0] sm:$0xff] }
 0x62c   : > { %7751 = vmatpush1.bf16.xpose.msra.mxu1 %v12686_v47  ;;  %v1102_v47 = vld [vmem:[%s18648_s1 + $0x15a0] sm:$0xff] }
 0x62d   : > { %7752 = vmatprep.subr.bf16.mxu1 %v12703_v37  ;;  %v1358_v37 = vld [vmem:[%s18648_s1 + $0x1da0] sm:$0xff]  ;;  %v12559_v46 = vcombine.high %v1102_v47, %v1110_v41  ;;  %v12558_v56 = vcombine.low %v1102_v47, %v1110_v41  ;;  %v1207_v47 = vld [vmem:[%s18648_s1 + $0x18e8] sm:$0xff] }
 0x62e   : > { %v12814_v57 = vcombine.low %v1358_v37, %v1366_v3 }
 0x632   : > { %7425 = vmatpush1.bf16.xpose.msra.mxu0 %v12446_v49  ;;  %v12815_v49 = vcombine.high %v1358_v37, %v1366_v3 }
 0x633   : > { %7426 = vmatprep.subr.bf16.mxu0 %v12463_v0  ;;  %v1126_v0 = vld [vmem:[%s18648_s1 + $0x1660] sm:$0xff] }
 0x634   : > { %7753 = vmatpush1.bf16.xpose.msra.mxu1 %v12702_v50  ;;  %v1118_v50 = vld [vmem:[%s18648_s1 + $0x1620] sm:$0xff] }
 0x635   : > { %7754 = vmatprep.subr.bf16.mxu1 %v12719_v10  ;;  %v1374_v10 = vld [vmem:[%s18648_s1 + $0x1e20] sm:$0xff]  ;;  %v12575_v58 = vcombine.high %v1118_v50, %v1126_v0  ;;  %v12574_v63 = vcombine.low %v1118_v50, %v1126_v0 }
 0x636   : > { %v12830_v22 = vcombine.low %v1374_v10, %v1382_v54 }
 0x63a   : > { %7427 = vmatpush1.bf16.xpose.msra.mxu0 %v12462_v59  ;;  %v12831_v59 = vcombine.high %v1374_v10, %v1382_v54 }
 0x63b   : > { %7428 = vmatprep.subr.bf16.mxu0 %v12479_v61  ;;  %v1142_v61 = vld [vmem:[%s18648_s1 + $0x16e0] sm:$0xff] }
 0x63c   : > { %7755 = vmatpush1.bf16.xpose.msra.mxu1 %v12718_v60  ;;  %v1134_v60 = vld [vmem:[%s18648_s1 + $0x16a0] sm:$0xff] }
 0x63d   : > { %7756 = vmatprep.subr.bf16.mxu1 %v12735_v44  ;;  %v1390_v44 = vld [vmem:[%s18648_s1 + $0x1ea0] sm:$0xff]  ;;  %v12591_v40 = vcombine.high %v1134_v60, %v1142_v61  ;;  %v12590_v7 = vcombine.low %v1134_v60, %v1142_v61 }
 0x63e   : > { %v12846_v8 = vcombine.low %v1390_v44, %v1398_v62 }
 0x642   : > { %7429 = vmatpush1.bf16.xpose.msra.mxu0 %v12478_v4  ;;  %v12847_v4 = vcombine.high %v1390_v44, %v1398_v62  ;;  %v991_v62 = vld [vmem:[%s18648_s1 + $0x1228] sm:$0xff] }
 0x643   : > { %7430 = vmatprep.subr.bf16.mxu0 %v12495_v53  ;;  %v1158_v53 = vld [vmem:[%s18648_s1 + $0x1760] sm:$0xff] }
 0x644   : > { %7757 = vmatpush1.bf16.xpose.msra.mxu1 %v12734_v5  ;;  %v1150_v5 = vld [vmem:[%s18648_s1 + $0x1720] sm:$0xff] }
 0x645   : > { %7758 = vmatprep.subr.bf16.mxu1 %v12751_v6  ;;  %v1406_v6 = vld [vmem:[%s18648_s1 + $0x1f20] sm:$0xff]  ;;  %v12607_v26 = vcombine.high %v1150_v5, %v1158_v53  ;;  %v12606_v14 = vcombine.low %v1150_v5, %v1158_v53 }
 0x646   : > { %v12862_v15 = vcombine.low %v1406_v6, %v1414_v25 }
 0x64a   : > { %7431 = vmatpush1.bf16.xpose.msra.mxu0 %v12494_v43  ;;  %v12863_v43 = vcombine.high %v1406_v6, %v1414_v25  ;;  %v1007_v25 = vld [vmem:[%s18648_s1 + $0x12a8] sm:$0xff] }
 0x64b   : > { %7432 = vmatprep.subr.bf16.mxu0 %v12511_v27  ;;  %v1174_v27 = vld [vmem:[%s18648_s1 + $0x17e0] sm:$0xff] }
 0x64c   : > { %7759 = vmatpush1.bf16.xpose.msra.mxu1 %v12750_v12  ;;  %v1166_v12 = vld [vmem:[%s18648_s1 + $0x17a0] sm:$0xff] }
 0x64d   : > { %7760 = vmatprep.subr.bf16.mxu1 %v12767_v13  ;;  %v1422_v13 = vld [vmem:[%s18648_s1 + $0x1fa0] sm:$0xff]  ;;  %v12623_v16 = vcombine.high %v1166_v12, %v1174_v27  ;;  %v12622_v34 = vcombine.low %v1166_v12, %v1174_v27 }
 0x64e   : > { %v12878_v23 = vcombine.low %v1422_v13, %v1430_v33 }
 0x652   : > { %7433 = vmatpush1.bf16.xpose.msra.mxu0 %v12510_v17  ;;  %v12879_v17 = vcombine.high %v1422_v13, %v1430_v33  ;;  %v1023_v33 = vld [vmem:[%s18648_s1 + $0x1328] sm:$0xff] }
 0x653   : > { %7434 = vmatprep.subr.bf16.mxu0 %v12527_v18  ;;  %v935_v18 = vld [vmem:[%s18648_s1 + $0x1068] sm:$0xff] }
 0x654   : > { %7761 = vmatpush1.bf16.xpose.msra.mxu1 %v12766_v38  ;;  %v927_v38 = vld [vmem:[%s18648_s1 + $0x1028] sm:$0xff] }
 0x655   : > { %7762 = vmatprep.subr.bf16.mxu1 %v12783_v19  ;;  %v1183_v19 = vld [vmem:[%s18648_s1 + $0x1828] sm:$0xff]  ;;  %v12385_v36 = vcombine.high %v927_v38, %v935_v18  ;;  %v12384_v41 = vcombine.low %v927_v38, %v935_v18 }
 0x656   : > { %v12640_v37 = vcombine.low %v1183_v19, %v1191_v20 }
 0x65a   : > { %7435 = vmatpush1.bf16.xpose.msra.mxu0 %v12526_v29  ;;  %v12641_v29 = vcombine.high %v1183_v19, %v1191_v20  ;;  %v1039_v20 = vld [vmem:[%s18648_s1 + $0x13a8] sm:$0xff] }
 0x65b   : > { %7436 = vmatprep.subr.bf16.mxu0 %v12543_v31  ;;  %v951_v31 = vld [vmem:[%s18648_s1 + $0x10e8] sm:$0xff] }
 0x65c   : > { %7763 = vmatpush1.bf16.xpose.msra.mxu1 %v12782_v30  ;;  %v943_v30 = vld [vmem:[%s18648_s1 + $0x10a8] sm:$0xff] }
 0x65d   : > { %7764 = vmatprep.subr.bf16.mxu1 %v12799_v32  ;;  %v1199_v32 = vld [vmem:[%s18648_s1 + $0x18a8] sm:$0xff]  ;;  %v12401_v3 = vcombine.high %v943_v30, %v951_v31  ;;  %v12400_v50 = vcombine.low %v943_v30, %v951_v31 }
 0x65e   : > { %v12656_v0 = vcombine.low %v1199_v32, %v1207_v47 }
 0x662   : > { %7437 = vmatpush1.bf16.xpose.msra.mxu0 %v12542_v2  ;;  %v12657_v2 = vcombine.high %v1199_v32, %v1207_v47  ;;  %v1055_v47 = vld [vmem:[%s18648_s1 + $0x1428] sm:$0xff] }
 0x663   : > { %7438 = vmatprep.subr.bf16.mxu0 %v12559_v46  ;;  %v967_v46 = vld [vmem:[%s18648_s1 + $0x1168] sm:$0xff] }
 0x664   : > { %7765 = vmatpush1.bf16.xpose.msra.mxu1 %v12798_v45  ;;  %v959_v45 = vld [vmem:[%s18648_s1 + $0x1128] sm:$0xff] }
 0x665   : > { %7766 = vmatprep.subr.bf16.mxu1 %v12815_v49  ;;  %v1215_v49 = vld [vmem:[%s18648_s1 + $0x1928] sm:$0xff]  ;;  %v12417_v10 = vcombine.high %v959_v45, %v967_v46 }
 0x66a   : > { %7439 = vmatpush1.bf16.xpose.msra.mxu0 %v12558_v56  ;;  %v975_v56 = vld [vmem:[%s18648_s1 + $0x11a8] sm:$0xff] }
 0x66b   : > { %7440 = vmatprep.subr.bf16.mxu0 %v12575_v58  ;;  %v1239_v58 = vld [vmem:[%s18648_s1 + $0x19e8] sm:$0xff] }
 0x66c   : > { %7767 = vmatpush1.bf16.xpose.msra.mxu1 %v12814_v57  ;;  %v983_v57 = vld [vmem:[%s18648_s1 + $0x11e8] sm:$0xff] }
 0x66d   : > { %7768 = vmatprep.subr.bf16.mxu1 %v12831_v59  ;;  %v12416_v59 = vcombine.low %v959_v45, %v967_v46  ;;  %v12433_v61 = vcombine.high %v975_v56, %v983_v57 }
 0x672   : > { %7441 = vmatpush1.bf16.xpose.msra.mxu0 %v12574_v63  ;;  %v999_v63 = vld [vmem:[%s18648_s1 + $0x1268] sm:$0xff] }
 0x673   : > { %7442 = vmatprep.subr.bf16.mxu0 %v12591_v40  ;;  %v1255_v40 = vld [vmem:[%s18648_s1 + $0x1a68] sm:$0xff]  ;;  %v12449_v53 = vcombine.high %v991_v62, %v999_v63 }
 0x674   : > { %7769 = vmatpush1.bf16.xpose.msra.mxu1 %v12830_v22  ;;  %v1247_v22 = vld [vmem:[%s18648_s1 + $0x1a28] sm:$0xff] }
 0x675   : > { %7770 = vmatprep.subr.bf16.mxu1 %v12847_v4  ;;  %v12432_v4 = vcombine.low %v975_v56, %v983_v57  ;;  %v12705_v6 = vcombine.high %v1247_v22, %v1255_v40  ;;  %v12704_v12 = vcombine.low %v1247_v22, %v1255_v40  ;;  %v1103_v40 = vld [vmem:[%s18648_s1 + $0x15a8] sm:$0xff] }
 0x67a   : > { %7443 = vmatpush1.bf16.xpose.msra.mxu0 %v12590_v7  ;;  %v1015_v7 = vld [vmem:[%s18648_s1 + $0x12e8] sm:$0xff] }
 0x67b   : > { %7444 = vmatprep.subr.bf16.mxu0 %v12607_v26  ;;  %v1271_v26 = vld [vmem:[%s18648_s1 + $0x1ae8] sm:$0xff]  ;;  %v12465_v27 = vcombine.high %v1007_v25, %v1015_v7 }
 0x67c   : > { %7771 = vmatpush1.bf16.xpose.msra.mxu1 %v12846_v8  ;;  %v1263_v8 = vld [vmem:[%s18648_s1 + $0x1aa8] sm:$0xff] }
 0x67d   : > { %7772 = vmatprep.subr.bf16.mxu1 %v12863_v43  ;;  %v12448_v43 = vcombine.low %v991_v62, %v999_v63  ;;  %v12721_v13 = vcombine.high %v1263_v8, %v1271_v26  ;;  %v12720_v38 = vcombine.low %v1263_v8, %v1271_v26  ;;  %v1119_v26 = vld [vmem:[%s18648_s1 + $0x1628] sm:$0xff] }
 0x682   : > { %7445 = vmatpush1.bf16.xpose.msra.mxu0 %v12606_v14  ;;  %v1031_v14 = vld [vmem:[%s18648_s1 + $0x1368] sm:$0xff] }
 0x683   : > { %7446 = vmatprep.subr.bf16.mxu0 %v12623_v16  ;;  %v1287_v16 = vld [vmem:[%s18648_s1 + $0x1b68] sm:$0xff]  ;;  %v12481_v18 = vcombine.high %v1023_v33, %v1031_v14 }
 0x684   : > { %7773 = vmatpush1.bf16.xpose.msra.mxu1 %v12862_v15  ;;  %v1279_v15 = vld [vmem:[%s18648_s1 + $0x1b28] sm:$0xff] }
 0x685   : > { %7774 = vmatprep.subr.bf16.mxu1 %v12879_v17  ;;  %v12464_v17 = vcombine.low %v1007_v25, %v1015_v7  ;;  %v12737_v19 = vcombine.high %v1279_v15, %v1287_v16  ;;  %v12736_v30 = vcombine.low %v1279_v15, %v1287_v16  ;;  %v1135_v16 = vld [vmem:[%s18648_s1 + $0x16a8] sm:$0xff] }
 0x68a   : > { %7447 = vmatpush1.bf16.xpose.msra.mxu0 %v12622_v34  ;;  %v1047_v34 = vld [vmem:[%s18648_s1 + $0x13e8] sm:$0xff] }
 0x68b   : > { %7457 = vmatprep.subr.bf16.mxu0 %v12385_v36  ;;  %v1303_v36 = vld [vmem:[%s18648_s1 + $0x1be8] sm:$0xff]  ;;  %v12497_v31 = vcombine.high %v1039_v20, %v1047_v34 }
 0x68c   : > { %7775 = vmatpush1.bf16.xpose.msra.mxu1 %v12878_v23  ;;  %v1295_v23 = vld [vmem:[%s18648_s1 + $0x1ba8] sm:$0xff] }
 0x68d   : > { %7785 = vmatprep.subr.bf16.mxu1 %v12641_v29  ;;  %v12480_v29 = vcombine.low %v1023_v33, %v1031_v14  ;;  %v12753_v32 = vcombine.high %v1295_v23, %v1303_v36  ;;  %v12752_v45 = vcombine.low %v1295_v23, %v1303_v36  ;;  %v1151_v36 = vld [vmem:[%s18648_s1 + $0x1728] sm:$0xff] }
 0x691   : > { %7449 = vmatmul.mubr.bf16.vlgmr.msra.gmra.mrb[4].mxu0 %v15241_v1 }
 0x692   : > { %7458 = vmatpush1.bf16.xpose.msra.mxu0 %v12384_v41  ;;  %7489 = vmatprep.mubr.bf16.mxu0 %v15251_v9  ;;  %v1063_v41 = vld [vmem:[%s18648_s1 + $0x1468] sm:$0xff] }
 0x693   : > { %7777 = vmatmul.mubr.bf16.vlgmr.msra.gmra.mrb[4].mxu1 %v15241_v1  ;;  %7459 = vmatprep.subr.bf16.mxu0 %v12401_v3  ;;  %v1223_v1 = vld [vmem:[%s18648_s1 + $0x1968] sm:$0xff]  ;;  %v12513_v46 = vcombine.high %v1055_v47, %v1063_v41 }
 0x694   : > { %7786 = vmatpush1.bf16.xpose.msra.mxu1 %v12640_v37  ;;  %7817 = vmatprep.mubr.bf16.mxu1 %v15251_v9  ;;  %v12673_v54 = vcombine.high %v1215_v49, %v1223_v1  ;;  %v1231_v9 = vld [vmem:[%s18648_s1 + $0x19a8] sm:$0xff]  ;;  %v12672_v60 = vcombine.low %v1215_v49, %v1223_v1 }
 0x695   : > { %7787 = vmatprep.subr.bf16.mxu1 %v12657_v2  ;;  %v12689_v44 = vcombine.high %v1231_v9, %v1239_v58  ;;  %v12688_v5 = vcombine.low %v1231_v9, %v1239_v58  ;;  %v1311_v37 = vld [vmem:[%s18648_s1 + $0x1c28] sm:$0xff]  ;;  %v12496_v2 = vcombine.low %v1039_v20, %v1047_v34 }
 0x696   : > { %v1319_v3 = vld [vmem:[%s18648_s1 + $0x1c68] sm:$0xff] }
 0x697   : > { %v12769_v49 = vcombine.high %v1311_v37, %v1319_v3  ;;  %v1071_v1 = vld [vmem:[%s18648_s1 + $0x14a8] sm:$0xff]  ;;  %v12768_v56 = vcombine.low %v1311_v37, %v1319_v3 }
 0x698   : > { %v1087_v58 = vld [vmem:[%s18648_s1 + $0x1528] sm:$0xff] }
 0x699   : > { %v1167_v3 = vld [vmem:[%s18648_s1 + $0x17a8] sm:$0xff] }
 0x69a   : > { %7460 = vmatpush1.bf16.xpose.msra.mxu0 %v12400_v50  ;;  %v1079_v50 = vld [vmem:[%s18648_s1 + $0x14e8] sm:$0xff] }
 0x69b   : > { %7461 = vmatprep.subr.bf16.mxu0 %v12417_v10  ;;  %v1335_v10 = vld [vmem:[%s18648_s1 + $0x1ce8] sm:$0xff]  ;;  %v12529_v57 = vcombine.high %v1071_v1, %v1079_v50 }
 0x69c   : > { %7788 = vmatpush1.bf16.xpose.msra.mxu1 %v12656_v0  ;;  %v1327_v0 = vld [vmem:[%s18648_s1 + $0x1ca8] sm:$0xff] }
 0x69d   : > { %7789 = vmatprep.subr.bf16.mxu1 %v12673_v54  ;;  %v12512_v54 = vcombine.low %v1055_v47, %v1063_v41  ;;  %v12785_v9 = vcombine.high %v1327_v0, %v1335_v10  ;;  %v12784_v62 = vcombine.low %v1327_v0, %v1335_v10  ;;  %v928_v10 = vld [vmem:[%s18648_s1 + $0x1030] sm:$0xff] }
 0x6a2   : > { %7462 = vmatpush1.bf16.xpose.msra.mxu0 %v12416_v59  ;;  %v1095_v59 = vld [vmem:[%s18648_s1 + $0x1568] sm:$0xff] }
 0x6a3   : > { %7463 = vmatprep.subr.bf16.mxu0 %v12433_v61  ;;  %v1351_v61 = vld [vmem:[%s18648_s1 + $0x1d68] sm:$0xff]  ;;  %v12545_v63 = vcombine.high %v1087_v58, %v1095_v59 }
 0x6a4   : > { %7790 = vmatpush1.bf16.xpose.msra.mxu1 %v12672_v60  ;;  %v1343_v60 = vld [vmem:[%s18648_s1 + $0x1d28] sm:$0xff] }
 0x6a5   : > { %7791 = vmatprep.subr.bf16.mxu1 %v12689_v44  ;;  %v12528_v44 = vcombine.low %v1071_v1, %v1079_v50  ;;  %v12801_v22 = vcombine.high %v1343_v60, %v1351_v61  ;;  %v12800_v25 = vcombine.low %v1343_v60, %v1351_v61  ;;  %v944_v61 = vld [vmem:[%s18648_s1 + $0x10b0] sm:$0xff] }
 0x6aa   : > { %7464 = vmatpush1.bf16.xpose.msra.mxu0 %v12432_v4  ;;  %v1111_v4 = vld [vmem:[%s18648_s1 + $0x15e8] sm:$0xff] }
 0x6ab   : > { %7465 = vmatprep.subr.bf16.mxu0 %v12449_v53  ;;  %v1367_v53 = vld [vmem:[%s18648_s1 + $0x1de8] sm:$0xff]  ;;  %v12561_v7 = vcombine.high %v1103_v40, %v1111_v4 }
 0x6ac   : > { %7792 = vmatpush1.bf16.xpose.msra.mxu1 %v12688_v5  ;;  %v1359_v5 = vld [vmem:[%s18648_s1 + $0x1da8] sm:$0xff] }
 0x6ad   : > { %7793 = vmatprep.subr.bf16.mxu1 %v12705_v6  ;;  %v12544_v6 = vcombine.low %v1087_v58, %v1095_v59  ;;  %v12817_v8 = vcombine.high %v1359_v5, %v1367_v53  ;;  %v12816_v33 = vcombine.low %v1359_v5, %v1367_v53  ;;  %v960_v53 = vld [vmem:[%s18648_s1 + $0x1130] sm:$0xff] }
 0x6b2   : > { %7466 = vmatpush1.bf16.xpose.msra.mxu0 %v12448_v43  ;;  %v1127_v43 = vld [vmem:[%s18648_s1 + $0x1668] sm:$0xff] }
 0x6b3   : > { %7467 = vmatprep.subr.bf16.mxu0 %v12465_v27  ;;  %v1383_v27 = vld [vmem:[%s18648_s1 + $0x1e68] sm:$0xff]  ;;  %v12577_v14 = vcombine.high %v1119_v26, %v1127_v43 }
 0x6b4   : > { %7794 = vmatpush1.bf16.xpose.msra.mxu1 %v12704_v12  ;;  %v1375_v12 = vld [vmem:[%s18648_s1 + $0x1e28] sm:$0xff] }
 0x6b5   : > { %7795 = vmatprep.subr.bf16.mxu1 %v12721_v13  ;;  %v12560_v13 = vcombine.low %v1103_v40, %v1111_v4  ;;  %v12833_v15 = vcombine.high %v1375_v12, %v1383_v27  ;;  %v12832_v20 = vcombine.low %v1375_v12, %v1383_v27  ;;  %v976_v12 = vld [vmem:[%s18648_s1 + $0x11b0] sm:$0xff] }
 0x6b6   : > { %v984_v27 = vld [vmem:[%s18648_s1 + $0x11f0] sm:$0xff] }
 0x6ba   : > { %7468 = vmatpush1.bf16.xpose.msra.mxu0 %v12464_v17  ;;  %v1143_v17 = vld [vmem:[%s18648_s1 + $0x16e8] sm:$0xff] }
 0x6bb   : > { %7469 = vmatprep.subr.bf16.mxu0 %v12481_v18  ;;  %v1399_v18 = vld [vmem:[%s18648_s1 + $0x1ee8] sm:$0xff]  ;;  %v12593_v34 = vcombine.high %v1135_v16, %v1143_v17 }
 0x6bc   : > { %7796 = vmatpush1.bf16.xpose.msra.mxu1 %v12720_v38  ;;  %v1391_v38 = vld [vmem:[%s18648_s1 + $0x1ea8] sm:$0xff] }
 0x6bd   : > { %7797 = vmatprep.subr.bf16.mxu1 %v12737_v19  ;;  %v12576_v19 = vcombine.low %v1119_v26, %v1127_v43  ;;  %v12849_v23 = vcombine.high %v1391_v38, %v1399_v18  ;;  %v12848_v47 = vcombine.low %v1391_v38, %v1399_v18  ;;  %v1000_v38 = vld [vmem:[%s18648_s1 + $0x1270] sm:$0xff] }
 0x6be   : > { %v1248_v18 = vld [vmem:[%s18648_s1 + $0x1a30] sm:$0xff] }
 0x6c2   : > { %7470 = vmatpush1.bf16.xpose.msra.mxu0 %v12480_v29  ;;  %v1159_v29 = vld [vmem:[%s18648_s1 + $0x1768] sm:$0xff] }
 0x6c3   : > { %7471 = vmatprep.subr.bf16.mxu0 %v12497_v31  ;;  %v1415_v31 = vld [vmem:[%s18648_s1 + $0x1f68] sm:$0xff]  ;;  %v12609_v41 = vcombine.high %v1151_v36, %v1159_v29 }
 0x6c4   : > { %7798 = vmatpush1.bf16.xpose.msra.mxu1 %v12736_v30  ;;  %v1407_v30 = vld [vmem:[%s18648_s1 + $0x1f28] sm:$0xff] }
 0x6c5   : > { %7799 = vmatprep.subr.bf16.mxu1 %v12753_v32  ;;  %v12592_v32 = vcombine.low %v1135_v16, %v1143_v17  ;;  %v12865_v37 = vcombine.high %v1407_v30, %v1415_v31  ;;  %v12864_v1 = vcombine.low %v1407_v30, %v1415_v31  ;;  %v992_v17 = vld [vmem:[%s18648_s1 + $0x1230] sm:$0xff] }
 0x6c6   : > { %v1016_v30 = vld [vmem:[%s18648_s1 + $0x12f0] sm:$0xff] }
 0x6c7   : > { %v1264_v31 = vld [vmem:[%s18648_s1 + $0x1ab0] sm:$0xff] }
 0x6ca   : > { %7472 = vmatpush1.bf16.xpose.msra.mxu0 %v12496_v2  ;;  %v1175_v2 = vld [vmem:[%s18648_s1 + $0x17e8] sm:$0xff] }
 0x6cb   : > { %7473 = vmatprep.subr.bf16.mxu0 %v12513_v46  ;;  %v1431_v46 = vld [vmem:[%s18648_s1 + $0x1fe8] sm:$0xff]  ;;  %v12625_v50 = vcombine.high %v1167_v3, %v1175_v2 }
 0x6cc   : > { %7800 = vmatpush1.bf16.xpose.msra.mxu1 %v12752_v45  ;;  %v1423_v45 = vld [vmem:[%s18648_s1 + $0x1fa8] sm:$0xff] }
 0x6cd   : > { %7801 = vmatprep.subr.bf16.mxu1 %v12769_v49  ;;  %v12608_v49 = vcombine.low %v1151_v36, %v1159_v29  ;;  %v12881_v0 = vcombine.high %v1423_v45, %v1431_v46  ;;  %v12880_v58 = vcombine.low %v1423_v45, %v1431_v46  ;;  %v1008_v29 = vld [vmem:[%s18648_s1 + $0x12b0] sm:$0xff] }
 0x6ce   : > { %v1032_v45 = vld [vmem:[%s18648_s1 + $0x1370] sm:$0xff] }
 0x6cf   : > { %v1280_v46 = vld [vmem:[%s18648_s1 + $0x1b30] sm:$0xff] }
 0x6d2   : > { %7474 = vmatpush1.bf16.xpose.msra.mxu0 %v12512_v54  ;;  %v936_v54 = vld [vmem:[%s18648_s1 + $0x1070] sm:$0xff] }
 0x6d3   : > { %7475 = vmatprep.subr.bf16.mxu0 %v12529_v57  ;;  %v1192_v57 = vld [vmem:[%s18648_s1 + $0x1870] sm:$0xff]  ;;  %v12387_v59 = vcombine.high %v928_v10, %v936_v54 }
 0x6d4   : > { %7802 = vmatpush1.bf16.xpose.msra.mxu1 %v12768_v56  ;;  %v1184_v56 = vld [vmem:[%s18648_s1 + $0x1830] sm:$0xff] }
 0x6d5   : > { %7803 = vmatprep.subr.bf16.mxu1 %v12785_v9  ;;  %v12624_v9 = vcombine.low %v1167_v3, %v1175_v2  ;;  %v12643_v60 = vcombine.high %v1184_v56, %v1192_v57  ;;  %v12642_v40 = vcombine.low %v1184_v56, %v1192_v57  ;;  %v1024_v2 = vld [vmem:[%s18648_s1 + $0x1330] sm:$0xff] }
 0x6d6   : > { %v1048_v56 = vld [vmem:[%s18648_s1 + $0x13f0] sm:$0xff] }
 0x6d7   : > { %v1296_v57 = vld [vmem:[%s18648_s1 + $0x1bb0] sm:$0xff] }
 0x6da   : > { %7476 = vmatpush1.bf16.xpose.msra.mxu0 %v12528_v44  ;;  %v952_v44 = vld [vmem:[%s18648_s1 + $0x10f0] sm:$0xff] }
 0x6db   : > { %7477 = vmatprep.subr.bf16.mxu0 %v12545_v63  ;;  %v1208_v63 = vld [vmem:[%s18648_s1 + $0x18f0] sm:$0xff]  ;;  %v12403_v4 = vcombine.high %v944_v61, %v952_v44 }
 0x6dc   : > { %7804 = vmatpush1.bf16.xpose.msra.mxu1 %v12784_v62  ;;  %v1200_v62 = vld [vmem:[%s18648_s1 + $0x18b0] sm:$0xff] }
 0x6dd   : > { %7805 = vmatprep.subr.bf16.mxu1 %v12801_v22  ;;  %v12386_v22 = vcombine.low %v928_v10, %v936_v54  ;;  %v12659_v5 = vcombine.high %v1200_v62, %v1208_v63  ;;  %v1040_v54 = vld [vmem:[%s18648_s1 + $0x13b0] sm:$0xff] }
 0x6e2   : > { %7478 = vmatpush1.bf16.xpose.msra.mxu0 %v12544_v6  ;;  %v968_v6 = vld [vmem:[%s18648_s1 + $0x1170] sm:$0xff] }
 0x6e3   : > { %7479 = vmatprep.subr.bf16.mxu0 %v12561_v7  ;;  %v12402_v7 = vcombine.low %v944_v61, %v952_v44  ;;  %v12419_v26 = vcombine.high %v960_v53, %v968_v6  ;;  %v1056_v44 = vld [vmem:[%s18648_s1 + $0x1430] sm:$0xff] }
 0x6e4   : > { %7806 = vmatpush1.bf16.xpose.msra.mxu1 %v12800_v25  ;;  %v1216_v25 = vld [vmem:[%s18648_s1 + $0x1930] sm:$0xff] }
 0x6e5   : > { %7807 = vmatprep.subr.bf16.mxu1 %v12817_v8  ;;  %v12658_v8 = vcombine.low %v1200_v62, %v1208_v63  ;;  %v1064_v62 = vld [vmem:[%s18648_s1 + $0x1470] sm:$0xff] }
 0x6e6   : > { %v1312_v63 = vld [vmem:[%s18648_s1 + $0x1c30] sm:$0xff] }
 0x6ea   : > { %7480 = vmatpush1.bf16.xpose.msra.mxu0 %v12560_v13  ;;  %v1240_v13 = vld [vmem:[%s18648_s1 + $0x19f0] sm:$0xff] }
 0x6eb   : > { %7481 = vmatprep.subr.bf16.mxu0 %v12577_v14 }
 0x6ec   : > { %7808 = vmatpush1.bf16.xpose.msra.mxu1 %v12816_v33  ;;  %v12418_v33 = vcombine.low %v960_v53, %v968_v6  ;;  %v1072_v6 = vld [vmem:[%s18648_s1 + $0x14b0] sm:$0xff] }
 0x6ed   : > { %7809 = vmatprep.subr.bf16.mxu1 %v12833_v15  ;;  %v12435_v15 = vcombine.high %v976_v12, %v984_v27 }
 0x6f2   : > { %7482 = vmatpush1.bf16.xpose.msra.mxu0 %v12576_v19  ;;  %v1256_v19 = vld [vmem:[%s18648_s1 + $0x1a70] sm:$0xff] }
 0x6f3   : > { %7483 = vmatprep.subr.bf16.mxu0 %v12593_v34  ;;  %v12707_v36 = vcombine.high %v1248_v18, %v1256_v19 }
 0x6f4   : > { %7810 = vmatpush1.bf16.xpose.msra.mxu1 %v12832_v20  ;;  %v12434_v20 = vcombine.low %v976_v12, %v984_v27  ;;  %v1088_v27 = vld [vmem:[%s18648_s1 + $0x1530] sm:$0xff] }
 0x6f5   : > { %7811 = vmatprep.subr.bf16.mxu1 %v12849_v23  ;;  %v12451_v23 = vcombine.high %v992_v17, %v1000_v38 }
 0x6fa   : > { %7484 = vmatpush1.bf16.xpose.msra.mxu0 %v12592_v32  ;;  %v1272_v32 = vld [vmem:[%s18648_s1 + $0x1af0] sm:$0xff] }
 0x6fb   : > { %7485 = vmatprep.subr.bf16.mxu0 %v12609_v41  ;;  %v12706_v41 = vcombine.low %v1248_v18, %v1256_v19  ;;  %v12723_v3 = vcombine.high %v1264_v31, %v1272_v32  ;;  %v1112_v18 = vld [vmem:[%s18648_s1 + $0x15f0] sm:$0xff] }
 0x6fc   : > { %7812 = vmatpush1.bf16.xpose.msra.mxu1 %v12848_v47  ;;  %v12450_v47 = vcombine.low %v992_v17, %v1000_v38  ;;  %v1104_v38 = vld [vmem:[%s18648_s1 + $0x15b0] sm:$0xff] }
 0x6fd   : > { %7813 = vmatprep.subr.bf16.mxu1 %v12865_v37  ;;  %v12467_v37 = vcombine.high %v1008_v29, %v1016_v30  ;;  %v1360_v19 = vld [vmem:[%s18648_s1 + $0x1db0] sm:$0xff] }
 0x702   : > { %7486 = vmatpush1.bf16.xpose.msra.mxu0 %v12608_v49  ;;  %v1288_v49 = vld [vmem:[%s18648_s1 + $0x1b70] sm:$0xff] }
 0x703   : > { %7487 = vmatprep.subr.bf16.mxu0 %v12625_v50  ;;  %v12722_v50 = vcombine.low %v1264_v31, %v1272_v32  ;;  %v12739_v10 = vcombine.high %v1280_v46, %v1288_v49  ;;  %v1128_v31 = vld [vmem:[%s18648_s1 + $0x1670] sm:$0xff] }
 0x704   : > { %7814 = vmatpush1.bf16.xpose.msra.mxu1 %v12864_v1  ;;  %v12466_v1 = vcombine.low %v1008_v29, %v1016_v30  ;;  %v1120_v30 = vld [vmem:[%s18648_s1 + $0x1630] sm:$0xff] }
 0x705   : > { %7815 = vmatprep.subr.bf16.mxu1 %v12881_v0  ;;  %v12483_v0 = vcombine.high %v1024_v2, %v1032_v45  ;;  %v1376_v32 = vld [vmem:[%s18648_s1 + $0x1e30] sm:$0xff] }
 0x70a   : > { %7488 = vmatpush1.bf16.xpose.msra.mxu0 %v12624_v9  ;;  %v1304_v9 = vld [vmem:[%s18648_s1 + $0x1bf0] sm:$0xff] }
 0x70b   : > { %7498 = vmatprep.subr.bf16.mxu0 %v12387_v59  ;;  %v12738_v59 = vcombine.low %v1280_v46, %v1288_v49  ;;  %v12755_v61 = vcombine.high %v1296_v57, %v1304_v9  ;;  %v1144_v46 = vld [vmem:[%s18648_s1 + $0x16f0] sm:$0xff] }
 0x70c   : > { %7816 = vmatpush1.bf16.xpose.msra.mxu1 %v12880_v58  ;;  %v12482_v58 = vcombine.low %v1024_v2, %v1032_v45  ;;  %v1136_v45 = vld [vmem:[%s18648_s1 + $0x16b0] sm:$0xff] }
 0x70d   : > { %7826 = vmatprep.subr.bf16.mxu1 %v12643_v60  ;;  %v12499_v60 = vcombine.high %v1040_v54, %v1048_v56  ;;  %v1392_v49 = vld [vmem:[%s18648_s1 + $0x1eb0] sm:$0xff] }
 0x711   : > { %7490 = vmatmul.mubr.bf16.vlgmr.msra.gmra.mrb[4].mxu0 %v15454_v42 }
 0x712   : > { %7499 = vmatpush1.bf16.xpose.msra.mxu0 %v12386_v22  ;;  %7530 = vmatprep.mubr.bf16.mxu0 %v15464_v24  ;;  %v1320_v22 = vld [vmem:[%s18648_s1 + $0x1c70] sm:$0xff] }
 0x713   : > { %7818 = vmatmul.mubr.bf16.vlgmr.msra.gmra.mrb[4].mxu1 %v15454_v42  ;;  %7500 = vmatprep.subr.bf16.mxu0 %v12403_v4  ;;  %v1224_v42 = vld [vmem:[%s18648_s1 + $0x1970] sm:$0xff]  ;;  %v12754_v4 = vcombine.low %v1296_v57, %v1304_v9  ;;  %v12771_v53 = vcombine.high %v1312_v63, %v1320_v22 }
 0x714   : > { %7827 = vmatpush1.bf16.xpose.msra.mxu1 %v12642_v40  ;;  %7858 = vmatprep.mubr.bf16.mxu1 %v15464_v24  ;;  %v12675_v43 = vcombine.high %v1216_v25, %v1224_v42  ;;  %v1232_v24 = vld [vmem:[%s18648_s1 + $0x19b0] sm:$0xff]  ;;  %v12674_v14 = vcombine.low %v1216_v25, %v1224_v42  ;;  %v12498_v40 = vcombine.low %v1040_v54, %v1048_v56 }
 0x715   : > { %7828 = vmatprep.subr.bf16.mxu1 %v12659_v5  ;;  %v12691_v16 = vcombine.high %v1232_v24, %v1240_v13  ;;  %v12690_v34 = vcombine.low %v1232_v24, %v1240_v13  ;;  %v12515_v5 = vcombine.high %v1056_v44, %v1064_v62  ;;  %v1080_v25 = vld [vmem:[%s18648_s1 + $0x14f0] sm:$0xff] }
 0x716   : > { %v1328_v42 = vld [vmem:[%s18648_s1 + $0x1cb0] sm:$0xff] }
 0x717   : > { %v1096_v24 = vld [vmem:[%s18648_s1 + $0x1570] sm:$0xff] }
 0x718   : > { %v1344_v13 = vld [vmem:[%s18648_s1 + $0x1d30] sm:$0xff] }
 0x719   : > { %v1152_v56 = vld [vmem:[%s18648_s1 + $0x1730] sm:$0xff] }
 0x71a   : > { %7501 = vmatpush1.bf16.xpose.msra.mxu0 %v12402_v7  ;;  %v1336_v7 = vld [vmem:[%s18648_s1 + $0x1cf0] sm:$0xff] }
 0x71b   : > { %7502 = vmatprep.subr.bf16.mxu0 %v12419_v26  ;;  %v12770_v26 = vcombine.low %v1312_v63, %v1320_v22  ;;  %v12787_v12 = vcombine.high %v1328_v42, %v1336_v7  ;;  %v1160_v57 = vld [vmem:[%s18648_s1 + $0x1770] sm:$0xff] }
 0x71c   : > { %7829 = vmatpush1.bf16.xpose.msra.mxu1 %v12658_v8  ;;  %v12514_v8 = vcombine.low %v1056_v44, %v1064_v62  ;;  %v1408_v9 = vld [vmem:[%s18648_s1 + $0x1f30] sm:$0xff] }
 0x71d   : > { %7830 = vmatprep.subr.bf16.mxu1 %v12675_v43  ;;  %v12531_v43 = vcombine.high %v1072_v6, %v1080_v25  ;;  %v1168_v62 = vld [vmem:[%s18648_s1 + $0x17b0] sm:$0xff] }
 0x71e   : > { %v1176_v63 = vld [vmem:[%s18648_s1 + $0x17f0] sm:$0xff] }
 0x71f   : > { %v1424_v22 = vld [vmem:[%s18648_s1 + $0x1fb0] sm:$0xff] }
 0x722   : > { %7503 = vmatpush1.bf16.xpose.msra.mxu0 %v12418_v33  ;;  %v1352_v33 = vld [vmem:[%s18648_s1 + $0x1d70] sm:$0xff] }
 0x723   : > { %7504 = vmatprep.subr.bf16.mxu0 %v12435_v15  ;;  %v12786_v15 = vcombine.low %v1328_v42, %v1336_v7  ;;  %v12803_v17 = vcombine.high %v1344_v13, %v1352_v33  ;;  %v937_v42 = vld [vmem:[%s18648_s1 + $0x1078] sm:$0xff] }
 0x724   : > { %7831 = vmatpush1.bf16.xpose.msra.mxu1 %v12674_v14  ;;  %v12530_v14 = vcombine.low %v1072_v6, %v1080_v25  ;;  %v929_v25 = vld [vmem:[%s18648_s1 + $0x1038] sm:$0xff] }
 0x725   : > { %7832 = vmatprep.subr.bf16.mxu1 %v12691_v16  ;;  %v12547_v16 = vcombine.high %v1088_v27, %v1096_v24  ;;  %v1185_v7 = vld [vmem:[%s18648_s1 + $0x1838] sm:$0xff] }
 0x72a   : > { %7505 = vmatpush1.bf16.xpose.msra.mxu0 %v12434_v20  ;;  %v1368_v20 = vld [vmem:[%s18648_s1 + $0x1df0] sm:$0xff] }
 0x72b   : > { %7506 = vmatprep.subr.bf16.mxu0 %v12451_v23  ;;  %v12802_v23 = vcombine.low %v1344_v13, %v1352_v33  ;;  %v12819_v29 = vcombine.high %v1360_v19, %v1368_v20  ;;  %v953_v13 = vld [vmem:[%s18648_s1 + $0x10f8] sm:$0xff] }
 0x72c   : > { %7833 = vmatpush1.bf16.xpose.msra.mxu1 %v12690_v34  ;;  %v12546_v34 = vcombine.low %v1088_v27, %v1096_v24  ;;  %v945_v24 = vld [vmem:[%s18648_s1 + $0x10b8] sm:$0xff] }
 0x72d   : > { %7834 = vmatprep.subr.bf16.mxu1 %v12707_v36  ;;  %v12563_v36 = vcombine.high %v1104_v38, %v1112_v18  ;;  %v1201_v33 = vld [vmem:[%s18648_s1 + $0x18b8] sm:$0xff] }
 0x732   : > { %7507 = vmatpush1.bf16.xpose.msra.mxu0 %v12450_v47  ;;  %v1384_v47 = vld [vmem:[%s18648_s1 + $0x1e70] sm:$0xff] }
 0x733   : > { %7508 = vmatprep.subr.bf16.mxu0 %v12467_v37  ;;  %v12818_v37 = vcombine.low %v1360_v19, %v1368_v20  ;;  %v12835_v2 = vcombine.high %v1376_v32, %v1384_v47  ;;  %v969_v19 = vld [vmem:[%s18648_s1 + $0x1178] sm:$0xff] }
 0x734   : > { %7835 = vmatpush1.bf16.xpose.msra.mxu1 %v12706_v41  ;;  %v12562_v41 = vcombine.low %v1104_v38, %v1112_v18  ;;  %v961_v18 = vld [vmem:[%s18648_s1 + $0x1138] sm:$0xff] }
 0x735   : > { %7836 = vmatprep.subr.bf16.mxu1 %v12723_v3  ;;  %v12579_v3 = vcombine.high %v1120_v30, %v1128_v31  ;;  %v1217_v20 = vld [vmem:[%s18648_s1 + $0x1938] sm:$0xff] }
 0x73a   : > { %7509 = vmatpush1.bf16.xpose.msra.mxu0 %v12466_v1  ;;  %v1400_v1 = vld [vmem:[%s18648_s1 + $0x1ef0] sm:$0xff] }
 0x73b   : > { %7510 = vmatprep.subr.bf16.mxu0 %v12483_v0  ;;  %v12834_v0 = vcombine.low %v1376_v32, %v1384_v47  ;;  %v12851_v54 = vcombine.high %v1392_v49, %v1400_v1  ;;  %v1241_v32 = vld [vmem:[%s18648_s1 + $0x19f8] sm:$0xff]  ;;  %v12420_v47 = vcombine.low %v961_v18, %v969_v19 }
 0x73c   : > { %7837 = vmatpush1.bf16.xpose.msra.mxu1 %v12722_v50  ;;  %v12578_v50 = vcombine.low %v1120_v30, %v1128_v31  ;;  %v977_v30 = vld [vmem:[%s18648_s1 + $0x11b8] sm:$0xff] }
 0x73d   : > { %7838 = vmatprep.subr.bf16.mxu1 %v12739_v10  ;;  %v12595_v10 = vcombine.high %v1136_v45, %v1144_v46  ;;  %v985_v31 = vld [vmem:[%s18648_s1 + $0x11f8] sm:$0xff] }
 0x742   : > { %7511 = vmatpush1.bf16.xpose.msra.mxu0 %v12482_v58  ;;  %v1416_v58 = vld [vmem:[%s18648_s1 + $0x1f70] sm:$0xff] }
 0x743   : > { %7512 = vmatprep.subr.bf16.mxu0 %v12499_v60  ;;  %v12850_v60 = vcombine.low %v1392_v49, %v1400_v1  ;;  %v12867_v44 = vcombine.high %v1408_v9, %v1416_v58  ;;  %v1257_v49 = vld [vmem:[%s18648_s1 + $0x1a78] sm:$0xff]  ;;  %v12436_v1 = vcombine.low %v977_v30, %v985_v31 }
 0x744   : > { %7839 = vmatpush1.bf16.xpose.msra.mxu1 %v12738_v59  ;;  %v12594_v59 = vcombine.low %v1136_v45, %v1144_v46  ;;  %v1001_v45 = vld [vmem:[%s18648_s1 + $0x1278] sm:$0xff] }
 0x745   : > { %7840 = vmatprep.subr.bf16.mxu1 %v12755_v61  ;;  %v12611_v61 = vcombine.high %v1152_v56, %v1160_v57  ;;  %v1249_v46 = vld [vmem:[%s18648_s1 + $0x1a38] sm:$0xff] }
 0x74a   : > { %7513 = vmatpush1.bf16.xpose.msra.mxu0 %v12498_v40  ;;  %v1432_v40 = vld [vmem:[%s18648_s1 + $0x1ff0] sm:$0xff] }
 0x74b   : > { %7514 = vmatprep.subr.bf16.mxu0 %v12515_v5  ;;  %v12866_v5 = vcombine.low %v1408_v9, %v1416_v58  ;;  %v12883_v6 = vcombine.high %v1424_v22, %v1432_v40  ;;  %v1273_v9 = vld [vmem:[%s18648_s1 + $0x1af8] sm:$0xff] }
 0x74c   : > { %7841 = vmatpush1.bf16.xpose.msra.mxu1 %v12754_v4  ;;  %v12610_v4 = vcombine.low %v1152_v56, %v1160_v57  ;;  %v1017_v56 = vld [vmem:[%s18648_s1 + $0x12f8] sm:$0xff] }
 0x74d   : > { %7842 = vmatprep.subr.bf16.mxu1 %v12771_v53  ;;  %v12627_v53 = vcombine.high %v1168_v62, %v1176_v63  ;;  %v1265_v57 = vld [vmem:[%s18648_s1 + $0x1ab8] sm:$0xff] }
 0x752   : > { %7515 = vmatpush1.bf16.xpose.msra.mxu0 %v12514_v8  ;;  %v1193_v8 = vld [vmem:[%s18648_s1 + $0x1878] sm:$0xff] }
 0x753   : > { %7516 = vmatprep.subr.bf16.mxu0 %v12531_v43  ;;  %v12882_v43 = vcombine.low %v1424_v22, %v1432_v40  ;;  %v12645_v27 = vcombine.high %v1185_v7, %v1193_v8  ;;  %v1289_v22 = vld [vmem:[%s18648_s1 + $0x1b78] sm:$0xff] }
 0x754   : > { %7843 = vmatpush1.bf16.xpose.msra.mxu1 %v12770_v26  ;;  %v12626_v26 = vcombine.low %v1168_v62, %v1176_v63  ;;  %v1033_v62 = vld [vmem:[%s18648_s1 + $0x1378] sm:$0xff] }
 0x755   : > { %7844 = vmatprep.subr.bf16.mxu1 %v12787_v12  ;;  %v12389_v12 = vcombine.high %v929_v25, %v937_v42  ;;  %v1281_v63 = vld [vmem:[%s18648_s1 + $0x1b38] sm:$0xff] }
 0x75a   : > { %7517 = vmatpush1.bf16.xpose.msra.mxu0 %v12530_v14  ;;  %v1209_v14 = vld [vmem:[%s18648_s1 + $0x18f8] sm:$0xff] }
 0x75b   : > { %7518 = vmatprep.subr.bf16.mxu0 %v12547_v16  ;;  %v12644_v16 = vcombine.low %v1185_v7, %v1193_v8  ;;  %v12661_v38 = vcombine.high %v1201_v33, %v1209_v14  ;;  %v1305_v7 = vld [vmem:[%s18648_s1 + $0x1bf8] sm:$0xff] }
 0x75c   : > { %7845 = vmatpush1.bf16.xpose.msra.mxu1 %v12786_v15  ;;  %v12388_v15 = vcombine.low %v929_v25, %v937_v42  ;;  %v1049_v25 = vld [vmem:[%s18648_s1 + $0x13f8] sm:$0xff] }
 0x75d   : > { %7846 = vmatprep.subr.bf16.mxu1 %v12803_v17  ;;  %v12405_v17 = vcombine.high %v945_v24, %v953_v13  ;;  %v1297_v42 = vld [vmem:[%s18648_s1 + $0x1bb8] sm:$0xff] }
 0x762   : > { %7519 = vmatpush1.bf16.xpose.msra.mxu0 %v12546_v34  ;;  %v12404_v34 = vcombine.low %v945_v24, %v953_v13  ;;  %v1065_v24 = vld [vmem:[%s18648_s1 + $0x1478] sm:$0xff] }
 0x763   : > { %7520 = vmatprep.subr.bf16.mxu0 %v12563_v36  ;;  %v12421_v36 = vcombine.high %v961_v18, %v969_v19  ;;  %v1313_v13 = vld [vmem:[%s18648_s1 + $0x1c38] sm:$0xff] }
 0x764   : > { %7847 = vmatpush1.bf16.xpose.msra.mxu1 %v12802_v23  ;;  %v12660_v23 = vcombine.low %v1201_v33, %v1209_v14  ;;  %v1321_v33 = vld [vmem:[%s18648_s1 + $0x1c78] sm:$0xff] }
 0x765   : > { %7848 = vmatprep.subr.bf16.mxu1 %v12819_v29  ;;  %v1081_v18 = vld [vmem:[%s18648_s1 + $0x14f8] sm:$0xff] }
 0x766   : > { %v1329_v19 = vld [vmem:[%s18648_s1 + $0x1cb8] sm:$0xff] }
 0x76a   : > { %7521 = vmatpush1.bf16.xpose.msra.mxu0 %v12562_v41 }
 0x76b   : > { %7522 = vmatprep.subr.bf16.mxu0 %v12579_v3 }
 0x76c   : > { %7849 = vmatpush1.bf16.xpose.msra.mxu1 %v12818_v37  ;;  %v12437_v37 = vcombine.high %v977_v30, %v985_v31  ;;  %v1097_v30 = vld [vmem:[%s18648_s1 + $0x1578] sm:$0xff] }
 0x76d   : > { %7850 = vmatprep.subr.bf16.mxu1 %v12835_v2  ;;  %v993_v2 = vld [vmem:[%s18648_s1 + $0x1238] sm:$0xff] }
 0x76e   : > { %v12452_v58 = vcombine.low %v993_v2, %v1001_v45  ;;  %v1345_v31 = vld [vmem:[%s18648_s1 + $0x1d38] sm:$0xff] }
 0x772   : > { %7523 = vmatpush1.bf16.xpose.msra.mxu0 %v12578_v50 }
 0x773   : > { %7524 = vmatprep.subr.bf16.mxu0 %v12595_v10  ;;  %v12709_v10 = vcombine.high %v1249_v46, %v1257_v49 }
 0x774   : > { %7851 = vmatpush1.bf16.xpose.msra.mxu1 %v12834_v0  ;;  %v12453_v0 = vcombine.high %v993_v2, %v1001_v45  ;;  %v1113_v2 = vld [vmem:[%s18648_s1 + $0x15f8] sm:$0xff] }
 0x775   : > { %7852 = vmatprep.subr.bf16.mxu1 %v12851_v54  ;;  %v1009_v54 = vld [vmem:[%s18648_s1 + $0x12b8] sm:$0xff] }
 0x776   : > { %v12468_v40 = vcombine.low %v1009_v54, %v1017_v56  ;;  %v1361_v45 = vld [vmem:[%s18648_s1 + $0x1db8] sm:$0xff] }
 0x77a   : > { %7525 = vmatpush1.bf16.xpose.msra.mxu0 %v12594_v59  ;;  %v12708_v59 = vcombine.low %v1249_v46, %v1257_v49  ;;  %v1369_v46 = vld [vmem:[%s18648_s1 + $0x1df8] sm:$0xff] }
 0x77b   : > { %7526 = vmatprep.subr.bf16.mxu0 %v12611_v61  ;;  %v12725_v61 = vcombine.high %v1265_v57, %v1273_v9 }
 0x77c   : > { %7853 = vmatpush1.bf16.xpose.msra.mxu1 %v12850_v60  ;;  %v12469_v60 = vcombine.high %v1009_v54, %v1017_v56  ;;  %v1129_v54 = vld [vmem:[%s18648_s1 + $0x1678] sm:$0xff] }
 0x77d   : > { %7854 = vmatprep.subr.bf16.mxu1 %v12867_v44  ;;  %v1025_v44 = vld [vmem:[%s18648_s1 + $0x1338] sm:$0xff] }
 0x77e   : > { %v12484_v8 = vcombine.low %v1025_v44, %v1033_v62  ;;  %v1377_v56 = vld [vmem:[%s18648_s1 + $0x1e38] sm:$0xff] }
 0x782   : > { %7527 = vmatpush1.bf16.xpose.msra.mxu0 %v12610_v4  ;;  %v12724_v4 = vcombine.low %v1265_v57, %v1273_v9  ;;  %v1385_v57 = vld [vmem:[%s18648_s1 + $0x1e78] sm:$0xff] }
 0x783   : > { %7528 = vmatprep.subr.bf16.mxu0 %v12627_v53  ;;  %v12741_v53 = vcombine.high %v1281_v63, %v1289_v22 }
 0x784   : > { %7855 = vmatpush1.bf16.xpose.msra.mxu1 %v12866_v5  ;;  %v12485_v5 = vcombine.high %v1025_v44, %v1033_v62  ;;  %v1145_v44 = vld [vmem:[%s18648_s1 + $0x16f8] sm:$0xff] }
 0x785   : > { %7856 = vmatprep.subr.bf16.mxu1 %v12883_v6  ;;  %v1041_v6 = vld [vmem:[%s18648_s1 + $0x13b8] sm:$0xff] }
 0x786   : > { %v12500_v14 = vcombine.low %v1041_v6, %v1049_v25  ;;  %v1393_v62 = vld [vmem:[%s18648_s1 + $0x1eb8] sm:$0xff] }
 0x78a   : > { %7529 = vmatpush1.bf16.xpose.msra.mxu0 %v12626_v26  ;;  %v12740_v26 = vcombine.low %v1281_v63, %v1289_v22  ;;  %v1401_v63 = vld [vmem:[%s18648_s1 + $0x1ef8] sm:$0xff] }
 0x78b   : > { %7539 = vmatprep.subr.bf16.mxu0 %v12389_v12  ;;  %v12757_v12 = vcombine.high %v1297_v42, %v1305_v7 }
 0x78c   : > { %7857 = vmatpush1.bf16.xpose.msra.mxu1 %v12882_v43  ;;  %v12501_v43 = vcombine.high %v1041_v6, %v1049_v25  ;;  %v1161_v6 = vld [vmem:[%s18648_s1 + $0x1778] sm:$0xff] }
 0x78d   : > { %7867 = vmatprep.subr.bf16.mxu1 %v12645_v27  ;;  %v1057_v27 = vld [vmem:[%s18648_s1 + $0x1438] sm:$0xff] }
 0x78e   : > { %v1409_v25 = vld [vmem:[%s18648_s1 + $0x1f38] sm:$0xff] }
 0x791   : > { %7531 = vmatmul.mubr.bf16.vlgmr.msra.gmra.mrb[4].mxu0 %v15663_v21 }
 0x792   : > { %7540 = vmatpush1.bf16.xpose.msra.mxu0 %v12388_v15  ;;  %7571 = vmatprep.mubr.bf16.mxu0 %v15673_v39  ;;  %v12756_v15 = vcombine.low %v1297_v42, %v1305_v7  ;;  %v1417_v42 = vld [vmem:[%s18648_s1 + $0x1f78] sm:$0xff] }
 0x793   : > { %7859 = vmatmul.mubr.bf16.vlgmr.msra.gmra.mrb[4].mxu1 %v15663_v21  ;;  %7541 = vmatprep.subr.bf16.mxu0 %v12405_v17  ;;  %v1225_v21 = vld [vmem:[%s18648_s1 + $0x1978] sm:$0xff]  ;;  %v12773_v17 = vcombine.high %v1313_v13, %v1321_v33 }
 0x794   : > { %7868 = vmatpush1.bf16.xpose.msra.mxu1 %v12644_v16  ;;  %7899 = vmatprep.mubr.bf16.mxu1 %v15673_v39  ;;  %v12677_v29 = vcombine.high %v1217_v20, %v1225_v21  ;;  %v1233_v39 = vld [vmem:[%s18648_s1 + $0x19b8] sm:$0xff]  ;;  %v12676_v41 = vcombine.low %v1217_v20, %v1225_v21  ;;  %v12517_v16 = vcombine.high %v1057_v27, %v1065_v24 }
 0x795   : > { %7869 = vmatprep.subr.bf16.mxu1 %v12661_v38  ;;  %v12693_v3 = vcombine.high %v1233_v39, %v1241_v32  ;;  %v12692_v50 = vcombine.low %v1233_v39, %v1241_v32  ;;  %v1073_v38 = vld [vmem:[%s18648_s1 + $0x14b8] sm:$0xff]  ;;  %v12516_v21 = vcombine.low %v1057_v27, %v1065_v24 }
 0x796   : > { %v1337_v20 = vld [vmem:[%s18648_s1 + $0x1cf8] sm:$0xff]  ;;  %v12532_v32 = vcombine.low %v1073_v38, %v1081_v18 }
 0x797   : > { %v1353_v39 = vld [vmem:[%s18648_s1 + $0x1d78] sm:$0xff] }
 0x798   : > { %v1177_v27 = vld [vmem:[%s18648_s1 + $0x17f8] sm:$0xff] }
 0x799   : > { %v1425_v24 = vld [vmem:[%s18648_s1 + $0x1fb8] sm:$0xff] }
 0x79a   : > { %7542 = vmatpush1.bf16.xpose.msra.mxu0 %v12404_v34  ;;  %v12772_v34 = vcombine.low %v1313_v13, %v1321_v33  ;;  %v1433_v13 = vld [vmem:[%s18648_s1 + $0x1ff8] sm:$0xff] }
 0x79b   : > { %7543 = vmatprep.subr.bf16.mxu0 %v12421_v36  ;;  %v12789_v36 = vcombine.high %v1329_v19, %v1337_v20 }
 0x79c   : > { %7870 = vmatpush1.bf16.xpose.msra.mxu1 %v12660_v23  ;;  %v12533_v23 = vcombine.high %v1073_v38, %v1081_v18  ;;  %v17433_v38 = vld [vmem:[%s18649_s2] sm:$0xff] }
 0x79d   : > { %7871 = vmatprep.subr.bf16.mxu1 %v12677_v29  ;;  %v1089_v29 = vld [vmem:[%s18648_s1 + $0x1538] sm:$0xff]  ;;  %v7924_v18 = vld [vmem:[%s18650_s3] sm:$0xff] }
 0x79e   : > { %v12548_v49 = vcombine.low %v1089_v29, %v1097_v30 }
 0x7a2   : > { %7544 = vmatpush1.bf16.xpose.msra.mxu0 %v12420_v47  ;;  %v12788_v47 = vcombine.low %v1329_v19, %v1337_v20  ;;  %v7928_v19 = vld [vmem:[%s18650_s3 + $0x20] sm:$0xff] }
 0x7a3   : > { %7545 = vmatprep.subr.bf16.mxu0 %v12437_v37  ;;  %v12805_v37 = vcombine.high %v1345_v31, %v1353_v39 }
 0x7a4   : > { %7872 = vmatpush1.bf16.xpose.msra.mxu1 %v12676_v41  ;;  %v12549_v41 = vcombine.high %v1089_v29, %v1097_v30  ;;  %v12887_v29 = vcombine.high %v7924_v18, %v7928_v19 }
 0x7a5   : > { %7873 = vmatprep.subr.bf16.mxu1 %v12693_v3  ;;  %v1105_v3 = vld [vmem:[%s18648_s1 + $0x15b8] sm:$0xff] }
 0x7a6   : > { %v12564_v9 = vcombine.low %v1105_v3, %v1113_v2 }
 0x7aa   : > { %7546 = vmatpush1.bf16.xpose.msra.mxu0 %v12436_v1  ;;  %v12804_v1 = vcombine.low %v1345_v31, %v1353_v39 }
 0x7ab   : > { %7547 = vmatprep.subr.bf16.mxu0 %v12453_v0  ;;  %v12821_v0 = vcombine.high %v1361_v45, %v1369_v46 }
 0x7ac   : > { %7874 = vmatpush1.bf16.xpose.msra.mxu1 %v12692_v50  ;;  %v12565_v50 = vcombine.high %v1105_v3, %v1113_v2 }
 0x7ad   : > { %7875 = vmatprep.subr.bf16.mxu1 %v12709_v10  ;;  %v1121_v10 = vld [vmem:[%s18648_s1 + $0x1638] sm:$0xff] }
 0x7ae   : > { %v12580_v22 = vcombine.low %v1121_v10, %v1129_v54 }
 0x7b2   : > { %7548 = vmatpush1.bf16.xpose.msra.mxu0 %v12452_v58  ;;  %v12820_v58 = vcombine.low %v1361_v45, %v1369_v46 }
 0x7b3   : > { %7549 = vmatprep.subr.bf16.mxu0 %v12469_v60  ;;  %v12837_v60 = vcombine.high %v1377_v56, %v1385_v57 }
 0x7b4   : > { %7876 = vmatpush1.bf16.xpose.msra.mxu1 %v12708_v59  ;;  %v12581_v59 = vcombine.high %v1121_v10, %v1129_v54 }
 0x7b5   : > { %7877 = vmatprep.subr.bf16.mxu1 %v12725_v61  ;;  %v1137_v61 = vld [vmem:[%s18648_s1 + $0x16b8] sm:$0xff] }
 0x7b6   : > { %v12596_v7 = vcombine.low %v1137_v61, %v1145_v44 }
 0x7ba   : > { %7550 = vmatpush1.bf16.xpose.msra.mxu0 %v12468_v40  ;;  %v12836_v40 = vcombine.low %v1377_v56, %v1385_v57  ;;  %v7948_v57 = vld [vmem:[%s18650_s3 + $0xc0] sm:$0xff] }
 0x7bb   : > { %7551 = vmatprep.subr.bf16.mxu0 %v12485_v5  ;;  %v12853_v5 = vcombine.high %v1393_v62, %v1401_v63 }
 0x7bc   : > { %7878 = vmatpush1.bf16.xpose.msra.mxu1 %v12724_v4  ;;  %v12597_v4 = vcombine.high %v1137_v61, %v1145_v44 }
 0x7bd   : > { %7879 = vmatprep.subr.bf16.mxu1 %v12741_v53  ;;  %v1153_v53 = vld [vmem:[%s18648_s1 + $0x1738] sm:$0xff] }
 0x7be   : > { %v12612_v33 = vcombine.low %v1153_v53, %v1161_v6 }
 0x7c2   : > { %7552 = vmatpush1.bf16.xpose.msra.mxu0 %v12484_v8  ;;  %v12852_v8 = vcombine.low %v1393_v62, %v1401_v63  ;;  %v7956_v63 = vld [vmem:[%s18650_s3 + $0x100] sm:$0xff] }
 0x7c3   : > { %7553 = vmatprep.subr.bf16.mxu0 %v12501_v43  ;;  %v12869_v43 = vcombine.high %v1409_v25, %v1417_v42 }
 0x7c4   : > { %7880 = vmatpush1.bf16.xpose.msra.mxu1 %v12740_v26  ;;  %v12613_v26 = vcombine.high %v1153_v53, %v1161_v6 }
 0x7c5   : > { %7881 = vmatprep.subr.bf16.mxu1 %v12757_v12  ;;  %v1169_v12 = vld [vmem:[%s18648_s1 + $0x17b8] sm:$0xff] }
 0x7ca   : > { %7554 = vmatpush1.bf16.xpose.msra.mxu0 %v12500_v14  ;;  %v12868_v14 = vcombine.low %v1409_v25, %v1417_v42  ;;  %v7964_v42 = vld [vmem:[%s18650_s3 + $0x140] sm:$0xff] }
 0x7cb   : > { %7555 = vmatprep.subr.bf16.mxu0 %v12517_v16  ;;  %v12885_v16 = vcombine.high %v1425_v24, %v1433_v13 }
 0x7cc   : > { %7882 = vmatpush1.bf16.xpose.msra.mxu1 %v12756_v15  ;;  %v12629_v15 = vcombine.high %v1169_v12, %v1177_v27 }
 0x7cd   : > { %7883 = vmatprep.subr.bf16.mxu1 %v12773_v17  ;;  %v17428_v17 = vsub.s32 1, %v14202_v28 }
 0x7cf   : > { %v1443_v20 = vrot.slane %v17433_v38, %v17428_v17 }
 0x7d1   : > { %v13406_v31 = vadd.f32 %v16205_v52, %v1443_v20  ;;  %v8064_v52 = vld [vmem:[%s18650_s3 + $0x460] sm:$0xff] }
 0x7d2   : > { %7556 = vmatpush1.bf16.xpose.msra.mxu0 %v12516_v21  ;;  %v8052_v21 = vld [vmem:[%s18650_s3 + $0x400] sm:$0xff] }
 0x7d3   : > { %7557 = vmatprep.subr.bf16.mxu0 %v12533_v23  ;;  %v12628_v23 = vcombine.low %v1169_v12, %v1177_v27  ;;  %v7909_v39 = vmax.f32 %v13406_v31, 0.0 }
 0x7d4   : > { %7884 = vmatpush1.bf16.xpose.msra.mxu1 %v12772_v34  ;;  %v8056_v34 = vld [vmem:[%s18650_s3 + $0x420] sm:$0xff] }
 0x7d5   : > { %7885 = vmatprep.subr.bf16.mxu1 %v12789_v36  ;;  %v12884_v36 = vcombine.low %v1425_v24, %v1433_v13  ;;  %v13015_v30 = vcombine.high %v8052_v21, %v8056_v34  ;;  %v13014_v3 = vcombine.low %v8052_v21, %v8056_v34  ;;  %v7917_v45 = vpack.c.bf16 %v7909_v39, %v7909_v39  ;;  %v7972_v13 = vld [vmem:[%s18650_s3 + $0x180] sm:$0xff] }
 0x7d6   : > { %v7980_v21 = vld [vmem:[%s18650_s3 + $0x1c0] sm:$0xff] }
 0x7d7   : > { %v7984_v34 = vld [vmem:[%s18650_s3 + $0x1e0] sm:$0xff] }
 0x7d8   : > { %v12943_v31 = vcombine.high %v7980_v21, %v7984_v34 }
 0x7da   : > { %7558 = vmatpush1.bf16.xpose.msra.mxu0 %v12532_v32  ;;  %v7932_v32 = vld [vmem:[%s18650_s3 + $0x40] sm:$0xff] }
 0x7db   : > { %7559 = vmatprep.subr.bf16.mxu0 %v12549_v41  ;;  %v12886_v41 = vcombine.low %v7924_v18, %v7928_v19 }
 0x7dc   : > { %7886 = vmatpush1.bf16.xpose.msra.mxu1 %v12788_v47  ;;  %v7936_v47 = vld [vmem:[%s18650_s3 + $0x60] sm:$0xff] }
 0x7dd   : > { %7887 = vmatprep.subr.bf16.mxu1 %v12805_v37  ;;  %v8060_v37 = vld [vmem:[%s18650_s3 + $0x440] sm:$0xff]  ;;  %v12895_v2 = vcombine.high %v7932_v32, %v7936_v47 }
 0x7de   : > { %v13023_v46 = vcombine.high %v8060_v37, %v8064_v52  ;;  %v13022_v10 = vcombine.low %v8060_v37, %v8064_v52  ;;  %v8120_v37 = vld [vmem:[%s18650_s3 + $0x620] sm:$0xff]  ;;  %v12942_v52 = vcombine.low %v7980_v21, %v7984_v34 }
 0x7df   : > { %v8040_v21 = vld [vmem:[%s18650_s3 + $0x3a0] sm:$0xff] }
 0x7e0   : > { %v8164_v34 = vld [vmem:[%s18650_s3 + $0x780] sm:$0xff] }
 0x7e2   : > { %7560 = vmatpush1.bf16.xpose.msra.mxu0 %v12548_v49  ;;  %v7940_v49 = vld [vmem:[%s18650_s3 + $0x80] sm:$0xff] }
 0x7e3   : > { %7561 = vmatprep.subr.bf16.mxu0 %v12565_v50  ;;  %v8068_v50 = vld [vmem:[%s18650_s3 + $0x480] sm:$0xff] }
 0x7e4   : > { %7888 = vmatpush1.bf16.xpose.msra.mxu1 %v12804_v1  ;;  %v7944_v1 = vld [vmem:[%s18650_s3 + $0xa0] sm:$0xff] }
 0x7e5   : > { %7889 = vmatprep.subr.bf16.mxu1 %v12821_v0  ;;  %v12894_v0 = vcombine.low %v7932_v32, %v7936_v47  ;;  %v12903_v54 = vcombine.high %v7940_v49, %v7944_v1  ;;  %v7988_v32 = vld [vmem:[%s18650_s3 + $0x200] sm:$0xff] }
 0x7e6   : > { %v7992_v47 = vld [vmem:[%s18650_s3 + $0x220] sm:$0xff] }
 0x7ea   : > { %7562 = vmatpush1.bf16.xpose.msra.mxu0 %v12564_v9  ;;  %v7952_v9 = vld [vmem:[%s18650_s3 + $0xe0] sm:$0xff] }
 0x7eb   : > { %7563 = vmatprep.subr.bf16.mxu0 %v12581_v59  ;;  %v8080_v59 = vld [vmem:[%s18650_s3 + $0x4e0] sm:$0xff]  ;;  %v12911_v44 = vcombine.high %v7948_v57, %v7952_v9 }
 0x7ec   : > { %7890 = vmatpush1.bf16.xpose.msra.mxu1 %v12820_v58  ;;  %v8076_v58 = vld [vmem:[%s18650_s3 + $0x4c0] sm:$0xff] }
 0x7ed   : > { %7891 = vmatprep.subr.bf16.mxu1 %v12837_v60  ;;  %v12902_v60 = vcombine.low %v7940_v49, %v7944_v1  ;;  %v13039_v62 = vcombine.high %v8076_v58, %v8080_v59  ;;  %v13038_v53 = vcombine.low %v8076_v58, %v8080_v59  ;;  %v8000_v49 = vld [vmem:[%s18650_s3 + $0x260] sm:$0xff] }
 0x7ee   : > { %v8124_v1 = vld [vmem:[%s18650_s3 + $0x640] sm:$0xff] }
 0x7ef   : > { %v8136_v58 = vld [vmem:[%s18650_s3 + $0x6a0] sm:$0xff] }
 0x7f2   : > { %7564 = vmatpush1.bf16.xpose.msra.mxu0 %v12580_v22  ;;  %v7960_v22 = vld [vmem:[%s18650_s3 + $0x120] sm:$0xff] }
 0x7f3   : > { %7565 = vmatprep.subr.bf16.mxu0 %v12597_v4  ;;  %v8088_v4 = vld [vmem:[%s18650_s3 + $0x520] sm:$0xff]  ;;  %v12919_v6 = vcombine.high %v7956_v63, %v7960_v22 }
 0x7f4   : > { %7892 = vmatpush1.bf16.xpose.msra.mxu1 %v12836_v40  ;;  %v8084_v40 = vld [vmem:[%s18650_s3 + $0x500] sm:$0xff] }
 0x7f5   : > { %7893 = vmatprep.subr.bf16.mxu1 %v12853_v5  ;;  %v12910_v5 = vcombine.low %v7948_v57, %v7952_v9  ;;  %v13047_v25 = vcombine.high %v8084_v40, %v8088_v4  ;;  %v13046_v12 = vcombine.low %v8084_v40, %v8088_v4  ;;  %v8008_v57 = vld [vmem:[%s18650_s3 + $0x2a0] sm:$0xff] }
 0x7f6   : > { %v8132_v9 = vld [vmem:[%s18650_s3 + $0x680] sm:$0xff] }
 0x7f7   : > { %v8144_v40 = vld [vmem:[%s18650_s3 + $0x6e0] sm:$0xff] }
 0x7fa   : > { %7566 = vmatpush1.bf16.xpose.msra.mxu0 %v12596_v7  ;;  %v7968_v7 = vld [vmem:[%s18650_s3 + $0x160] sm:$0xff] }
 0x7fb   : > { %7567 = vmatprep.subr.bf16.mxu0 %v12613_v26  ;;  %v8096_v26 = vld [vmem:[%s18650_s3 + $0x560] sm:$0xff]  ;;  %v12927_v27 = vcombine.high %v7964_v42, %v7968_v7 }
 0x7fc   : > { %7894 = vmatpush1.bf16.xpose.msra.mxu1 %v12852_v8  ;;  %v8092_v8 = vld [vmem:[%s18650_s3 + $0x540] sm:$0xff] }
 0x7fd   : > { %7895 = vmatprep.subr.bf16.mxu1 %v12869_v43  ;;  %v12918_v43 = vcombine.low %v7956_v63, %v7960_v22  ;;  %v13055_v24 = vcombine.high %v8092_v8, %v8096_v26  ;;  %v13054_v18 = vcombine.low %v8092_v8, %v8096_v26  ;;  %v8016_v63 = vld [vmem:[%s18650_s3 + $0x2e0] sm:$0xff] }
 0x7fe   : > { %v8140_v22 = vld [vmem:[%s18650_s3 + $0x6c0] sm:$0xff] }
 0x7ff   : > { %v8152_v8 = vld [vmem:[%s18650_s3 + $0x720] sm:$0xff] }
 0x802   : > { %7568 = vmatpush1.bf16.xpose.msra.mxu0 %v12612_v33  ;;  %v7976_v33 = vld [vmem:[%s18650_s3 + $0x1a0] sm:$0xff] }
 0x803   : > { %7569 = vmatprep.subr.bf16.mxu0 %v12629_v15  ;;  %v8104_v15 = vld [vmem:[%s18650_s3 + $0x5a0] sm:$0xff]  ;;  %v12935_v19 = vcombine.high %v7972_v13, %v7976_v33 }
 0x804   : > { %7896 = vmatpush1.bf16.xpose.msra.mxu1 %v12868_v14  ;;  %v8100_v14 = vld [vmem:[%s18650_s3 + $0x580] sm:$0xff] }
 0x805   : > { %7897 = vmatprep.subr.bf16.mxu1 %v12885_v16  ;;  %v12926_v16 = vcombine.low %v7964_v42, %v7968_v7  ;;  %v13063_v20 = vcombine.high %v8100_v14, %v8104_v15  ;;  %v8024_v42 = vld [vmem:[%s18650_s3 + $0x320] sm:$0xff] }
 0x806   : > { %v8148_v7 = vld [vmem:[%s18650_s3 + $0x700] sm:$0xff] }
 0x80a   : > { %7570 = vmatpush1.bf16.xpose.msra.mxu0 %v12628_v23  ;;  %v8108_v23 = vld [vmem:[%s18650_s3 + $0x5c0] sm:$0xff] }
 0x80b   : > { %9482 = vmatprep.subr.bf16.mxu0 %v12887_v29  ;;  %v12934_v29 = vcombine.low %v7972_v13, %v7976_v33  ;;  %v8032_v13 = vld [vmem:[%s18650_s3 + $0x360] sm:$0xff] }
 0x80c   : > { %7898 = vmatpush1.bf16.xpose.msra.mxu1 %v12884_v36  ;;  %v8112_v36 = vld [vmem:[%s18650_s3 + $0x5e0] sm:$0xff] }
 0x80d   : > { %9646 = vmatprep.subr.bf16.mxu1 %v13015_v30  ;;  %v13062_v30 = vcombine.low %v8100_v14, %v8104_v15  ;;  %v13071_v39 = vcombine.high %v8108_v23, %v8112_v36  ;;  %v8156_v33 = vld [vmem:[%s18650_s3 + $0x740] sm:$0xff] }
 0x80e   : > { %v8160_v14 = vld [vmem:[%s18650_s3 + $0x760] sm:$0xff] }
 0x811   : > { %7572 = vmatmul.mubr.bf16.vlgmr.msra.gmra.mrb[4].mxu0 %v15867_v11 }
 0x812   : > { %9483 = vmatpush1.bf16.xpose.msra.mxu0 %v12886_v41  ;;  %9514 = vmatprep.mubr.bf16.mxu0 %v7917_v45  ;;  %v8116_v41 = vld [vmem:[%s18650_s3 + $0x600] sm:$0xff] }
 0x813   : > { %7900 = vmatmul.mubr.bf16.vlgmr.msra.gmra.mrb[4].mxu1 %v15867_v11  ;;  %9484 = vmatprep.subr.bf16.mxu0 %v12895_v2  ;;  %v8072_v11 = vld [vmem:[%s18650_s3 + $0x4a0] sm:$0xff]  ;;  %v12951_v2 = vcombine.high %v7988_v32, %v7992_v47 }
 0x814   : > { %9647 = vmatpush1.bf16.xpose.msra.mxu1 %v13014_v3  ;;  %9678 = vmatprep.mubr.bf16.mxu1 %v7917_v45  ;;  %v13031_v56 = vcombine.high %v8068_v50, %v8072_v11  ;;  %v13030_v61 = vcombine.low %v8068_v50, %v8072_v11  ;;  %v13070_v3 = vcombine.low %v8108_v23, %v8112_v36  ;;  %v8128_v50 = vld [vmem:[%s18650_s3 + $0x660] sm:$0xff] }
 0x815   : > { %9648 = vmatprep.subr.bf16.mxu1 %v13023_v46  ;;  %v13079_v45 = vcombine.high %v8116_v41, %v8120_v37  ;;  %v7996_v46 = vld [vmem:[%s18650_s3 + $0x240] sm:$0xff]  ;;  %v12950_v11 = vcombine.low %v7988_v32, %v7992_v47 }
 0x816   : > { %v12958_v59 = vcombine.low %v7996_v46, %v8000_v49  ;;  %v8168_v23 = vld [vmem:[%s18650_s3 + $0x7a0] sm:$0xff] }
 0x817   : > { %v8048_v32 = vld [vmem:[%s18650_s3 + $0x3e0] sm:$0xff] }
 0x818   : > { %v8172_v47 = vld [vmem:[%s18650_s3 + $0x7c0] sm:$0xff] }
 0x81a   : > { %9485 = vmatpush1.bf16.xpose.msra.mxu0 %v12894_v0  ;;  %v13078_v0 = vcombine.low %v8116_v41, %v8120_v37  ;;  %v8176_v41 = vld [vmem:[%s18650_s3 + $0x7e0] sm:$0xff] }
 0x81b   : > { %9486 = vmatprep.subr.bf16.mxu0 %v12903_v54  ;;  %v13087_v54 = vcombine.high %v8124_v1, %v8128_v50 }
 0x81c   : > { %9649 = vmatpush1.bf16.xpose.msra.mxu1 %v13022_v10  ;;  %v12959_v10 = vcombine.high %v7996_v46, %v8000_v49  ;;  %v17636_v46 = vsub.s32 3, %v14202_v28 }
 0x81d   : > { %9650 = vmatprep.subr.bf16.mxu1 %v13031_v56  ;;  %v8004_v56 = vld [vmem:[%s18650_s3 + $0x280] sm:$0xff] }
 0x81e   : > { %v12966_v4 = vcombine.low %v8004_v56, %v8008_v57 }
 0x822   : > { %9487 = vmatpush1.bf16.xpose.msra.mxu0 %v12902_v60  ;;  %v13086_v60 = vcombine.low %v8124_v1, %v8128_v50  ;;  %v7925_v1 = vld [vmem:[%s18650_s3 + $0x8] sm:$0xff] }
 0x823   : > { %9488 = vmatprep.subr.bf16.mxu0 %v12911_v44  ;;  %v13095_v44 = vcombine.high %v8132_v9, %v8136_v58  ;;  %v7929_v50 = vld [vmem:[%s18650_s3 + $0x28] sm:$0xff] }
 0x824   : > { %9651 = vmatpush1.bf16.xpose.msra.mxu1 %v13030_v61  ;;  %v12967_v61 = vcombine.high %v8004_v56, %v8008_v57  ;;  %v13134_v57 = vcombine.low %v8172_v47, %v8176_v41 }
 0x825   : > { %9652 = vmatprep.subr.bf16.mxu1 %v13039_v62  ;;  %v8012_v62 = vld [vmem:[%s18650_s3 + $0x2c0] sm:$0xff] }
 0x826   : > { %v12974_v26 = vcombine.low %v8012_v62, %v8016_v63 }
 0x82a   : > { %9489 = vmatpush1.bf16.xpose.msra.mxu0 %v12910_v5  ;;  %v13094_v5 = vcombine.low %v8132_v9, %v8136_v58  ;;  %v12889_v9 = vcombine.high %v7925_v1, %v7929_v50 }
 0x82b   : > { %9490 = vmatprep.subr.bf16.mxu0 %v12919_v6  ;;  %v13103_v6 = vcombine.high %v8140_v22, %v8144_v40 }
 0x82c   : > { %9653 = vmatpush1.bf16.xpose.msra.mxu1 %v13038_v53  ;;  %v12975_v53 = vcombine.high %v8012_v62, %v8016_v63  ;;  %v7937_v62 = vld [vmem:[%s18650_s3 + $0x68] sm:$0xff] }
 0x82d   : > { %9654 = vmatprep.subr.bf16.mxu1 %v13047_v25  ;;  %v8020_v25 = vld [vmem:[%s18650_s3 + $0x300] sm:$0xff]  ;;  %v8061_v63 = vld [vmem:[%s18650_s3 + $0x448] sm:$0xff] }
 0x82e   : > { %v12982_v15 = vcombine.low %v8020_v25, %v8024_v42 }
 0x832   : > { %9491 = vmatpush1.bf16.xpose.msra.mxu0 %v12918_v43  ;;  %v13102_v43 = vcombine.low %v8140_v22, %v8144_v40 }
 0x833   : > { %9492 = vmatprep.subr.bf16.mxu0 %v12927_v27  ;;  %v13111_v27 = vcombine.high %v8148_v7, %v8152_v8 }
 0x834   : > { %9655 = vmatpush1.bf16.xpose.msra.mxu1 %v13046_v12  ;;  %v12983_v12 = vcombine.high %v8020_v25, %v8024_v42  ;;  %v7945_v25 = vld [vmem:[%s18650_s3 + $0xa8] sm:$0xff] }
 0x835   : > { %9656 = vmatprep.subr.bf16.mxu1 %v13055_v24  ;;  %v8028_v24 = vld [vmem:[%s18650_s3 + $0x340] sm:$0xff]  ;;  %v8069_v42 = vld [vmem:[%s18650_s3 + $0x488] sm:$0xff] }
 0x836   : > { %v12990_v36 = vcombine.low %v8028_v24, %v8032_v13 }
 0x83a   : > { %9493 = vmatpush1.bf16.xpose.msra.mxu0 %v12926_v16  ;;  %v13110_v16 = vcombine.low %v8148_v7, %v8152_v8  ;;  %v8073_v7 = vld [vmem:[%s18650_s3 + $0x4a8] sm:$0xff] }
 0x83b   : > { %9494 = vmatprep.subr.bf16.mxu0 %v12935_v19  ;;  %v13119_v19 = vcombine.high %v8156_v33, %v8160_v14 }
 0x83c   : > { %9657 = vmatpush1.bf16.xpose.msra.mxu1 %v13054_v18  ;;  %v12991_v18 = vcombine.high %v8028_v24, %v8032_v13  ;;  %v7953_v24 = vld [vmem:[%s18650_s3 + $0xe8] sm:$0xff] }
 0x83d   : > { %9658 = vmatprep.subr.bf16.mxu1 %v13063_v20  ;;  %v8036_v20 = vld [vmem:[%s18650_s3 + $0x380] sm:$0xff]  ;;  %v8077_v13 = vld [vmem:[%s18650_s3 + $0x4c8] sm:$0xff] }
 0x83e   : > { %v12998_v37 = vcombine.low %v8036_v20, %v8040_v21 }
 0x842   : > { %9495 = vmatpush1.bf16.xpose.msra.mxu0 %v12934_v29  ;;  %v13118_v29 = vcombine.low %v8156_v33, %v8160_v14  ;;  %v8081_v33 = vld [vmem:[%s18650_s3 + $0x4e8] sm:$0xff] }
 0x843   : > { %9496 = vmatprep.subr.bf16.mxu0 %v12943_v31  ;;  %v13127_v31 = vcombine.high %v8164_v34, %v8168_v23 }
 0x844   : > { %9659 = vmatpush1.bf16.xpose.msra.mxu1 %v13062_v30  ;;  %v12999_v30 = vcombine.high %v8036_v20, %v8040_v21  ;;  %v7961_v20 = vld [vmem:[%s18650_s3 + $0x128] sm:$0xff] }
 0x845   : > { %9660 = vmatprep.subr.bf16.mxu1 %v13071_v39  ;;  %v8044_v39 = vld [vmem:[%s18650_s3 + $0x3c0] sm:$0xff]  ;;  %v8085_v21 = vld [vmem:[%s18650_s3 + $0x508] sm:$0xff] }
 0x84a   : > { %9497 = vmatpush1.bf16.xpose.msra.mxu0 %v12942_v52  ;;  %v17633_v52 = vsub.s32 0, %v14202_v28 }
 0x84b   : > { %9498 = vmatprep.subr.bf16.mxu0 %v12951_v2  ;;  %v13007_v2 = vcombine.high %v8044_v39, %v8048_v32 }
 0x84c   : > { %9661 = vmatpush1.bf16.xpose.msra.mxu1 %v13070_v3  ;;  %v13126_v3 = vcombine.low %v8164_v34, %v8168_v23  ;;  %v1439_v49 = vrot.slane %v17433_v38, %v17633_v52  ;;  %v8089_v34 = vld [vmem:[%s18650_s3 + $0x528] sm:$0xff] }
 0x84d   : > { %9662 = vmatprep.subr.bf16.mxu1 %v13079_v45  ;;  %v13135_v45 = vcombine.high %v8172_v47, %v8176_v41  ;;  %v8097_v47 = vld [vmem:[%s18650_s3 + $0x568] sm:$0xff] }
 0x84e   : > { %v13405_v56 = vadd.f32 %v16195_v48, %v1439_v49  ;;  %v12888_v48 = vcombine.low %v7925_v1, %v7929_v50  ;;  %v7977_v49 = vld [vmem:[%s18650_s3 + $0x1a8] sm:$0xff] }
 0x84f   : > { %v8101_v1 = vld [vmem:[%s18650_s3 + $0x588] sm:$0xff] }
 0x850   : > { %v8105_v50 = vld [vmem:[%s18650_s3 + $0x5a8] sm:$0xff] }
 0x852   : > { %9499 = vmatpush1.bf16.xpose.msra.mxu0 %v12950_v11  ;;  %v1451_v11 = vrot.slane %v17433_v38, %v17636_v46 }
 0x853   : > { %9500 = vmatprep.subr.bf16.mxu0 %v12959_v10  ;;  %v8057_v10 = vld [vmem:[%s18650_s3 + $0x428] sm:$0xff] }
 0x854   : > { %9663 = vmatpush1.bf16.xpose.msra.mxu1 %v13078_v0  ;;  %v8053_v0 = vld [vmem:[%s18650_s3 + $0x408] sm:$0xff] }
 0x855   : > { %9664 = vmatprep.subr.bf16.mxu1 %v13087_v54  ;;  %v13006_v54 = vcombine.low %v8044_v39, %v8048_v32  ;;  %v13017_v58 = vcombine.high %v8053_v0, %v8057_v10  ;;  %v13016_v40 = vcombine.low %v8053_v0, %v8057_v10  ;;  %v7969_v39 = vld [vmem:[%s18650_s3 + $0x168] sm:$0xff] }
 0x856   : > { %v8093_v32 = vld [vmem:[%s18650_s3 + $0x548] sm:$0xff] }
 0x857   : > { %v13056_v0 = vcombine.low %v8093_v32, %v8097_v47 }
 0x85a   : > { %9501 = vmatpush1.bf16.xpose.msra.mxu0 %v12958_v59  ;;  %v13408_v59 = vadd.f32 %v16213_v55, %v1451_v11  ;;  %v8065_v55 = vld [vmem:[%s18650_s3 + $0x468] sm:$0xff] }
 0x85b   : > { %9502 = vmatprep.subr.bf16.mxu0 %v12967_v61 }
 0x85c   : > { %9665 = vmatpush1.bf16.xpose.msra.mxu1 %v13086_v60  ;;  %v7908_v60 = vmax.f32 %v13405_v56, 0.0  ;;  %v7911_v61 = vmax.f32 %v13408_v59, 0.0  ;;  %v7981_v56 = vld [vmem:[%s18650_s3 + $0x1c8] sm:$0xff] }
 0x85d   : > { %9666 = vmatprep.subr.bf16.mxu1 %v13095_v44  ;;  %v7933_v44 = vld [vmem:[%s18650_s3 + $0x48] sm:$0xff] }
 0x85e   : > { %v7916_v22 = vpack.c.bf16 %v7908_v60, %v7908_v60  ;;  %v12896_v8 = vcombine.low %v7933_v44, %v7937_v62  ;;  %v13064_v60 = vcombine.low %v8101_v1, %v8105_v50 }
 0x862   : > { %9503 = vmatpush1.bf16.xpose.msra.mxu0 %v12966_v4  ;;  %v12897_v4 = vcombine.high %v7933_v44, %v7937_v62  ;;  %v7989_v62 = vld [vmem:[%s18650_s3 + $0x208] sm:$0xff] }
 0x863   : > { %9504 = vmatprep.subr.bf16.mxu0 %v12975_v53  ;;  %v13025_v53 = vcombine.high %v8061_v63, %v8065_v55 }
 0x864   : > { %9667 = vmatpush1.bf16.xpose.msra.mxu1 %v13094_v5  ;;  %v7919_v5 = vpack.c.bf16 %v7911_v61, %v7911_v61 }
 0x865   : > { %9668 = vmatprep.subr.bf16.mxu1 %v13103_v6  ;;  %v7941_v6 = vld [vmem:[%s18650_s3 + $0x88] sm:$0xff] }
 0x866   : > { %v12904_v14 = vcombine.low %v7941_v6, %v7945_v25 }
 0x86a   : > { %9505 = vmatpush1.bf16.xpose.msra.mxu0 %v12974_v26  ;;  %v13024_v26 = vcombine.low %v8061_v63, %v8065_v55  ;;  %v8117_v63 = vld [vmem:[%s18650_s3 + $0x608] sm:$0xff] }
 0x86b   : > { %9506 = vmatprep.subr.bf16.mxu0 %v12983_v12  ;;  %v13033_v12 = vcombine.high %v8069_v42, %v8073_v7  ;;  %v8121_v55 = vld [vmem:[%s18650_s3 + $0x628] sm:$0xff] }
 0x86c   : > { %9669 = vmatpush1.bf16.xpose.msra.mxu1 %v13102_v43  ;;  %v12905_v43 = vcombine.high %v7941_v6, %v7945_v25  ;;  %v8001_v6 = vld [vmem:[%s18650_s3 + $0x268] sm:$0xff] }
 0x86d   : > { %9670 = vmatprep.subr.bf16.mxu1 %v13111_v27  ;;  %v7949_v27 = vld [vmem:[%s18650_s3 + $0xc8] sm:$0xff] }
 0x86e   : > { %v12912_v23 = vcombine.low %v7949_v27, %v7953_v24  ;;  %v8125_v25 = vld [vmem:[%s18650_s3 + $0x648] sm:$0xff] }
 0x872   : > { %9507 = vmatpush1.bf16.xpose.msra.mxu0 %v12982_v15  ;;  %v13032_v15 = vcombine.low %v8069_v42, %v8073_v7  ;;  %v8129_v42 = vld [vmem:[%s18650_s3 + $0x668] sm:$0xff] }
 0x873   : > { %9508 = vmatprep.subr.bf16.mxu0 %v12991_v18  ;;  %v13041_v18 = vcombine.high %v8077_v13, %v8081_v33 }
 0x874   : > { %9671 = vmatpush1.bf16.xpose.msra.mxu1 %v13110_v16  ;;  %v12913_v16 = vcombine.high %v7949_v27, %v7953_v24  ;;  %v8009_v27 = vld [vmem:[%s18650_s3 + $0x2a8] sm:$0xff] }
 0x875   : > { %9672 = vmatprep.subr.bf16.mxu1 %v13119_v19  ;;  %v7957_v19 = vld [vmem:[%s18650_s3 + $0x108] sm:$0xff] }
 0x876   : > { %v12920_v41 = vcombine.low %v7957_v19, %v7961_v20  ;;  %v8133_v24 = vld [vmem:[%s18650_s3 + $0x688] sm:$0xff] }
 0x87a   : > { %9509 = vmatpush1.bf16.xpose.msra.mxu0 %v12990_v36  ;;  %v13040_v36 = vcombine.low %v8077_v13, %v8081_v33  ;;  %v8137_v13 = vld [vmem:[%s18650_s3 + $0x6a8] sm:$0xff] }
 0x87b   : > { %9510 = vmatprep.subr.bf16.mxu0 %v12999_v30  ;;  %v13049_v30 = vcombine.high %v8085_v21, %v8089_v34 }
 0x87c   : > { %9673 = vmatpush1.bf16.xpose.msra.mxu1 %v13118_v29  ;;  %v12921_v29 = vcombine.high %v7957_v19, %v7961_v20  ;;  %v8017_v19 = vld [vmem:[%s18650_s3 + $0x2e8] sm:$0xff] }
 0x87d   : > { %9674 = vmatprep.subr.bf16.mxu1 %v13127_v31  ;;  %v7965_v31 = vld [vmem:[%s18650_s3 + $0x148] sm:$0xff] }
 0x87e   : > { %v12928_v11 = vcombine.low %v7965_v31, %v7969_v39  ;;  %v8141_v20 = vld [vmem:[%s18650_s3 + $0x6c8] sm:$0xff] }
 0x882   : > { %9511 = vmatpush1.bf16.xpose.msra.mxu0 %v12998_v37  ;;  %v13048_v37 = vcombine.low %v8085_v21, %v8089_v34  ;;  %v8145_v21 = vld [vmem:[%s18650_s3 + $0x6e8] sm:$0xff] }
 0x883   : > { %9512 = vmatprep.subr.bf16.mxu0 %v13007_v2  ;;  %v13057_v2 = vcombine.high %v8093_v32, %v8097_v47 }
 0x884   : > { %9675 = vmatpush1.bf16.xpose.msra.mxu1 %v13126_v3  ;;  %v12929_v3 = vcombine.high %v7965_v31, %v7969_v39  ;;  %v8021_v31 = vld [vmem:[%s18650_s3 + $0x308] sm:$0xff] }
 0x885   : > { %9676 = vmatprep.subr.bf16.mxu1 %v13135_v45  ;;  %v7973_v45 = vld [vmem:[%s18650_s3 + $0x188] sm:$0xff] }
 0x886   : > { %v12937_v10 = vcombine.high %v7973_v45, %v7977_v49  ;;  %v12936_v59 = vcombine.low %v7973_v45, %v7977_v49  ;;  %v8025_v39 = vld [vmem:[%s18650_s3 + $0x328] sm:$0xff] }
 0x88a   : > { %9513 = vmatpush1.bf16.xpose.msra.mxu0 %v13006_v54  ;;  %v13065_v54 = vcombine.high %v8101_v1, %v8105_v50  ;;  %v13104_v50 = vcombine.low %v8141_v20, %v8145_v21 }
 0x88b   : > { %9523 = vmatprep.subr.bf16.mxu0 %v12889_v9  ;;  %v8109_v9 = vld [vmem:[%s18650_s3 + $0x5c8] sm:$0xff] }
 0x88c   : > { %9677 = vmatpush1.bf16.xpose.msra.mxu1 %v13134_v57  ;;  %v7985_v57 = vld [vmem:[%s18650_s3 + $0x1e8] sm:$0xff] }
 0x88d   : > { %9687 = vmatprep.subr.bf16.mxu1 %v13017_v58  ;;  %v8113_v58 = vld [vmem:[%s18650_s3 + $0x5e8] sm:$0xff]  ;;  %v12945_v61 = vcombine.high %v7981_v56, %v7985_v57 }
 0x88e   : > { %v13073_v44 = vcombine.high %v8109_v9, %v8113_v58 }
 0x891   : > { %9515 = vmatmul.mubr.bf16.vlgmr.msra.gmra.mrb[8].mxu0 %v7916_v22 }
 0x892   : > { %9524 = vmatpush1.bf16.xpose.msra.mxu0 %v12888_v48  ;;  %9555 = vmatprep.mubr.bf16.mxu0 %v7919_v5  ;;  %v7993_v48 = vld [vmem:[%s18650_s3 + $0x228] sm:$0xff] }
 0x893   : > { %9679 = vmatmul.mubr.bf16.vlgmr.msra.gmra.mrb[8].mxu1 %v7916_v22  ;;  %9525 = vmatprep.subr.bf16.mxu0 %v12897_v4  ;;  %v12944_v22 = vcombine.low %v7981_v56, %v7985_v57  ;;  %v12953_v4 = vcombine.high %v7989_v62, %v7993_v48  ;;  %v12952_v7 = vcombine.low %v7989_v62, %v7993_v48  ;;  %v8033_v56 = vld [vmem:[%s18650_s3 + $0x368] sm:$0xff] }
 0x894   : > { %9688 = vmatpush1.bf16.xpose.msra.mxu1 %v13016_v40  ;;  %9719 = vmatprep.mubr.bf16.mxu1 %v7919_v5  ;;  %v13072_v40 = vcombine.low %v8109_v9, %v8113_v58  ;;  %v13081_v5 = vcombine.high %v8117_v63, %v8121_v55  ;;  %v8157_v57 = vld [vmem:[%s18650_s3 + $0x748] sm:$0xff]  ;;  %v12984_v58 = vcombine.low %v8021_v31, %v8025_v39 }
 0x895   : > { %9689 = vmatprep.subr.bf16.mxu1 %v13025_v53  ;;  %v7997_v53 = vld [vmem:[%s18650_s3 + $0x248] sm:$0xff] }
 0x896   : > { %v12960_v33 = vcombine.low %v7997_v53, %v8001_v6  ;;  %v8161_v9 = vld [vmem:[%s18650_s3 + $0x768] sm:$0xff] }
 0x897   : > { %v8041_v62 = vld [vmem:[%s18650_s3 + $0x3a8] sm:$0xff] }
 0x898   : > { %v8165_v48 = vld [vmem:[%s18650_s3 + $0x788] sm:$0xff] }
 0x89a   : > { %9526 = vmatpush1.bf16.xpose.msra.mxu0 %v12896_v8  ;;  %v13080_v8 = vcombine.low %v8117_v63, %v8121_v55  ;;  %v8169_v63 = vld [vmem:[%s18650_s3 + $0x7a8] sm:$0xff] }
 0x89b   : > { %9527 = vmatprep.subr.bf16.mxu0 %v12905_v43  ;;  %v13089_v43 = vcombine.high %v8125_v25, %v8129_v42 }
 0x89c   : > { %9690 = vmatpush1.bf16.xpose.msra.mxu1 %v13024_v26  ;;  %v12961_v26 = vcombine.high %v7997_v53, %v8001_v6  ;;  %v8049_v53 = vld [vmem:[%s18650_s3 + $0x3e8] sm:$0xff] }
 0x89d   : > { %9691 = vmatprep.subr.bf16.mxu1 %v13033_v12  ;;  %v8005_v12 = vld [vmem:[%s18650_s3 + $0x288] sm:$0xff] }
 0x89e   : > { %v12968_v34 = vcombine.low %v8005_v12, %v8009_v27  ;;  %v8173_v6 = vld [vmem:[%s18650_s3 + $0x7c8] sm:$0xff] }
 0x8a2   : > { %9528 = vmatpush1.bf16.xpose.msra.mxu0 %v12904_v14  ;;  %v13088_v14 = vcombine.low %v8125_v25, %v8129_v42  ;;  %v8177_v25 = vld [vmem:[%s18650_s3 + $0x7e8] sm:$0xff] }
 0x8a3   : > { %9529 = vmatprep.subr.bf16.mxu0 %v12913_v16  ;;  %v13097_v16 = vcombine.high %v8133_v24, %v8137_v13 }
 0x8a4   : > { %9692 = vmatpush1.bf16.xpose.msra.mxu1 %v13032_v15  ;;  %v12969_v15 = vcombine.high %v8005_v12, %v8009_v27  ;;  %v1458_v12 = vsub.s32 5, %v14202_v28 }
 0x8a5   : > { %9693 = vmatprep.subr.bf16.mxu1 %v13041_v18  ;;  %v8013_v18 = vld [vmem:[%s18650_s3 + $0x2c8] sm:$0xff] }
 0x8a6   : > { %v12976_v45 = vcombine.low %v8013_v18, %v8017_v19 }
 0x8aa   : > { %9530 = vmatpush1.bf16.xpose.msra.mxu0 %v12912_v23  ;;  %v13096_v23 = vcombine.low %v8133_v24, %v8137_v13  ;;  %v7926_v24 = vld [vmem:[%s18650_s3 + $0x10] sm:$0xff] }
 0x8ab   : > { %9531 = vmatprep.subr.bf16.mxu0 %v12921_v29  ;;  %v13105_v29 = vcombine.high %v8141_v20, %v8145_v21  ;;  %v7930_v13 = vld [vmem:[%s18650_s3 + $0x30] sm:$0xff] }
 0x8ac   : > { %9694 = vmatpush1.bf16.xpose.msra.mxu1 %v13040_v36  ;;  %v12977_v36 = vcombine.high %v8013_v18, %v8017_v19  ;;  %v13136_v19 = vcombine.low %v8173_v6, %v8177_v25  ;;  %v12891_v20 = vcombine.high %v7926_v24, %v7930_v13 }
 0x8ad   : > { %9695 = vmatprep.subr.bf16.mxu1 %v13049_v30 }
 0x8b2   : > { %9532 = vmatpush1.bf16.xpose.msra.mxu0 %v12920_v41  ;;  %v8149_v41 = vld [vmem:[%s18650_s3 + $0x708] sm:$0xff] }
 0x8b3   : > { %9533 = vmatprep.subr.bf16.mxu0 %v12929_v3 }
 0x8b4   : > { %9696 = vmatpush1.bf16.xpose.msra.mxu1 %v13048_v37  ;;  %v8153_v37 = vld [vmem:[%s18650_s3 + $0x728] sm:$0xff] }
 0x8b5   : > { %9697 = vmatprep.subr.bf16.mxu1 %v13057_v2 }
 0x8ba   : > { %9534 = vmatpush1.bf16.xpose.msra.mxu0 %v12928_v11  ;;  %v12985_v11 = vcombine.high %v8021_v31, %v8025_v39  ;;  %v8062_v31 = vld [vmem:[%s18650_s3 + $0x450] sm:$0xff] }
 0x8bb   : > { %9535 = vmatprep.subr.bf16.mxu0 %v12937_v10  ;;  %v13113_v10 = vcombine.high %v8149_v41, %v8153_v37  ;;  %v8066_v39 = vld [vmem:[%s18650_s3 + $0x470] sm:$0xff] }
 0x8bc   : > { %9698 = vmatpush1.bf16.xpose.msra.mxu1 %v13056_v0 }
 0x8bd   : > { %9699 = vmatprep.subr.bf16.mxu1 %v13065_v54  ;;  %v8029_v54 = vld [vmem:[%s18650_s3 + $0x348] sm:$0xff] }
 0x8be   : > { %v12992_v55 = vcombine.low %v8029_v54, %v8033_v56 }
 0x8c2   : > { %9536 = vmatpush1.bf16.xpose.msra.mxu0 %v12936_v59  ;;  %v13112_v59 = vcombine.low %v8149_v41, %v8153_v37 }
 0x8c3   : > { %9537 = vmatprep.subr.bf16.mxu0 %v12945_v61  ;;  %v13121_v61 = vcombine.high %v8157_v57, %v8161_v9 }
 0x8c4   : > { %9700 = vmatpush1.bf16.xpose.msra.mxu1 %v13064_v60  ;;  %v12993_v60 = vcombine.high %v8029_v54, %v8033_v56 }
 0x8c5   : > { %9701 = vmatprep.subr.bf16.mxu1 %v13073_v44  ;;  %v8037_v44 = vld [vmem:[%s18650_s3 + $0x388] sm:$0xff] }
 0x8c6   : > { %v13000_v42 = vcombine.low %v8037_v44, %v8041_v62 }
 0x8ca   : > { %9538 = vmatpush1.bf16.xpose.msra.mxu0 %v12944_v22  ;;  %v13120_v22 = vcombine.low %v8157_v57, %v8161_v9  ;;  %v7950_v57 = vld [vmem:[%s18650_s3 + $0xd0] sm:$0xff] }
 0x8cb   : > { %9539 = vmatprep.subr.bf16.mxu0 %v12953_v4  ;;  %v13129_v4 = vcombine.high %v8165_v48, %v8169_v63  ;;  %v7954_v9 = vld [vmem:[%s18650_s3 + $0xf0] sm:$0xff] }
 0x8cc   : > { %9702 = vmatpush1.bf16.xpose.msra.mxu1 %v13072_v40  ;;  %v13001_v40 = vcombine.high %v8037_v44, %v8041_v62  ;;  %v12915_v44 = vcombine.high %v7950_v57, %v7954_v9 }
 0x8cd   : > { %9703 = vmatprep.subr.bf16.mxu1 %v13081_v5  ;;  %v8045_v5 = vld [vmem:[%s18650_s3 + $0x3c8] sm:$0xff] }
 0x8d2   : > { %9540 = vmatpush1.bf16.xpose.msra.mxu0 %v12952_v7  ;;  %v17845_v7 = vsub.s32 2, %v14202_v28 }
 0x8d3   : > { %9541 = vmatprep.subr.bf16.mxu0 %v12961_v26  ;;  %v13009_v26 = vcombine.high %v8045_v5, %v8049_v53 }
 0x8d4   : > { %9704 = vmatpush1.bf16.xpose.msra.mxu1 %v13080_v8  ;;  %v13128_v8 = vcombine.low %v8165_v48, %v8169_v63  ;;  %v1447_v27 = vrot.slane %v17433_v38, %v17845_v7  ;;  %v7958_v48 = vld [vmem:[%s18650_s3 + $0x110] sm:$0xff] }
 0x8d5   : > { %9705 = vmatprep.subr.bf16.mxu1 %v13089_v43  ;;  %v13137_v43 = vcombine.high %v8173_v6, %v8177_v25  ;;  %v7962_v63 = vld [vmem:[%s18650_s3 + $0x130] sm:$0xff] }
 0x8d6   : > { %v13407_v18 = vadd.f32 %v16203_v51, %v1447_v27  ;;  %v12890_v51 = vcombine.low %v7926_v24, %v7930_v13  ;;  %v7966_v6 = vld [vmem:[%s18650_s3 + $0x150] sm:$0xff] }
 0x8d7   : > { %v7970_v25 = vld [vmem:[%s18650_s3 + $0x170] sm:$0xff] }
 0x8d8   : > { %v12931_v27 = vcombine.high %v7966_v6, %v7970_v25  ;;  %v7974_v13 = vld [vmem:[%s18650_s3 + $0x190] sm:$0xff] }
 0x8da   : > { %9542 = vmatpush1.bf16.xpose.msra.mxu0 %v12960_v33  ;;  %v1459_v33 = vrot.slane %v17433_v38, %v1458_v12 }
 0x8db   : > { %9543 = vmatprep.subr.bf16.mxu0 %v12969_v15  ;;  %v8058_v15 = vld [vmem:[%s18650_s3 + $0x430] sm:$0xff] }
 0x8dc   : > { %9706 = vmatpush1.bf16.xpose.msra.mxu1 %v13088_v14  ;;  %v8054_v14 = vld [vmem:[%s18650_s3 + $0x410] sm:$0xff] }
 0x8dd   : > { %9707 = vmatprep.subr.bf16.mxu1 %v13097_v16  ;;  %v13008_v16 = vcombine.low %v8045_v5, %v8049_v53  ;;  %v13019_v21 = vcombine.high %v8054_v14, %v8058_v15  ;;  %v13018_v41 = vcombine.low %v8054_v14, %v8058_v15  ;;  %v12923_v5 = vcombine.high %v7958_v48, %v7962_v63  ;;  %v8102_v14 = vld [vmem:[%s18650_s3 + $0x590] sm:$0xff] }
 0x8de   : > { %v8106_v15 = vld [vmem:[%s18650_s3 + $0x5b0] sm:$0xff] }
 0x8e2   : > { %9544 = vmatpush1.bf16.xpose.msra.mxu0 %v12968_v34 }
 0x8e3   : > { %9545 = vmatprep.subr.bf16.mxu0 %v12977_v36  ;;  %v7934_v36 = vld [vmem:[%s18650_s3 + $0x50] sm:$0xff] }
 0x8e4   : > { %9708 = vmatpush1.bf16.xpose.msra.mxu1 %v13096_v23  ;;  %v17788_v30 = vpop.f32.mrb[4].mxu0  ;;  %v7910_v23 = vmax.f32 %v13407_v18, 0.0 }
 0x8e5   : > { %9709 = vmatprep.subr.bf16.mxu1 %v13105_v29  ;;  %v17798_v47 = vpop.f32.mrb[5].mxu0  ;;  %v7938_v29 = vld [vmem:[%s18650_s3 + $0x70] sm:$0xff] }
 0x8e6   : > { %v17796_v32 = vpop.f32.mrb[4].mxu1  ;;  %v7577_v2 = vpop.f32.mrb[6].mxu0  ;;  %v13410_v34 = vadd.f32 %v17798_v47, %v1459_v33  ;;  %v7918_v47 = vpack.c.bf16 %v7910_v23, %v7910_v23  ;;  %v12899_v37 = vcombine.high %v7934_v36, %v7938_v29  ;;  %v7978_v33 = vld [vmem:[%s18650_s3 + $0x1b0] sm:$0xff] }
 0x8e7   : > { %v17806_v3 = vpop.f32.mrb[5].mxu1  ;;  %v7578_v1 = vpop.f32.mrb[7].mxu0  ;;  %v8110_v23 = vld [vmem:[%s18650_s3 + $0x5d0] sm:$0xff] }
 0x8e8   : > { %v7905_v49 = vpop.f32.mrb[6].mxu1  ;;  %v7913_v38 = vmax.f32 %v13410_v34, 0.0  ;;  %v7946_v1 = vld [vmem:[%s18650_s3 + $0xb0] sm:$0xff] }
 0x8e9   : > { %v7906_v0 = vpop.f32.mrb[7].mxu1  ;;  %v7942_v49 = vld [vmem:[%s18650_s3 + $0x90] sm:$0xff] }
 0x8ea   : > { %9546 = vmatpush1.bf16.xpose.msra.mxu0 %v12976_v45  ;;  %v7921_v2 = vpack.c.bf16 %v7913_v38, %v7913_v38  ;;  %v13027_v45 = vcombine.high %v8062_v31, %v8066_v39  ;;  %v12898_v0 = vcombine.low %v7934_v36, %v7938_v29  ;;  %v12907_v54 = vcombine.high %v7942_v49, %v7946_v1  ;;  %v7986_v34 = vld [vmem:[%s18650_s3 + $0x1f0] sm:$0xff] }
 0x8eb   : > { %9547 = vmatprep.subr.bf16.mxu0 %v12985_v11  ;;  %v8074_v11 = vld [vmem:[%s18650_s3 + $0x4b0] sm:$0xff]  ;;  %v12938_v36 = vcombine.low %v7974_v13, %v7978_v33  ;;  %v13066_v29 = vcombine.low %v8102_v14, %v8106_v15 }
 0x8ec   : > { %9710 = vmatpush1.bf16.xpose.msra.mxu1 %v13104_v50  ;;  %v8070_v50 = vld [vmem:[%s18650_s3 + $0x490] sm:$0xff] }
 0x8ed   : > { %9711 = vmatprep.subr.bf16.mxu1 %v13113_v10  ;;  %v13026_v10 = vcombine.low %v8062_v31, %v8066_v39  ;;  %v13035_v56 = vcombine.high %v8070_v50, %v8074_v11  ;;  %v8114_v38 = vld [vmem:[%s18650_s3 + $0x5f0] sm:$0xff] }
 0x8ee   : > { %v13075_v31 = vcombine.high %v8110_v23, %v8114_v38  ;;  %v7990_v39 = vld [vmem:[%s18650_s3 + $0x210] sm:$0xff] }
 0x8f2   : > { %9548 = vmatpush1.bf16.xpose.msra.mxu0 %v12984_v58  ;;  %v8078_v58 = vld [vmem:[%s18650_s3 + $0x4d0] sm:$0xff] }
 0x8f3   : > { %9549 = vmatprep.subr.bf16.mxu0 %v12993_v60  ;;  %v12906_v60 = vcombine.low %v7942_v49, %v7946_v1 }
 0x8f4   : > { %9712 = vmatpush1.bf16.xpose.msra.mxu1 %v13112_v59  ;;  %v8082_v59 = vld [vmem:[%s18650_s3 + $0x4f0] sm:$0xff] }
 0x8f5   : > { %9713 = vmatprep.subr.bf16.mxu1 %v13121_v61  ;;  %v13034_v61 = vcombine.low %v8070_v50, %v8074_v11  ;;  %v13043_v62 = vcombine.high %v8078_v58, %v8082_v59  ;;  %v7998_v50 = vld [vmem:[%s18650_s3 + $0x250] sm:$0xff] }
 0x8f6   : > { %v8002_v11 = vld [vmem:[%s18650_s3 + $0x270] sm:$0xff] }
 0x8fa   : > { %9550 = vmatpush1.bf16.xpose.msra.mxu0 %v12992_v55  ;;  %v8086_v55 = vld [vmem:[%s18650_s3 + $0x510] sm:$0xff] }
 0x8fb   : > { %9551 = vmatprep.subr.bf16.mxu0 %v13001_v40  ;;  %v12914_v40 = vcombine.low %v7950_v57, %v7954_v9  ;;  %v12963_v57 = vcombine.high %v7998_v50, %v8002_v11 }
 0x8fc   : > { %9714 = vmatpush1.bf16.xpose.msra.mxu1 %v13120_v22  ;;  %v8090_v22 = vld [vmem:[%s18650_s3 + $0x530] sm:$0xff] }
 0x8fd   : > { %9715 = vmatprep.subr.bf16.mxu1 %v13129_v4  ;;  %v13042_v4 = vcombine.low %v8078_v58, %v8082_v59  ;;  %v13051_v53 = vcombine.high %v8086_v55, %v8090_v22  ;;  %v8006_v58 = vld [vmem:[%s18650_s3 + $0x290] sm:$0xff] }
 0x8fe   : > { %v8010_v59 = vld [vmem:[%s18650_s3 + $0x2b0] sm:$0xff] }
 0x902   : > { %9552 = vmatpush1.bf16.xpose.msra.mxu0 %v13000_v42  ;;  %v8094_v42 = vld [vmem:[%s18650_s3 + $0x550] sm:$0xff] }
 0x903   : > { %9553 = vmatprep.subr.bf16.mxu0 %v13009_v26  ;;  %v12922_v26 = vcombine.low %v7958_v48, %v7962_v63  ;;  %v12971_v48 = vcombine.high %v8006_v58, %v8010_v59 }
 0x904   : > { %9716 = vmatpush1.bf16.xpose.msra.mxu1 %v13128_v8  ;;  %v8098_v8 = vld [vmem:[%s18650_s3 + $0x570] sm:$0xff] }
 0x905   : > { %9717 = vmatprep.subr.bf16.mxu1 %v13137_v43  ;;  %v13050_v43 = vcombine.low %v8086_v55, %v8090_v22  ;;  %v13059_v24 = vcombine.high %v8094_v42, %v8098_v8  ;;  %v13058_v18 = vcombine.low %v8094_v42, %v8098_v8  ;;  %v8014_v55 = vld [vmem:[%s18650_s3 + $0x2d0] sm:$0xff] }
 0x906   : > { %v8018_v22 = vld [vmem:[%s18650_s3 + $0x2f0] sm:$0xff] }
 0x907   : > { %v8022_v42 = vld [vmem:[%s18650_s3 + $0x310] sm:$0xff] }
 0x908   : > { %v8026_v8 = vld [vmem:[%s18650_s3 + $0x330] sm:$0xff] }
 0x90a   : > { %9554 = vmatpush1.bf16.xpose.msra.mxu0 %v13008_v16  ;;  %v12930_v16 = vcombine.low %v7966_v6, %v7970_v25  ;;  %v12979_v6 = vcombine.high %v8014_v55, %v8018_v22 }
 0x90b   : > { %9564 = vmatprep.subr.bf16.mxu0 %v12891_v20  ;;  %v13067_v20 = vcombine.high %v8102_v14, %v8106_v15  ;;  %v8030_v14 = vld [vmem:[%s18650_s3 + $0x350] sm:$0xff] }
 0x90c   : > { %9718 = vmatpush1.bf16.xpose.msra.mxu1 %v13136_v19  ;;  %v12939_v19 = vcombine.high %v7974_v13, %v7978_v33  ;;  %v12987_v13 = vcombine.high %v8022_v42, %v8026_v8  ;;  %v8034_v15 = vld [vmem:[%s18650_s3 + $0x370] sm:$0xff] }
 0x90d   : > { %9728 = vmatprep.subr.bf16.mxu1 %v13019_v21  ;;  %v7982_v21 = vld [vmem:[%s18650_s3 + $0x1d0] sm:$0xff] }
 0x911   : > { %9556 = vmatmul.mubr.bf16.vlgmr.msra.gmra.mrb[8].mxu0 %v7918_v47 }
 0x912   : > { %9565 = vmatpush1.bf16.xpose.msra.mxu0 %v12890_v51  ;;  %9596 = vmatprep.mubr.bf16.mxu0 %v7921_v2  ;;  %v12947_v51 = vcombine.high %v7982_v21, %v7986_v34 }
 0x913   : > { %9720 = vmatmul.mubr.bf16.vlgmr.msra.gmra.mrb[8].mxu1 %v7918_v47  ;;  %9566 = vmatprep.subr.bf16.mxu0 %v12899_v37  ;;  %v7994_v47 = vld [vmem:[%s18650_s3 + $0x230] sm:$0xff] }
 0x914   : > { %9729 = vmatpush1.bf16.xpose.msra.mxu1 %v13018_v41  ;;  %9760 = vmatprep.mubr.bf16.mxu1 %v7921_v2  ;;  %v8118_v41 = vld [vmem:[%s18650_s3 + $0x610] sm:$0xff]  ;;  %v12946_v2 = vcombine.low %v7982_v21, %v7986_v34  ;;  %v12955_v49 = vcombine.high %v7990_v39, %v7994_v47  ;;  %v12995_v21 = vcombine.high %v8030_v14, %v8034_v15 }
 0x915   : > { %9730 = vmatprep.subr.bf16.mxu1 %v13027_v45  ;;  %v8122_v37 = vld [vmem:[%s18650_s3 + $0x630] sm:$0xff]  ;;  %v13074_v45 = vcombine.low %v8110_v23, %v8114_v38 }
 0x916   : > { %v13083_v1 = vcombine.high %v8118_v41, %v8122_v37  ;;  %v8038_v23 = vld [vmem:[%s18650_s3 + $0x390] sm:$0xff] }
 0x917   : > { %v8042_v38 = vld [vmem:[%s18650_s3 + $0x3b0] sm:$0xff] }
 0x91a   : > { %9567 = vmatpush1.bf16.xpose.msra.mxu0 %v12898_v0  ;;  %v8126_v0 = vld [vmem:[%s18650_s3 + $0x650] sm:$0xff] }
 0x91b   : > { %9568 = vmatprep.subr.bf16.mxu0 %v12907_v54  ;;  %v12954_v54 = vcombine.low %v7990_v39, %v7994_v47  ;;  %v13003_v39 = vcombine.high %v8038_v23, %v8042_v38 }
 0x91c   : > { %9731 = vmatpush1.bf16.xpose.msra.mxu1 %v13026_v10  ;;  %v8130_v10 = vld [vmem:[%s18650_s3 + $0x670] sm:$0xff] }
 0x91d   : > { %9732 = vmatprep.subr.bf16.mxu1 %v13035_v56  ;;  %v13082_v56 = vcombine.low %v8118_v41, %v8122_v37  ;;  %v13091_v9 = vcombine.high %v8126_v0, %v8130_v10  ;;  %v8046_v41 = vld [vmem:[%s18650_s3 + $0x3d0] sm:$0xff] }
 0x91e   : > { %v8050_v37 = vld [vmem:[%s18650_s3 + $0x3f0] sm:$0xff] }
 0x922   : > { %9569 = vmatpush1.bf16.xpose.msra.mxu0 %v12906_v60  ;;  %v8134_v60 = vld [vmem:[%s18650_s3 + $0x690] sm:$0xff] }
 0x923   : > { %9570 = vmatprep.subr.bf16.mxu0 %v12915_v44  ;;  %v12962_v44 = vcombine.low %v7998_v50, %v8002_v11  ;;  %v13011_v11 = vcombine.high %v8046_v41, %v8050_v37 }
 0x924   : > { %9733 = vmatpush1.bf16.xpose.msra.mxu1 %v13034_v61  ;;  %v8138_v61 = vld [vmem:[%s18650_s3 + $0x6b0] sm:$0xff] }
 0x925   : > { %9734 = vmatprep.subr.bf16.mxu1 %v13043_v62  ;;  %v13090_v62 = vcombine.low %v8126_v0, %v8130_v10  ;;  %v13099_v63 = vcombine.high %v8134_v60, %v8138_v61  ;;  %v1466_v10 = vsub.s32 7, %v14202_v28 }
 0x92a   : > { %9571 = vmatpush1.bf16.xpose.msra.mxu0 %v12914_v40  ;;  %v8142_v40 = vld [vmem:[%s18650_s3 + $0x6d0] sm:$0xff] }
 0x92b   : > { %9572 = vmatprep.subr.bf16.mxu0 %v12923_v5  ;;  %v12970_v5 = vcombine.low %v8006_v58, %v8010_v59  ;;  %v8055_v59 = vld [vmem:[%s18650_s3 + $0x418] sm:$0xff] }
 0x92c   : > { %9735 = vmatpush1.bf16.xpose.msra.mxu1 %v13042_v4  ;;  %v8146_v4 = vld [vmem:[%s18650_s3 + $0x6f0] sm:$0xff] }
 0x92d   : > { %9736 = vmatprep.subr.bf16.mxu1 %v13051_v53  ;;  %v13098_v53 = vcombine.low %v8134_v60, %v8138_v61  ;;  %v13107_v25 = vcombine.high %v8142_v40, %v8146_v4  ;;  %v8059_v60 = vld [vmem:[%s18650_s3 + $0x438] sm:$0xff]  ;;  %v13010_v61 = vcombine.low %v8046_v41, %v8050_v37 }
 0x932   : > { %9573 = vmatpush1.bf16.xpose.msra.mxu0 %v12922_v26  ;;  %v8150_v26 = vld [vmem:[%s18650_s3 + $0x710] sm:$0xff] }
 0x933   : > { %9574 = vmatprep.subr.bf16.mxu0 %v12931_v27  ;;  %v12978_v27 = vcombine.low %v8014_v55, %v8018_v22 }
 0x934   : > { %9737 = vmatpush1.bf16.xpose.msra.mxu1 %v13050_v43  ;;  %v8154_v43 = vld [vmem:[%s18650_s3 + $0x730] sm:$0xff] }
 0x935   : > { %9738 = vmatprep.subr.bf16.mxu1 %v13059_v24  ;;  %v13106_v24 = vcombine.low %v8142_v40, %v8146_v4  ;;  %v13115_v33 = vcombine.high %v8150_v26, %v8154_v43  ;;  %v7935_v4 = vld [vmem:[%s18650_s3 + $0x58] sm:$0xff] }
 0x93a   : > { %9575 = vmatpush1.bf16.xpose.msra.mxu0 %v12930_v16  ;;  %v8158_v16 = vld [vmem:[%s18650_s3 + $0x750] sm:$0xff] }
 0x93b   : > { %9576 = vmatprep.subr.bf16.mxu0 %v12939_v19  ;;  %v12986_v19 = vcombine.low %v8022_v42, %v8026_v8 }
 0x93c   : > { %9739 = vmatpush1.bf16.xpose.msra.mxu1 %v13058_v18  ;;  %v8162_v18 = vld [vmem:[%s18650_s3 + $0x770] sm:$0xff] }
 0x93d   : > { %9740 = vmatprep.subr.bf16.mxu1 %v13067_v20  ;;  %v13114_v20 = vcombine.low %v8150_v26, %v8154_v43  ;;  %v13123_v34 = vcombine.high %v8158_v16, %v8162_v18  ;;  %v7943_v43 = vld [vmem:[%s18650_s3 + $0x98] sm:$0xff] }
 0x942   : > { %9577 = vmatpush1.bf16.xpose.msra.mxu0 %v12938_v36  ;;  %v8166_v36 = vld [vmem:[%s18650_s3 + $0x790] sm:$0xff] }
 0x943   : > { %9578 = vmatprep.subr.bf16.mxu0 %v12947_v51  ;;  %v12994_v51 = vcombine.low %v8030_v14, %v8034_v15 }
 0x944   : > { %9741 = vmatpush1.bf16.xpose.msra.mxu1 %v13066_v29  ;;  %v8170_v29 = vld [vmem:[%s18650_s3 + $0x7b0] sm:$0xff] }
 0x945   : > { %9742 = vmatprep.subr.bf16.mxu1 %v13075_v31  ;;  %v13122_v31 = vcombine.low %v8158_v16, %v8162_v18  ;;  %v13131_v47 = vcombine.high %v8166_v36, %v8170_v29  ;;  %v13130_v50 = vcombine.low %v8166_v36, %v8170_v29  ;;  %v7951_v18 = vld [vmem:[%s18650_s3 + $0xd8] sm:$0xff] }
 0x946   : > { %v7959_v29 = vld [vmem:[%s18650_s3 + $0x118] sm:$0xff] }
 0x94a   : > { %9579 = vmatpush1.bf16.xpose.msra.mxu0 %v12946_v2  ;;  %v8174_v2 = vld [vmem:[%s18650_s3 + $0x7d0] sm:$0xff] }
 0x94b   : > { %9580 = vmatprep.subr.bf16.mxu0 %v12955_v49  ;;  %v13002_v49 = vcombine.low %v8038_v23, %v8042_v38 }
 0x94c   : > { %9743 = vmatpush1.bf16.xpose.msra.mxu1 %v13074_v45  ;;  %v8178_v45 = vld [vmem:[%s18650_s3 + $0x7f0] sm:$0xff] }
 0x94d   : > { %9744 = vmatprep.subr.bf16.mxu1 %v13083_v1  ;;  %v1454_v1 = vsub.s32 4, %v14202_v28  ;;  %v13139_v0 = vcombine.high %v8174_v2, %v8178_v45 }
 0x952   : > { %9581 = vmatpush1.bf16.xpose.msra.mxu0 %v12954_v54  ;;  %v18052_v54 = vld [vmem:[%s18649_s2] sm:$0xff] }
 0x953   : > { %9582 = vmatprep.subr.bf16.mxu0 %v12963_v57  ;;  %v7927_v57 = vld [vmem:[%s18650_s3 + $0x18] sm:$0xff]  ;;  %v1467_v58 = vrot.slane %v18052_v54, %v1466_v10 }
 0x954   : > { %9745 = vmatpush1.bf16.xpose.msra.mxu1 %v13082_v56  ;;  %v1455_v56 = vrot.slane %v18052_v54, %v1454_v1 }
 0x955   : > { %9746 = vmatprep.subr.bf16.mxu1 %v13091_v9  ;;  %v7931_v9 = vld [vmem:[%s18650_s3 + $0x38] sm:$0xff]  ;;  %v13412_v55 = vadd.f32 %v17806_v3, %v1467_v58 }
 0x956   : > { %v8063_v3 = vld [vmem:[%s18650_s3 + $0x458] sm:$0xff] }
 0x957   : > { %v7915_v40 = vmax.f32 %v13412_v55, 0.0  ;;  %v7975_v58 = vld [vmem:[%s18650_s3 + $0x198] sm:$0xff] }
 0x958   : > { %v7983_v55 = vld [vmem:[%s18650_s3 + $0x1d8] sm:$0xff] }
 0x959   : > { %v7923_v8 = vpack.c.bf16 %v7915_v40, %v7915_v40  ;;  %v8111_v40 = vld [vmem:[%s18650_s3 + $0x5d8] sm:$0xff] }
 0x95a   : > { %9583 = vmatpush1.bf16.xpose.msra.mxu0 %v12962_v44  ;;  %v13409_v44 = vadd.f32 %v17788_v30, %v1455_v56  ;;  %v7939_v30 = vld [vmem:[%s18650_s3 + $0x78] sm:$0xff] }
 0x95b   : > { %9584 = vmatprep.subr.bf16.mxu0 %v12971_v48  ;;  %v12893_v48 = vcombine.high %v7927_v57, %v7931_v9  ;;  %v12901_v42 = vcombine.high %v7935_v4, %v7939_v30 }
 0x95c   : > { %9747 = vmatpush1.bf16.xpose.msra.mxu1 %v13090_v62  ;;  %v13138_v62 = vcombine.low %v8174_v2, %v8178_v45  ;;  %v7912_v22 = vmax.f32 %v13409_v44, 0.0  ;;  %v7967_v45 = vld [vmem:[%s18650_s3 + $0x158] sm:$0xff] }
 0x95d   : > { %9748 = vmatprep.subr.bf16.mxu1 %v13099_v63  ;;  %v13021_v63 = vcombine.high %v8055_v59, %v8059_v60 }
 0x962   : > { %9585 = vmatpush1.bf16.xpose.msra.mxu0 %v12970_v5  ;;  %v12892_v5 = vcombine.low %v7927_v57, %v7931_v9 }
 0x963   : > { %9586 = vmatprep.subr.bf16.mxu0 %v12979_v6  ;;  %v7920_v6 = vpack.c.bf16 %v7912_v22, %v7912_v22  ;;  %v7987_v22 = vld [vmem:[%s18650_s3 + $0x1f8] sm:$0xff] }
 0x964   : > { %9749 = vmatpush1.bf16.xpose.msra.mxu1 %v13098_v53  ;;  %v8067_v53 = vld [vmem:[%s18650_s3 + $0x478] sm:$0xff] }
 0x965   : > { %9750 = vmatprep.subr.bf16.mxu1 %v13107_v25  ;;  %v13020_v25 = vcombine.low %v8055_v59, %v8059_v60  ;;  %v13029_v26 = vcombine.high %v8063_v3, %v8067_v53  ;;  %v13028_v14 = vcombine.low %v8063_v3, %v8067_v53  ;;  %v7979_v59 = vld [vmem:[%s18650_s3 + $0x1b8] sm:$0xff]  ;;  %v12949_v3 = vcombine.high %v7983_v55, %v7987_v22 }
 0x966   : > { %v8103_v60 = vld [vmem:[%s18650_s3 + $0x598] sm:$0xff] }
 0x96a   : > { %9587 = vmatpush1.bf16.xpose.msra.mxu0 %v12978_v27  ;;  %v7947_v27 = vld [vmem:[%s18650_s3 + $0xb8] sm:$0xff] }
 0x96b   : > { %9588 = vmatprep.subr.bf16.mxu0 %v12987_v13  ;;  %v8075_v13 = vld [vmem:[%s18650_s3 + $0x4b8] sm:$0xff]  ;;  %v12909_v15 = vcombine.high %v7943_v43, %v7947_v27 }
 0x96c   : > { %9751 = vmatpush1.bf16.xpose.msra.mxu1 %v13106_v24  ;;  %v8071_v24 = vld [vmem:[%s18650_s3 + $0x498] sm:$0xff] }
 0x96d   : > { %9752 = vmatprep.subr.bf16.mxu1 %v13115_v33  ;;  %v12900_v33 = vcombine.low %v7935_v4, %v7939_v30  ;;  %v13037_v16 = vcombine.high %v8071_v24, %v8075_v13  ;;  %v13036_v23 = vcombine.low %v8071_v24, %v8075_v13  ;;  %v8115_v4 = vld [vmem:[%s18650_s3 + $0x5f8] sm:$0xff]  ;;  %v12940_v30 = vcombine.low %v7975_v58, %v7979_v59 }
 0x96e   : > { %v13077_v53 = vcombine.high %v8111_v40, %v8115_v4  ;;  %v7999_v13 = vld [vmem:[%s18650_s3 + $0x258] sm:$0xff] }
 0x972   : > { %9589 = vmatpush1.bf16.xpose.msra.mxu0 %v12986_v19  ;;  %v7955_v19 = vld [vmem:[%s18650_s3 + $0xf8] sm:$0xff] }
 0x973   : > { %9590 = vmatprep.subr.bf16.mxu0 %v12995_v21  ;;  %v8083_v21 = vld [vmem:[%s18650_s3 + $0x4f8] sm:$0xff]  ;;  %v12917_v38 = vcombine.high %v7951_v18, %v7955_v19 }
 0x974   : > { %9753 = vmatpush1.bf16.xpose.msra.mxu1 %v13114_v20  ;;  %v8079_v20 = vld [vmem:[%s18650_s3 + $0x4d8] sm:$0xff] }
 0x975   : > { %9754 = vmatprep.subr.bf16.mxu1 %v13123_v34  ;;  %v12908_v34 = vcombine.low %v7943_v43, %v7947_v27  ;;  %v13045_v36 = vcombine.high %v8079_v20, %v8083_v21  ;;  %v13044_v41 = vcombine.low %v8079_v20, %v8083_v21  ;;  %v13076_v43 = vcombine.low %v8111_v40, %v8115_v4  ;;  %v8007_v21 = vld [vmem:[%s18650_s3 + $0x298] sm:$0xff] }
 0x976   : > { %v8039_v4 = vld [vmem:[%s18650_s3 + $0x398] sm:$0xff] }
 0x97a   : > { %9591 = vmatpush1.bf16.xpose.msra.mxu0 %v12994_v51  ;;  %v7963_v51 = vld [vmem:[%s18650_s3 + $0x138] sm:$0xff] }
 0x97b   : > { %9592 = vmatprep.subr.bf16.mxu0 %v13003_v39  ;;  %v8091_v39 = vld [vmem:[%s18650_s3 + $0x538] sm:$0xff]  ;;  %v12925_v37 = vcombine.high %v7959_v29, %v7963_v51 }
 0x97c   : > { %9755 = vmatpush1.bf16.xpose.msra.mxu1 %v13122_v31  ;;  %v8087_v31 = vld [vmem:[%s18650_s3 + $0x518] sm:$0xff] }
 0x97d   : > { %9756 = vmatprep.subr.bf16.mxu1 %v13131_v47  ;;  %v12916_v47 = vcombine.low %v7951_v18, %v7955_v19  ;;  %v13053_v2 = vcombine.high %v8087_v31, %v8091_v39  ;;  %v13052_v56 = vcombine.low %v8087_v31, %v8091_v39  ;;  %v8015_v39 = vld [vmem:[%s18650_s3 + $0x2d8] sm:$0xff] }
 0x982   : > { %9593 = vmatpush1.bf16.xpose.msra.mxu0 %v13002_v49  ;;  %v7971_v49 = vld [vmem:[%s18650_s3 + $0x178] sm:$0xff] }
 0x983   : > { %9594 = vmatprep.subr.bf16.mxu0 %v13011_v11  ;;  %v8099_v11 = vld [vmem:[%s18650_s3 + $0x578] sm:$0xff]  ;;  %v12933_v57 = vcombine.high %v7967_v45, %v7971_v49  ;;  %v12932_v44 = vcombine.low %v7967_v45, %v7971_v49 }
 0x984   : > { %9757 = vmatpush1.bf16.xpose.msra.mxu1 %v13130_v50  ;;  %v8095_v50 = vld [vmem:[%s18650_s3 + $0x558] sm:$0xff] }
 0x985   : > { %9758 = vmatprep.subr.bf16.mxu1 %v13139_v0  ;;  %v12924_v0 = vcombine.low %v7959_v29, %v7963_v51  ;;  %v13061_v9 = vcombine.high %v8095_v50, %v8099_v11 }
 0x98a   : > { %9595 = vmatpush1.bf16.xpose.msra.mxu0 %v13010_v61  ;;  %v8107_v61 = vld [vmem:[%s18650_s3 + $0x5b8] sm:$0xff] }
 0x98b   : > { %9605 = vmatprep.subr.bf16.mxu0 %v12893_v48  ;;  %v12941_v48 = vcombine.high %v7975_v58, %v7979_v59 }
 0x98c   : > { %9759 = vmatpush1.bf16.xpose.msra.mxu1 %v13138_v62  ;;  %v13060_v62 = vcombine.low %v8095_v50, %v8099_v11  ;;  %v8023_v11 = vld [vmem:[%s18650_s3 + $0x318] sm:$0xff] }
 0x98d   : > { %9769 = vmatprep.subr.bf16.mxu1 %v13021_v63  ;;  %v13069_v63 = vcombine.high %v8103_v60, %v8107_v61 }
 0x991   : > { %9597 = vmatmul.mubr.bf16.vlgmr.msra.gmra.mrb[8].mxu0 %v7920_v6 }
 0x992   : > { %9606 = vmatpush1.bf16.xpose.msra.mxu0 %v12892_v5  ;;  %9637 = vmatprep.mubr.bf16.mxu0 %v7923_v8  ;;  %v13068_v5 = vcombine.low %v8103_v60, %v8107_v61  ;;  %v8031_v61 = vld [vmem:[%s18650_s3 + $0x358] sm:$0xff] }
 0x993   : > { %9761 = vmatmul.mubr.bf16.vlgmr.msra.gmra.mrb[8].mxu1 %v7920_v6  ;;  %9607 = vmatprep.subr.bf16.mxu0 %v12901_v42  ;;  %v7991_v6 = vld [vmem:[%s18650_s3 + $0x218] sm:$0xff] }
 0x994   : > { %9770 = vmatpush1.bf16.xpose.msra.mxu1 %v13020_v25  ;;  %9801 = vmatprep.mubr.bf16.mxu1 %v7923_v8  ;;  %v7995_v25 = vld [vmem:[%s18650_s3 + $0x238] sm:$0xff] }
 0x995   : > { %9771 = vmatprep.subr.bf16.mxu1 %v13029_v26  ;;  %v8119_v42 = vld [vmem:[%s18650_s3 + $0x618] sm:$0xff]  ;;  %v12948_v26 = vcombine.low %v7983_v55, %v7987_v22  ;;  %v12957_v27 = vcombine.high %v7991_v6, %v7995_v25 }
 0x996   : > { %v8123_v8 = vld [vmem:[%s18650_s3 + $0x638] sm:$0xff] }
 0x997   : > { %v13085_v24 = vcombine.high %v8119_v42, %v8123_v8  ;;  %v13084_v18 = vcombine.low %v8119_v42, %v8123_v8  ;;  %v8047_v8 = vld [vmem:[%s18650_s3 + $0x3d8] sm:$0xff] }
 0x99a   : > { %9608 = vmatpush1.bf16.xpose.msra.mxu0 %v12900_v33  ;;  %v8003_v33 = vld [vmem:[%s18650_s3 + $0x278] sm:$0xff] }
 0x99b   : > { %9609 = vmatprep.subr.bf16.mxu0 %v12909_v15  ;;  %v8131_v15 = vld [vmem:[%s18650_s3 + $0x678] sm:$0xff]  ;;  %v12965_v19 = vcombine.high %v7999_v13, %v8003_v33 }
 0x99c   : > { %9772 = vmatpush1.bf16.xpose.msra.mxu1 %v13028_v14  ;;  %v8127_v14 = vld [vmem:[%s18650_s3 + $0x658] sm:$0xff] }
 0x99d   : > { %9773 = vmatprep.subr.bf16.mxu1 %v13037_v16  ;;  %v12956_v16 = vcombine.low %v7991_v6, %v7995_v25  ;;  %v13093_v20 = vcombine.high %v8127_v14, %v8131_v15  ;;  %v13092_v29 = vcombine.low %v8127_v14, %v8131_v15 }
 0x9a2   : > { %9610 = vmatpush1.bf16.xpose.msra.mxu0 %v12908_v34  ;;  %v8011_v34 = vld [vmem:[%s18650_s3 + $0x2b8] sm:$0xff] }
 0x9a3   : > { %9611 = vmatprep.subr.bf16.mxu0 %v12917_v38  ;;  %v8139_v38 = vld [vmem:[%s18650_s3 + $0x6b8] sm:$0xff]  ;;  %v12973_v51 = vcombine.high %v8007_v21, %v8011_v34 }
 0x9a4   : > { %9774 = vmatpush1.bf16.xpose.msra.mxu1 %v13036_v23  ;;  %v8135_v23 = vld [vmem:[%s18650_s3 + $0x698] sm:$0xff] }
 0x9a5   : > { %9775 = vmatprep.subr.bf16.mxu1 %v13045_v36  ;;  %v12964_v36 = vcombine.low %v7999_v13, %v8003_v33  ;;  %v13101_v31 = vcombine.high %v8135_v23, %v8139_v38  ;;  %v13100_v45 = vcombine.low %v8135_v23, %v8139_v38  ;;  %v1462_v13 = vsub.s32 6, %v14202_v28 }
 0x9aa   : > { %9612 = vmatpush1.bf16.xpose.msra.mxu0 %v12916_v47  ;;  %v8019_v47 = vld [vmem:[%s18650_s3 + $0x2f8] sm:$0xff] }
 0x9ab   : > { %9613 = vmatprep.subr.bf16.mxu0 %v12925_v37  ;;  %v8147_v37 = vld [vmem:[%s18650_s3 + $0x6f8] sm:$0xff]  ;;  %v12981_v49 = vcombine.high %v8015_v39, %v8019_v47 }
 0x9ac   : > { %9776 = vmatpush1.bf16.xpose.msra.mxu1 %v13044_v41  ;;  %v8143_v41 = vld [vmem:[%s18650_s3 + $0x6d8] sm:$0xff] }
 0x9ad   : > { %9777 = vmatprep.subr.bf16.mxu1 %v13053_v2  ;;  %v12972_v2 = vcombine.low %v8007_v21, %v8011_v34  ;;  %v13109_v50 = vcombine.high %v8143_v41, %v8147_v37  ;;  %v13108_v58 = vcombine.low %v8143_v41, %v8147_v37  ;;  %v13623_v21 = vld [vmem:[%s18102_s21 + $0x4] ss:$16 sps:$4 sm:$0xff]   ;;  %v13633_v41 = vld [vmem:[%s18102_s21 + $0x40] ss:$16 sps:$4 sm:$0xff]  }
 0x9ae   : > { %v13626_v34 = vld [vmem:[%s18102_s21 + $0x204] ss:$16 sps:$4 sm:$0xff]   ;;  %v13636_v37 = vld [vmem:[%s18102_s21 + $0x240] ss:$16 sps:$4 sm:$0xff]  }
 0x9b2   : > { %9614 = vmatpush1.bf16.xpose.msra.mxu0 %v12924_v0  ;;  %v8027_v0 = vld [vmem:[%s18650_s3 + $0x338] sm:$0xff] }
 0x9b3   : > { %9615 = vmatprep.subr.bf16.mxu0 %v12933_v57  ;;  %v8155_v57 = vld [vmem:[%s18650_s3 + $0x738] sm:$0xff]  ;;  %v12989_v59 = vcombine.high %v8023_v11, %v8027_v0 }
 0x9b4   : > { %9778 = vmatpush1.bf16.xpose.msra.mxu1 %v13052_v56  ;;  %v8151_v56 = vld [vmem:[%s18650_s3 + $0x718] sm:$0xff] }
 0x9b5   : > { %9779 = vmatprep.subr.bf16.mxu1 %v13061_v9  ;;  %v12980_v9 = vcombine.low %v8015_v39, %v8019_v47  ;;  %v13117_v60 = vcombine.high %v8151_v56, %v8155_v57  ;;  %v13116_v55 = vcombine.low %v8151_v56, %v8155_v57  ;;  %v13635_v39 = vld [vmem:[%s18102_s21 + $0x44] ss:$16 sps:$4 sm:$0xff]   ;;  %v13645_v56 = vld [vmem:[%s18102_s21 + $0x80] ss:$16 sps:$4 sm:$0xff]  }
 0x9b6   : > { %v13638_v47 = vld [vmem:[%s18102_s21 + $0x244] ss:$16 sps:$4 sm:$0xff]   ;;  %v13648_v57 = vld [vmem:[%s18102_s21 + $0x280] ss:$16 sps:$4 sm:$0xff]  }
 0x9ba   : > { %9616 = vmatpush1.bf16.xpose.msra.mxu0 %v12932_v44  ;;  %v8035_v44 = vld [vmem:[%s18650_s3 + $0x378] sm:$0xff] }
 0x9bb   : > { %9617 = vmatprep.subr.bf16.mxu0 %v12941_v48  ;;  %v8163_v48 = vld [vmem:[%s18650_s3 + $0x778] sm:$0xff]  ;;  %v12997_v22 = vcombine.high %v8031_v61, %v8035_v44 }
 0x9bc   : > { %9780 = vmatpush1.bf16.xpose.msra.mxu1 %v13060_v62  ;;  %v8159_v62 = vld [vmem:[%s18650_s3 + $0x758] sm:$0xff] }
 0x9bd   : > { %9781 = vmatprep.subr.bf16.mxu1 %v13069_v63  ;;  %v12988_v63 = vcombine.low %v8023_v11, %v8027_v0  ;;  %v13125_v40 = vcombine.high %v8159_v62, %v8163_v48  ;;  %v13124_v6 = vcombine.low %v8159_v62, %v8163_v48  ;;  %v13647_v11 = vld [vmem:[%s18102_s21 + $0x84] ss:$16 sps:$4 sm:$0xff]   ;;  %v13657_v62 = vld [vmem:[%s18102_s21 + $0xc0] ss:$16 sps:$4 sm:$0xff]  }
 0x9be   : > { %v13650_v0 = vld [vmem:[%s18102_s21 + $0x284] ss:$16 sps:$4 sm:$0xff]   ;;  %v13660_v48 = vld [vmem:[%s18102_s21 + $0x2c0] ss:$16 sps:$4 sm:$0xff]  }
 0x9c2   : > { %9618 = vmatpush1.bf16.xpose.msra.mxu0 %v12940_v30  ;;  %v8043_v30 = vld [vmem:[%s18650_s3 + $0x3b8] sm:$0xff] }
 0x9c3   : > { %9619 = vmatprep.subr.bf16.mxu0 %v12949_v3  ;;  %v8171_v3 = vld [vmem:[%s18650_s3 + $0x7b8] sm:$0xff]  ;;  %v13005_v25 = vcombine.high %v8039_v4, %v8043_v30 }
 0x9c4   : > { %9782 = vmatpush1.bf16.xpose.msra.mxu1 %v13068_v5  ;;  %v8167_v5 = vld [vmem:[%s18650_s3 + $0x798] sm:$0xff] }
 0x9c5   : > { %9783 = vmatprep.subr.bf16.mxu1 %v13077_v53  ;;  %v12996_v53 = vcombine.low %v8031_v61, %v8035_v44  ;;  %v13133_v42 = vcombine.high %v8167_v5, %v8171_v3  ;;  %v13132_v33 = vcombine.low %v8167_v5, %v8171_v3  ;;  %v13659_v61 = vld [vmem:[%s18102_s21 + $0xc4] ss:$16 sps:$4 sm:$0xff]   ;;  %v13669_v5 = vld [vmem:[%s18102_s21 + $0x100] ss:$16 sps:$4 sm:$0xff]  }
 0x9c6   : > { %v13662_v44 = vld [vmem:[%s18102_s21 + $0x2c4] ss:$16 sps:$4 sm:$0xff]   ;;  %v13672_v3 = vld [vmem:[%s18102_s21 + $0x300] ss:$16 sps:$4 sm:$0xff]  }
 0x9ca   : > { %9620 = vmatpush1.bf16.xpose.msra.mxu0 %v12948_v26  ;;  %v8051_v26 = vld [vmem:[%s18650_s3 + $0x3f8] sm:$0xff] }
 0x9cb   : > { %9621 = vmatprep.subr.bf16.mxu0 %v12957_v27  ;;  %v8179_v27 = vld [vmem:[%s18650_s3 + $0x7f8] sm:$0xff]  ;;  %v13013_v14 = vcombine.high %v8047_v8, %v8051_v26 }
 0x9cc   : > { %9784 = vmatpush1.bf16.xpose.msra.mxu1 %v13076_v43  ;;  %v8175_v43 = vld [vmem:[%s18650_s3 + $0x7d8] sm:$0xff] }
 0x9cd   : > { %9785 = vmatprep.subr.bf16.mxu1 %v13085_v24  ;;  %v13004_v24 = vcombine.low %v8039_v4, %v8043_v30  ;;  %v13141_v15 = vcombine.high %v8175_v43, %v8179_v27  ;;  %v13671_v4 = vld [vmem:[%s18102_s21 + $0x104] ss:$16 sps:$4 sm:$0xff]  }
 0x9ce   : > { %v13674_v30 = vld [vmem:[%s18102_s21 + $0x304] ss:$16 sps:$4 sm:$0xff]  }
 0x9d2   : > { %9622 = vmatpush1.bf16.xpose.msra.mxu0 %v12956_v16  ;;  %v1463_v16 = vrot.slane %v18052_v54, %v1462_v13  ;;  %v13621_v54 = vld [vmem:[%s18102_s21] ss:$16 sps:$4 sm:$0xff]  }
 0x9d3   : > { %9623 = vmatprep.subr.bf16.mxu0 %v12965_v19 }
 0x9d4   : > { %9786 = vmatpush1.bf16.xpose.msra.mxu1 %v13084_v18  ;;  %v13012_v18 = vcombine.low %v8047_v8, %v8051_v26  ;;  %v13411_v19 = vadd.f32 %v17796_v32, %v1463_v16  ;;  %v13627_v32 = vld [vmem:[%s18102_s21 + $0x20] ss:$16 sps:$4 sm:$0xff]   ;;  %v13683_v8 = vld [vmem:[%s18102_s21 + $0x144] ss:$16 sps:$4 sm:$0xff]  }
 0x9d5   : > { %9787 = vmatprep.subr.bf16.mxu1 %v13093_v20  ;;  %v13140_v20 = vcombine.low %v8175_v43, %v8179_v27  ;;  %v13686_v26 = vld [vmem:[%s18102_s21 + $0x344] ss:$16 sps:$4 sm:$0xff]   ;;  %v13681_v43 = vld [vmem:[%s18102_s21 + $0x140] ss:$16 sps:$4 sm:$0xff]  }
 0x9d6   : > { %v7914_v23 = vmax.f32 %v13411_v19, 0.0  ;;  %v13684_v27 = vld [vmem:[%s18102_s21 + $0x340] ss:$16 sps:$4 sm:$0xff]   ;;  %v13695_v16 = vld [vmem:[%s18102_s21 + $0x184] ss:$16 sps:$4 sm:$0xff]  }
 0x9d7   : > { %v13693_v19 = vld [vmem:[%s18102_s21 + $0x180] ss:$16 sps:$4 sm:$0xff]  }
 0x9d8   : > { %v7922_v38 = vpack.c.bf16 %v7914_v23, %v7914_v23  ;;  %v13699_v23 = vld [vmem:[%s18102_s21 + $0x1a0] ss:$16 sps:$4 sm:$0xff]  }
 0x9da   : > { %9624 = vmatpush1.bf16.xpose.msra.mxu0 %v12964_v36  ;;  %v13624_v36 = vld [vmem:[%s18102_s21 + $0x200] ss:$16 sps:$4 sm:$0xff]  }
 0x9db   : > { %9625 = vmatprep.subr.bf16.mxu0 %v12973_v51  ;;  %v13632_v51 = vld [vmem:[%s18102_s21 + $0x224] ss:$16 sps:$4 sm:$0xff]  }
 0x9dc   : > { %9788 = vmatpush1.bf16.xpose.msra.mxu1 %v13092_v29  ;;  %v13629_v29 = vld [vmem:[%s18102_s21 + $0x24] ss:$16 sps:$4 sm:$0xff]  }
 0x9dd   : > { %9789 = vmatprep.subr.bf16.mxu1 %v13101_v31  ;;  %v13630_v31 = vld [vmem:[%s18102_s21 + $0x220] ss:$16 sps:$4 sm:$0xff]  }
 0x9e2   : > { %9626 = vmatpush1.bf16.xpose.msra.mxu0 %v12972_v2  ;;  %v13641_v2 = vld [vmem:[%s18102_s21 + $0x64] ss:$16 sps:$4 sm:$0xff]  }
 0x9e3   : > { %9627 = vmatprep.subr.bf16.mxu0 %v12981_v49  ;;  %v13639_v49 = vld [vmem:[%s18102_s21 + $0x60] ss:$16 sps:$4 sm:$0xff]  }
 0x9e4   : > { %9790 = vmatpush1.bf16.xpose.msra.mxu1 %v13100_v45  ;;  %v13644_v45 = vld [vmem:[%s18102_s21 + $0x264] ss:$16 sps:$4 sm:$0xff]  }
 0x9e5   : > { %9791 = vmatprep.subr.bf16.mxu1 %v13109_v50  ;;  %v13642_v50 = vld [vmem:[%s18102_s21 + $0x260] ss:$16 sps:$4 sm:$0xff]  }
 0x9ea   : > { %9628 = vmatpush1.bf16.xpose.msra.mxu0 %v12980_v9  ;;  %v13653_v9 = vld [vmem:[%s18102_s21 + $0xa4] ss:$16 sps:$4 sm:$0xff]  }
 0x9eb   : > { %9629 = vmatprep.subr.bf16.mxu0 %v12989_v59  ;;  %v13651_v59 = vld [vmem:[%s18102_s21 + $0xa0] ss:$16 sps:$4 sm:$0xff]  }
 0x9ec   : > { %9792 = vmatpush1.bf16.xpose.msra.mxu1 %v13108_v58  ;;  %v13656_v58 = vld [vmem:[%s18102_s21 + $0x2a4] ss:$16 sps:$4 sm:$0xff]  }
 0x9ed   : > { %9793 = vmatprep.subr.bf16.mxu1 %v13117_v60  ;;  %v13654_v60 = vld [vmem:[%s18102_s21 + $0x2a0] ss:$16 sps:$4 sm:$0xff]  }
 0x9f2   : > { %9630 = vmatpush1.bf16.xpose.msra.mxu0 %v12988_v63  ;;  %v13665_v63 = vld [vmem:[%s18102_s21 + $0xe4] ss:$16 sps:$4 sm:$0xff]  }
 0x9f3   : > { %9631 = vmatprep.subr.bf16.mxu0 %v12997_v22  ;;  %v13663_v22 = vld [vmem:[%s18102_s21 + $0xe0] ss:$16 sps:$4 sm:$0xff]  }
 0x9f4   : > { %9794 = vmatpush1.bf16.xpose.msra.mxu1 %v13116_v55  ;;  %v13668_v55 = vld [vmem:[%s18102_s21 + $0x2e4] ss:$16 sps:$4 sm:$0xff]  }
 0x9f5   : > { %9795 = vmatprep.subr.bf16.mxu1 %v13125_v40  ;;  %v13666_v40 = vld [vmem:[%s18102_s21 + $0x2e0] ss:$16 sps:$4 sm:$0xff]  }
 0x9fa   : > { %9632 = vmatpush1.bf16.xpose.msra.mxu0 %v12996_v53  ;;  %v13677_v53 = vld [vmem:[%s18102_s21 + $0x124] ss:$16 sps:$4 sm:$0xff]  }
 0x9fb   : > { %9633 = vmatprep.subr.bf16.mxu0 %v13005_v25  ;;  %v13675_v25 = vld [vmem:[%s18102_s21 + $0x120] ss:$16 sps:$4 sm:$0xff]  }
 0x9fc   : > { %9796 = vmatpush1.bf16.xpose.msra.mxu1 %v13124_v6  ;;  %v13680_v6 = vld [vmem:[%s18102_s21 + $0x324] ss:$16 sps:$4 sm:$0xff]  }
 0x9fd   : > { %9797 = vmatprep.subr.bf16.mxu1 %v13133_v42  ;;  %v13678_v42 = vld [vmem:[%s18102_s21 + $0x320] ss:$16 sps:$4 sm:$0xff]  }
 0xa02   : > { %9634 = vmatpush1.bf16.xpose.msra.mxu0 %v13004_v24  ;;  %v13689_v24 = vld [vmem:[%s18102_s21 + $0x164] ss:$16 sps:$4 sm:$0xff]  }
 0xa03   : > { %9635 = vmatprep.subr.bf16.mxu0 %v13013_v14  ;;  %v13687_v14 = vld [vmem:[%s18102_s21 + $0x160] ss:$16 sps:$4 sm:$0xff]  }
 0xa04   : > { %9798 = vmatpush1.bf16.xpose.msra.mxu1 %v13132_v33  ;;  %v13692_v33 = vld [vmem:[%s18102_s21 + $0x364] ss:$16 sps:$4 sm:$0xff]  }
 0xa05   : > { %9799 = vmatprep.subr.bf16.mxu1 %v13141_v15  ;;  %v13690_v15 = vld [vmem:[%s18102_s21 + $0x360] ss:$16 sps:$4 sm:$0xff]  }
 0xa0a   : > { %9636 = vmatpush1.bf16.xpose.msra.mxu0 %v13012_v18  ;;  %v13698_v18 = vld [vmem:[%s18102_s21 + $0x384] ss:$16 sps:$4 sm:$0xff]  }
 0xa0b   : > { %11396 = vmatprep.subr.bf16.mxu0 %v13623_v21  ;;  %v13701_v21 = vld [vmem:[%s18102_s21 + $0x1a4] ss:$16 sps:$4 sm:$0xff]  }
 0xa0c   : > { %9800 = vmatpush1.bf16.xpose.msra.mxu1 %v13140_v20  ;;  %v13696_v20 = vld [vmem:[%s18102_s21 + $0x380] ss:$16 sps:$4 sm:$0xff]  }
 0xa0d   : > { %11478 = vmatprep.subr.bf16.mxu1 %v13626_v34  ;;  %v13704_v34 = vld [vmem:[%s18102_s21 + $0x3a4] ss:$16 sps:$4 sm:$0xff]  }
 0xa11   : > { %9638 = vmatmul.mubr.bf16.vlgmr.msra.gmra.mrb[8].mxu0 %v7922_v38 }
 0xa12   : > { %11397 = vmatpush1.bf16.xpose.msra.mxu0 %v13621_v54  ;;  %v13702_v54 = vld [vmem:[%s18102_s21 + $0x3a0] ss:$16 sps:$4 sm:$0xff]  }
 0xa13   : > { %9802 = vmatmul.mubr.bf16.vlgmr.msra.gmra.mrb[8].mxu1 %v7922_v38  ;;  %11398 = vmatprep.subr.bf16.mxu0 %v13629_v29  ;;  %v13707_v38 = vld [vmem:[%s18102_s21 + $0x1c4] ss:$16 sps:$4 sm:$0xff]   ;;  %v13705_v29 = vld [vmem:[%s18102_s21 + $0x1c0] ss:$16 sps:$4 sm:$0xff]  }
 0xa14   : > { %11479 = vmatpush1.bf16.xpose.msra.mxu1 %v13624_v36  ;;  %v13710_v36 = vld [vmem:[%s18102_s21 + $0x3c4] ss:$16 sps:$4 sm:$0xff]  }
 0xa15   : > { %11480 = vmatprep.subr.bf16.mxu1 %v13632_v51  ;;  %v13708_v51 = vld [vmem:[%s18102_s21 + $0x3c0] ss:$16 sps:$4 sm:$0xff]  }
 0xa1a   : > { %11399 = vmatpush1.bf16.xpose.msra.mxu0 %v13627_v32  ;;  %v13713_v32 = vld [vmem:[%s18102_s21 + $0x1e4] ss:$16 sps:$4 sm:$0xff]  }
 0xa1b   : > { %11400 = vmatprep.subr.bf16.mxu0 %v13635_v39  ;;  %v13711_v39 = vld [vmem:[%s18102_s21 + $0x1e0] ss:$16 sps:$4 sm:$0xff]  }
 0xa1c   : > { %11481 = vmatpush1.bf16.xpose.msra.mxu1 %v13630_v31  ;;  %v13716_v31 = vld [vmem:[%s18102_s21 + $0x3e4] ss:$16 sps:$4 sm:$0xff]  }
 0xa1d   : > { %11482 = vmatprep.subr.bf16.mxu1 %v13638_v47  ;;  %v13714_v47 = vld [vmem:[%s18102_s21 + $0x3e0] ss:$16 sps:$4 sm:$0xff]  }
 0xa22   : > { %11401 = vmatpush1.bf16.xpose.msra.mxu0 %v13633_v41  ;;  %v13719_v41 = vld [vmem:[%s18102_s21 + $0xc] ss:$16 sps:$4 sm:$0xff]  }
 0xa23   : > { %11402 = vmatprep.subr.bf16.mxu0 %v13641_v2  ;;  %v18334_v2 = vld [vmem:[%s18651_s4] sm:$0xf] }
 0xa24   : > { %11483 = vmatpush1.bf16.xpose.msra.mxu1 %v13636_v37  ;;  %v13722_v37 = vld [vmem:[%s18102_s21 + $0x20c] ss:$16 sps:$4 sm:$0xff]  }
 0xa25   : > { %11484 = vmatprep.subr.bf16.mxu1 %v13644_v45  ;;  %v8185_v45 = vrot.slane %v18334_v2, %v17633_v52 }
 0xa2a   : > { %11403 = vmatpush1.bf16.xpose.msra.mxu0 %v13639_v49  ;;  %v8189_v49 = vrot.slane %v18334_v2, %v17428_v17 }
 0xa2b   : > { %11404 = vmatprep.subr.bf16.mxu0 %v13647_v11 }
 0xa2c   : > { %11485 = vmatpush1.bf16.xpose.msra.mxu1 %v13642_v50  ;;  %v8197_v50 = vrot.slane %v18334_v2, %v17636_v46 }
 0xa2d   : > { %11486 = vmatprep.subr.bf16.mxu1 %v13650_v0 }
 0xa32   : > { %11405 = vmatpush1.bf16.xpose.msra.mxu0 %v13645_v56 }
 0xa33   : > { %11406 = vmatprep.subr.bf16.mxu0 %v13653_v9 }
 0xa34   : > { %11487 = vmatpush1.bf16.xpose.msra.mxu1 %v13648_v57 }
 0xa35   : > { %11488 = vmatprep.subr.bf16.mxu1 %v13656_v58 }
 0xa3a   : > { %11407 = vmatpush1.bf16.xpose.msra.mxu0 %v13651_v59 }
 0xa3b   : > { %11408 = vmatprep.subr.bf16.mxu0 %v13659_v61 }
 0xa3c   : > { %11489 = vmatpush1.bf16.xpose.msra.mxu1 %v13654_v60 }
 0xa3d   : > { %11490 = vmatprep.subr.bf16.mxu1 %v13662_v44 }
 0xa42   : > { %11409 = vmatpush1.bf16.xpose.msra.mxu0 %v13657_v62 }
 0xa43   : > { %11410 = vmatprep.subr.bf16.mxu0 %v13665_v63 }
 0xa44   : > { %11491 = vmatpush1.bf16.xpose.msra.mxu1 %v13660_v48 }
 0xa45   : > { %11492 = vmatprep.subr.bf16.mxu1 %v13668_v55 }
 0xa4a   : > { %11411 = vmatpush1.bf16.xpose.msra.mxu0 %v13663_v22 }
 0xa4b   : > { %11412 = vmatprep.subr.bf16.mxu0 %v13671_v4  ;;  %v13720_v4 = vld [vmem:[%s18102_s21 + $0x208] ss:$16 sps:$4 sm:$0xff]  }
 0xa4c   : > { %11493 = vmatpush1.bf16.xpose.msra.mxu1 %v13666_v40  ;;  %v13717_v40 = vld [vmem:[%s18102_s21 + $0x8] ss:$16 sps:$4 sm:$0xff]  }
 0xa4d   : > { %11494 = vmatprep.subr.bf16.mxu1 %v13674_v30 }
 0xa52   : > { %11413 = vmatpush1.bf16.xpose.msra.mxu0 %v13669_v5  ;;  %v13725_v5 = vld [vmem:[%s18102_s21 + $0x2c] ss:$16 sps:$4 sm:$0xff]  }
 0xa53   : > { %11414 = vmatprep.subr.bf16.mxu0 %v13677_v53 }
 0xa54   : > { %11495 = vmatpush1.bf16.xpose.msra.mxu1 %v13672_v3  ;;  %v13728_v3 = vld [vmem:[%s18102_s21 + $0x22c] ss:$16 sps:$4 sm:$0xff]  }
 0xa55   : > { %11496 = vmatprep.subr.bf16.mxu1 %v13680_v6  ;;  %v13723_v6 = vld [vmem:[%s18102_s21 + $0x28] ss:$16 sps:$4 sm:$0xff]  }
 0xa5a   : > { %11415 = vmatpush1.bf16.xpose.msra.mxu0 %v13675_v25  ;;  %v13726_v25 = vld [vmem:[%s18102_s21 + $0x228] ss:$16 sps:$4 sm:$0xff]  }
 0xa5b   : > { %11416 = vmatprep.subr.bf16.mxu0 %v13683_v8  ;;  %v13734_v8 = vld [vmem:[%s18102_s21 + $0x24c] ss:$16 sps:$4 sm:$0xff]  }
 0xa5c   : > { %11497 = vmatpush1.bf16.xpose.msra.mxu1 %v13678_v42  ;;  %v13731_v42 = vld [vmem:[%s18102_s21 + $0x4c] ss:$16 sps:$4 sm:$0xff]  }
 0xa5d   : > { %11498 = vmatprep.subr.bf16.mxu1 %v13686_v26  ;;  %v13729_v26 = vld [vmem:[%s18102_s21 + $0x48] ss:$16 sps:$4 sm:$0xff]  }
 0xa62   : > { %11417 = vmatpush1.bf16.xpose.msra.mxu0 %v13681_v43  ;;  %v13732_v43 = vld [vmem:[%s18102_s21 + $0x248] ss:$16 sps:$4 sm:$0xff]  }
 0xa63   : > { %11418 = vmatprep.subr.bf16.mxu0 %v13689_v24  ;;  %v13740_v24 = vld [vmem:[%s18102_s21 + $0x26c] ss:$16 sps:$4 sm:$0xff]  }
 0xa64   : > { %11499 = vmatpush1.bf16.xpose.msra.mxu1 %v13684_v27  ;;  %v13737_v27 = vld [vmem:[%s18102_s21 + $0x6c] ss:$16 sps:$4 sm:$0xff]  }
 0xa65   : > { %11500 = vmatprep.subr.bf16.mxu1 %v13692_v33  ;;  %v13735_v33 = vld [vmem:[%s18102_s21 + $0x68] ss:$16 sps:$4 sm:$0xff]  }
 0xa6a   : > { %11419 = vmatpush1.bf16.xpose.msra.mxu0 %v13687_v14  ;;  %v13738_v14 = vld [vmem:[%s18102_s21 + $0x268] ss:$16 sps:$4 sm:$0xff]  }
 0xa6b   : > { %11420 = vmatprep.subr.bf16.mxu0 %v13695_v16  ;;  %v13746_v16 = vld [vmem:[%s18102_s21 + $0x28c] ss:$16 sps:$4 sm:$0xff]  }
 0xa6c   : > { %11501 = vmatpush1.bf16.xpose.msra.mxu1 %v13690_v15  ;;  %v13743_v15 = vld [vmem:[%s18102_s21 + $0x8c] ss:$16 sps:$4 sm:$0xff]  }
 0xa6d   : > { %11502 = vmatprep.subr.bf16.mxu1 %v13698_v18  ;;  %v13741_v18 = vld [vmem:[%s18102_s21 + $0x88] ss:$16 sps:$4 sm:$0xff]  }
 0xa72   : > { %11421 = vmatpush1.bf16.xpose.msra.mxu0 %v13693_v19  ;;  %v13744_v19 = vld [vmem:[%s18102_s21 + $0x288] ss:$16 sps:$4 sm:$0xff]  }
 0xa73   : > { %11422 = vmatprep.subr.bf16.mxu0 %v13701_v21  ;;  %v13752_v21 = vld [vmem:[%s18102_s21 + $0x2ac] ss:$16 sps:$4 sm:$0xff]  }
 0xa74   : > { %11503 = vmatpush1.bf16.xpose.msra.mxu1 %v13696_v20  ;;  %v13749_v20 = vld [vmem:[%s18102_s21 + $0xac] ss:$16 sps:$4 sm:$0xff]  }
 0xa75   : > { %11504 = vmatprep.subr.bf16.mxu1 %v13704_v34  ;;  %v13747_v34 = vld [vmem:[%s18102_s21 + $0xa8] ss:$16 sps:$4 sm:$0xff]  }
 0xa7a   : > { %11423 = vmatpush1.bf16.xpose.msra.mxu0 %v13699_v23  ;;  %v13750_v23 = vld [vmem:[%s18102_s21 + $0x2a8] ss:$16 sps:$4 sm:$0xff]  }
 0xa7b   : > { %11424 = vmatprep.subr.bf16.mxu0 %v13707_v38  ;;  %v13758_v38 = vld [vmem:[%s18102_s21 + $0x2cc] ss:$16 sps:$4 sm:$0xff]  }
 0xa7c   : > { %11505 = vmatpush1.bf16.xpose.msra.mxu1 %v13702_v54  ;;  %v13755_v54 = vld [vmem:[%s18102_s21 + $0xcc] ss:$16 sps:$4 sm:$0xff]  }
 0xa7d   : > { %11506 = vmatprep.subr.bf16.mxu1 %v13710_v36  ;;  %v13753_v36 = vld [vmem:[%s18102_s21 + $0xc8] ss:$16 sps:$4 sm:$0xff]  }
 0xa82   : > { %11425 = vmatpush1.bf16.xpose.msra.mxu0 %v13705_v29  ;;  %v13756_v29 = vld [vmem:[%s18102_s21 + $0x2c8] ss:$16 sps:$4 sm:$0xff]  }
 0xa83   : > { %11426 = vmatprep.subr.bf16.mxu0 %v13713_v32  ;;  %v13764_v32 = vld [vmem:[%s18102_s21 + $0x2ec] ss:$16 sps:$4 sm:$0xff]  }
 0xa84   : > { %11507 = vmatpush1.bf16.xpose.msra.mxu1 %v13708_v51  ;;  %v13761_v51 = vld [vmem:[%s18102_s21 + $0xec] ss:$16 sps:$4 sm:$0xff]  }
 0xa85   : > { %11508 = vmatprep.subr.bf16.mxu1 %v13716_v31  ;;  %v13759_v31 = vld [vmem:[%s18102_s21 + $0xe8] ss:$16 sps:$4 sm:$0xff]  }
 0xa8a   : > { %11427 = vmatpush1.bf16.xpose.msra.mxu0 %v13711_v39  ;;  %v13762_v39 = vld [vmem:[%s18102_s21 + $0x2e8] ss:$16 sps:$4 sm:$0xff]  }
 0xa8b   : > { %11437 = vmatprep.subr.bf16.mxu0 %v13719_v41  ;;  %v13770_v41 = vld [vmem:[%s18102_s21 + $0x30c] ss:$16 sps:$4 sm:$0xff]  }
 0xa8c   : > { %11509 = vmatpush1.bf16.xpose.msra.mxu1 %v13714_v47  ;;  %v13767_v47 = vld [vmem:[%s18102_s21 + $0x10c] ss:$16 sps:$4 sm:$0xff]  }
 0xa8d   : > { %11519 = vmatprep.subr.bf16.mxu1 %v13722_v37  ;;  %v13765_v37 = vld [vmem:[%s18102_s21 + $0x108] ss:$16 sps:$4 sm:$0xff]  }
 0xae4   : > { %v9639_v11 = vpop.f32.mrb[8].mxu0 }
 0xae5   : > { %v13413_v0 = vadd.f32 %v9639_v11, %v8185_v45  ;;  %v9641_v57 = vpop.f32.mrb[9].mxu0  ;;  %v13768_v45 = vld [vmem:[%s18102_s21 + $0x308] ss:$16 sps:$4 sm:$0xff]  }
 0xae6   : > { %v18342_v56 = vpop.f32.mrb[8].mxu1  ;;  %v13414_v9 = vadd.f32 %v9641_v57, %v8189_v49  ;;  %v9643_v59 = vpop.f32.mrb[10].mxu0  ;;  %v13773_v49 = vld [vmem:[%s18102_s21 + $0x12c] ss:$16 sps:$4 sm:$0xff]   ;;  %v13771_v11 = vld [vmem:[%s18102_s21 + $0x128] ss:$16 sps:$4 sm:$0xff]  }
 0xae7   : > { %v9805_v58 = vpop.f32.mrb[9].mxu1  ;;  %v9810_v60 = vmax.f32 %v13413_v0, 0.0  ;;  %v9644_v62 = vpop.f32.mrb[11].mxu0  ;;  %v13774_v0 = vld [vmem:[%s18102_s21 + $0x328] ss:$16 sps:$4 sm:$0xff]  }
 0xae8   : > { %v13416_v61 = vadd.f32 %v9805_v58, %v8197_v50  ;;  %v9807_v44 = vpop.f32.mrb[10].mxu1  ;;  %v9811_v48 = vmax.f32 %v13414_v9, 0.0  ;;  %v13776_v50 = vld [vmem:[%s18102_s21 + $0x32c] ss:$16 sps:$4 sm:$0xff]   ;;  %v13777_v58 = vld [vmem:[%s18102_s21 + $0x148] ss:$16 sps:$4 sm:$0xff]  }
 0xae9   : > { %v9808_v63 = vpop.f32.mrb[11].mxu1  ;;  %v18348_v30 = vpack.c.bf16 %v9810_v60, %v9810_v60  ;;  %v13779_v57 = vld [vmem:[%s18102_s21 + $0x14c] ss:$16 sps:$4 sm:$0xff]   ;;  %v13780_v59 = vld [vmem:[%s18102_s21 + $0x348] ss:$16 sps:$4 sm:$0xff]  }
 0xaea   : > { %v9813_v55 = vmax.f32 %v13416_v61, 0.0  ;;  %v18344_v22 = vpack.c.bf16 %v9811_v48, %v9811_v48  ;;  %v13782_v9 = vld [vmem:[%s18102_s21 + $0x34c] ss:$16 sps:$4 sm:$0xff]   ;;  %v13783_v44 = vld [vmem:[%s18102_s21 + $0x168] ss:$16 sps:$4 sm:$0xff]  }
 0xaeb   : > { %v13785_v60 = vld [vmem:[%s18102_s21 + $0x16c] ss:$16 sps:$4 sm:$0xff]   ;;  %v13786_v62 = vld [vmem:[%s18102_s21 + $0x368] ss:$16 sps:$4 sm:$0xff]  }
 0xaec   : > { %11428 = vmatprep.mubr.bf16.mxu0 %v18344_v22  ;;  %11510 = vmatprep.mubr.bf16.mxu1 %v18344_v22  ;;  %v18354_v53 = vpack.c.bf16 %v9813_v55, %v9813_v55  ;;  %v13788_v61 = vld [vmem:[%s18102_s21 + $0x36c] ss:$16 sps:$4 sm:$0xff]   ;;  %v13789_v55 = vld [vmem:[%s18102_s21 + $0x188] ss:$16 sps:$4 sm:$0xff]  }
 0xaed   : > { %11429 = vmatmul.mubr.bf16.vlgmr.msra.gmra.mrb[12].mxu0 %v18348_v30  ;;  %11511 = vmatmul.mubr.bf16.vlgmr.msra.gmra.mrb[12].mxu1 %v18348_v30  ;;  %v13791_v48 = vld [vmem:[%s18102_s21 + $0x18c] ss:$16 sps:$4 sm:$0xff]  }
 0xaee   : > { %11438 = vmatpush1.bf16.xpose.msra.mxu0 %v13717_v40  ;;  %11520 = vmatpush1.bf16.xpose.msra.mxu1 %v13720_v4  ;;  %v13794_v63 = vld [vmem:[%s18102_s21 + $0x38c] ss:$16 sps:$4 sm:$0xff]   ;;  %v13792_v40 = vld [vmem:[%s18102_s21 + $0x388] ss:$16 sps:$4 sm:$0xff]  }
 0xaef   : > { %11469 = vmatprep.mubr.bf16.mxu0 %v18354_v53  ;;  %11551 = vmatprep.mubr.bf16.mxu1 %v18354_v53  ;;  %v13797_v4 = vld [vmem:[%s18102_s21 + $0x1ac] ss:$16 sps:$4 sm:$0xff]  }
 0xaf0   : > { %11439 = vmatprep.subr.bf16.mxu0 %v13725_v5  ;;  %11521 = vmatprep.subr.bf16.mxu1 %v13728_v3  ;;  %v13800_v5 = vld [vmem:[%s18102_s21 + $0x3ac] ss:$16 sps:$4 sm:$0xff]   ;;  %v13795_v3 = vld [vmem:[%s18102_s21 + $0x1a8] ss:$16 sps:$4 sm:$0xff]  }
 0xaf6   : > { %11440 = vmatpush1.bf16.xpose.msra.mxu0 %v13723_v6  ;;  %11522 = vmatpush1.bf16.xpose.msra.mxu1 %v13726_v25  ;;  %v13798_v6 = vld [vmem:[%s18102_s21 + $0x3a8] ss:$16 sps:$4 sm:$0xff]   ;;  %v13803_v25 = vld [vmem:[%s18102_s21 + $0x1cc] ss:$16 sps:$4 sm:$0xff]  }
 0xaf7   : > { %11441 = vmatprep.subr.bf16.mxu0 %v13731_v42  ;;  %11523 = vmatprep.subr.bf16.mxu1 %v13734_v8  ;;  %v13806_v42 = vld [vmem:[%s18102_s21 + $0x3cc] ss:$16 sps:$4 sm:$0xff]   ;;  %v13801_v8 = vld [vmem:[%s18102_s21 + $0x1c8] ss:$16 sps:$4 sm:$0xff]  }
 0xafe   : > { %11442 = vmatpush1.bf16.xpose.msra.mxu0 %v13729_v26  ;;  %11524 = vmatpush1.bf16.xpose.msra.mxu1 %v13732_v43  ;;  %v13804_v26 = vld [vmem:[%s18102_s21 + $0x3c8] ss:$16 sps:$4 sm:$0xff]   ;;  %v13809_v43 = vld [vmem:[%s18102_s21 + $0x1ec] ss:$16 sps:$4 sm:$0xff]  }
 0xaff   : > { %11443 = vmatprep.subr.bf16.mxu0 %v13737_v27  ;;  %11525 = vmatprep.subr.bf16.mxu1 %v13740_v24  ;;  %v13812_v27 = vld [vmem:[%s18102_s21 + $0x3ec] ss:$16 sps:$4 sm:$0xff]   ;;  %v8193_v24 = vrot.slane %v18334_v2, %v17845_v7 }
 0xb06   : > { %11444 = vmatpush1.bf16.xpose.msra.mxu0 %v13735_v33  ;;  %11526 = vmatpush1.bf16.xpose.msra.mxu1 %v13738_v14  ;;  %v13807_v33 = vld [vmem:[%s18102_s21 + $0x1e8] ss:$16 sps:$4 sm:$0xff]  }
 0xb07   : > { %11445 = vmatprep.subr.bf16.mxu0 %v13743_v15  ;;  %11527 = vmatprep.subr.bf16.mxu1 %v13746_v16  ;;  %v13810_v14 = vld [vmem:[%s18102_s21 + $0x3e8] ss:$16 sps:$4 sm:$0xff]   ;;  %v13415_v15 = vadd.f32 %v18342_v56, %v8193_v24  ;;  %v13815_v16 = vld [vmem:[%s18102_s21 + $0x404] ss:$16 sps:$4 sm:$0xff]   ;;  %v13819_v56 = vld [vmem:[%s18102_s21 + $0x420] ss:$16 sps:$4 sm:$0xff]  }
 0xb08   : > { %v13879_v24 = vld [vmem:[%s18102_s21 + $0x560] ss:$16 sps:$4 sm:$0xff]  }
 0xb0e   : > { %11446 = vmatpush1.bf16.xpose.msra.mxu0 %v13741_v18  ;;  %11528 = vmatpush1.bf16.xpose.msra.mxu1 %v13744_v19  ;;  %v13818_v18 = vld [vmem:[%s18102_s21 + $0x604] ss:$16 sps:$4 sm:$0xff]   ;;  %v9812_v19 = vmax.f32 %v13415_v15, 0.0 }
 0xb0f   : > { %11447 = vmatprep.subr.bf16.mxu0 %v13749_v20  ;;  %11529 = vmatprep.subr.bf16.mxu1 %v13752_v21  ;;  %v13813_v20 = vld [vmem:[%s18102_s21 + $0x400] ss:$16 sps:$4 sm:$0xff]   ;;  %v13890_v15 = vld [vmem:[%s18102_s21 + $0x784] ss:$16 sps:$4 sm:$0xff]  }
 0xb10   : > { %v18424_v2 = vpack.c.bf16 %v9812_v19, %v9812_v19  ;;  %v13816_v21 = vld [vmem:[%s18102_s21 + $0x600] ss:$16 sps:$4 sm:$0xff]   ;;  %v13893_v19 = vld [vmem:[%s18102_s21 + $0x5a4] ss:$16 sps:$4 sm:$0xff]  }
 0xb16   : > { %11448 = vmatpush1.bf16.xpose.msra.mxu0 %v13747_v34  ;;  %11530 = vmatpush1.bf16.xpose.msra.mxu1 %v13750_v23  ;;  %v13821_v34 = vld [vmem:[%s18102_s21 + $0x424] ss:$16 sps:$4 sm:$0xff]  }
 0xb17   : > { %11449 = vmatprep.subr.bf16.mxu0 %v13755_v54  ;;  %11531 = vmatprep.subr.bf16.mxu1 %v13758_v38  ;;  %v13824_v23 = vld [vmem:[%s18102_s21 + $0x624] ss:$16 sps:$4 sm:$0xff]   ;;  %v13822_v54 = vld [vmem:[%s18102_s21 + $0x620] ss:$16 sps:$4 sm:$0xff]  }
 0xb18   : > { %v13827_v38 = vld [vmem:[%s18102_s21 + $0x444] ss:$16 sps:$4 sm:$0xff]  }
 0xb1e   : > { %11450 = vmatpush1.bf16.xpose.msra.mxu0 %v13753_v36  ;;  %11532 = vmatpush1.bf16.xpose.msra.mxu1 %v13756_v29  ;;  %v13830_v36 = vld [vmem:[%s18102_s21 + $0x644] ss:$16 sps:$4 sm:$0xff]   ;;  %v13825_v29 = vld [vmem:[%s18102_s21 + $0x440] ss:$16 sps:$4 sm:$0xff]  }
 0xb1f   : > { %11451 = vmatprep.subr.bf16.mxu0 %v13761_v51  ;;  %11533 = vmatprep.subr.bf16.mxu1 %v13764_v32  ;;  %v13828_v51 = vld [vmem:[%s18102_s21 + $0x640] ss:$16 sps:$4 sm:$0xff]   ;;  %v13833_v32 = vld [vmem:[%s18102_s21 + $0x464] ss:$16 sps:$4 sm:$0xff]  }
 0xb26   : > { %11452 = vmatpush1.bf16.xpose.msra.mxu0 %v13759_v31  ;;  %11534 = vmatpush1.bf16.xpose.msra.mxu1 %v13762_v39  ;;  %v13831_v31 = vld [vmem:[%s18102_s21 + $0x460] ss:$16 sps:$4 sm:$0xff]  }
 0xb27   : > { %11453 = vmatprep.subr.bf16.mxu0 %v13767_v47  ;;  %11535 = vmatprep.subr.bf16.mxu1 %v13770_v41  ;;  %v13834_v39 = vld [vmem:[%s18102_s21 + $0x660] ss:$16 sps:$4 sm:$0xff]   ;;  %v13839_v47 = vld [vmem:[%s18102_s21 + $0x484] ss:$16 sps:$4 sm:$0xff]  }
 0xb28   : > { %v13842_v41 = vld [vmem:[%s18102_s21 + $0x684] ss:$16 sps:$4 sm:$0xff]  }
 0xb2e   : > { %11454 = vmatpush1.bf16.xpose.msra.mxu0 %v13765_v37  ;;  %11536 = vmatpush1.bf16.xpose.msra.mxu1 %v13768_v45  ;;  %v13837_v37 = vld [vmem:[%s18102_s21 + $0x480] ss:$16 sps:$4 sm:$0xff]  }
 0xb2f   : > { %11455 = vmatprep.subr.bf16.mxu0 %v13773_v49  ;;  %11537 = vmatprep.subr.bf16.mxu1 %v13776_v50  ;;  %v13840_v45 = vld [vmem:[%s18102_s21 + $0x680] ss:$16 sps:$4 sm:$0xff]   ;;  %v13845_v49 = vld [vmem:[%s18102_s21 + $0x4a4] ss:$16 sps:$4 sm:$0xff]  }
 0xb30   : > { %v13848_v50 = vld [vmem:[%s18102_s21 + $0x6a4] ss:$16 sps:$4 sm:$0xff]  }
 0xb36   : > { %11456 = vmatpush1.bf16.xpose.msra.mxu0 %v13771_v11  ;;  %11538 = vmatpush1.bf16.xpose.msra.mxu1 %v13774_v0  ;;  %v13843_v11 = vld [vmem:[%s18102_s21 + $0x4a0] ss:$16 sps:$4 sm:$0xff]  }
 0xb37   : > { %11457 = vmatprep.subr.bf16.mxu0 %v13779_v57  ;;  %11539 = vmatprep.subr.bf16.mxu1 %v13782_v9  ;;  %v13846_v0 = vld [vmem:[%s18102_s21 + $0x6a0] ss:$16 sps:$4 sm:$0xff]   ;;  %v13851_v57 = vld [vmem:[%s18102_s21 + $0x4c4] ss:$16 sps:$4 sm:$0xff]  }
 0xb38   : > { %v13854_v9 = vld [vmem:[%s18102_s21 + $0x6c4] ss:$16 sps:$4 sm:$0xff]  }
 0xb3e   : > { %11458 = vmatpush1.bf16.xpose.msra.mxu0 %v13777_v58  ;;  %11540 = vmatpush1.bf16.xpose.msra.mxu1 %v13780_v59  ;;  %v13849_v58 = vld [vmem:[%s18102_s21 + $0x4c0] ss:$16 sps:$4 sm:$0xff]  }
 0xb3f   : > { %11459 = vmatprep.subr.bf16.mxu0 %v13785_v60  ;;  %11541 = vmatprep.subr.bf16.mxu1 %v13788_v61  ;;  %v13852_v59 = vld [vmem:[%s18102_s21 + $0x6c0] ss:$16 sps:$4 sm:$0xff]   ;;  %v13857_v60 = vld [vmem:[%s18102_s21 + $0x4e4] ss:$16 sps:$4 sm:$0xff]  }
 0xb40   : > { %v13860_v61 = vld [vmem:[%s18102_s21 + $0x6e4] ss:$16 sps:$4 sm:$0xff]  }
 0xb46   : > { %11460 = vmatpush1.bf16.xpose.msra.mxu0 %v13783_v44  ;;  %11542 = vmatpush1.bf16.xpose.msra.mxu1 %v13786_v62  ;;  %v13855_v44 = vld [vmem:[%s18102_s21 + $0x4e0] ss:$16 sps:$4 sm:$0xff]  }
 0xb47   : > { %11461 = vmatprep.subr.bf16.mxu0 %v13791_v48  ;;  %11543 = vmatprep.subr.bf16.mxu1 %v13794_v63  ;;  %v13858_v62 = vld [vmem:[%s18102_s21 + $0x6e0] ss:$16 sps:$4 sm:$0xff]   ;;  %v13863_v48 = vld [vmem:[%s18102_s21 + $0x504] ss:$16 sps:$4 sm:$0xff]  }
 0xb48   : > { %v13866_v63 = vld [vmem:[%s18102_s21 + $0x704] ss:$16 sps:$4 sm:$0xff]  }
 0xb4e   : > { %11462 = vmatpush1.bf16.xpose.msra.mxu0 %v13789_v55  ;;  %11544 = vmatpush1.bf16.xpose.msra.mxu1 %v13792_v40  ;;  %v13861_v55 = vld [vmem:[%s18102_s21 + $0x500] ss:$16 sps:$4 sm:$0xff]  }
 0xb4f   : > { %11463 = vmatprep.subr.bf16.mxu0 %v13797_v4  ;;  %11545 = vmatprep.subr.bf16.mxu1 %v13800_v5  ;;  %v13864_v40 = vld [vmem:[%s18102_s21 + $0x700] ss:$16 sps:$4 sm:$0xff]   ;;  %v13869_v4 = vld [vmem:[%s18102_s21 + $0x524] ss:$16 sps:$4 sm:$0xff]  }
 0xb50   : > { %v13872_v5 = vld [vmem:[%s18102_s21 + $0x724] ss:$16 sps:$4 sm:$0xff]  }
 0xb56   : > { %11464 = vmatpush1.bf16.xpose.msra.mxu0 %v13795_v3  ;;  %11546 = vmatpush1.bf16.xpose.msra.mxu1 %v13798_v6  ;;  %v13867_v3 = vld [vmem:[%s18102_s21 + $0x520] ss:$16 sps:$4 sm:$0xff]  }
 0xb57   : > { %11465 = vmatprep.subr.bf16.mxu0 %v13803_v25  ;;  %11547 = vmatprep.subr.bf16.mxu1 %v13806_v42  ;;  %v13870_v6 = vld [vmem:[%s18102_s21 + $0x720] ss:$16 sps:$4 sm:$0xff]   ;;  %v13875_v25 = vld [vmem:[%s18102_s21 + $0x544] ss:$16 sps:$4 sm:$0xff]  }
 0xb58   : > { %v13878_v42 = vld [vmem:[%s18102_s21 + $0x744] ss:$16 sps:$4 sm:$0xff]  }
 0xb5e   : > { %11466 = vmatpush1.bf16.xpose.msra.mxu0 %v13801_v8  ;;  %11548 = vmatpush1.bf16.xpose.msra.mxu1 %v13804_v26  ;;  %v13873_v8 = vld [vmem:[%s18102_s21 + $0x540] ss:$16 sps:$4 sm:$0xff]  }
 0xb5f   : > { %11467 = vmatprep.subr.bf16.mxu0 %v13809_v43  ;;  %11549 = vmatprep.subr.bf16.mxu1 %v13812_v27  ;;  %v13876_v26 = vld [vmem:[%s18102_s21 + $0x740] ss:$16 sps:$4 sm:$0xff]   ;;  %v13881_v43 = vld [vmem:[%s18102_s21 + $0x564] ss:$16 sps:$4 sm:$0xff]  }
 0xb60   : > { %v13884_v27 = vld [vmem:[%s18102_s21 + $0x764] ss:$16 sps:$4 sm:$0xff]  }
 0xb66   : > { %11468 = vmatpush1.bf16.xpose.msra.mxu0 %v13807_v33  ;;  %11550 = vmatpush1.bf16.xpose.msra.mxu1 %v13810_v14  ;;  %v13882_v33 = vld [vmem:[%s18102_s21 + $0x760] ss:$16 sps:$4 sm:$0xff]   ;;  %v13887_v14 = vld [vmem:[%s18102_s21 + $0x584] ss:$16 sps:$4 sm:$0xff]  }
 0xb67   : > { %11560 = vmatprep.subr.bf16.mxu0 %v13815_v16  ;;  %11642 = vmatprep.subr.bf16.mxu1 %v13818_v18  ;;  %v13885_v16 = vld [vmem:[%s18102_s21 + $0x580] ss:$16 sps:$4 sm:$0xff]  }
 0xb68   : > { %v13888_v18 = vld [vmem:[%s18102_s21 + $0x780] ss:$16 sps:$4 sm:$0xff]  }
 0xb6d   : > { %11470 = vmatmul.mubr.bf16.vlgmr.msra.gmra.mrb[12].mxu0 %v18424_v2  ;;  %11552 = vmatmul.mubr.bf16.vlgmr.msra.gmra.mrb[12].mxu1 %v18424_v2 }
 0xb6e   : > { %11561 = vmatpush1.bf16.xpose.msra.mxu0 %v13813_v20  ;;  %11592 = vmatprep.mubr.bf16.mxu0 %v18344_v22  ;;  %v13896_v20 = vld [vmem:[%s18102_s21 + $0x7a4] ss:$16 sps:$4 sm:$0xff]  }
 0xb6f   : > { %11643 = vmatpush1.bf16.xpose.msra.mxu1 %v13816_v21  ;;  %11674 = vmatprep.mubr.bf16.mxu1 %v18344_v22  ;;  %v13836_v22 = vld [vmem:[%s18102_s21 + $0x664] ss:$16 sps:$4 sm:$0xff]   ;;  %v13891_v21 = vld [vmem:[%s18102_s21 + $0x5a0] ss:$16 sps:$4 sm:$0xff]  }
 0xb70   : > { %11562 = vmatprep.subr.bf16.mxu0 %v13821_v34  ;;  %11644 = vmatprep.subr.bf16.mxu1 %v13824_v23  ;;  %v13894_v34 = vld [vmem:[%s18102_s21 + $0x7a0] ss:$16 sps:$4 sm:$0xff]   ;;  %v13899_v23 = vld [vmem:[%s18102_s21 + $0x5c4] ss:$16 sps:$4 sm:$0xff]  }
 0xb76   : > { %11563 = vmatpush1.bf16.xpose.msra.mxu0 %v13819_v56  ;;  %v13902_v56 = vld [vmem:[%s18102_s21 + $0x7c4] ss:$16 sps:$4 sm:$0xff]  }
 0xb77   : > { %11645 = vmatpush1.bf16.xpose.msra.mxu1 %v13822_v54  ;;  %11564 = vmatprep.subr.bf16.mxu0 %v13827_v38  ;;  %v13897_v54 = vld [vmem:[%s18102_s21 + $0x5c0] ss:$16 sps:$4 sm:$0xff]  }
 0xb78   : > { %11646 = vmatprep.subr.bf16.mxu1 %v13830_v36  ;;  %v13900_v38 = vld [vmem:[%s18102_s21 + $0x7c0] ss:$16 sps:$4 sm:$0xff]   ;;  %v13905_v36 = vld [vmem:[%s18102_s21 + $0x5e4] ss:$16 sps:$4 sm:$0xff]  }
 0xb7e   : > { %11565 = vmatpush1.bf16.xpose.msra.mxu0 %v13825_v29  ;;  %v13908_v29 = vld [vmem:[%s18102_s21 + $0x7e4] ss:$16 sps:$4 sm:$0xff]  }
 0xb7f   : > { %11647 = vmatpush1.bf16.xpose.msra.mxu1 %v13828_v51  ;;  %11566 = vmatprep.subr.bf16.mxu0 %v13833_v32  ;;  %v13903_v51 = vld [vmem:[%s18102_s21 + $0x5e0] ss:$16 sps:$4 sm:$0xff]  }
 0xb80   : > { %11648 = vmatprep.subr.bf16.mxu1 %v13836_v22  ;;  %v13906_v32 = vld [vmem:[%s18102_s21 + $0x7e0] ss:$16 sps:$4 sm:$0xff]   ;;  %v13911_v22 = vld [vmem:[%s18102_s21 + $0x40c] ss:$16 sps:$4 sm:$0xff]  }
 0xb86   : > { %11567 = vmatpush1.bf16.xpose.msra.mxu0 %v13831_v31  ;;  %v13914_v31 = vld [vmem:[%s18102_s21 + $0x60c] ss:$16 sps:$4 sm:$0xff]  }
 0xb87   : > { %11649 = vmatpush1.bf16.xpose.msra.mxu1 %v13834_v39  ;;  %11568 = vmatprep.subr.bf16.mxu0 %v13839_v47  ;;  %v13909_v39 = vld [vmem:[%s18102_s21 + $0x408] ss:$16 sps:$4 sm:$0xff]  }
 0xb88   : > { %11650 = vmatprep.subr.bf16.mxu1 %v13842_v41  ;;  %v13912_v47 = vld [vmem:[%s18102_s21 + $0x608] ss:$16 sps:$4 sm:$0xff]   ;;  %v13917_v41 = vld [vmem:[%s18102_s21 + $0x42c] ss:$16 sps:$4 sm:$0xff]  }
 0xb8e   : > { %11569 = vmatpush1.bf16.xpose.msra.mxu0 %v13837_v37  ;;  %v13920_v37 = vld [vmem:[%s18102_s21 + $0x62c] ss:$16 sps:$4 sm:$0xff]  }
 0xb8f   : > { %11651 = vmatpush1.bf16.xpose.msra.mxu1 %v13840_v45  ;;  %11570 = vmatprep.subr.bf16.mxu0 %v13845_v49  ;;  %v13915_v45 = vld [vmem:[%s18102_s21 + $0x428] ss:$16 sps:$4 sm:$0xff]  }
 0xb90   : > { %11652 = vmatprep.subr.bf16.mxu1 %v13848_v50  ;;  %v13918_v49 = vld [vmem:[%s18102_s21 + $0x628] ss:$16 sps:$4 sm:$0xff]   ;;  %v13923_v50 = vld [vmem:[%s18102_s21 + $0x44c] ss:$16 sps:$4 sm:$0xff]  }
 0xb96   : > { %11571 = vmatpush1.bf16.xpose.msra.mxu0 %v13843_v11  ;;  %v13926_v11 = vld [vmem:[%s18102_s21 + $0x64c] ss:$16 sps:$4 sm:$0xff]  }
 0xb97   : > { %11653 = vmatpush1.bf16.xpose.msra.mxu1 %v13846_v0  ;;  %11572 = vmatprep.subr.bf16.mxu0 %v13851_v57  ;;  %v13924_v0 = vld [vmem:[%s18102_s21 + $0x648] ss:$16 sps:$4 sm:$0xff]   ;;  %v13929_v57 = vld [vmem:[%s18102_s21 + $0x46c] ss:$16 sps:$4 sm:$0xff]  }
 0xb98   : > { %11654 = vmatprep.subr.bf16.mxu1 %v13854_v9  ;;  %v13927_v9 = vld [vmem:[%s18102_s21 + $0x468] ss:$16 sps:$4 sm:$0xff]  }
 0xb9e   : > { %11573 = vmatpush1.bf16.xpose.msra.mxu0 %v13849_v58  ;;  %v13930_v58 = vld [vmem:[%s18102_s21 + $0x668] ss:$16 sps:$4 sm:$0xff]  }
 0xb9f   : > { %11655 = vmatpush1.bf16.xpose.msra.mxu1 %v13852_v59  ;;  %11574 = vmatprep.subr.bf16.mxu0 %v13857_v60  ;;  %v13935_v59 = vld [vmem:[%s18102_s21 + $0x48c] ss:$16 sps:$4 sm:$0xff]  }
 0xba0   : > { %11656 = vmatprep.subr.bf16.mxu1 %v13860_v61  ;;  %v13938_v60 = vld [vmem:[%s18102_s21 + $0x68c] ss:$16 sps:$4 sm:$0xff]   ;;  %v13933_v61 = vld [vmem:[%s18102_s21 + $0x488] ss:$16 sps:$4 sm:$0xff]  }
 0xba6   : > { %11575 = vmatpush1.bf16.xpose.msra.mxu0 %v13855_v44  ;;  %v13936_v44 = vld [vmem:[%s18102_s21 + $0x688] ss:$16 sps:$4 sm:$0xff]  }
 0xba7   : > { %11657 = vmatpush1.bf16.xpose.msra.mxu1 %v13858_v62  ;;  %11576 = vmatprep.subr.bf16.mxu0 %v13863_v48  ;;  %v13941_v62 = vld [vmem:[%s18102_s21 + $0x4ac] ss:$16 sps:$4 sm:$0xff]  }
 0xba8   : > { %11658 = vmatprep.subr.bf16.mxu1 %v13866_v63  ;;  %v13944_v48 = vld [vmem:[%s18102_s21 + $0x6ac] ss:$16 sps:$4 sm:$0xff]   ;;  %v13939_v63 = vld [vmem:[%s18102_s21 + $0x4a8] ss:$16 sps:$4 sm:$0xff]  }
 0xbae   : > { %11577 = vmatpush1.bf16.xpose.msra.mxu0 %v13861_v55  ;;  %v13942_v55 = vld [vmem:[%s18102_s21 + $0x6a8] ss:$16 sps:$4 sm:$0xff]  }
 0xbaf   : > { %11659 = vmatpush1.bf16.xpose.msra.mxu1 %v13864_v40  ;;  %11578 = vmatprep.subr.bf16.mxu0 %v13869_v4  ;;  %v13947_v40 = vld [vmem:[%s18102_s21 + $0x4cc] ss:$16 sps:$4 sm:$0xff]  }
 0xbb0   : > { %11660 = vmatprep.subr.bf16.mxu1 %v13872_v5  ;;  %v13950_v4 = vld [vmem:[%s18102_s21 + $0x6cc] ss:$16 sps:$4 sm:$0xff]   ;;  %v13945_v5 = vld [vmem:[%s18102_s21 + $0x4c8] ss:$16 sps:$4 sm:$0xff]  }
 0xbb6   : > { %11579 = vmatpush1.bf16.xpose.msra.mxu0 %v13867_v3  ;;  %v13948_v3 = vld [vmem:[%s18102_s21 + $0x6c8] ss:$16 sps:$4 sm:$0xff]  }
 0xbb7   : > { %11661 = vmatpush1.bf16.xpose.msra.mxu1 %v13870_v6  ;;  %11580 = vmatprep.subr.bf16.mxu0 %v13875_v25  ;;  %v13953_v6 = vld [vmem:[%s18102_s21 + $0x4ec] ss:$16 sps:$4 sm:$0xff]  }
 0xbb8   : > { %11662 = vmatprep.subr.bf16.mxu1 %v13878_v42  ;;  %v13956_v25 = vld [vmem:[%s18102_s21 + $0x6ec] ss:$16 sps:$4 sm:$0xff]   ;;  %v13951_v42 = vld [vmem:[%s18102_s21 + $0x4e8] ss:$16 sps:$4 sm:$0xff]  }
 0xbbe   : > { %11581 = vmatpush1.bf16.xpose.msra.mxu0 %v13873_v8  ;;  %v13954_v8 = vld [vmem:[%s18102_s21 + $0x6e8] ss:$16 sps:$4 sm:$0xff]  }
 0xbbf   : > { %11663 = vmatpush1.bf16.xpose.msra.mxu1 %v13876_v26  ;;  %11582 = vmatprep.subr.bf16.mxu0 %v13881_v43  ;;  %v13959_v26 = vld [vmem:[%s18102_s21 + $0x50c] ss:$16 sps:$4 sm:$0xff]  }
 0xbc0   : > { %11664 = vmatprep.subr.bf16.mxu1 %v13884_v27  ;;  %v13962_v43 = vld [vmem:[%s18102_s21 + $0x70c] ss:$16 sps:$4 sm:$0xff]   ;;  %v13957_v27 = vld [vmem:[%s18102_s21 + $0x508] ss:$16 sps:$4 sm:$0xff]  }
 0xbc6   : > { %11583 = vmatpush1.bf16.xpose.msra.mxu0 %v13879_v24  ;;  %v13960_v24 = vld [vmem:[%s18102_s21 + $0x708] ss:$16 sps:$4 sm:$0xff]  }
 0xbc7   : > { %11665 = vmatpush1.bf16.xpose.msra.mxu1 %v13882_v33  ;;  %11584 = vmatprep.subr.bf16.mxu0 %v13887_v14  ;;  %v13965_v33 = vld [vmem:[%s18102_s21 + $0x52c] ss:$16 sps:$4 sm:$0xff]  }
 0xbc8   : > { %11666 = vmatprep.subr.bf16.mxu1 %v13890_v15  ;;  %v13968_v14 = vld [vmem:[%s18102_s21 + $0x72c] ss:$16 sps:$4 sm:$0xff]   ;;  %v13963_v15 = vld [vmem:[%s18102_s21 + $0x528] ss:$16 sps:$4 sm:$0xff]  }
 0xbce   : > { %11585 = vmatpush1.bf16.xpose.msra.mxu0 %v13885_v16  ;;  %v13966_v16 = vld [vmem:[%s18102_s21 + $0x728] ss:$16 sps:$4 sm:$0xff]  }
 0xbcf   : > { %11667 = vmatpush1.bf16.xpose.msra.mxu1 %v13888_v18  ;;  %11586 = vmatprep.subr.bf16.mxu0 %v13893_v19  ;;  %v13971_v18 = vld [vmem:[%s18102_s21 + $0x54c] ss:$16 sps:$4 sm:$0xff]  }
 0xbd0   : > { %11668 = vmatprep.subr.bf16.mxu1 %v13896_v20  ;;  %v13974_v19 = vld [vmem:[%s18102_s21 + $0x74c] ss:$16 sps:$4 sm:$0xff]   ;;  %v13969_v20 = vld [vmem:[%s18102_s21 + $0x548] ss:$16 sps:$4 sm:$0xff]  }
 0xbd6   : > { %11587 = vmatpush1.bf16.xpose.msra.mxu0 %v13891_v21  ;;  %v18542_v21 = vld [vmem:[%s299_s23] sm:$0xff] }
 0xbd7   : > { %11669 = vmatpush1.bf16.xpose.msra.mxu1 %v13894_v34  ;;  %11588 = vmatprep.subr.bf16.mxu0 %v13899_v23  ;;  %v13972_v34 = vld [vmem:[%s18102_s21 + $0x748] ss:$16 sps:$4 sm:$0xff]   ;;  %v13977_v23 = vld [vmem:[%s18102_s21 + $0x56c] ss:$16 sps:$4 sm:$0xff]  }
 0xbd8   : > { %11670 = vmatprep.subr.bf16.mxu1 %v13902_v56  ;;  %v13980_v56 = vld [vmem:[%s18102_s21 + $0x76c] ss:$16 sps:$4 sm:$0xff]  }
 0xbde   : > { %11589 = vmatpush1.bf16.xpose.msra.mxu0 %v13897_v54  ;;  %v10079_v54 = vrot.slane %v18542_v21, %v17633_v52 }
 0xbdf   : > { %11671 = vmatpush1.bf16.xpose.msra.mxu1 %v13900_v38  ;;  %11590 = vmatprep.subr.bf16.mxu0 %v13905_v36  ;;  %v10087_v38 = vrot.slane %v18542_v21, %v17845_v7  ;;  %v10083_v36 = vrot.slane %v18542_v21, %v17428_v17 }
 0xbe0   : > { %11672 = vmatprep.subr.bf16.mxu1 %v13908_v29  ;;  %v10091_v29 = vrot.slane %v18542_v21, %v17636_v46 }
 0xbe6   : > { %11591 = vmatpush1.bf16.xpose.msra.mxu0 %v13903_v51 }
 0xbe7   : > { %11673 = vmatpush1.bf16.xpose.msra.mxu1 %v13906_v32  ;;  %11601 = vmatprep.subr.bf16.mxu0 %v13911_v22 }
 0xbe8   : > { %11683 = vmatprep.subr.bf16.mxu1 %v13914_v31 }
 0xbed   : > { %11593 = vmatmul.mubr.bf16.vlgmr.msra.gmra.mrb[16].mxu0 %v18348_v30 }
 0xbee   : > { %11675 = vmatmul.mubr.bf16.vlgmr.msra.gmra.mrb[16].mxu1 %v18348_v30  ;;  %11602 = vmatpush1.bf16.xpose.msra.mxu0 %v13909_v39  ;;  %v13921_v30 = vld [vmem:[%s18102_s21 + $0x448] ss:$16 sps:$4 sm:$0xff]  }
 0xbef   : > { %11633 = vmatprep.mubr.bf16.mxu0 %v18354_v53  ;;  %11684 = vmatpush1.bf16.xpose.msra.mxu1 %v13912_v47 }
 0xbf0   : > { %11715 = vmatprep.mubr.bf16.mxu1 %v18354_v53  ;;  %11603 = vmatprep.subr.bf16.mxu0 %v13917_v41  ;;  %v13932_v53 = vld [vmem:[%s18102_s21 + $0x66c] ss:$16 sps:$4 sm:$0xff]  }
 0xbf1   : > { %11685 = vmatprep.subr.bf16.mxu1 %v13920_v37  ;;  %v13975_v37 = vld [vmem:[%s18102_s21 + $0x568] ss:$16 sps:$4 sm:$0xff]  }
 0xbf6   : > { %11604 = vmatpush1.bf16.xpose.msra.mxu0 %v13915_v45 }
 0xbf7   : > { %11686 = vmatpush1.bf16.xpose.msra.mxu1 %v13918_v49  ;;  %11605 = vmatprep.subr.bf16.mxu0 %v13923_v50  ;;  %v13978_v49 = vld [vmem:[%s18102_s21 + $0x768] ss:$16 sps:$4 sm:$0xff]   ;;  %v13983_v50 = vld [vmem:[%s18102_s21 + $0x58c] ss:$16 sps:$4 sm:$0xff]  }
 0xbf8   : > { %11687 = vmatprep.subr.bf16.mxu1 %v13926_v11 }
 0xbfe   : > { %11606 = vmatpush1.bf16.xpose.msra.mxu0 %v13921_v30 }
 0xbff   : > { %11688 = vmatpush1.bf16.xpose.msra.mxu1 %v13924_v0  ;;  %11607 = vmatprep.subr.bf16.mxu0 %v13929_v57  ;;  %v13986_v0 = vld [vmem:[%s18102_s21 + $0x78c] ss:$16 sps:$4 sm:$0xff]  }
 0xc00   : > { %11689 = vmatprep.subr.bf16.mxu1 %v13932_v53 }
 0xc06   : > { %11608 = vmatpush1.bf16.xpose.msra.mxu0 %v13927_v9 }
 0xc07   : > { %11690 = vmatpush1.bf16.xpose.msra.mxu1 %v13930_v58  ;;  %11609 = vmatprep.subr.bf16.mxu0 %v13935_v59  ;;  %v13981_v58 = vld [vmem:[%s18102_s21 + $0x588] ss:$16 sps:$4 sm:$0xff]  }
 0xc08   : > { %11691 = vmatprep.subr.bf16.mxu1 %v13938_v60  ;;  %v13984_v59 = vld [vmem:[%s18102_s21 + $0x788] ss:$16 sps:$4 sm:$0xff]   ;;  %v13989_v60 = vld [vmem:[%s18102_s21 + $0x5ac] ss:$16 sps:$4 sm:$0xff]  }
 0xc0e   : > { %11610 = vmatpush1.bf16.xpose.msra.mxu0 %v13933_v61  ;;  %v13992_v61 = vld [vmem:[%s18102_s21 + $0x7ac] ss:$16 sps:$4 sm:$0xff]  }
 0xc0f   : > { %11692 = vmatpush1.bf16.xpose.msra.mxu1 %v13936_v44  ;;  %11611 = vmatprep.subr.bf16.mxu0 %v13941_v62  ;;  %v13987_v44 = vld [vmem:[%s18102_s21 + $0x5a8] ss:$16 sps:$4 sm:$0xff]  }
 0xc10   : > { %11693 = vmatprep.subr.bf16.mxu1 %v13944_v48  ;;  %v13990_v62 = vld [vmem:[%s18102_s21 + $0x7a8] ss:$16 sps:$4 sm:$0xff]   ;;  %v13995_v48 = vld [vmem:[%s18102_s21 + $0x5cc] ss:$16 sps:$4 sm:$0xff]  }
 0xc16   : > { %11612 = vmatpush1.bf16.xpose.msra.mxu0 %v13939_v63  ;;  %v13998_v63 = vld [vmem:[%s18102_s21 + $0x7cc] ss:$16 sps:$4 sm:$0xff]  }
 0xc17   : > { %11694 = vmatpush1.bf16.xpose.msra.mxu1 %v13942_v55  ;;  %11613 = vmatprep.subr.bf16.mxu0 %v13947_v40  ;;  %v13993_v55 = vld [vmem:[%s18102_s21 + $0x5c8] ss:$16 sps:$4 sm:$0xff]  }
 0xc18   : > { %11695 = vmatprep.subr.bf16.mxu1 %v13950_v4  ;;  %v13996_v40 = vld [vmem:[%s18102_s21 + $0x7c8] ss:$16 sps:$4 sm:$0xff]   ;;  %v14001_v4 = vld [vmem:[%s18102_s21 + $0x5ec] ss:$16 sps:$4 sm:$0xff]  }
 0xc1e   : > { %11614 = vmatpush1.bf16.xpose.msra.mxu0 %v13945_v5  ;;  %v14004_v5 = vld [vmem:[%s18102_s21 + $0x7ec] ss:$16 sps:$4 sm:$0xff]  }
 0xc1f   : > { %11696 = vmatpush1.bf16.xpose.msra.mxu1 %v13948_v3  ;;  %11615 = vmatprep.subr.bf16.mxu0 %v13953_v6  ;;  %v13999_v3 = vld [vmem:[%s18102_s21 + $0x5e8] ss:$16 sps:$4 sm:$0xff]  }
 0xc20   : > { %11697 = vmatprep.subr.bf16.mxu1 %v13956_v25  ;;  %v14002_v6 = vld [vmem:[%s18102_s21 + $0x7e8] ss:$16 sps:$4 sm:$0xff]   ;;  %v10095_v25 = vrot.slane %v18542_v21, %v1454_v1  ;;  %s13404_s21 = sshll.u32 %s14133_s28, 8  ;;  %s14071_s28 = smov [#allocation2]  }
 0xc21   : > { %s18602_s20 = scalar_lea.hbm %s18654_s7, %s13404_s21  ;;  %s14010_s8 = sshll.u32 %s14071_s28, 4  ;;  %s14011_s8 = int_to_ptr.vmem [resolvable:$false] %s14010_s8 }
 0xc22   : > { %s14012_s9 = scalar_lea.vmem %s14011_s8, 512  ;;  %p14013_p1 = scmp.lt.s32.totalorder %s18604_s17, %s14011_s8 }
 0xc23   : > { %p14014_p2 = scmp.lt.s32.totalorder %s14012_s9, %s14006_s29 }
 0xc25   : > { %p14015_p3 = por %p14014_p2, %p14013_p1 }
 0xc26   : > { %11616 = vmatpush1.bf16.xpose.msra.mxu0 %v13951_v42  ;;  %v10103_v42 = vrot.slane %v18542_v21, %v1462_v13 }
 0xc27   : > { %11698 = vmatpush1.bf16.xpose.msra.mxu1 %v13954_v8  ;;  %11617 = vmatprep.subr.bf16.mxu0 %v13959_v26  ;;  %v10099_v8 = vrot.slane %v18542_v21, %v1458_v12  ;;  %v10107_v26 = vrot.slane %v18542_v21, %v1466_v10  ;;  %p14016_p4 = pnand %p14015_p3, %p14009_p0 }
 0xc28   : > { %11699 = vmatprep.subr.bf16.mxu1 %v13962_v43 }
 0xc2e   : > { %11618 = vmatpush1.bf16.xpose.msra.mxu0 %v13957_v27 }
 0xc2f   : > { %11700 = vmatpush1.bf16.xpose.msra.mxu1 %v13960_v24  ;;  %11619 = vmatprep.subr.bf16.mxu0 %v13965_v33 }
 0xc30   : > { %11701 = vmatprep.subr.bf16.mxu1 %v13968_v14 }
 0xc36   : > { %11620 = vmatpush1.bf16.xpose.msra.mxu0 %v13963_v15 }
 0xc37   : > { %11702 = vmatpush1.bf16.xpose.msra.mxu1 %v13966_v16  ;;  %11621 = vmatprep.subr.bf16.mxu0 %v13971_v18 }
 0xc38   : > { %11703 = vmatprep.subr.bf16.mxu1 %v13974_v19 }
 0xc3e   : > { %11622 = vmatpush1.bf16.xpose.msra.mxu0 %v13969_v20 }
 0xc3f   : > { %11704 = vmatpush1.bf16.xpose.msra.mxu1 %v13972_v34  ;;  %11623 = vmatprep.subr.bf16.mxu0 %v13977_v23 }
 0xc40   : > { %v11471_v51 = vpop.f32.mrb[12].mxu0  ;;  %v11553_v32 = vpop.f32.mrb[12].mxu1  ;;  %11705 = vmatprep.subr.bf16.mxu1 %v13980_v56 }
 0xc41   : > { %v13417_v22 = vadd.f32 %v11471_v51, %v10079_v54  ;;  %v13419_v52 = vadd.f32 %v11553_v32, %v10087_v38  ;;  %v11473_v7 = vpop.f32.mrb[13].mxu0  ;;  %v11555_v31 = vpop.f32.mrb[13].mxu1 }
 0xc42   : > { %v13418_v39 = vadd.f32 %v11473_v7, %v10083_v36  ;;  %v13420_v17 = vadd.f32 %v11555_v31, %v10091_v29  ;;  %v11475_v47 = vpop.f32.mrb[14].mxu0  ;;  %v11557_v41 = vpop.f32.mrb[14].mxu1 }
 0xc43   : > { %v11476_v46 = vpop.f32.mrb[15].mxu0  ;;  %v11558_v45 = vpop.f32.mrb[15].mxu1 }
 0xc44   : > { %v11732_v11 = vcombine.low %v13417_v22, %v13418_v39  ;;  %v11733_v30 = vcombine.low %v13419_v52, %v13420_v17 }
 0xc46   : > { %v11740_v57 = vrot.slane %v11732_v11, %v14211_v35  ;;  %v11747_v53 = vrot.slane %v11733_v30, %v14211_v35  ;;  %11624 = vmatpush1.bf16.xpose.msra.mxu0 %v13975_v37 }
 0xc47   : > { %11706 = vmatpush1.bf16.xpose.msra.mxu1 %v13978_v49  ;;  %11625 = vmatprep.subr.bf16.mxu0 %v13983_v50 }
 0xc48   : > { %v11748_v9 = vcombine.low %v11740_v57, %v11747_v53  ;;  %11707 = vmatprep.subr.bf16.mxu1 %v13986_v0 }
 0xc4a   : > { %11768 = vst [vmem:[%s18565_s16] sm:$0xff] %v11748_v9 }
 0xc4e   : > { %11626 = vmatpush1.bf16.xpose.msra.mxu0 %v13981_v58 }
 0xc4f   : > { %11708 = vmatpush1.bf16.xpose.msra.mxu1 %v13984_v59  ;;  %11627 = vmatprep.subr.bf16.mxu0 %v13989_v60 }
 0xc50   : > { %11709 = vmatprep.subr.bf16.mxu1 %v13992_v61 }
 0xc56   : > { %11628 = vmatpush1.bf16.xpose.msra.mxu0 %v13987_v44 }
 0xc57   : > { %11710 = vmatpush1.bf16.xpose.msra.mxu1 %v13990_v62  ;;  %11629 = vmatprep.subr.bf16.mxu0 %v13995_v48 }
 0xc58   : > { %11711 = vmatprep.subr.bf16.mxu1 %v13998_v63 }
 0xc5e   : > { %11630 = vmatpush1.bf16.xpose.msra.mxu0 %v13993_v55 }
 0xc5f   : > { %11712 = vmatpush1.bf16.xpose.msra.mxu1 %v13996_v40  ;;  %11631 = vmatprep.subr.bf16.mxu0 %v14001_v4 }
 0xc60   : > { %11713 = vmatprep.subr.bf16.mxu1 %v14004_v5 }
 0xc66   : > { %11632 = vmatpush1.bf16.xpose.msra.mxu0 %v13999_v3 }
 0xc67   : > { %11714 = vmatpush1.bf16.xpose.msra.mxu1 %v14002_v6 }
 0xc6d   : > { %11634 = vmatmul.mubr.bf16.vlgmr.msra.gmra.mrb[16].mxu0 %v18424_v2 }
 0xc6e   : > { %11716 = vmatmul.mubr.bf16.vlgmr.msra.gmra.mrb[16].mxu1 %v18424_v2 }
 0xd40   : > { %v11635_v43 = vpop.f32.mrb[16].mxu0 }
 0xd41   : > { %v13421_v2 = vadd.f32 %v11635_v43, %v10095_v25  ;;  %v11717_v27 = vpop.f32.mrb[16].mxu1  ;;  %v11637_v24 = vpop.f32.mrb[17].mxu0 }
 0xd42   : > { %v13423_v33 = vadd.f32 %v11717_v27, %v10103_v42  ;;  %v13422_v1 = vadd.f32 %v11637_v24, %v10099_v8  ;;  %v11719_v14 = vpop.f32.mrb[17].mxu1  ;;  %v11639_v13 = vpop.f32.mrb[18].mxu0 }
 0xd43   : > { %v13424_v15 = vadd.f32 %v11719_v14, %v10107_v26  ;;  %v11721_v16 = vpop.f32.mrb[18].mxu1  ;;  %v11640_v12 = vpop.f32.mrb[19].mxu0 }
 0xd44   : > { %v11749_v18 = vcombine.low %v13421_v2, %v13422_v1  ;;  %v11722_v28 = vpop.f32.mrb[19].mxu1 }
 0xd45   : > { %v11750_v19 = vcombine.low %v13423_v33, %v13424_v15 }
 0xd46   : > { %v11757_v10 = vrot.slane %v11749_v18, %v14211_v35 }
 0xd47   : > { %v11764_v20 = vrot.slane %v11750_v19, %v14211_v35 }
 0xd49   : > { %v11765_v21 = vcombine.low %v11757_v10, %v11764_v20 }
 0xd4b   : > { %11769 = vst [vmem:[%s18565_s16 + $0x8] sm:$0xff] %v11765_v21 }
 0xd4c   : > { %14019 = shalt.err (!%p14016_p4)
}
 0xd4d   : > { %s14020_s13 = scalar_lea.hbm %s18602_s20, 256  ;;  %s14024_s15 = scalar_lea.hbm %s18654_s7, 512 }
 0xd4e   : > { %p14021_p7 = scmp.ne.s32.totalorder %s18602_s20, %s14020_s13  ;;  %p14025_p10 = scmp.lt.u32.totalorder %s18602_s20, %s18654_s7 }
 0xd4f   : > { %p14026_p11 = scmp.lt.u32.totalorder %s14024_s15, %s14020_s13  ;;  %p14028_p13 = scmp.lt.u32.totalorder %s14020_s13, %s18602_s20 }
 0xd50   : > { %p14022_p8 = pnand %p14021_p7, %p14150_p5 }
 0xd51   : > { %p14027_p12 = por %p14026_p11, %p14025_p10 }
 0xd52   : > { %p14023_p9 = pneg %p14022_p8 }
 0xd53   : > { %p14029_p0 = por %p14028_p13, %p14027_p12 }
 0xd55   : > { %p14030_p1 = pnand %p14029_p0, %p14023_p9 }
 0xd57   : > { %14033 = shalt.err (!%p14030_p1)
}
 0xd58   : > { %13577 = dma.vmem_to_hbm [thread:$0]  (%p14150_p5), %s18604_s17, 256, %s18602_s20, %s11771_s22  }
 0xd59 PF: > { %p13583_p2 = scmp.ge.s32.totalorder %s14068_s27, 2  ;;  %s11797_s18 = sand.u32 1, %s14056_s24  }
 0xd5a   : > { %s11798_s19 = scalar_lea.sflag [#allocation3], %s11797_s18 }
 0xd5b   : > { %p13580_p3 = pnand %p13583_p2, %p14154_p6 }
 0xd5d   : > { %14051 = dma.done.wait (!%p13580_p3), %s11798_s19, 256  }
 0xd5e   : > { %14053 = vsyncadd (!%p13580_p3), %s11798_s19, 4294967040  ;;  %p17_p4 = scmp.ge.s32.totalorder %s14137_s30, 4   ;;  %s18657_s24 = smov %s14060_s25 }
 0xd5f   : > { %s18658_s25 = smov %s14064_s26  ;;  %s18659_s26 = smov %s14148_s10 }
 0xd60   : > { %s18660_s27 = smov %s14137_s30  ;;  %19 = sbr.rel (!%p17_p4) target bundleno = 3 (0x3), region = 86 }
 0xd67   :  { %11803 = vsyncpa [#allocation3], 1 }
 0xd68   :  { %11805 = vsyncpa [#allocation3 + $0x1], 1 }

</bundles_post_ra>
